<compile_context>
chip_gen: v5e
topology: v5e:2x2
jax: 0.10.0
libtpu: 0.0.40
codegen_flags: <defaults>
</compile_context>

<pallas_src>
import functools
import math

import jax
import jax.numpy as jnp
from jax.experimental import pallas as pl
from jax.experimental.pallas import tpu as pltpu


# ------------------------------ tiling helpers -------------------------------

def _tile(dim, target, align):
    """Largest multiple of `align` that divides `dim` and is <= target.

    Falls back to the full dimension (always a legal block) when no aligned
    divisor exists or when dim <= target.
    """
    if dim <= target:
        return dim
    cands = [d for d in range(align, target + 1, align) if dim % d == 0]
    return cands[-1] if cands else dim


@functools.lru_cache(maxsize=None)
def _vmem_limit_bytes():
    """Generation-aware scoped-VMEM budget (v5e/v6e: 128 MiB, v7x: 64 MiB)."""
    cap = 0
    try:
        info = pltpu.get_tpu_info()
        for name in ("vmem_capacity_bytes", "vmem_size_bytes", "vmem_bytes"):
            v = getattr(info, name, None)
            if v:
                cap = int(v)
                break
    except Exception:
        cap = 0
    if cap <= 0:
        cap = 64 * 1024 * 1024            # conservative default (v7x per-TC)
    return max(32 * 1024 * 1024, min(cap * 3 // 4, 100 * 1024 * 1024))


def _bytes(a):
    return int(a.size) * jnp.dtype(a.dtype).itemsize


# ----------------------------- dense (tiled GEMM) ----------------------------

def _dense_kernel(x_ref, w_ref, b_ref, *rest, activation, has_residual):
    if has_residual:
        r_ref, o_ref, acc_ref = rest
    else:
        o_ref, acc_ref = rest
        r_ref = None

    k = pl.program_id(2)

    @pl.when(k == 0)
    def _():
        acc_ref[...] = jnp.zeros_like(acc_ref)

    acc_ref[...] += jnp.dot(
        x_ref[...].astype(jnp.bfloat16),
        w_ref[...].astype(jnp.bfloat16),
        preferred_element_type=jnp.float32)

    @pl.when(k == pl.num_programs(2) - 1)
    def _():
        y = acc_ref[...] + b_ref[...]
        if activation == "gelu":
            y = jax.nn.gelu(y)                       # tanh approx (see TODO)
        if has_residual:
            y = y + r_ref[...].astype(jnp.float32)
        o_ref[...] = y.astype(o_ref.dtype)


def dense(x, w, b, activation=None, residual=None, out_dtype=jnp.bfloat16,
          tm_target=512, tn_target=512, tk_target=1024):
    """x:(M,K) @ w:(K,N) + b, fused optional GELU + residual add.

    K-tiled with a VMEM f32 accumulator; x/w fed to the MXU in bf16.
    """
    M, K = x.shape
    N = w.shape[1]
    tm = _tile(M, tm_target, 8)
    tn = _tile(N, tn_target, 128)
    tk = _tile(K, tk_target, 128)
    grid = (M // tm, N // tn, K // tk)

    in_specs = [
        pl.BlockSpec((tm, tk), lambda i, j, k: (i, k)),
        pl.BlockSpec((tk, tn), lambda i, j, k: (k, j)),
        pl.BlockSpec((1, tn), lambda i, j, k: (0, j)),
    ]
    args = [x, w, b.reshape(1, N)]
    if residual is not None:
        in_specs.append(pl.BlockSpec((tm, tn), lambda i, j, k: (i, j)))
        args.append(residual)

    bytes_accessed = (_bytes(x) + _bytes(w)
                      + M * N * jnp.dtype(out_dtype).itemsize
                      + (_bytes(residual) if residual is not None else 0))

    return pl.pallas_call(
        functools.partial(_dense_kernel, activation=activation,
                          has_residual=residual is not None),
        out_shape=jax.ShapeDtypeStruct((M, N), out_dtype),
        grid=grid,
        in_specs=in_specs,
        out_specs=pl.BlockSpec((tm, tn), lambda i, j, k: (i, j)),
        scratch_shapes=[pltpu.VMEM((tm, tn), jnp.float32)],
        compiler_params=pltpu.CompilerParams(
            dimension_semantics=("parallel", "parallel", "arbitrary"),
            vmem_limit_bytes=_vmem_limit_bytes()),
        cost_estimate=pl.CostEstimate(
            flops=2 * M * N * K,
            transcendentals=(M * N if activation == "gelu" else 0),
            bytes_accessed=bytes_accessed),
    )(*args)


# ------------------------- fused LayerNorm + dense ----------------------------

def _ln_dense_kernel(x_ref, g_ref, bln_ref, w_ref, b_ref, *rest,
                     activation, has_residual, eps):
    if has_residual:
        r_ref, o_ref, xn_ref = rest
    else:
        o_ref, xn_ref = rest
        r_ref = None

    j = pl.program_id(1)

    # LN of this row tile computed once (j == 0) and cached for all N tiles.
    @pl.when(j == 0)
    def _():
        x = x_ref[...].astype(jnp.float32)
        mu = jnp.mean(x, axis=-1, keepdims=True)
        var = jnp.mean(jnp.square(x - mu), axis=-1, keepdims=True)
        xn = (x - mu) * jax.lax.rsqrt(var + eps)
        xn_ref[...] = (xn * g_ref[...] + bln_ref[...]).astype(jnp.bfloat16)

    y = jnp.dot(xn_ref[...], w_ref[...].astype(jnp.bfloat16),
                preferred_element_type=jnp.float32) + b_ref[...]
    if activation == "gelu":
        y = jax.nn.gelu(y)
    if has_residual:
        y = y + r_ref[...].astype(jnp.float32)
    o_ref[...] = y.astype(o_ref.dtype)


def ln_dense(x, g, bln, w, b, activation=None, residual=None,
             out_dtype=jnp.bfloat16, tm_target=256, tn_target=512, eps=1e-5):
    """LayerNorm(x) @ w + b, fused (x block carries full K so LN is local)."""
    M, K = x.shape
    N = w.shape[1]
    tm = _tile(M, tm_target, 8)
    tn = _tile(N, tn_target, 128)
    grid = (M // tm, N // tn)

    in_specs = [
        pl.BlockSpec((tm, K), lambda i, j: (i, 0)),
        pl.BlockSpec((1, K), lambda i, j: (0, 0)),
        pl.BlockSpec((1, K), lambda i, j: (0, 0)),
        pl.BlockSpec((K, tn), lambda i, j: (0, j)),
        pl.BlockSpec((1, tn), lambda i, j: (0, j)),
    ]
    args = [x, g.reshape(1, K), bln.reshape(1, K), w, b.reshape(1, N)]
    if residual is not None:
        in_specs.append(pl.BlockSpec((tm, tn), lambda i, j: (i, j)))
        args.append(residual)

    bytes_accessed = (_bytes(x) + _bytes(w)
                      + M * N * jnp.dtype(out_dtype).itemsize
                      + (_bytes(residual) if residual is not None else 0))

    return pl.pallas_call(
        functools.partial(_ln_dense_kernel, activation=activation,
                          has_residual=residual is not None, eps=eps),
        out_shape=jax.ShapeDtypeStruct((M, N), out_dtype),
        grid=grid,
        in_specs=in_specs,
        out_specs=pl.BlockSpec((tm, tn), lambda i, j: (i, j)),
        scratch_shapes=[pltpu.VMEM((tm, K), jnp.bfloat16)],
        compiler_params=pltpu.CompilerParams(
            # j axis reuses the cached LN scratch -> "arbitrary" (sequential).
            dimension_semantics=("parallel", "arbitrary"),
            vmem_limit_bytes=_vmem_limit_bytes()),
        cost_estimate=pl.CostEstimate(
            flops=2 * M * N * K + 6 * M * K,
            transcendentals=M + (M * N if activation == "gelu" else 0),
            bytes_accessed=bytes_accessed),
    )(*args)


# ------------------------------ row-tiled LayerNorm ---------------------------

def _layernorm_kernel(x_ref, g_ref, b_ref, o_ref, *, eps):
    x = x_ref[...].astype(jnp.float32)
    mu = jnp.mean(x, axis=-1, keepdims=True)
    var = jnp.mean(jnp.square(x - mu), axis=-1, keepdims=True)
    xn = (x - mu) * jax.lax.rsqrt(var + eps)
    o_ref[...] = (xn * g_ref[...] + b_ref[...]).astype(o_ref.dtype)


def layernorm(x, g, b, out_dtype=jnp.bfloat16, eps=1e-5):
    M, D = x.shape
    tm = _tile(M, 1024, 8)
    return pl.pallas_call(
        functools.partial(_layernorm_kernel, eps=eps),
        out_shape=jax.ShapeDtypeStruct((M, D), out_dtype),
        grid=(M // tm,),
        in_specs=[
            pl.BlockSpec((tm, D), lambda i: (i, 0)),
            pl.BlockSpec((1, D), lambda i: (0, 0)),
            pl.BlockSpec((1, D), lambda i: (0, 0)),
        ],
        out_specs=pl.BlockSpec((tm, D), lambda i: (i, 0)),
        compiler_params=pltpu.CompilerParams(
            dimension_semantics=("parallel",),
            vmem_limit_bytes=_vmem_limit_bytes()),
    )(x, g.reshape(1, D), b.reshape(1, D))


# ---------------------- flash-style multi-head attention ----------------------

def _mha_kernel(q_ref, k_ref, v_ref, bias_ref, o_ref, m_sc, l_sc, acc_sc,
                *, num_heads, scale):
    kv = pl.program_id(2)

    @pl.when(kv == 0)
    def _():
        m_sc[...] = jnp.full_like(m_sc, -jnp.inf)
        l_sc[...] = jnp.zeros_like(l_sc)
        acc_sc[...] = jnp.zeros_like(acc_sc)

    # scale folded into q (O(tq*D) once per kv step, shared by all heads)
    q = (q_ref[0].astype(jnp.float32) * scale).astype(jnp.bfloat16)   # (tq, D)
    k = k_ref[0]                                                      # (tkv, D)
    v = v_ref[0]
    bias = bias_ref[0]                                                # (1, tkv) f32
    D = q.shape[-1]
    Dh = D // num_heads

    for h in range(num_heads):           # heads sliced in-VMEM (see TODO)
        qh = q[:, h * Dh:(h + 1) * Dh]
        kh = k[:, h * Dh:(h + 1) * Dh].astype(jnp.bfloat16)
        vh = v[:, h * Dh:(h + 1) * Dh].astype(jnp.bfloat16)
        s = jax.lax.dot_general(qh, kh, (((1,), (1,)), ((), ())),
                                preferred_element_type=jnp.float32)
        s = s + bias                                                  # (tq, tkv)
        m_prev = m_sc[h]
        m_new = jnp.maximum(m_prev, jnp.max(s, axis=-1, keepdims=True))
        alpha = jnp.exp(m_prev - m_new)
        p = jnp.exp(s - m_new)
        l_sc[h] = alpha * l_sc[h] + jnp.sum(p, axis=-1, keepdims=True)
        acc_sc[h] = alpha * acc_sc[h] + jnp.dot(
            p.astype(jnp.bfloat16), vh, preferred_element_type=jnp.float32)
        m_sc[h] = m_new

    @pl.when(kv == pl.num_programs(2) - 1)
    def _():
        outs = [acc_sc[h] / l_sc[h] for h in range(num_heads)]        # exact div
        out = outs[0] if num_heads == 1 else jnp.concatenate(outs, axis=-1)
        o_ref[0] = out.astype(o_ref.dtype)      # single lane-dense (tq, D) store


def mha(q_arr, q_col, k_arr, k_col, v_arr, v_col, key_mask, num_heads, d_model,
        tq_target=256, tkv_target=512):
    """Flash-style MHA.

    q_arr:(B,Lq,nq*D), k_arr:(B,Lk,nk*D), v_arr:(B,Lk,nv*D); q_col/k_col/v_col
    select the D-wide column block of each (so a fused QKV projection can be
    consumed directly without jnp.split HBM copies).  key_mask:(B,Lk) bool.
    KV dimension is tiled with online-softmax accumulation in VMEM scratch.
    """
    B, Lq = q_arr.shape[0], q_arr.shape[1]
    Lk = k_arr.shape[1]
    D = d_model
    assert D % num_heads == 0
    Dh = D // num_heads
    tq = _tile(Lq, tq_target, 8)
    tkv = _tile(Lk, tkv_target, 128)     # also the bias last-dim block -> 128-aligned
    bias = jnp.where(key_mask, 0.0, -1e9).astype(jnp.float32).reshape(B, 1, Lk)

    grid = (B, Lq // tq, Lk // tkv)

    in_specs = [
        pl.BlockSpec((1, tq, D), lambda b, i, kv, c=q_col: (b, i, c)),
        pl.BlockSpec((1, tkv, D), lambda b, i, kv, c=k_col: (b, kv, c)),
        pl.BlockSpec((1, tkv, D), lambda b, i, kv, c=v_col: (b, kv, c)),
        pl.BlockSpec((1, 1, tkv), lambda b, i, kv: (b, 0, kv)),
    ]

    bytes_accessed = (B * Lq * D + 2 * B * Lk * D) * 2 + B * Lk * 4 \
        + B * Lq * D * 2

    return pl.pallas_call(
        functools.partial(_mha_kernel, num_heads=num_heads,
                          scale=1.0 / math.sqrt(Dh)),
        out_shape=jax.ShapeDtypeStruct((B, Lq, D), jnp.bfloat16),
        grid=grid,
        in_specs=in_specs,
        out_specs=pl.BlockSpec((1, tq, D), lambda b, i, kv: (b, i, 0)),
        scratch_shapes=[
            pltpu.VMEM((num_heads, tq, 1), jnp.float32),    # running max
            pltpu.VMEM((num_heads, tq, 1), jnp.float32),    # running denom
            pltpu.VMEM((num_heads, tq, Dh), jnp.float32),   # running acc
        ],
        compiler_params=pltpu.CompilerParams(
            dimension_semantics=("parallel", "parallel", "arbitrary"),
            vmem_limit_bytes=_vmem_limit_bytes()),
        cost_estimate=pl.CostEstimate(
            flops=4 * B * Lq * Lk * D,
            transcendentals=B * num_heads * Lq * Lk,
            bytes_accessed=bytes_accessed),
    )(q_arr, k_arr, v_arr, bias)


def _self_attn(qkv_flat, B, L, D, mask, heads):
    """qkv_flat: (B*L, 3D) fused projection output."""
    if D % 128 == 0:
        q3 = qkv_flat.reshape(B, L, 3 * D)
        return mha(q3, 0, q3, 1, q3, 2, mask, heads, D)
    q, k, v = jnp.split(qkv_flat, 3, axis=-1)       # fallback for narrow D
    return mha(q.reshape(B, L, D), 0, k.reshape(B, L, D), 0,
               v.reshape(B, L, D), 0, mask, heads, D)


def _cross_attn(q_flat, kv_flat, B, Lq, Lk, D, mask, heads):
    """q_flat: (B*Lq, D), kv_flat: (B*Lk, 2D) fused K/V projection output."""
    qa = q_flat.reshape(B, Lq, D)
    if D % 128 == 0:
        kva = kv_flat.reshape(B, Lk, 2 * D)
        return mha(qa, 0, kva, 0, kva, 1, mask, heads, D)
    k, v = jnp.split(kv_flat, 2, axis=-1)            # fallback for narrow D
    return mha(qa, 0, k.reshape(B, Lk, D), 0, v.reshape(B, Lk, D), 0,
               mask, heads, D)


# --------------------------------- glue --------------------------------------

def create_mask(x, lengths):
    """x: (B, L, C), lengths: (B,) -> bool mask (B, L)."""
    _, L, _ = x.shape
    return jnp.arange(L)[None, :] < lengths[:, None]


def timestep_embedding(t, dim, max_period=10000.0):
    half = dim // 2
    freqs = jnp.exp(-math.log(max_period)
                    * jnp.arange(half, dtype=jnp.float32) / half)
    args = t.astype(jnp.float32)[:, None] * freqs[None, :]
    return jnp.concatenate([jnp.cos(args), jnp.sin(args)], axis=-1)


def vit_forward(p, x, mask, num_heads):
    """Speaker encoder (ViT approximation): one masked transformer block."""
    B, L, D = x.shape
    M = B * L
    h = x.reshape(M, D)

    # fused LN + QKV projection (single matmul, fed straight into attention)
    qkv = ln_dense(h, p["ln1_g"], p["ln1_b"], p["wqkv"], p["bqkv"])   # (M, 3D)
    a = _self_attn(qkv, B, L, D, mask, num_heads)
    h = dense(a.reshape(M, D), p["wo"], p["bo"], residual=h)          # +residual

    # fused LN + MLP
    m = ln_dense(h, p["ln2_g"], p["ln2_b"], p["w1"], p["b1"], activation="gelu")
    h = dense(m, p["w2"], p["b2"], residual=h)                        # +residual

    h = layernorm(h, p["lnf_g"], p["lnf_b"])
    return h.reshape(B, L, D)


def udit_forward(p, x, timesteps, context, x_mask, ctx_mask, num_heads,
                 out_chans):
    """UDiT approximation: timestep conditioning + self-attn + cross-attn + MLP."""
    B, L, Cin = x.shape
    Lc, Dc = context.shape[1], context.shape[2]
    H = p["w_in"].shape[1]
    M = B * L

    h = dense(x.reshape(M, Cin), p["w_in"], p["b_in"])                # (M, H)
    temb = timestep_embedding(timesteps, H)
    temb = dense(temb, p["tw1"], p["tb1"], activation="gelu")
    temb = dense(temb, p["tw2"], p["tb2"])
    h = (h.reshape(B, L, H) + temb[:, None, :]).reshape(M, H)

    # masked self-attention (fused LN + QKV, no split round-trip)
    qkv = ln_dense(h, p["ln1_g"], p["ln1_b"], p["s_qkv_w"], p["s_qkv_b"])
    a = _self_attn(qkv, B, L, H, x_mask, num_heads)
    h = dense(a.reshape(M, H), p["so_w"], p["so_b"], residual=h)

    # cross-attention with speaker context (fused LN + Q, fused LN + KV)
    q = ln_dense(h, p["ln2_g"], p["ln2_b"], p["cq_w"], p["cq_b"])     # (M, H)
    kv = ln_dense(context.reshape(B * Lc, Dc), p["lnc_g"], p["lnc_b"],
                  p["c_kv_w"], p["c_kv_b"])                           # (B*Lc, 2H)
    a = _cross_attn(q, kv, B, L, Lc, H, ctx_mask, num_heads)
    h = dense(a.reshape(M, H), p["co_w"], p["co_b"], residual=h)

    # MLP (fused LN + up-proj + GELU, down-proj + residual)
    m = ln_dense(h, p["ln3_g"], p["ln3_b"], p["m1_w"], p["m1_b"], activation="gelu")
    h = dense(m, p["m2_w"], p["m2_b"], residual=h)

    # output head (fused LN + proj), N padded to 128 for lane-dense stores,
    # sliced back to out_chans here.
    out = ln_dense(h, p["lnf_g"], p["lnf_b"], p["wo_w"], p["wo_b"],
                   out_dtype=jnp.float32)
    return out[:, :out_chans].reshape(B, L, out_chans)


def solospeech_tse_forward(params, x, timesteps, mixture, reference,
                           x_len, ref_len, cfg):
    # reference.clone() is a no-op under JAX (functional arrays).
    x_mask = create_mask(x, x_len)               # (B, L) bool
    ref_mask = create_mask(reference, ref_len)   # (B, Lr) bool

    B, Lr, Dr = reference.shape
    ref = dense(reference.reshape(B * Lr, Dr),
                params["spk_proj_w"], params["spk_proj_b"]).reshape(B, Lr, -1)
    ref = vit_forward(params["vit"], ref, ref_mask, cfg["vit_heads"])

    xin = jnp.concatenate([x, mixture], axis=-1)  # (B, L, 2*out_chans)
    # PyTorch: xin.transpose(1,2) -> (B, 2C, L) into UDiT, transpose back after.
    # Our UDiT consumes channels-last directly, so both transposes cancel.
    out = udit_forward(params["udit"], xin, timesteps, ref,
                       x_mask, ref_mask, cfg["udit_heads"], cfg["out_chans"])
    return out, x_mask


# ------------------------------- parameters ----------------------------------

def init_params(cfg, seed=0):
    C, D, H = cfg["out_chans"], cfg["context_dim"], cfg["hidden"]
    Cpad = max(128, ((C + 127) // 128) * 128)    # lane-dense output head
    base = jax.random.PRNGKey(seed)
    cnt = [0]

    def nk():
        cnt[0] += 1
        return jax.random.fold_in(base, cnt[0])

    def lin(din, dout):
        # weights stored bf16 (MXU input dtype), biases fp32.
        w = (0.02 * jax.random.normal(nk(), (din, dout), jnp.float32))
        return w.astype(jnp.bfloat16), jnp.zeros((dout,), jnp.float32)

    def ln(d):
        return jnp.ones((d,), jnp.float32), jnp.zeros((d,), jnp.float32)

    params = {}
    params["spk_proj_w"], params["spk_proj_b"] = lin(C, D)

    vit = {}
    vit["ln1_g"], vit["ln1_b"] = ln(D)
    vit["wqkv"], vit["bqkv"] = lin(D, 3 * D)     # fused Q/K/V
    vit["wo"], vit["bo"] = lin(D, D)
    vit["ln2_g"], vit["ln2_b"] = ln(D)
    vit["w1"], vit["b1"] = lin(D, 4 * D)
    vit["w2"], vit["b2"] = lin(4 * D, D)
    vit["lnf_g"], vit["lnf_b"] = ln(D)
    params["vit"] = vit

    udit = {}
    udit["w_in"], udit["b_in"] = lin(2 * C, H)
    udit["tw1"], udit["tb1"] = lin(H, H)
    udit["tw2"], udit["tb2"] = lin(H, H)
    udit["ln1_g"], udit["ln1_b"] = ln(H)
    udit["s_qkv_w"], udit["s_qkv_b"] = lin(H, 3 * H)   # fused self-attn Q/K/V
    udit["so_w"], udit["so_b"] = lin(H, H)
    udit["ln2_g"], udit["ln2_b"] = ln(H)
    udit["lnc_g"], udit["lnc_b"] = ln(D)
    udit["cq_w"], udit["cq_b"] = lin(H, H)
    udit["c_kv_w"], udit["c_kv_b"] = lin(D, 2 * H)     # fused cross-attn K/V
    udit["co_w"], udit["co_b"] = lin(H, H)
    udit["ln3_g"], udit["ln3_b"] = ln(H)
    udit["m1_w"], udit["m1_b"] = lin(H, 4 * H)
    udit["m2_w"], udit["m2_b"] = lin(4 * H, H)
    udit["lnf_g"], udit["lnf_b"] = ln(H)
    udit["wo_w"], udit["wo_b"] = lin(H, Cpad)          # padded to 128 lanes
    params["udit"] = udit
    return params


# ---------------------------------- main --------------------------------------

if __name__ == "__main__":
    # hidden/context_dim kept at 128 so the fused-QKV column indexing and the
    # lane-dense output path are exercised with legal (…,128) blocks.
    cfg = dict(out_chans=8, context_dim=128, hidden=128,
               udit_heads=2, vit_heads=2)
    params = init_params(cfg, seed=0)

    key = jax.random.PRNGKey(0)
    k1, k2, k3, k4 = jax.random.split(key, 4)
    B, L, Lr, C = 2, 16, 8, cfg["out_chans"]
    x = jax.random.normal(k1, (B, L, C), jnp.float32)
    mixture = jax.random.normal(k2, (B, L, C), jnp.float32)
    reference = jax.random.normal(k3, (B, Lr, C), jnp.float32)
    timesteps = jax.random.uniform(k4, (B,), jnp.float32) * 1000.0
    x_len = jnp.array([L, L - 4], jnp.int32)
    ref_len = jnp.array([Lr, Lr - 2], jnp.int32)

    fwd = jax.jit(functools.partial(solospeech_tse_forward, cfg=cfg))
    out, x_mask = fwd(params, x, timesteps, mixture, reference, x_len, ref_len)
    jax.block_until_ready((out, x_mask))

    assert out.shape == (B, L, C), out.shape
    assert out.dtype == jnp.float32
    assert x_mask.shape == (B, L), x_mask.shape
    assert x_mask.dtype == jnp.bool_
    assert bool(jnp.all(jnp.isfinite(out)))
    print("KERNEL_OK")
</pallas_src>

<mosaic_0001>
module attributes {stable_mosaic.version = 11 : i64} {
  func.func @_dense_kernel(%arg0: i32, %arg1: i32, %arg2: i32, %arg3: memref<32x16xf32, #tpu.memory_space<vmem>>, %arg4: memref<16x128xbf16, #tpu.memory_space<vmem>>, %arg5: memref<1x128xf32, #tpu.memory_space<vmem>>, %arg6: memref<32x128xbf16, #tpu.memory_space<vmem>>, %arg7: memref<32x128xf32, #tpu.memory_space<vmem>>) attributes {dimension_semantics = [#tpu.dimension_semantics<parallel>, #tpu.dimension_semantics<parallel>, #tpu.dimension_semantics<arbitrary>], iteration_bounds = array<i64: 1, 1, 1>, scalar_prefetch = 0 : i64, scratch_operands = 1 : i64, tpu.core_type = #tpu.core_type<tc>, window_params = [{transform_indices = @transform_0, window_bounds = array<i64: 32, 16>}, {transform_indices = @transform_1, window_bounds = array<i64: 16, 128>}, {transform_indices = @transform_2, window_bounds = array<i64: 1, 128>}, {transform_indices = @transform_3, window_bounds = array<i64: 32, 128>}]} {
    %c0_i32 = arith.constant 0 : i32
    %0 = arith.cmpi eq, %arg2, %c0_i32 : i32
    %1 = arith.extui %0 : i1 to i32
    %c0_i32_0 = arith.constant 0 : i32
    %2 = arith.cmpi ne, %1, %c0_i32_0 : i32
    scf.if %2 {
      %cst_10 = arith.constant 0.000000e+00 : f32
      %13 = vector.broadcast %cst_10 : f32 to vector<32x128xf32>
      %c0_11 = arith.constant 0 : index
      %c0_12 = arith.constant 0 : index
      %14 = vector.load %arg7[%c0_11, %c0_12] : memref<32x128xf32, #tpu.memory_space<vmem>>, vector<32x128xf32>
      tpu.vector_store %arg7[%c0_11, %c0_12], %13 {strides = array<i32>} : memref<32x128xf32, #tpu.memory_space<vmem>>, vector<32x128xf32>,
    } else {
    }
    %c0 = arith.constant 0 : index
    %c0_1 = arith.constant 0 : index
    %3 = vector.load %arg7[%c0, %c0_1] : memref<32x128xf32, #tpu.memory_space<vmem>>, vector<32x128xf32>
    %c0_2 = arith.constant 0 : index
    %c0_3 = arith.constant 0 : index
    %4 = vector.load %arg3[%c0_2, %c0_3] : memref<32x16xf32, #tpu.memory_space<vmem>>, vector<32x16xf32>
    %5 = arith.truncf %4 : vector<32x16xf32> to vector<32x16xbf16>
    %c0_4 = arith.constant 0 : index
    %c0_5 = arith.constant 0 : index
    %6 = vector.load %arg4[%c0_4, %c0_5] : memref<16x128xbf16, #tpu.memory_space<vmem>>, vector<16x128xbf16>
    %cst = arith.constant dense<0.000000e+00> : vector<32x128xf32>
    %7 = tpu.matmul %5, %6, %cst {dimension_numbers = #tpu.dot_dimension_numbers<[1], [0], [0], [1], [0, 0, 1, 1], [], []>} : vector<32x16xbf16>, vector<16x128xbf16>, vector<32x128xf32> -> vector<32x128xf32>
    %8 = arith.addf %3, %7 : vector<32x128xf32>
    %c0_6 = arith.constant 0 : index
    %c0_7 = arith.constant 0 : index
    %9 = vector.load %arg7[%c0_6, %c0_7] : memref<32x128xf32, #tpu.memory_space<vmem>>, vector<32x128xf32>
    tpu.vector_store %arg7[%c0_6, %c0_7], %8 {strides = array<i32>} : memref<32x128xf32, #tpu.memory_space<vmem>>, vector<32x128xf32>,
    %c0_i32_8 = arith.constant 0 : i32
    %10 = arith.cmpi eq, %arg2, %c0_i32_8 : i32
    %11 = arith.extui %10 : i1 to i32
    %c0_i32_9 = arith.constant 0 : i32
    %12 = arith.cmpi ne, %11, %c0_i32_9 : i32
    scf.if %12 {
      %c0_10 = arith.constant 0 : index
      %c0_11 = arith.constant 0 : index
      %13 = vector.load %arg7[%c0_10, %c0_11] : memref<32x128xf32, #tpu.memory_space<vmem>>, vector<32x128xf32>
      %c0_12 = arith.constant 0 : index
      %c0_13 = arith.constant 0 : index
      %14 = vector.load %arg5[%c0_12, %c0_13] : memref<1x128xf32, #tpu.memory_space<vmem>>, vector<1x128xf32>
      %15 = vector.broadcast %14 : vector<1x128xf32> to vector<32x128xf32>
      %16 = arith.addf %13, %15 : vector<32x128xf32>
      %17 = arith.truncf %16 : vector<32x128xf32> to vector<32x128xbf16>
      %c0_14 = arith.constant 0 : index
      %c0_15 = arith.constant 0 : index
      %18 = vector.load %arg6[%c0_14, %c0_15] : memref<32x128xbf16, #tpu.memory_space<vmem>>, vector<32x128xbf16>
      tpu.vector_store %arg6[%c0_14, %c0_15], %17 {strides = array<i32>} : memref<32x128xbf16, #tpu.memory_space<vmem>>, vector<32x128xbf16>,
    } else {
    }
    return
  }
  func.func @transform_0(%arg0: i32, %arg1: i32, %arg2: i32) -> (i32, i32) {
    %c0_i32 = arith.constant 0 : i32
    return %arg0, %arg2 : i32, i32
  }
  func.func @transform_1(%arg0: i32, %arg1: i32, %arg2: i32) -> (i32, i32) {
    %c0_i32 = arith.constant 0 : i32
    return %arg2, %arg1 : i32, i32
  }
  func.func @transform_2(%arg0: i32, %arg1: i32, %arg2: i32) -> (i32, i32) {
    %c0_i32 = arith.constant 0 : i32
    %c0_i32_0 = arith.constant 0 : i32
    return %c0_i32, %arg1 : i32, i32
  }
  func.func @transform_3(%arg0: i32, %arg1: i32, %arg2: i32) -> (i32, i32) {
    %c0_i32 = arith.constant 0 : i32
    return %arg0, %arg1 : i32, i32
  }
}

module attributes {stable_mosaic.version = 11 : i64} {
  func.func @_dense_kernel(%arg0: i32, %arg1: i32, %arg2: i32, %arg3: memref<2x128xbf16, #tpu.memory_space<vmem>>, %arg4: memref<128x128xbf16, #tpu.memory_space<vmem>>, %arg5: memref<1x128xf32, #tpu.memory_space<vmem>>, %arg6: memref<2x128xbf16, #tpu.memory_space<vmem>>, %arg7: memref<2x128xf32, #tpu.memory_space<vmem>>) attributes {dimension_semantics = [#tpu.dimension_semantics<parallel>, #tpu.dimension_semantics<parallel>, #tpu.dimension_semantics<arbitrary>], iteration_bounds = array<i64: 1, 1, 1>, scalar_prefetch = 0 : i64, scratch_operands = 1 : i64, tpu.core_type = #tpu.core_type<tc>, window_params = [{transform_indices = @transform_0, window_bounds = array<i64: 2, 128>}, {transform_indices = @transform_1, window_bounds = array<i64: 128, 128>}, {transform_indices = @transform_2, window_bounds = array<i64: 1, 128>}, {transform_indices = @transform_3, window_bounds = array<i64: 2, 128>}]} {
    %c0_i32 = arith.constant 0 : i32
    %0 = arith.cmpi eq, %arg2, %c0_i32 : i32
    %1 = arith.extui %0 : i1 to i32
    %c0_i32_0 = arith.constant 0 : i32
    %2 = arith.cmpi ne, %1, %c0_i32_0 : i32
    scf.if %2 {
      %cst_10 = arith.constant 0.000000e+00 : f32
      %12 = vector.broadcast %cst_10 : f32 to vector<2x128xf32>
      %c0_11 = arith.constant 0 : index
      %c0_12 = arith.constant 0 : index
      %13 = vector.load %arg7[%c0_11, %c0_12] : memref<2x128xf32, #tpu.memory_space<vmem>>, vector<2x128xf32>
      tpu.vector_store %arg7[%c0_11, %c0_12], %12 {strides = array<i32>} : memref<2x128xf32, #tpu.memory_space<vmem>>, vector<2x128xf32>,
    } else {
    }
    %c0 = arith.constant 0 : index
    %c0_1 = arith.constant 0 : index
    %3 = vector.load %arg7[%c0, %c0_1] : memref<2x128xf32, #tpu.memory_space<vmem>>, vector<2x128xf32>
    %c0_2 = arith.constant 0 : index
    %c0_3 = arith.constant 0 : index
    %4 = vector.load %arg3[%c0_2, %c0_3] : memref<2x128xbf16, #tpu.memory_space<vmem>>, vector<2x128xbf16>
    %c0_4 = arith.constant 0 : index
    %c0_5 = arith.constant 0 : index
    %5 = vector.load %arg4[%c0_4, %c0_5] : memref<128x128xbf16, #tpu.memory_space<vmem>>, vector<128x128xbf16>
    %cst = arith.constant dense<0.000000e+00> : vector<2x128xf32>
    %6 = tpu.matmul %4, %5, %cst {dimension_numbers = #tpu.dot_dimension_numbers<[1], [0], [0], [1], [0, 0, 1, 1], [], []>} : vector<2x128xbf16>, vector<128x128xbf16>, vector<2x128xf32> -> vector<2x128xf32>
    %7 = arith.addf %3, %6 : vector<2x128xf32>
    %c0_6 = arith.constant 0 : index
    %c0_7 = arith.constant 0 : index
    %8 = vector.load %arg7[%c0_6, %c0_7] : memref<2x128xf32, #tpu.memory_space<vmem>>, vector<2x128xf32>
    tpu.vector_store %arg7[%c0_6, %c0_7], %7 {strides = array<i32>} : memref<2x128xf32, #tpu.memory_space<vmem>>, vector<2x128xf32>,
    %c0_i32_8 = arith.constant 0 : i32
    %9 = arith.cmpi eq, %arg2, %c0_i32_8 : i32
    %10 = arith.extui %9 : i1 to i32
    %c0_i32_9 = arith.constant 0 : i32
    %11 = arith.cmpi ne, %10, %c0_i32_9 : i32
    scf.if %11 {
      %c0_10 = arith.constant 0 : index
      %c0_11 = arith.constant 0 : index
      %12 = vector.load %arg7[%c0_10, %c0_11] : memref<2x128xf32, #tpu.memory_space<vmem>>, vector<2x128xf32>
      %c0_12 = arith.constant 0 : index
      %c0_13 = arith.constant 0 : index
      %13 = vector.load %arg5[%c0_12, %c0_13] : memref<1x128xf32, #tpu.memory_space<vmem>>, vector<1x128xf32>
      %14 = vector.broadcast %13 : vector<1x128xf32> to vector<2x128xf32>
      %15 = arith.addf %12, %14 : vector<2x128xf32>
      %16 = arith.truncf %15 : vector<2x128xf32> to vector<2x128xbf16>
      %c0_14 = arith.constant 0 : index
      %c0_15 = arith.constant 0 : index
      %17 = vector.load %arg6[%c0_14, %c0_15] : memref<2x128xbf16, #tpu.memory_space<vmem>>, vector<2x128xbf16>
      tpu.vector_store %arg6[%c0_14, %c0_15], %16 {strides = array<i32>} : memref<2x128xbf16, #tpu.memory_space<vmem>>, vector<2x128xbf16>,
    } else {
    }
    return
  }
  func.func @transform_0(%arg0: i32, %arg1: i32, %arg2: i32) -> (i32, i32) {
    %c0_i32 = arith.constant 0 : i32
    return %arg0, %arg2 : i32, i32
  }
  func.func @transform_1(%arg0: i32, %arg1: i32, %arg2: i32) -> (i32, i32) {
    %c0_i32 = arith.constant 0 : i32
    return %arg2, %arg1 : i32, i32
  }
  func.func @transform_2(%arg0: i32, %arg1: i32, %arg2: i32) -> (i32, i32) {
    %c0_i32 = arith.constant 0 : i32
    %c0_i32_0 = arith.constant 0 : i32
    return %c0_i32, %arg1 : i32, i32
  }
  func.func @transform_3(%arg0: i32, %arg1: i32, %arg2: i32) -> (i32, i32) {
    %c0_i32 = arith.constant 0 : i32
    return %arg0, %arg1 : i32, i32
  }
}

module attributes {stable_mosaic.version = 11 : i64} {
  func.func @_dense_kernel(%arg0: i32, %arg1: i32, %arg2: i32, %arg3: memref<2x128xf32, #tpu.memory_space<vmem>>, %arg4: memref<128x128xbf16, #tpu.memory_space<vmem>>, %arg5: memref<1x128xf32, #tpu.memory_space<vmem>>, %arg6: memref<2x128xbf16, #tpu.memory_space<vmem>>, %arg7: memref<2x128xf32, #tpu.memory_space<vmem>>) attributes {dimension_semantics = [#tpu.dimension_semantics<parallel>, #tpu.dimension_semantics<parallel>, #tpu.dimension_semantics<arbitrary>], iteration_bounds = array<i64: 1, 1, 1>, scalar_prefetch = 0 : i64, scratch_operands = 1 : i64, tpu.core_type = #tpu.core_type<tc>, window_params = [{transform_indices = @transform_0, window_bounds = array<i64: 2, 128>}, {transform_indices = @transform_1, window_bounds = array<i64: 128, 128>}, {transform_indices = @transform_2, window_bounds = array<i64: 1, 128>}, {transform_indices = @transform_3, window_bounds = array<i64: 2, 128>}]} {
    %c0_i32 = arith.constant 0 : i32
    %0 = arith.cmpi eq, %arg2, %c0_i32 : i32
    %1 = arith.extui %0 : i1 to i32
    %c0_i32_0 = arith.constant 0 : i32
    %2 = arith.cmpi ne, %1, %c0_i32_0 : i32
    scf.if %2 {
      %cst_10 = arith.constant 0.000000e+00 : f32
      %13 = vector.broadcast %cst_10 : f32 to vector<2x128xf32>
      %c0_11 = arith.constant 0 : index
      %c0_12 = arith.constant 0 : index
      %14 = vector.load %arg7[%c0_11, %c0_12] : memref<2x128xf32, #tpu.memory_space<vmem>>, vector<2x128xf32>
      tpu.vector_store %arg7[%c0_11, %c0_12], %13 {strides = array<i32>} : memref<2x128xf32, #tpu.memory_space<vmem>>, vector<2x128xf32>,
    } else {
    }
    %c0 = arith.constant 0 : index
    %c0_1 = arith.constant 0 : index
    %3 = vector.load %arg7[%c0, %c0_1] : memref<2x128xf32, #tpu.memory_space<vmem>>, vector<2x128xf32>
    %c0_2 = arith.constant 0 : index
    %c0_3 = arith.constant 0 : index
    %4 = vector.load %arg3[%c0_2, %c0_3] : memref<2x128xf32, #tpu.memory_space<vmem>>, vector<2x128xf32>
    %5 = arith.truncf %4 : vector<2x128xf32> to vector<2x128xbf16>
    %c0_4 = arith.constant 0 : index
    %c0_5 = arith.constant 0 : index
    %6 = vector.load %arg4[%c0_4, %c0_5] : memref<128x128xbf16, #tpu.memory_space<vmem>>, vector<128x128xbf16>
    %cst = arith.constant dense<0.000000e+00> : vector<2x128xf32>
    %7 = tpu.matmul %5, %6, %cst {dimension_numbers = #tpu.dot_dimension_numbers<[1], [0], [0], [1], [0, 0, 1, 1], [], []>} : vector<2x128xbf16>, vector<128x128xbf16>, vector<2x128xf32> -> vector<2x128xf32>
    %8 = arith.addf %3, %7 : vector<2x128xf32>
    %c0_6 = arith.constant 0 : index
    %c0_7 = arith.constant 0 : index
    %9 = vector.load %arg7[%c0_6, %c0_7] : memref<2x128xf32, #tpu.memory_space<vmem>>, vector<2x128xf32>
    tpu.vector_store %arg7[%c0_6, %c0_7], %8 {strides = array<i32>} : memref<2x128xf32, #tpu.memory_space<vmem>>, vector<2x128xf32>,
    %c0_i32_8 = arith.constant 0 : i32
    %10 = arith.cmpi eq, %arg2, %c0_i32_8 : i32
    %11 = arith.extui %10 : i1 to i32
    %c0_i32_9 = arith.constant 0 : i32
    %12 = arith.cmpi ne, %11, %c0_i32_9 : i32
    scf.if %12 {
      %c0_10 = arith.constant 0 : index
      %c0_11 = arith.constant 0 : index
      %13 = vector.load %arg7[%c0_10, %c0_11] : memref<2x128xf32, #tpu.memory_space<vmem>>, vector<2x128xf32>
      %c0_12 = arith.constant 0 : index
      %c0_13 = arith.constant 0 : index
      %14 = vector.load %arg5[%c0_12, %c0_13] : memref<1x128xf32, #tpu.memory_space<vmem>>, vector<1x128xf32>
      %15 = vector.broadcast %14 : vector<1x128xf32> to vector<2x128xf32>
      %16 = arith.addf %13, %15 : vector<2x128xf32>
      %17 = arith.mulf %16, %16 : vector<2x128xf32>
      %18 = arith.mulf %16, %17 : vector<2x128xf32>
      %cst_14 = arith.constant 4.471500e-02 : f32
      %19 = vector.broadcast %cst_14 : f32 to vector<2x128xf32>
      %20 = arith.mulf %19, %18 : vector<2x128xf32>
      %21 = arith.addf %16, %20 : vector<2x128xf32>
      %cst_15 = arith.constant 0.797884583 : f32
      %22 = vector.broadcast %cst_15 : f32 to vector<2x128xf32>
      %23 = arith.mulf %22, %21 : vector<2x128xf32>
      %24 = math.tanh %23 : vector<2x128xf32>
      %cst_16 = arith.constant 1.000000e+00 : f32
      %25 = vector.broadcast %cst_16 : f32 to vector<2x128xf32>
      %26 = arith.addf %25, %24 : vector<2x128xf32>
      %cst_17 = arith.constant 5.000000e-01 : f32
      %27 = vector.broadcast %cst_17 : f32 to vector<2x128xf32>
      %28 = arith.mulf %27, %26 : vector<2x128xf32>
      %29 = arith.mulf %16, %28 : vector<2x128xf32>
      %30 = arith.truncf %29 : vector<2x128xf32> to vector<2x128xbf16>
      %c0_18 = arith.constant 0 : index
      %c0_19 = arith.constant 0 : index
      %31 = vector.load %arg6[%c0_18, %c0_19] : memref<2x128xbf16, #tpu.memory_space<vmem>>, vector<2x128xbf16>
      tpu.vector_store %arg6[%c0_18, %c0_19], %30 {strides = array<i32>} : memref<2x128xbf16, #tpu.memory_space<vmem>>, vector<2x128xbf16>,
    } else {
    }
    return
  }
  func.func @transform_0(%arg0: i32, %arg1: i32, %arg2: i32) -> (i32, i32) {
    %c0_i32 = arith.constant 0 : i32
    return %arg0, %arg2 : i32, i32
  }
  func.func @transform_1(%arg0: i32, %arg1: i32, %arg2: i32) -> (i32, i32) {
    %c0_i32 = arith.constant 0 : i32
    return %arg2, %arg1 : i32, i32
  }
  func.func @transform_2(%arg0: i32, %arg1: i32, %arg2: i32) -> (i32, i32) {
    %c0_i32 = arith.constant 0 : i32
    %c0_i32_0 = arith.constant 0 : i32
    return %c0_i32, %arg1 : i32, i32
  }
  func.func @transform_3(%arg0: i32, %arg1: i32, %arg2: i32) -> (i32, i32) {
    %c0_i32 = arith.constant 0 : i32
    return %arg0, %arg1 : i32, i32
  }
}

module attributes {stable_mosaic.version = 11 : i64} {
  func.func @_ln_dense_kernel(%arg0: i32, %arg1: i32, %arg2: memref<32x128xbf16, #tpu.memory_space<vmem>>, %arg3: memref<1x128xf32, #tpu.memory_space<vmem>>, %arg4: memref<1x128xf32, #tpu.memory_space<vmem>>, %arg5: memref<128x384xbf16, #tpu.memory_space<vmem>>, %arg6: memref<1x384xf32, #tpu.memory_space<vmem>>, %arg7: memref<32x384xbf16, #tpu.memory_space<vmem>>, %arg8: memref<32x128xbf16, #tpu.memory_space<vmem>>) attributes {dimension_semantics = [#tpu.dimension_semantics<parallel>, #tpu.dimension_semantics<arbitrary>], iteration_bounds = array<i64: 1, 1>, scalar_prefetch = 0 : i64, scratch_operands = 1 : i64, tpu.core_type = #tpu.core_type<tc>, window_params = [{transform_indices = @transform_0, window_bounds = array<i64: 32, 128>}, {pipeline_mode = #tpu.pipeline_mode<synchronous>, transform_indices = @transform_1, window_bounds = array<i64: 1, 128>}, {pipeline_mode = #tpu.pipeline_mode<synchronous>, transform_indices = @transform_2, window_bounds = array<i64: 1, 128>}, {transform_indices = @transform_3, window_bounds = array<i64: 128, 384>}, {transform_indices = @transform_4, window_bounds = array<i64: 1, 384>}, {transform_indices = @transform_5, window_bounds = array<i64: 32, 384>}]} {
    %c0_i32 = arith.constant 0 : i32
    %0 = arith.cmpi eq, %arg1, %c0_i32 : i32
    %1 = arith.extui %0 : i1 to i32
    %c0_i32_0 = arith.constant 0 : i32
    %2 = arith.cmpi ne, %1, %c0_i32_0 : i32
    scf.if %2 {
      %c0_8 = arith.constant 0 : index
      %c0_9 = arith.constant 0 : index
      %11 = vector.load %arg2[%c0_8, %c0_9] : memref<32x128xbf16, #tpu.memory_space<vmem>>, vector<32x128xbf16>
      %12 = arith.extf %11 : vector<32x128xbf16> to vector<32x128xf32>
      %cst_10 = arith.constant dense<0.000000e+00> : vector<32xf32>
      %13 = vector.multi_reduction <add>, %12, %cst_10 [1] : vector<32x128xf32> to vector<32xf32>
      %14 = vector.shape_cast %13 : vector<32xf32> to vector<32x1xf32>
      %cst_11 = arith.constant 1.280000e+02 : f32
      %15 = vector.broadcast %cst_11 : f32 to vector<32x1xf32>
      %16 = arith.divf %14, %15 : vector<32x1xf32>
      %17 = vector.broadcast %16 : vector<32x1xf32> to vector<32x128xf32>
      %18 = arith.subf %12, %17 : vector<32x128xf32>
      %19 = arith.mulf %18, %18 : vector<32x128xf32>
      %cst_12 = arith.constant dense<0.000000e+00> : vector<32xf32>
      %20 = vector.multi_reduction <add>, %19, %cst_12 [1] : vector<32x128xf32> to vector<32xf32>
      %21 = vector.shape_cast %20 : vector<32xf32> to vector<32x1xf32>
      %cst_13 = arith.constant 1.280000e+02 : f32
      %22 = vector.broadcast %cst_13 : f32 to vector<32x1xf32>
      %23 = arith.divf %21, %22 : vector<32x1xf32>
      %24 = vector.broadcast %16 : vector<32x1xf32> to vector<32x128xf32>
      %25 = arith.subf %12, %24 : vector<32x128xf32>
      %cst_14 = arith.constant 9.99999974E-6 : f32
      %26 = vector.broadcast %cst_14 : f32 to vector<32x1xf32>
      %27 = arith.addf %23, %26 : vector<32x1xf32>
      %28 = math.rsqrt %27 : vector<32x1xf32>
      %29 = vector.broadcast %28 : vector<32x1xf32> to vector<32x128xf32>
      %30 = arith.mulf %25, %29 : vector<32x128xf32>
      %c0_15 = arith.constant 0 : index
      %c0_16 = arith.constant 0 : index
      %31 = vector.load %arg3[%c0_15, %c0_16] : memref<1x128xf32, #tpu.memory_space<vmem>>, vector<1x128xf32>
      %32 = vector.broadcast %31 : vector<1x128xf32> to vector<32x128xf32>
      %33 = arith.mulf %30, %32 : vector<32x128xf32>
      %c0_17 = arith.constant 0 : index
      %c0_18 = arith.constant 0 : index
      %34 = vector.load %arg4[%c0_17, %c0_18] : memref<1x128xf32, #tpu.memory_space<vmem>>, vector<1x128xf32>
      %35 = vector.broadcast %34 : vector<1x128xf32> to vector<32x128xf32>
      %36 = arith.addf %33, %35 : vector<32x128xf32>
      %37 = arith.truncf %36 : vector<32x128xf32> to vector<32x128xbf16>
      %c0_19 = arith.constant 0 : index
      %c0_20 = arith.constant 0 : index
      %38 = vector.load %arg8[%c0_19, %c0_20] : memref<32x128xbf16, #tpu.memory_space<vmem>>, vector<32x128xbf16>
      tpu.vector_store %arg8[%c0_19, %c0_20], %37 {strides = array<i32>} : memref<32x128xbf16, #tpu.memory_space<vmem>>, vector<32x128xbf16>,
    } else {
    }
    %c0 = arith.constant 0 : index
    %c0_1 = arith.constant 0 : index
    %3 = vector.load %arg8[%c0, %c0_1] : memref<32x128xbf16, #tpu.memory_space<vmem>>, vector<32x128xbf16>
    %c0_2 = arith.constant 0 : index
    %c0_3 = arith.constant 0 : index
    %4 = vector.load %arg5[%c0_2, %c0_3] : memref<128x384xbf16, #tpu.memory_space<vmem>>, vector<128x384xbf16>
    %cst = arith.constant dense<0.000000e+00> : vector<32x384xf32>
    %5 = tpu.matmul %3, %4, %cst {dimension_numbers = #tpu.dot_dimension_numbers<[1], [0], [0], [1], [0, 0, 1, 1], [], []>} : vector<32x128xbf16>, vector<128x384xbf16>, vector<32x384xf32> -> vector<32x384xf32>
    %c0_4 = arith.constant 0 : index
    %c0_5 = arith.constant 0 : index
    %6 = vector.load %arg6[%c0_4, %c0_5] : memref<1x384xf32, #tpu.memory_space<vmem>>, vector<1x384xf32>
    %7 = vector.broadcast %6 : vector<1x384xf32> to vector<32x384xf32>
    %8 = arith.addf %5, %7 : vector<32x384xf32>
    %9 = arith.truncf %8 : vector<32x384xf32> to vector<32x384xbf16>
    %c0_6 = arith.constant 0 : index
    %c0_7 = arith.constant 0 : index
    %10 = vector.load %arg7[%c0_6, %c0_7] : memref<32x384xbf16, #tpu.memory_space<vmem>>, vector<32x384xbf16>
    tpu.vector_store %arg7[%c0_6, %c0_7], %9 {strides = array<i32>} : memref<32x384xbf16, #tpu.memory_space<vmem>>, vector<32x384xbf16>,
    return
  }
  func.func @transform_0(%arg0: i32, %arg1: i32) -> (i32, i32) {
    %c0_i32 = arith.constant 0 : i32
    %c0_i32_0 = arith.constant 0 : i32
    return %arg0, %c0_i32 : i32, i32
  }
  func.func @transform_1(%arg0: i32, %arg1: i32) -> (i32, i32) {
    %c0_i32 = arith.constant 0 : i32
    %c0_i32_0 = arith.constant 0 : i32
    %c0_i32_1 = arith.constant 0 : i32
    return %c0_i32, %c0_i32_0 : i32, i32
  }
  func.func @transform_2(%arg0: i32, %arg1: i32) -> (i32, i32) {
    %c0_i32 = arith.constant 0 : i32
    %c0_i32_0 = arith.constant 0 : i32
    %c0_i32_1 = arith.constant 0 : i32
    return %c0_i32, %c0_i32_0 : i32, i32
  }
  func.func @transform_3(%arg0: i32, %arg1: i32) -> (i32, i32) {
    %c0_i32 = arith.constant 0 : i32
    %c0_i32_0 = arith.constant 0 : i32
    return %c0_i32, %arg1 : i32, i32
  }
  func.func @transform_4(%arg0: i32, %arg1: i32) -> (i32, i32) {
    %c0_i32 = arith.constant 0 : i32
    %c0_i32_0 = arith.constant 0 : i32
    return %c0_i32, %arg1 : i32, i32
  }
  func.func @transform_5(%arg0: i32, %arg1: i32) -> (i32, i32) {
    %c0_i32 = arith.constant 0 : i32
    return %arg0, %arg1 : i32, i32
  }
}

module attributes {stable_mosaic.version = 11 : i64} {
  func.func @_dense_kernel(%arg0: i32, %arg1: i32, %arg2: i32, %arg3: memref<32x128xbf16, #tpu.memory_space<vmem>>, %arg4: memref<128x128xbf16, #tpu.memory_space<vmem>>, %arg5: memref<1x128xf32, #tpu.memory_space<vmem>>, %arg6: memref<32x128xbf16, #tpu.memory_space<vmem>>, %arg7: memref<32x128xbf16, #tpu.memory_space<vmem>>, %arg8: memref<32x128xf32, #tpu.memory_space<vmem>>) attributes {dimension_semantics = [#tpu.dimension_semantics<parallel>, #tpu.dimension_semantics<parallel>, #tpu.dimension_semantics<arbitrary>], iteration_bounds = array<i64: 1, 1, 1>, scalar_prefetch = 0 : i64, scratch_operands = 1 : i64, tpu.core_type = #tpu.core_type<tc>, window_params = [{transform_indices = @transform_0, window_bounds = array<i64: 32, 128>}, {transform_indices = @transform_1, window_bounds = array<i64: 128, 128>}, {transform_indices = @transform_2, window_bounds = array<i64: 1, 128>}, {transform_indices = @transform_3, window_bounds = array<i64: 32, 128>}, {transform_indices = @transform_4, window_bounds = array<i64: 32, 128>}]} {
    %c0_i32 = arith.constant 0 : i32
    %0 = arith.cmpi eq, %arg2, %c0_i32 : i32
    %1 = arith.extui %0 : i1 to i32
    %c0_i32_0 = arith.constant 0 : i32
    %2 = arith.cmpi ne, %1, %c0_i32_0 : i32
    scf.if %2 {
      %cst_10 = arith.constant 0.000000e+00 : f32
      %12 = vector.broadcast %cst_10 : f32 to vector<32x128xf32>
      %c0_11 = arith.constant 0 : index
      %c0_12 = arith.constant 0 : index
      %13 = vector.load %arg8[%c0_11, %c0_12] : memref<32x128xf32, #tpu.memory_space<vmem>>, vector<32x128xf32>
      tpu.vector_store %arg8[%c0_11, %c0_12], %12 {strides = array<i32>} : memref<32x128xf32, #tpu.memory_space<vmem>>, vector<32x128xf32>,
    } else {
    }
    %c0 = arith.constant 0 : index
    %c0_1 = arith.constant 0 : index
    %3 = vector.load %arg8[%c0, %c0_1] : memref<32x128xf32, #tpu.memory_space<vmem>>, vector<32x128xf32>
    %c0_2 = arith.constant 0 : index
    %c0_3 = arith.constant 0 : index
    %4 = vector.load %arg3[%c0_2, %c0_3] : memref<32x128xbf16, #tpu.memory_space<vmem>>, vector<32x128xbf16>
    %c0_4 = arith.constant 0 : index
    %c0_5 = arith.constant 0 : index
    %5 = vector.load %arg4[%c0_4, %c0_5] : memref<128x128xbf16, #tpu.memory_space<vmem>>, vector<128x128xbf16>
    %cst = arith.constant dense<0.000000e+00> : vector<32x128xf32>
    %6 = tpu.matmul %4, %5, %cst {dimension_numbers = #tpu.dot_dimension_numbers<[1], [0], [0], [1], [0, 0, 1, 1], [], []>} : vector<32x128xbf16>, vector<128x128xbf16>, vector<32x128xf32> -> vector<32x128xf32>
    %7 = arith.addf %3, %6 : vector<32x128xf32>
    %c0_6 = arith.constant 0 : index
    %c0_7 = arith.constant 0 : index
    %8 = vector.load %arg8[%c0_6, %c0_7] : memref<32x128xf32, #tpu.memory_space<vmem>>, vector<32x128xf32>
    tpu.vector_store %arg8[%c0_6, %c0_7], %7 {strides = array<i32>} : memref<32x128xf32, #tpu.memory_space<vmem>>, vector<32x128xf32>,
    %c0_i32_8 = arith.constant 0 : i32
    %9 = arith.cmpi eq, %arg2, %c0_i32_8 : i32
    %10 = arith.extui %9 : i1 to i32
    %c0_i32_9 = arith.constant 0 : i32
    %11 = arith.cmpi ne, %10, %c0_i32_9 : i32
    scf.if %11 {
      %c0_10 = arith.constant 0 : index
      %c0_11 = arith.constant 0 : index
      %12 = vector.load %arg8[%c0_10, %c0_11] : memref<32x128xf32, #tpu.memory_space<vmem>>, vector<32x128xf32>
      %c0_12 = arith.constant 0 : index
      %c0_13 = arith.constant 0 : index
      %13 = vector.load %arg5[%c0_12, %c0_13] : memref<1x128xf32, #tpu.memory_space<vmem>>, vector<1x128xf32>
      %14 = vector.broadcast %13 : vector<1x128xf32> to vector<32x128xf32>
      %15 = arith.addf %12, %14 : vector<32x128xf32>
      %c0_14 = arith.constant 0 : index
      %c0_15 = arith.constant 0 : index
      %16 = vector.load %arg6[%c0_14, %c0_15] : memref<32x128xbf16, #tpu.memory_space<vmem>>, vector<32x128xbf16>
      %17 = arith.extf %16 : vector<32x128xbf16> to vector<32x128xf32>
      %18 = arith.addf %15, %17 : vector<32x128xf32>
      %19 = arith.truncf %18 : vector<32x128xf32> to vector<32x128xbf16>
      %c0_16 = arith.constant 0 : index
      %c0_17 = arith.constant 0 : index
      %20 = vector.load %arg7[%c0_16, %c0_17] : memref<32x128xbf16, #tpu.memory_space<vmem>>, vector<32x128xbf16>
      tpu.vector_store %arg7[%c0_16, %c0_17], %19 {strides = array<i32>} : memref<32x128xbf16, #tpu.memory_space<vmem>>, vector<32x128xbf16>,
    } else {
    }
    return
  }
  func.func @transform_0(%arg0: i32, %arg1: i32, %arg2: i32) -> (i32, i32) {
    %c0_i32 = arith.constant 0 : i32
    return %arg0, %arg2 : i32, i32
  }
  func.func @transform_1(%arg0: i32, %arg1: i32, %arg2: i32) -> (i32, i32) {
    %c0_i32 = arith.constant 0 : i32
    return %arg2, %arg1 : i32, i32
  }
  func.func @transform_2(%arg0: i32, %arg1: i32, %arg2: i32) -> (i32, i32) {
    %c0_i32 = arith.constant 0 : i32
    %c0_i32_0 = arith.constant 0 : i32
    return %c0_i32, %arg1 : i32, i32
  }
  func.func @transform_3(%arg0: i32, %arg1: i32, %arg2: i32) -> (i32, i32) {
    %c0_i32 = arith.constant 0 : i32
    return %arg0, %arg1 : i32, i32
  }
  func.func @transform_4(%arg0: i32, %arg1: i32, %arg2: i32) -> (i32, i32) {
    %c0_i32 = arith.constant 0 : i32
    return %arg0, %arg1 : i32, i32
  }
}

module attributes {stable_mosaic.version = 11 : i64} {
  func.func @_mha_kernel(%arg0: i32, %arg1: i32, %arg2: i32, %arg3: memref<1x16x128xbf16, #tpu.memory_space<vmem>>, %arg4: memref<1x16x128xbf16, #tpu.memory_space<vmem>>, %arg5: memref<1x16x128xbf16, #tpu.memory_space<vmem>>, %arg6: memref<1x1x16xf32, #tpu.memory_space<vmem>>, %arg7: memref<1x16x128xbf16, #tpu.memory_space<vmem>>, %arg8: memref<2x16x1xf32, #tpu.memory_space<vmem>>, %arg9: memref<2x16x1xf32, #tpu.memory_space<vmem>>, %arg10: memref<2x16x64xf32, #tpu.memory_space<vmem>>) attributes {dimension_semantics = [#tpu.dimension_semantics<parallel>, #tpu.dimension_semantics<parallel>, #tpu.dimension_semantics<arbitrary>], iteration_bounds = array<i64: 2, 1, 1>, scalar_prefetch = 0 : i64, scratch_operands = 3 : i64, tpu.core_type = #tpu.core_type<tc>, window_params = [{transform_indices = @transform_0, window_bounds = array<i64: 1, 16, 128>}, {transform_indices = @transform_1, window_bounds = array<i64: 1, 16, 128>}, {transform_indices = @transform_2, window_bounds = array<i64: 1, 16, 128>}, {transform_indices = @transform_3, window_bounds = array<i64: 1, 1, 16>}, {transform_indices = @transform_4, window_bounds = array<i64: 1, 16, 128>}]} {
    %c0_i32 = arith.constant 0 : i32
    %0 = arith.cmpi eq, %arg2, %c0_i32 : i32
    %1 = arith.extui %0 : i1 to i32
    %c0_i32_0 = arith.constant 0 : i32
    %2 = arith.cmpi ne, %1, %c0_i32_0 : i32
    scf.if %2 {
      %cst_57 = arith.constant 0xFF800000 : f32
      %94 = vector.broadcast %cst_57 : f32 to vector<2x16x1xf32>
      %c0_58 = arith.constant 0 : index
      %c0_59 = arith.constant 0 : index
      %c0_60 = arith.constant 0 : index
      %95 = vector.load %arg8[%c0_58, %c0_59, %c0_60] : memref<2x16x1xf32, #tpu.memory_space<vmem>>, vector<2x16x1xf32>
      tpu.vector_store %arg8[%c0_58, %c0_59, %c0_60], %94 {strides = array<i32>} : memref<2x16x1xf32, #tpu.memory_space<vmem>>, vector<2x16x1xf32>,
      %cst_61 = arith.constant 0.000000e+00 : f32
      %96 = vector.broadcast %cst_61 : f32 to vector<2x16x1xf32>
      %c0_62 = arith.constant 0 : index
      %c0_63 = arith.constant 0 : index
      %c0_64 = arith.constant 0 : index
      %97 = vector.load %arg9[%c0_62, %c0_63, %c0_64] : memref<2x16x1xf32, #tpu.memory_space<vmem>>, vector<2x16x1xf32>
      tpu.vector_store %arg9[%c0_62, %c0_63, %c0_64], %96 {strides = array<i32>} : memref<2x16x1xf32, #tpu.memory_space<vmem>>, vector<2x16x1xf32>,
      %cst_65 = arith.constant 0.000000e+00 : f32
      %98 = vector.broadcast %cst_65 : f32 to vector<2x16x64xf32>
      %c0_66 = arith.constant 0 : index
      %c0_67 = arith.constant 0 : index
      %c0_68 = arith.constant 0 : index
      %99 = vector.load %arg10[%c0_66, %c0_67, %c0_68] : memref<2x16x64xf32, #tpu.memory_space<vmem>>, vector<2x16x64xf32>
      tpu.vector_store %arg10[%c0_66, %c0_67, %c0_68], %98 {strides = array<i32>} : memref<2x16x64xf32, #tpu.memory_space<vmem>>, vector<2x16x64xf32>,
    } else {
    }
    %c0 = arith.constant 0 : index
    %c0_1 = arith.constant 0 : index
    %c0_2 = arith.constant 0 : index
    %3 = vector.load %arg3[%c0, %c0_1, %c0_2] : memref<1x16x128xbf16, #tpu.memory_space<vmem>>, vector<1x16x128xbf16>
    %4 = vector.shape_cast %3 : vector<1x16x128xbf16> to vector<16x128xbf16>
    %5 = arith.extf %4 : vector<16x128xbf16> to vector<16x128xf32>
    %cst = arith.constant 1.250000e-01 : f32
    %6 = vector.broadcast %cst : f32 to vector<16x128xf32>
    %7 = arith.mulf %5, %6 : vector<16x128xf32>
    %8 = arith.truncf %7 : vector<16x128xf32> to vector<16x128xbf16>
    %c0_3 = arith.constant 0 : index
    %c0_4 = arith.constant 0 : index
    %c0_5 = arith.constant 0 : index
    %9 = vector.load %arg4[%c0_3, %c0_4, %c0_5] : memref<1x16x128xbf16, #tpu.memory_space<vmem>>, vector<1x16x128xbf16>
    %10 = vector.shape_cast %9 : vector<1x16x128xbf16> to vector<16x128xbf16>
    %c0_6 = arith.constant 0 : index
    %c0_7 = arith.constant 0 : index
    %c0_8 = arith.constant 0 : index
    %11 = vector.load %arg5[%c0_6, %c0_7, %c0_8] : memref<1x16x128xbf16, #tpu.memory_space<vmem>>, vector<1x16x128xbf16>
    %12 = vector.shape_cast %11 : vector<1x16x128xbf16> to vector<16x128xbf16>
    %c0_9 = arith.constant 0 : index
    %c0_10 = arith.constant 0 : index
    %c0_11 = arith.constant 0 : index
    %13 = vector.load %arg6[%c0_9, %c0_10, %c0_11] : memref<1x1x16xf32, #tpu.memory_space<vmem>>, vector<1x1x16xf32>
    %14 = vector.shape_cast %13 : vector<1x1x16xf32> to vector<1x16xf32>
    %15 = vector.extract_strided_slice %8 {offsets = [0, 0], sizes = [16, 64], strides = [1, 1]} : vector<16x128xbf16> to vector<16x64xbf16>
    %16 = vector.extract_strided_slice %10 {offsets = [0, 0], sizes = [16, 64], strides = [1, 1]} : vector<16x128xbf16> to vector<16x64xbf16>
    %17 = vector.extract_strided_slice %12 {offsets = [0, 0], sizes = [16, 64], strides = [1, 1]} : vector<16x128xbf16> to vector<16x64xbf16>
    %cst_12 = arith.constant dense<0.000000e+00> : vector<16x16xf32>
    %18 = tpu.matmul %15, %16, %cst_12 {dimension_numbers = #tpu.dot_dimension_numbers<[1], [1], [0], [0], [0, 0, 1, 0], [], []>} : vector<16x64xbf16>, vector<16x64xbf16>, vector<16x16xf32> -> vector<16x16xf32>
    %19 = vector.broadcast %14 : vector<1x16xf32> to vector<16x16xf32>
    %20 = arith.addf %18, %19 : vector<16x16xf32>
    %c0_13 = arith.constant 0 : index
    %c0_14 = arith.constant 0 : index
    %c0_15 = arith.constant 0 : index
    %21 = vector.load %arg8[%c0_13, %c0_14, %c0_15] : memref<2x16x1xf32, #tpu.memory_space<vmem>>, vector<1x16x1xf32>
    %22 = vector.shape_cast %21 : vector<1x16x1xf32> to vector<16x1xf32>
    %cst_16 = arith.constant dense<0xFF800000> : vector<16xf32>
    %23 = vector.multi_reduction <maximumf>, %20, %cst_16 [1] : vector<16x16xf32> to vector<16xf32>
    %24 = vector.shape_cast %23 : vector<16xf32> to vector<16x1xf32>
    %25 = arith.maximumf %22, %24 : vector<16x1xf32>
    %26 = arith.subf %22, %25 : vector<16x1xf32>
    %27 = math.exp %26 : vector<16x1xf32>
    %28 = vector.broadcast %25 : vector<16x1xf32> to vector<16x16xf32>
    %29 = arith.subf %20, %28 : vector<16x16xf32>
    %30 = math.exp %29 : vector<16x16xf32>
    %c0_17 = arith.constant 0 : index
    %c0_18 = arith.constant 0 : index
    %c0_19 = arith.constant 0 : index
    %31 = vector.load %arg9[%c0_17, %c0_18, %c0_19] : memref<2x16x1xf32, #tpu.memory_space<vmem>>, vector<1x16x1xf32>
    %32 = vector.shape_cast %31 : vector<1x16x1xf32> to vector<16x1xf32>
    %33 = arith.mulf %27, %32 : vector<16x1xf32>
    %cst_20 = arith.constant dense<0.000000e+00> : vector<16xf32>
    %34 = vector.multi_reduction <add>, %30, %cst_20 [1] : vector<16x16xf32> to vector<16xf32>
    %35 = vector.shape_cast %34 : vector<16xf32> to vector<16x1xf32>
    %36 = arith.addf %33, %35 : vector<16x1xf32>
    %c0_21 = arith.constant 0 : index
    %c0_22 = arith.constant 0 : index
    %c0_23 = arith.constant 0 : index
    %37 = vector.load %arg9[%c0_21, %c0_22, %c0_23] : memref<2x16x1xf32, #tpu.memory_space<vmem>>, vector<1x16x1xf32>
    %38 = vector.shape_cast %37 : vector<1x16x1xf32> to vector<16x1xf32>
    %39 = vector.shape_cast %36 : vector<16x1xf32> to vector<1x16x1xf32>
    tpu.vector_store %arg9[%c0_21, %c0_22, %c0_23], %39 {strides = array<i32>} : memref<2x16x1xf32, #tpu.memory_space<vmem>>, vector<1x16x1xf32>,
    %c0_24 = arith.constant 0 : index
    %c0_25 = arith.constant 0 : index
    %c0_26 = arith.constant 0 : index
    %40 = vector.load %arg10[%c0_24, %c0_25, %c0_26] : memref<2x16x64xf32, #tpu.memory_space<vmem>>, vector<1x16x64xf32>
    %41 = vector.shape_cast %40 : vector<1x16x64xf32> to vector<16x64xf32>
    %42 = vector.broadcast %27 : vector<16x1xf32> to vector<16x64xf32>
    %43 = arith.mulf %42, %41 : vector<16x64xf32>
    %44 = arith.truncf %30 : vector<16x16xf32> to vector<16x16xbf16>
    %cst_27 = arith.constant dense<0.000000e+00> : vector<16x64xf32>
    %45 = tpu.matmul %44, %17, %cst_27 {dimension_numbers = #tpu.dot_dimension_numbers<[1], [0], [0], [1], [0, 0, 1, 1], [], []>} : vector<16x16xbf16>, vector<16x64xbf16>, vector<16x64xf32> -> vector<16x64xf32>
    %46 = arith.addf %43, %45 : vector<16x64xf32>
    %c0_28 = arith.constant 0 : index
    %c0_29 = arith.constant 0 : index
    %c0_30 = arith.constant 0 : index
    %47 = vector.load %arg10[%c0_28, %c0_29, %c0_30] : memref<2x16x64xf32, #tpu.memory_space<vmem>>, vector<1x16x64xf32>
    %48 = vector.shape_cast %47 : vector<1x16x64xf32> to vector<16x64xf32>
    %49 = vector.shape_cast %46 : vector<16x64xf32> to vector<1x16x64xf32>
    tpu.vector_store %arg10[%c0_28, %c0_29, %c0_30], %49 {strides = array<i32>} : memref<2x16x64xf32, #tpu.memory_space<vmem>>, vector<1x16x64xf32>,
    %c0_31 = arith.constant 0 : index
    %c0_32 = arith.constant 0 : index
    %c0_33 = arith.constant 0 : index
    %50 = vector.load %arg8[%c0_31, %c0_32, %c0_33] : memref<2x16x1xf32, #tpu.memory_space<vmem>>, vector<1x16x1xf32>
    %51 = vector.shape_cast %50 : vector<1x16x1xf32> to vector<16x1xf32>
    %52 = vector.shape_cast %25 : vector<16x1xf32> to vector<1x16x1xf32>
    tpu.vector_store %arg8[%c0_31, %c0_32, %c0_33], %52 {strides = array<i32>} : memref<2x16x1xf32, #tpu.memory_space<vmem>>, vector<1x16x1xf32>,
    %53 = vector.extract_strided_slice %8 {offsets = [0, 64], sizes = [16, 64], strides = [1, 1]} : vector<16x128xbf16> to vector<16x64xbf16>
    %54 = vector.extract_strided_slice %10 {offsets = [0, 64], sizes = [16, 64], strides = [1, 1]} : vector<16x128xbf16> to vector<16x64xbf16>
    %55 = vector.extract_strided_slice %12 {offsets = [0, 64], sizes = [16, 64], strides = [1, 1]} : vector<16x128xbf16> to vector<16x64xbf16>
    %cst_34 = arith.constant dense<0.000000e+00> : vector<16x16xf32>
    %56 = tpu.matmul %53, %54, %cst_34 {dimension_numbers = #tpu.dot_dimension_numbers<[1], [1], [0], [0], [0, 0, 1, 0], [], []>} : vector<16x64xbf16>, vector<16x64xbf16>, vector<16x16xf32> -> vector<16x16xf32>
    %57 = vector.broadcast %14 : vector<1x16xf32> to vector<16x16xf32>
    %58 = arith.addf %56, %57 : vector<16x16xf32>
    %c1 = arith.constant 1 : index
    %c0_35 = arith.constant 0 : index
    %c0_36 = arith.constant 0 : index
    %59 = vector.load %arg8[%c1, %c0_35, %c0_36] : memref<2x16x1xf32, #tpu.memory_space<vmem>>, vector<1x16x1xf32>
    %60 = vector.shape_cast %59 : vector<1x16x1xf32> to vector<16x1xf32>
    %cst_37 = arith.constant dense<0xFF800000> : vector<16xf32>
    %61 = vector.multi_reduction <maximumf>, %58, %cst_37 [1] : vector<16x16xf32> to vector<16xf32>
    %62 = vector.shape_cast %61 : vector<16xf32> to vector<16x1xf32>
    %63 = arith.maximumf %60, %62 : vector<16x1xf32>
    %64 = arith.subf %60, %63 : vector<16x1xf32>
    %65 = math.exp %64 : vector<16x1xf32>
    %66 = vector.broadcast %63 : vector<16x1xf32> to vector<16x16xf32>
    %67 = arith.subf %58, %66 : vector<16x16xf32>
    %68 = math.exp %67 : vector<16x16xf32>
    %c1_38 = arith.constant 1 : index
    %c0_39 = arith.constant 0 : index
    %c0_40 = arith.constant 0 : index
    %69 = vector.load %arg9[%c1_38, %c0_39, %c0_40] : memref<2x16x1xf32, #tpu.memory_space<vmem>>, vector<1x16x1xf32>
    %70 = vector.shape_cast %69 : vector<1x16x1xf32> to vector<16x1xf32>
    %71 = arith.mulf %65, %70 : vector<16x1xf32>
    %cst_41 = arith.constant dense<0.000000e+00> : vector<16xf32>
    %72 = vector.multi_reduction <add>, %68, %cst_41 [1] : vector<16x16xf32> to vector<16xf32>
    %73 = vector.shape_cast %72 : vector<16xf32> to vector<16x1xf32>
    %74 = arith.addf %71, %73 : vector<16x1xf32>
    %c1_42 = arith.constant 1 : index
    %c0_43 = arith.constant 0 : index
    %c0_44 = arith.constant 0 : index
    %75 = vector.load %arg9[%c1_42, %c0_43, %c0_44] : memref<2x16x1xf32, #tpu.memory_space<vmem>>, vector<1x16x1xf32>
    %76 = vector.shape_cast %75 : vector<1x16x1xf32> to vector<16x1xf32>
    %77 = vector.shape_cast %74 : vector<16x1xf32> to vector<1x16x1xf32>
    tpu.vector_store %arg9[%c1_42, %c0_43, %c0_44], %77 {strides = array<i32>} : memref<2x16x1xf32, #tpu.memory_space<vmem>>, vector<1x16x1xf32>,
    %c1_45 = arith.constant 1 : index
    %c0_46 = arith.constant 0 : index
    %c0_47 = arith.constant 0 : index
    %78 = vector.load %arg10[%c1_45, %c0_46, %c0_47] : memref<2x16x64xf32, #tpu.memory_space<vmem>>, vector<1x16x64xf32>
    %79 = vector.shape_cast %78 : vector<1x16x64xf32> to vector<16x64xf32>
    %80 = vector.broadcast %65 : vector<16x1xf32> to vector<16x64xf32>
    %81 = arith.mulf %80, %79 : vector<16x64xf32>
    %82 = arith.truncf %68 : vector<16x16xf32> to vector<16x16xbf16>
    %cst_48 = arith.constant dense<0.000000e+00> : vector<16x64xf32>
    %83 = tpu.matmul %82, %55, %cst_48 {dimension_numbers = #tpu.dot_dimension_numbers<[1], [0], [0], [1], [0, 0, 1, 1], [], []>} : vector<16x16xbf16>, vector<16x64xbf16>, vector<16x64xf32> -> vector<16x64xf32>
    %84 = arith.addf %81, %83 : vector<16x64xf32>
    %c1_49 = arith.constant 1 : index
    %c0_50 = arith.constant 0 : index
    %c0_51 = arith.constant 0 : index
    %85 = vector.load %arg10[%c1_49, %c0_50, %c0_51] : memref<2x16x64xf32, #tpu.memory_space<vmem>>, vector<1x16x64xf32>
    %86 = vector.shape_cast %85 : vector<1x16x64xf32> to vector<16x64xf32>
    %87 = vector.shape_cast %84 : vector<16x64xf32> to vector<1x16x64xf32>
    tpu.vector_store %arg10[%c1_49, %c0_50, %c0_51], %87 {strides = array<i32>} : memref<2x16x64xf32, #tpu.memory_space<vmem>>, vector<1x16x64xf32>,
    %c1_52 = arith.constant 1 : index
    %c0_53 = arith.constant 0 : index
    %c0_54 = arith.constant 0 : index
    %88 = vector.load %arg8[%c1_52, %c0_53, %c0_54] : memref<2x16x1xf32, #tpu.memory_space<vmem>>, vector<1x16x1xf32>
    %89 = vector.shape_cast %88 : vector<1x16x1xf32> to vector<16x1xf32>
    %90 = vector.shape_cast %63 : vector<16x1xf32> to vector<1x16x1xf32>
    tpu.vector_store %arg8[%c1_52, %c0_53, %c0_54], %90 {strides = array<i32>} : memref<2x16x1xf32, #tpu.memory_space<vmem>>, vector<1x16x1xf32>,
    %c0_i32_55 = arith.constant 0 : i32
    %91 = arith.cmpi eq, %arg2, %c0_i32_55 : i32
    %92 = arith.extui %91 : i1 to i32
    %c0_i32_56 = arith.constant 0 : i32
    %93 = arith.cmpi ne, %92, %c0_i32_56 : i32
    scf.if %93 {
      %c0_57 = arith.constant 0 : index
      %c0_58 = arith.constant 0 : index
      %c0_59 = arith.constant 0 : index
      %94 = vector.load %arg10[%c0_57, %c0_58, %c0_59] : memref<2x16x64xf32, #tpu.memory_space<vmem>>, vector<1x16x64xf32>
      %95 = vector.shape_cast %94 : vector<1x16x64xf32> to vector<16x64xf32>
      %c0_60 = arith.constant 0 : index
      %c0_61 = arith.constant 0 : index
      %c0_62 = arith.constant 0 : index
      %96 = vector.load %arg9[%c0_60, %c0_61, %c0_62] : memref<2x16x1xf32, #tpu.memory_space<vmem>>, vector<1x16x1xf32>
      %97 = vector.shape_cast %96 : vector<1x16x1xf32> to vector<16x1xf32>
      %98 = vector.broadcast %97 : vector<16x1xf32> to vector<16x64xf32>
      %99 = arith.divf %95, %98 : vector<16x64xf32>
      %c1_63 = arith.constant 1 : index
      %c0_64 = arith.constant 0 : index
      %c0_65 = arith.constant 0 : index
      %100 = vector.load %arg10[%c1_63, %c0_64, %c0_65] : memref<2x16x64xf32, #tpu.memory_space<vmem>>, vector<1x16x64xf32>
      %101 = vector.shape_cast %100 : vector<1x16x64xf32> to vector<16x64xf32>
      %c1_66 = arith.constant 1 : index
      %c0_67 = arith.constant 0 : index
      %c0_68 = arith.constant 0 : index
      %102 = vector.load %arg9[%c1_66, %c0_67, %c0_68] : memref<2x16x1xf32, #tpu.memory_space<vmem>>, vector<1x16x1xf32>
      %103 = vector.shape_cast %102 : vector<1x16x1xf32> to vector<16x1xf32>
      %104 = vector.broadcast %103 : vector<16x1xf32> to vector<16x64xf32>
      %105 = arith.divf %101, %104 : vector<16x64xf32>
      %106 = tpu.concatenate %99, %105 in 1 : vector<16x64xf32>, vector<16x64xf32> -> vector<16x128xf32>
      %107 = arith.truncf %106 : vector<16x128xf32> to vector<16x128xbf16>
      %c0_69 = arith.constant 0 : index
      %c0_70 = arith.constant 0 : index
      %c0_71 = arith.constant 0 : index
      %108 = vector.load %arg7[%c0_69, %c0_70, %c0_71] : memref<1x16x128xbf16, #tpu.memory_space<vmem>>, vector<1x16x128xbf16>
      %109 = vector.shape_cast %108 : vector<1x16x128xbf16> to vector<16x128xbf16>
      %110 = vector.shape_cast %107 : vector<16x128xbf16> to vector<1x16x128xbf16>
      tpu.vector_store %arg7[%c0_69, %c0_70, %c0_71], %110 {strides = array<i32>} : memref<1x16x128xbf16, #tpu.memory_space<vmem>>, vector<1x16x128xbf16>,
    } else {
    }
    return
  }
  func.func @transform_0(%arg0: i32, %arg1: i32, %arg2: i32) -> (i32, i32, i32) {
    %c0_i32 = arith.constant 0 : i32
    %c0_i32_0 = arith.constant 0 : i32
    return %arg0, %arg1, %c0_i32 : i32, i32, i32
  }
  func.func @transform_1(%arg0: i32, %arg1: i32, %arg2: i32) -> (i32, i32, i32) {
    %c1_i32 = arith.constant 1 : i32
    %c0_i32 = arith.constant 0 : i32
    return %arg0, %arg2, %c1_i32 : i32, i32, i32
  }
  func.func @transform_2(%arg0: i32, %arg1: i32, %arg2: i32) -> (i32, i32, i32) {
    %c2_i32 = arith.constant 2 : i32
    %c0_i32 = arith.constant 0 : i32
    return %arg0, %arg2, %c2_i32 : i32, i32, i32
  }
  func.func @transform_3(%arg0: i32, %arg1: i32, %arg2: i32) -> (i32, i32, i32) {
    %c0_i32 = arith.constant 0 : i32
    %c0_i32_0 = arith.constant 0 : i32
    return %arg0, %c0_i32, %arg2 : i32, i32, i32
  }
  func.func @transform_4(%arg0: i32, %arg1: i32, %arg2: i32) -> (i32, i32, i32) {
    %c0_i32 = arith.constant 0 : i32
    %c0_i32_0 = arith.constant 0 : i32
    return %arg0, %arg1, %c0_i32 : i32, i32, i32
  }
}

module attributes {stable_mosaic.version = 11 : i64} {
  func.func @_ln_dense_kernel(%arg0: i32, %arg1: i32, %arg2: memref<32x128xbf16, #tpu.memory_space<vmem>>, %arg3: memref<1x128xf32, #tpu.memory_space<vmem>>, %arg4: memref<1x128xf32, #tpu.memory_space<vmem>>, %arg5: memref<128x128xbf16, #tpu.memory_space<vmem>>, %arg6: memref<1x128xf32, #tpu.memory_space<vmem>>, %arg7: memref<32x128xbf16, #tpu.memory_space<vmem>>, %arg8: memref<32x128xbf16, #tpu.memory_space<vmem>>) attributes {dimension_semantics = [#tpu.dimension_semantics<parallel>, #tpu.dimension_semantics<arbitrary>], iteration_bounds = array<i64: 1, 1>, scalar_prefetch = 0 : i64, scratch_operands = 1 : i64, tpu.core_type = #tpu.core_type<tc>, window_params = [{transform_indices = @transform_0, window_bounds = array<i64: 32, 128>}, {pipeline_mode = #tpu.pipeline_mode<synchronous>, transform_indices = @transform_1, window_bounds = array<i64: 1, 128>}, {pipeline_mode = #tpu.pipeline_mode<synchronous>, transform_indices = @transform_2, window_bounds = array<i64: 1, 128>}, {transform_indices = @transform_3, window_bounds = array<i64: 128, 128>}, {transform_indices = @transform_4, window_bounds = array<i64: 1, 128>}, {transform_indices = @transform_5, window_bounds = array<i64: 32, 128>}]} {
    %c0_i32 = arith.constant 0 : i32
    %0 = arith.cmpi eq, %arg1, %c0_i32 : i32
    %1 = arith.extui %0 : i1 to i32
    %c0_i32_0 = arith.constant 0 : i32
    %2 = arith.cmpi ne, %1, %c0_i32_0 : i32
    scf.if %2 {
      %c0_8 = arith.constant 0 : index
      %c0_9 = arith.constant 0 : index
      %11 = vector.load %arg2[%c0_8, %c0_9] : memref<32x128xbf16, #tpu.memory_space<vmem>>, vector<32x128xbf16>
      %12 = arith.extf %11 : vector<32x128xbf16> to vector<32x128xf32>
      %cst_10 = arith.constant dense<0.000000e+00> : vector<32xf32>
      %13 = vector.multi_reduction <add>, %12, %cst_10 [1] : vector<32x128xf32> to vector<32xf32>
      %14 = vector.shape_cast %13 : vector<32xf32> to vector<32x1xf32>
      %cst_11 = arith.constant 1.280000e+02 : f32
      %15 = vector.broadcast %cst_11 : f32 to vector<32x1xf32>
      %16 = arith.divf %14, %15 : vector<32x1xf32>
      %17 = vector.broadcast %16 : vector<32x1xf32> to vector<32x128xf32>
      %18 = arith.subf %12, %17 : vector<32x128xf32>
      %19 = arith.mulf %18, %18 : vector<32x128xf32>
      %cst_12 = arith.constant dense<0.000000e+00> : vector<32xf32>
      %20 = vector.multi_reduction <add>, %19, %cst_12 [1] : vector<32x128xf32> to vector<32xf32>
      %21 = vector.shape_cast %20 : vector<32xf32> to vector<32x1xf32>
      %cst_13 = arith.constant 1.280000e+02 : f32
      %22 = vector.broadcast %cst_13 : f32 to vector<32x1xf32>
      %23 = arith.divf %21, %22 : vector<32x1xf32>
      %24 = vector.broadcast %16 : vector<32x1xf32> to vector<32x128xf32>
      %25 = arith.subf %12, %24 : vector<32x128xf32>
      %cst_14 = arith.constant 9.99999974E-6 : f32
      %26 = vector.broadcast %cst_14 : f32 to vector<32x1xf32>
      %27 = arith.addf %23, %26 : vector<32x1xf32>
      %28 = math.rsqrt %27 : vector<32x1xf32>
      %29 = vector.broadcast %28 : vector<32x1xf32> to vector<32x128xf32>
      %30 = arith.mulf %25, %29 : vector<32x128xf32>
      %c0_15 = arith.constant 0 : index
      %c0_16 = arith.constant 0 : index
      %31 = vector.load %arg3[%c0_15, %c0_16] : memref<1x128xf32, #tpu.memory_space<vmem>>, vector<1x128xf32>
      %32 = vector.broadcast %31 : vector<1x128xf32> to vector<32x128xf32>
      %33 = arith.mulf %30, %32 : vector<32x128xf32>
      %c0_17 = arith.constant 0 : index
      %c0_18 = arith.constant 0 : index
      %34 = vector.load %arg4[%c0_17, %c0_18] : memref<1x128xf32, #tpu.memory_space<vmem>>, vector<1x128xf32>
      %35 = vector.broadcast %34 : vector<1x128xf32> to vector<32x128xf32>
      %36 = arith.addf %33, %35 : vector<32x128xf32>
      %37 = arith.truncf %36 : vector<32x128xf32> to vector<32x128xbf16>
      %c0_19 = arith.constant 0 : index
      %c0_20 = arith.constant 0 : index
      %38 = vector.load %arg8[%c0_19, %c0_20] : memref<32x128xbf16, #tpu.memory_space<vmem>>, vector<32x128xbf16>
      tpu.vector_store %arg8[%c0_19, %c0_20], %37 {strides = array<i32>} : memref<32x128xbf16, #tpu.memory_space<vmem>>, vector<32x128xbf16>,
    } else {
    }
    %c0 = arith.constant 0 : index
    %c0_1 = arith.constant 0 : index
    %3 = vector.load %arg8[%c0, %c0_1] : memref<32x128xbf16, #tpu.memory_space<vmem>>, vector<32x128xbf16>
    %c0_2 = arith.constant 0 : index
    %c0_3 = arith.constant 0 : index
    %4 = vector.load %arg5[%c0_2, %c0_3] : memref<128x128xbf16, #tpu.memory_space<vmem>>, vector<128x128xbf16>
    %cst = arith.constant dense<0.000000e+00> : vector<32x128xf32>
    %5 = tpu.matmul %3, %4, %cst {dimension_numbers = #tpu.dot_dimension_numbers<[1], [0], [0], [1], [0, 0, 1, 1], [], []>} : vector<32x128xbf16>, vector<128x128xbf16>, vector<32x128xf32> -> vector<32x128xf32>
    %c0_4 = arith.constant 0 : index
    %c0_5 = arith.constant 0 : index
    %6 = vector.load %arg6[%c0_4, %c0_5] : memref<1x128xf32, #tpu.memory_space<vmem>>, vector<1x128xf32>
    %7 = vector.broadcast %6 : vector<1x128xf32> to vector<32x128xf32>
    %8 = arith.addf %5, %7 : vector<32x128xf32>
    %9 = arith.truncf %8 : vector<32x128xf32> to vector<32x128xbf16>
    %c0_6 = arith.constant 0 : index
    %c0_7 = arith.constant 0 : index
    %10 = vector.load %arg7[%c0_6, %c0_7] : memref<32x128xbf16, #tpu.memory_space<vmem>>, vector<32x128xbf16>
    tpu.vector_store %arg7[%c0_6, %c0_7], %9 {strides = array<i32>} : memref<32x128xbf16, #tpu.memory_space<vmem>>, vector<32x128xbf16>,
    return
  }
  func.func @transform_0(%arg0: i32, %arg1: i32) -> (i32, i32) {
    %c0_i32 = arith.constant 0 : i32
    %c0_i32_0 = arith.constant 0 : i32
    return %arg0, %c0_i32 : i32, i32
  }
  func.func @transform_1(%arg0: i32, %arg1: i32) -> (i32, i32) {
    %c0_i32 = arith.constant 0 : i32
    %c0_i32_0 = arith.constant 0 : i32
    %c0_i32_1 = arith.constant 0 : i32
    return %c0_i32, %c0_i32_0 : i32, i32
  }
  func.func @transform_2(%arg0: i32, %arg1: i32) -> (i32, i32) {
    %c0_i32 = arith.constant 0 : i32
    %c0_i32_0 = arith.constant 0 : i32
    %c0_i32_1 = arith.constant 0 : i32
    return %c0_i32, %c0_i32_0 : i32, i32
  }
  func.func @transform_3(%arg0: i32, %arg1: i32) -> (i32, i32) {
    %c0_i32 = arith.constant 0 : i32
    %c0_i32_0 = arith.constant 0 : i32
    return %c0_i32, %arg1 : i32, i32
  }
  func.func @transform_4(%arg0: i32, %arg1: i32) -> (i32, i32) {
    %c0_i32 = arith.constant 0 : i32
    %c0_i32_0 = arith.constant 0 : i32
    return %c0_i32, %arg1 : i32, i32
  }
  func.func @transform_5(%arg0: i32, %arg1: i32) -> (i32, i32) {
    %c0_i32 = arith.constant 0 : i32
    return %arg0, %arg1 : i32, i32
  }
}

module attributes {stable_mosaic.version = 11 : i64} {
  func.func @_dense_kernel(%arg0: i32, %arg1: i32, %arg2: i32, %arg3: memref<16x8xf32, #tpu.memory_space<vmem>>, %arg4: memref<8x128xbf16, #tpu.memory_space<vmem>>, %arg5: memref<1x128xf32, #tpu.memory_space<vmem>>, %arg6: memref<16x128xbf16, #tpu.memory_space<vmem>>, %arg7: memref<16x128xf32, #tpu.memory_space<vmem>>) attributes {dimension_semantics = [#tpu.dimension_semantics<parallel>, #tpu.dimension_semantics<parallel>, #tpu.dimension_semantics<arbitrary>], iteration_bounds = array<i64: 1, 1, 1>, scalar_prefetch = 0 : i64, scratch_operands = 1 : i64, tpu.core_type = #tpu.core_type<tc>, window_params = [{transform_indices = @transform_0, window_bounds = array<i64: 16, 8>}, {transform_indices = @transform_1, window_bounds = array<i64: 8, 128>}, {transform_indices = @transform_2, window_bounds = array<i64: 1, 128>}, {transform_indices = @transform_3, window_bounds = array<i64: 16, 128>}]} {
    %c0_i32 = arith.constant 0 : i32
    %0 = arith.cmpi eq, %arg2, %c0_i32 : i32
    %1 = arith.extui %0 : i1 to i32
    %c0_i32_0 = arith.constant 0 : i32
    %2 = arith.cmpi ne, %1, %c0_i32_0 : i32
    scf.if %2 {
      %cst_10 = arith.constant 0.000000e+00 : f32
      %13 = vector.broadcast %cst_10 : f32 to vector<16x128xf32>
      %c0_11 = arith.constant 0 : index
      %c0_12 = arith.constant 0 : index
      %14 = vector.load %arg7[%c0_11, %c0_12] : memref<16x128xf32, #tpu.memory_space<vmem>>, vector<16x128xf32>
      tpu.vector_store %arg7[%c0_11, %c0_12], %13 {strides = array<i32>} : memref<16x128xf32, #tpu.memory_space<vmem>>, vector<16x128xf32>,
    } else {
    }
    %c0 = arith.constant 0 : index
    %c0_1 = arith.constant 0 : index
    %3 = vector.load %arg7[%c0, %c0_1] : memref<16x128xf32, #tpu.memory_space<vmem>>, vector<16x128xf32>
    %c0_2 = arith.constant 0 : index
    %c0_3 = arith.constant 0 : index
    %4 = vector.load %arg3[%c0_2, %c0_3] : memref<16x8xf32, #tpu.memory_space<vmem>>, vector<16x8xf32>
    %5 = arith.truncf %4 : vector<16x8xf32> to vector<16x8xbf16>
    %c0_4 = arith.constant 0 : index
    %c0_5 = arith.constant 0 : index
    %6 = vector.load %arg4[%c0_4, %c0_5] : memref<8x128xbf16, #tpu.memory_space<vmem>>, vector<8x128xbf16>
    %cst = arith.constant dense<0.000000e+00> : vector<16x128xf32>
    %7 = tpu.matmul %5, %6, %cst {dimension_numbers = #tpu.dot_dimension_numbers<[1], [0], [0], [1], [0, 0, 1, 1], [], []>} : vector<16x8xbf16>, vector<8x128xbf16>, vector<16x128xf32> -> vector<16x128xf32>
    %8 = arith.addf %3, %7 : vector<16x128xf32>
    %c0_6 = arith.constant 0 : index
    %c0_7 = arith.constant 0 : index
    %9 = vector.load %arg7[%c0_6, %c0_7] : memref<16x128xf32, #tpu.memory_space<vmem>>, vector<16x128xf32>
    tpu.vector_store %arg7[%c0_6, %c0_7], %8 {strides = array<i32>} : memref<16x128xf32, #tpu.memory_space<vmem>>, vector<16x128xf32>,
    %c0_i32_8 = arith.constant 0 : i32
    %10 = arith.cmpi eq, %arg2, %c0_i32_8 : i32
    %11 = arith.extui %10 : i1 to i32
    %c0_i32_9 = arith.constant 0 : i32
    %12 = arith.cmpi ne, %11, %c0_i32_9 : i32
    scf.if %12 {
      %c0_10 = arith.constant 0 : index
      %c0_11 = arith.constant 0 : index
      %13 = vector.load %arg7[%c0_10, %c0_11] : memref<16x128xf32, #tpu.memory_space<vmem>>, vector<16x128xf32>
      %c0_12 = arith.constant 0 : index
      %c0_13 = arith.constant 0 : index
      %14 = vector.load %arg5[%c0_12, %c0_13] : memref<1x128xf32, #tpu.memory_space<vmem>>, vector<1x128xf32>
      %15 = vector.broadcast %14 : vector<1x128xf32> to vector<16x128xf32>
      %16 = arith.addf %13, %15 : vector<16x128xf32>
      %17 = arith.truncf %16 : vector<16x128xf32> to vector<16x128xbf16>
      %c0_14 = arith.constant 0 : index
      %c0_15 = arith.constant 0 : index
      %18 = vector.load %arg6[%c0_14, %c0_15] : memref<16x128xbf16, #tpu.memory_space<vmem>>, vector<16x128xbf16>
      tpu.vector_store %arg6[%c0_14, %c0_15], %17 {strides = array<i32>} : memref<16x128xbf16, #tpu.memory_space<vmem>>, vector<16x128xbf16>,
    } else {
    }
    return
  }
  func.func @transform_0(%arg0: i32, %arg1: i32, %arg2: i32) -> (i32, i32) {
    %c0_i32 = arith.constant 0 : i32
    return %arg0, %arg2 : i32, i32
  }
  func.func @transform_1(%arg0: i32, %arg1: i32, %arg2: i32) -> (i32, i32) {
    %c0_i32 = arith.constant 0 : i32
    return %arg2, %arg1 : i32, i32
  }
  func.func @transform_2(%arg0: i32, %arg1: i32, %arg2: i32) -> (i32, i32) {
    %c0_i32 = arith.constant 0 : i32
    %c0_i32_0 = arith.constant 0 : i32
    return %c0_i32, %arg1 : i32, i32
  }
  func.func @transform_3(%arg0: i32, %arg1: i32, %arg2: i32) -> (i32, i32) {
    %c0_i32 = arith.constant 0 : i32
    return %arg0, %arg1 : i32, i32
  }
}

module attributes {stable_mosaic.version = 11 : i64} {
  func.func @_ln_dense_kernel(%arg0: i32, %arg1: i32, %arg2: memref<16x128xbf16, #tpu.memory_space<vmem>>, %arg3: memref<1x128xf32, #tpu.memory_space<vmem>>, %arg4: memref<1x128xf32, #tpu.memory_space<vmem>>, %arg5: memref<128x384xbf16, #tpu.memory_space<vmem>>, %arg6: memref<1x384xf32, #tpu.memory_space<vmem>>, %arg7: memref<16x384xbf16, #tpu.memory_space<vmem>>, %arg8: memref<16x128xbf16, #tpu.memory_space<vmem>>) attributes {dimension_semantics = [#tpu.dimension_semantics<parallel>, #tpu.dimension_semantics<arbitrary>], iteration_bounds = array<i64: 1, 1>, scalar_prefetch = 0 : i64, scratch_operands = 1 : i64, tpu.core_type = #tpu.core_type<tc>, window_params = [{transform_indices = @transform_0, window_bounds = array<i64: 16, 128>}, {pipeline_mode = #tpu.pipeline_mode<synchronous>, transform_indices = @transform_1, window_bounds = array<i64: 1, 128>}, {pipeline_mode = #tpu.pipeline_mode<synchronous>, transform_indices = @transform_2, window_bounds = array<i64: 1, 128>}, {transform_indices = @transform_3, window_bounds = array<i64: 128, 384>}, {transform_indices = @transform_4, window_bounds = array<i64: 1, 384>}, {transform_indices = @transform_5, window_bounds = array<i64: 16, 384>}]} {
    %c0_i32 = arith.constant 0 : i32
    %0 = arith.cmpi eq, %arg1, %c0_i32 : i32
    %1 = arith.extui %0 : i1 to i32
    %c0_i32_0 = arith.constant 0 : i32
    %2 = arith.cmpi ne, %1, %c0_i32_0 : i32
    scf.if %2 {
      %c0_8 = arith.constant 0 : index
      %c0_9 = arith.constant 0 : index
      %11 = vector.load %arg2[%c0_8, %c0_9] : memref<16x128xbf16, #tpu.memory_space<vmem>>, vector<16x128xbf16>
      %12 = arith.extf %11 : vector<16x128xbf16> to vector<16x128xf32>
      %cst_10 = arith.constant dense<0.000000e+00> : vector<16xf32>
      %13 = vector.multi_reduction <add>, %12, %cst_10 [1] : vector<16x128xf32> to vector<16xf32>
      %14 = vector.shape_cast %13 : vector<16xf32> to vector<16x1xf32>
      %cst_11 = arith.constant 1.280000e+02 : f32
      %15 = vector.broadcast %cst_11 : f32 to vector<16x1xf32>
      %16 = arith.divf %14, %15 : vector<16x1xf32>
      %17 = vector.broadcast %16 : vector<16x1xf32> to vector<16x128xf32>
      %18 = arith.subf %12, %17 : vector<16x128xf32>
      %19 = arith.mulf %18, %18 : vector<16x128xf32>
      %cst_12 = arith.constant dense<0.000000e+00> : vector<16xf32>
      %20 = vector.multi_reduction <add>, %19, %cst_12 [1] : vector<16x128xf32> to vector<16xf32>
      %21 = vector.shape_cast %20 : vector<16xf32> to vector<16x1xf32>
      %cst_13 = arith.constant 1.280000e+02 : f32
      %22 = vector.broadcast %cst_13 : f32 to vector<16x1xf32>
      %23 = arith.divf %21, %22 : vector<16x1xf32>
      %24 = vector.broadcast %16 : vector<16x1xf32> to vector<16x128xf32>
      %25 = arith.subf %12, %24 : vector<16x128xf32>
      %cst_14 = arith.constant 9.99999974E-6 : f32
      %26 = vector.broadcast %cst_14 : f32 to vector<16x1xf32>
      %27 = arith.addf %23, %26 : vector<16x1xf32>
      %28 = math.rsqrt %27 : vector<16x1xf32>
      %29 = vector.broadcast %28 : vector<16x1xf32> to vector<16x128xf32>
      %30 = arith.mulf %25, %29 : vector<16x128xf32>
      %c0_15 = arith.constant 0 : index
      %c0_16 = arith.constant 0 : index
      %31 = vector.load %arg3[%c0_15, %c0_16] : memref<1x128xf32, #tpu.memory_space<vmem>>, vector<1x128xf32>
      %32 = vector.broadcast %31 : vector<1x128xf32> to vector<16x128xf32>
      %33 = arith.mulf %30, %32 : vector<16x128xf32>
      %c0_17 = arith.constant 0 : index
      %c0_18 = arith.constant 0 : index
      %34 = vector.load %arg4[%c0_17, %c0_18] : memref<1x128xf32, #tpu.memory_space<vmem>>, vector<1x128xf32>
      %35 = vector.broadcast %34 : vector<1x128xf32> to vector<16x128xf32>
      %36 = arith.addf %33, %35 : vector<16x128xf32>
      %37 = arith.truncf %36 : vector<16x128xf32> to vector<16x128xbf16>
      %c0_19 = arith.constant 0 : index
      %c0_20 = arith.constant 0 : index
      %38 = vector.load %arg8[%c0_19, %c0_20] : memref<16x128xbf16, #tpu.memory_space<vmem>>, vector<16x128xbf16>
      tpu.vector_store %arg8[%c0_19, %c0_20], %37 {strides = array<i32>} : memref<16x128xbf16, #tpu.memory_space<vmem>>, vector<16x128xbf16>,
    } else {
    }
    %c0 = arith.constant 0 : index
    %c0_1 = arith.constant 0 : index
    %3 = vector.load %arg8[%c0, %c0_1] : memref<16x128xbf16, #tpu.memory_space<vmem>>, vector<16x128xbf16>
    %c0_2 = arith.constant 0 : index
    %c0_3 = arith.constant 0 : index
    %4 = vector.load %arg5[%c0_2, %c0_3] : memref<128x384xbf16, #tpu.memory_space<vmem>>, vector<128x384xbf16>
    %cst = arith.constant dense<0.000000e+00> : vector<16x384xf32>
    %5 = tpu.matmul %3, %4, %cst {dimension_numbers = #tpu.dot_dimension_numbers<[1], [0], [0], [1], [0, 0, 1, 1], [], []>} : vector<16x128xbf16>, vector<128x384xbf16>, vector<16x384xf32> -> vector<16x384xf32>
    %c0_4 = arith.constant 0 : index
    %c0_5 = arith.constant 0 : index
    %6 = vector.load %arg6[%c0_4, %c0_5] : memref<1x384xf32, #tpu.memory_space<vmem>>, vector<1x384xf32>
    %7 = vector.broadcast %6 : vector<1x384xf32> to vector<16x384xf32>
    %8 = arith.addf %5, %7 : vector<16x384xf32>
    %9 = arith.truncf %8 : vector<16x384xf32> to vector<16x384xbf16>
    %c0_6 = arith.constant 0 : index
    %c0_7 = arith.constant 0 : index
    %10 = vector.load %arg7[%c0_6, %c0_7] : memref<16x384xbf16, #tpu.memory_space<vmem>>, vector<16x384xbf16>
    tpu.vector_store %arg7[%c0_6, %c0_7], %9 {strides = array<i32>} : memref<16x384xbf16, #tpu.memory_space<vmem>>, vector<16x384xbf16>,
    return
  }
  func.func @transform_0(%arg0: i32, %arg1: i32) -> (i32, i32) {
    %c0_i32 = arith.constant 0 : i32
    %c0_i32_0 = arith.constant 0 : i32
    return %arg0, %c0_i32 : i32, i32
  }
  func.func @transform_1(%arg0: i32, %arg1: i32) -> (i32, i32) {
    %c0_i32 = arith.constant 0 : i32
    %c0_i32_0 = arith.constant 0 : i32
    %c0_i32_1 = arith.constant 0 : i32
    return %c0_i32, %c0_i32_0 : i32, i32
  }
  func.func @transform_2(%arg0: i32, %arg1: i32) -> (i32, i32) {
    %c0_i32 = arith.constant 0 : i32
    %c0_i32_0 = arith.constant 0 : i32
    %c0_i32_1 = arith.constant 0 : i32
    return %c0_i32, %c0_i32_0 : i32, i32
  }
  func.func @transform_3(%arg0: i32, %arg1: i32) -> (i32, i32) {
    %c0_i32 = arith.constant 0 : i32
    %c0_i32_0 = arith.constant 0 : i32
    return %c0_i32, %arg1 : i32, i32
  }
  func.func @transform_4(%arg0: i32, %arg1: i32) -> (i32, i32) {
    %c0_i32 = arith.constant 0 : i32
    %c0_i32_0 = arith.constant 0 : i32
    return %c0_i32, %arg1 : i32, i32
  }
  func.func @transform_5(%arg0: i32, %arg1: i32) -> (i32, i32) {
    %c0_i32 = arith.constant 0 : i32
    return %arg0, %arg1 : i32, i32
  }
}

module attributes {stable_mosaic.version = 11 : i64} {
  func.func @_dense_kernel(%arg0: i32, %arg1: i32, %arg2: i32, %arg3: memref<16x128xbf16, #tpu.memory_space<vmem>>, %arg4: memref<128x128xbf16, #tpu.memory_space<vmem>>, %arg5: memref<1x128xf32, #tpu.memory_space<vmem>>, %arg6: memref<16x128xbf16, #tpu.memory_space<vmem>>, %arg7: memref<16x128xbf16, #tpu.memory_space<vmem>>, %arg8: memref<16x128xf32, #tpu.memory_space<vmem>>) attributes {dimension_semantics = [#tpu.dimension_semantics<parallel>, #tpu.dimension_semantics<parallel>, #tpu.dimension_semantics<arbitrary>], iteration_bounds = array<i64: 1, 1, 1>, scalar_prefetch = 0 : i64, scratch_operands = 1 : i64, tpu.core_type = #tpu.core_type<tc>, window_params = [{transform_indices = @transform_0, window_bounds = array<i64: 16, 128>}, {transform_indices = @transform_1, window_bounds = array<i64: 128, 128>}, {transform_indices = @transform_2, window_bounds = array<i64: 1, 128>}, {transform_indices = @transform_3, window_bounds = array<i64: 16, 128>}, {transform_indices = @transform_4, window_bounds = array<i64: 16, 128>}]} {
    %c0_i32 = arith.constant 0 : i32
    %0 = arith.cmpi eq, %arg2, %c0_i32 : i32
    %1 = arith.extui %0 : i1 to i32
    %c0_i32_0 = arith.constant 0 : i32
    %2 = arith.cmpi ne, %1, %c0_i32_0 : i32
    scf.if %2 {
      %cst_10 = arith.constant 0.000000e+00 : f32
      %12 = vector.broadcast %cst_10 : f32 to vector<16x128xf32>
      %c0_11 = arith.constant 0 : index
      %c0_12 = arith.constant 0 : index
      %13 = vector.load %arg8[%c0_11, %c0_12] : memref<16x128xf32, #tpu.memory_space<vmem>>, vector<16x128xf32>
      tpu.vector_store %arg8[%c0_11, %c0_12], %12 {strides = array<i32>} : memref<16x128xf32, #tpu.memory_space<vmem>>, vector<16x128xf32>,
    } else {
    }
    %c0 = arith.constant 0 : index
    %c0_1 = arith.constant 0 : index
    %3 = vector.load %arg8[%c0, %c0_1] : memref<16x128xf32, #tpu.memory_space<vmem>>, vector<16x128xf32>
    %c0_2 = arith.constant 0 : index
    %c0_3 = arith.constant 0 : index
    %4 = vector.load %arg3[%c0_2, %c0_3] : memref<16x128xbf16, #tpu.memory_space<vmem>>, vector<16x128xbf16>
    %c0_4 = arith.constant 0 : index
    %c0_5 = arith.constant 0 : index
    %5 = vector.load %arg4[%c0_4, %c0_5] : memref<128x128xbf16, #tpu.memory_space<vmem>>, vector<128x128xbf16>
    %cst = arith.constant dense<0.000000e+00> : vector<16x128xf32>
    %6 = tpu.matmul %4, %5, %cst {dimension_numbers = #tpu.dot_dimension_numbers<[1], [0], [0], [1], [0, 0, 1, 1], [], []>} : vector<16x128xbf16>, vector<128x128xbf16>, vector<16x128xf32> -> vector<16x128xf32>
    %7 = arith.addf %3, %6 : vector<16x128xf32>
    %c0_6 = arith.constant 0 : index
    %c0_7 = arith.constant 0 : index
    %8 = vector.load %arg8[%c0_6, %c0_7] : memref<16x128xf32, #tpu.memory_space<vmem>>, vector<16x128xf32>
    tpu.vector_store %arg8[%c0_6, %c0_7], %7 {strides = array<i32>} : memref<16x128xf32, #tpu.memory_space<vmem>>, vector<16x128xf32>,
    %c0_i32_8 = arith.constant 0 : i32
    %9 = arith.cmpi eq, %arg2, %c0_i32_8 : i32
    %10 = arith.extui %9 : i1 to i32
    %c0_i32_9 = arith.constant 0 : i32
    %11 = arith.cmpi ne, %10, %c0_i32_9 : i32
    scf.if %11 {
      %c0_10 = arith.constant 0 : index
      %c0_11 = arith.constant 0 : index
      %12 = vector.load %arg8[%c0_10, %c0_11] : memref<16x128xf32, #tpu.memory_space<vmem>>, vector<16x128xf32>
      %c0_12 = arith.constant 0 : index
      %c0_13 = arith.constant 0 : index
      %13 = vector.load %arg5[%c0_12, %c0_13] : memref<1x128xf32, #tpu.memory_space<vmem>>, vector<1x128xf32>
      %14 = vector.broadcast %13 : vector<1x128xf32> to vector<16x128xf32>
      %15 = arith.addf %12, %14 : vector<16x128xf32>
      %c0_14 = arith.constant 0 : index
      %c0_15 = arith.constant 0 : index
      %16 = vector.load %arg6[%c0_14, %c0_15] : memref<16x128xbf16, #tpu.memory_space<vmem>>, vector<16x128xbf16>
      %17 = arith.extf %16 : vector<16x128xbf16> to vector<16x128xf32>
      %18 = arith.addf %15, %17 : vector<16x128xf32>
      %19 = arith.truncf %18 : vector<16x128xf32> to vector<16x128xbf16>
      %c0_16 = arith.constant 0 : index
      %c0_17 = arith.constant 0 : index
      %20 = vector.load %arg7[%c0_16, %c0_17] : memref<16x128xbf16, #tpu.memory_space<vmem>>, vector<16x128xbf16>
      tpu.vector_store %arg7[%c0_16, %c0_17], %19 {strides = array<i32>} : memref<16x128xbf16, #tpu.memory_space<vmem>>, vector<16x128xbf16>,
    } else {
    }
    return
  }
  func.func @transform_0(%arg0: i32, %arg1: i32, %arg2: i32) -> (i32, i32) {
    %c0_i32 = arith.constant 0 : i32
    return %arg0, %arg2 : i32, i32
  }
  func.func @transform_1(%arg0: i32, %arg1: i32, %arg2: i32) -> (i32, i32) {
    %c0_i32 = arith.constant 0 : i32
    return %arg2, %arg1 : i32, i32
  }
  func.func @transform_2(%arg0: i32, %arg1: i32, %arg2: i32) -> (i32, i32) {
    %c0_i32 = arith.constant 0 : i32
    %c0_i32_0 = arith.constant 0 : i32
    return %c0_i32, %arg1 : i32, i32
  }
  func.func @transform_3(%arg0: i32, %arg1: i32, %arg2: i32) -> (i32, i32) {
    %c0_i32 = arith.constant 0 : i32
    return %arg0, %arg1 : i32, i32
  }
  func.func @transform_4(%arg0: i32, %arg1: i32, %arg2: i32) -> (i32, i32) {
    %c0_i32 = arith.constant 0 : i32
    return %arg0, %arg1 : i32, i32
  }
}

module attributes {stable_mosaic.version = 11 : i64} {
  func.func @_mha_kernel(%arg0: i32, %arg1: i32, %arg2: i32, %arg3: memref<1x8x128xbf16, #tpu.memory_space<vmem>>, %arg4: memref<1x8x128xbf16, #tpu.memory_space<vmem>>, %arg5: memref<1x8x128xbf16, #tpu.memory_space<vmem>>, %arg6: memref<1x1x8xf32, #tpu.memory_space<vmem>>, %arg7: memref<1x8x128xbf16, #tpu.memory_space<vmem>>, %arg8: memref<2x8x1xf32, #tpu.memory_space<vmem>>, %arg9: memref<2x8x1xf32, #tpu.memory_space<vmem>>, %arg10: memref<2x8x64xf32, #tpu.memory_space<vmem>>) attributes {dimension_semantics = [#tpu.dimension_semantics<parallel>, #tpu.dimension_semantics<parallel>, #tpu.dimension_semantics<arbitrary>], iteration_bounds = array<i64: 2, 1, 1>, scalar_prefetch = 0 : i64, scratch_operands = 3 : i64, tpu.core_type = #tpu.core_type<tc>, window_params = [{transform_indices = @transform_0, window_bounds = array<i64: 1, 8, 128>}, {transform_indices = @transform_1, window_bounds = array<i64: 1, 8, 128>}, {transform_indices = @transform_2, window_bounds = array<i64: 1, 8, 128>}, {transform_indices = @transform_3, window_bounds = array<i64: 1, 1, 8>}, {transform_indices = @transform_4, window_bounds = array<i64: 1, 8, 128>}]} {
    %c0_i32 = arith.constant 0 : i32
    %0 = arith.cmpi eq, %arg2, %c0_i32 : i32
    %1 = arith.extui %0 : i1 to i32
    %c0_i32_0 = arith.constant 0 : i32
    %2 = arith.cmpi ne, %1, %c0_i32_0 : i32
    scf.if %2 {
      %cst_57 = arith.constant 0xFF800000 : f32
      %94 = vector.broadcast %cst_57 : f32 to vector<2x8x1xf32>
      %c0_58 = arith.constant 0 : index
      %c0_59 = arith.constant 0 : index
      %c0_60 = arith.constant 0 : index
      %95 = vector.load %arg8[%c0_58, %c0_59, %c0_60] : memref<2x8x1xf32, #tpu.memory_space<vmem>>, vector<2x8x1xf32>
      tpu.vector_store %arg8[%c0_58, %c0_59, %c0_60], %94 {strides = array<i32>} : memref<2x8x1xf32, #tpu.memory_space<vmem>>, vector<2x8x1xf32>,
      %cst_61 = arith.constant 0.000000e+00 : f32
      %96 = vector.broadcast %cst_61 : f32 to vector<2x8x1xf32>
      %c0_62 = arith.constant 0 : index
      %c0_63 = arith.constant 0 : index
      %c0_64 = arith.constant 0 : index
      %97 = vector.load %arg9[%c0_62, %c0_63, %c0_64] : memref<2x8x1xf32, #tpu.memory_space<vmem>>, vector<2x8x1xf32>
      tpu.vector_store %arg9[%c0_62, %c0_63, %c0_64], %96 {strides = array<i32>} : memref<2x8x1xf32, #tpu.memory_space<vmem>>, vector<2x8x1xf32>,
      %cst_65 = arith.constant 0.000000e+00 : f32
      %98 = vector.broadcast %cst_65 : f32 to vector<2x8x64xf32>
      %c0_66 = arith.constant 0 : index
      %c0_67 = arith.constant 0 : index
      %c0_68 = arith.constant 0 : index
      %99 = vector.load %arg10[%c0_66, %c0_67, %c0_68] : memref<2x8x64xf32, #tpu.memory_space<vmem>>, vector<2x8x64xf32>
      tpu.vector_store %arg10[%c0_66, %c0_67, %c0_68], %98 {strides = array<i32>} : memref<2x8x64xf32, #tpu.memory_space<vmem>>, vector<2x8x64xf32>,
    } else {
    }
    %c0 = arith.constant 0 : index
    %c0_1 = arith.constant 0 : index
    %c0_2 = arith.constant 0 : index
    %3 = vector.load %arg3[%c0, %c0_1, %c0_2] : memref<1x8x128xbf16, #tpu.memory_space<vmem>>, vector<1x8x128xbf16>
    %4 = vector.shape_cast %3 : vector<1x8x128xbf16> to vector<8x128xbf16>
    %5 = arith.extf %4 : vector<8x128xbf16> to vector<8x128xf32>
    %cst = arith.constant 1.250000e-01 : f32
    %6 = vector.broadcast %cst : f32 to vector<8x128xf32>
    %7 = arith.mulf %5, %6 : vector<8x128xf32>
    %8 = arith.truncf %7 : vector<8x128xf32> to vector<8x128xbf16>
    %c0_3 = arith.constant 0 : index
    %c0_4 = arith.constant 0 : index
    %c0_5 = arith.constant 0 : index
    %9 = vector.load %arg4[%c0_3, %c0_4, %c0_5] : memref<1x8x128xbf16, #tpu.memory_space<vmem>>, vector<1x8x128xbf16>
    %10 = vector.shape_cast %9 : vector<1x8x128xbf16> to vector<8x128xbf16>
    %c0_6 = arith.constant 0 : index
    %c0_7 = arith.constant 0 : index
    %c0_8 = arith.constant 0 : index
    %11 = vector.load %arg5[%c0_6, %c0_7, %c0_8] : memref<1x8x128xbf16, #tpu.memory_space<vmem>>, vector<1x8x128xbf16>
    %12 = vector.shape_cast %11 : vector<1x8x128xbf16> to vector<8x128xbf16>
    %c0_9 = arith.constant 0 : index
    %c0_10 = arith.constant 0 : index
    %c0_11 = arith.constant 0 : index
    %13 = vector.load %arg6[%c0_9, %c0_10, %c0_11] : memref<1x1x8xf32, #tpu.memory_space<vmem>>, vector<1x1x8xf32>
    %14 = vector.shape_cast %13 : vector<1x1x8xf32> to vector<1x8xf32>
    %15 = vector.extract_strided_slice %8 {offsets = [0, 0], sizes = [8, 64], strides = [1, 1]} : vector<8x128xbf16> to vector<8x64xbf16>
    %16 = vector.extract_strided_slice %10 {offsets = [0, 0], sizes = [8, 64], strides = [1, 1]} : vector<8x128xbf16> to vector<8x64xbf16>
    %17 = vector.extract_strided_slice %12 {offsets = [0, 0], sizes = [8, 64], strides = [1, 1]} : vector<8x128xbf16> to vector<8x64xbf16>
    %cst_12 = arith.constant dense<0.000000e+00> : vector<8x8xf32>
    %18 = tpu.matmul %15, %16, %cst_12 {dimension_numbers = #tpu.dot_dimension_numbers<[1], [1], [0], [0], [0, 0, 1, 0], [], []>} : vector<8x64xbf16>, vector<8x64xbf16>, vector<8x8xf32> -> vector<8x8xf32>
    %19 = vector.broadcast %14 : vector<1x8xf32> to vector<8x8xf32>
    %20 = arith.addf %18, %19 : vector<8x8xf32>
    %c0_13 = arith.constant 0 : index
    %c0_14 = arith.constant 0 : index
    %c0_15 = arith.constant 0 : index
    %21 = vector.load %arg8[%c0_13, %c0_14, %c0_15] : memref<2x8x1xf32, #tpu.memory_space<vmem>>, vector<1x8x1xf32>
    %22 = vector.shape_cast %21 : vector<1x8x1xf32> to vector<8x1xf32>
    %cst_16 = arith.constant dense<0xFF800000> : vector<8xf32>
    %23 = vector.multi_reduction <maximumf>, %20, %cst_16 [1] : vector<8x8xf32> to vector<8xf32>
    %24 = vector.shape_cast %23 : vector<8xf32> to vector<8x1xf32>
    %25 = arith.maximumf %22, %24 : vector<8x1xf32>
    %26 = arith.subf %22, %25 : vector<8x1xf32>
    %27 = math.exp %26 : vector<8x1xf32>
    %28 = vector.broadcast %25 : vector<8x1xf32> to vector<8x8xf32>
    %29 = arith.subf %20, %28 : vector<8x8xf32>
    %30 = math.exp %29 : vector<8x8xf32>
    %c0_17 = arith.constant 0 : index
    %c0_18 = arith.constant 0 : index
    %c0_19 = arith.constant 0 : index
    %31 = vector.load %arg9[%c0_17, %c0_18, %c0_19] : memref<2x8x1xf32, #tpu.memory_space<vmem>>, vector<1x8x1xf32>
    %32 = vector.shape_cast %31 : vector<1x8x1xf32> to vector<8x1xf32>
    %33 = arith.mulf %27, %32 : vector<8x1xf32>
    %cst_20 = arith.constant dense<0.000000e+00> : vector<8xf32>
    %34 = vector.multi_reduction <add>, %30, %cst_20 [1] : vector<8x8xf32> to vector<8xf32>
    %35 = vector.shape_cast %34 : vector<8xf32> to vector<8x1xf32>
    %36 = arith.addf %33, %35 : vector<8x1xf32>
    %c0_21 = arith.constant 0 : index
    %c0_22 = arith.constant 0 : index
    %c0_23 = arith.constant 0 : index
    %37 = vector.load %arg9[%c0_21, %c0_22, %c0_23] : memref<2x8x1xf32, #tpu.memory_space<vmem>>, vector<1x8x1xf32>
    %38 = vector.shape_cast %37 : vector<1x8x1xf32> to vector<8x1xf32>
    %39 = vector.shape_cast %36 : vector<8x1xf32> to vector<1x8x1xf32>
    tpu.vector_store %arg9[%c0_21, %c0_22, %c0_23], %39 {strides = array<i32>} : memref<2x8x1xf32, #tpu.memory_space<vmem>>, vector<1x8x1xf32>,
    %c0_24 = arith.constant 0 : index
    %c0_25 = arith.constant 0 : index
    %c0_26 = arith.constant 0 : index
    %40 = vector.load %arg10[%c0_24, %c0_25, %c0_26] : memref<2x8x64xf32, #tpu.memory_space<vmem>>, vector<1x8x64xf32>
    %41 = vector.shape_cast %40 : vector<1x8x64xf32> to vector<8x64xf32>
    %42 = vector.broadcast %27 : vector<8x1xf32> to vector<8x64xf32>
    %43 = arith.mulf %42, %41 : vector<8x64xf32>
    %44 = arith.truncf %30 : vector<8x8xf32> to vector<8x8xbf16>
    %cst_27 = arith.constant dense<0.000000e+00> : vector<8x64xf32>
    %45 = tpu.matmul %44, %17, %cst_27 {dimension_numbers = #tpu.dot_dimension_numbers<[1], [0], [0], [1], [0, 0, 1, 1], [], []>} : vector<8x8xbf16>, vector<8x64xbf16>, vector<8x64xf32> -> vector<8x64xf32>
    %46 = arith.addf %43, %45 : vector<8x64xf32>
    %c0_28 = arith.constant 0 : index
    %c0_29 = arith.constant 0 : index
    %c0_30 = arith.constant 0 : index
    %47 = vector.load %arg10[%c0_28, %c0_29, %c0_30] : memref<2x8x64xf32, #tpu.memory_space<vmem>>, vector<1x8x64xf32>
    %48 = vector.shape_cast %47 : vector<1x8x64xf32> to vector<8x64xf32>
    %49 = vector.shape_cast %46 : vector<8x64xf32> to vector<1x8x64xf32>
    tpu.vector_store %arg10[%c0_28, %c0_29, %c0_30], %49 {strides = array<i32>} : memref<2x8x64xf32, #tpu.memory_space<vmem>>, vector<1x8x64xf32>,
    %c0_31 = arith.constant 0 : index
    %c0_32 = arith.constant 0 : index
    %c0_33 = arith.constant 0 : index
    %50 = vector.load %arg8[%c0_31, %c0_32, %c0_33] : memref<2x8x1xf32, #tpu.memory_space<vmem>>, vector<1x8x1xf32>
    %51 = vector.shape_cast %50 : vector<1x8x1xf32> to vector<8x1xf32>
    %52 = vector.shape_cast %25 : vector<8x1xf32> to vector<1x8x1xf32>
    tpu.vector_store %arg8[%c0_31, %c0_32, %c0_33], %52 {strides = array<i32>} : memref<2x8x1xf32, #tpu.memory_space<vmem>>, vector<1x8x1xf32>,
    %53 = vector.extract_strided_slice %8 {offsets = [0, 64], sizes = [8, 64], strides = [1, 1]} : vector<8x128xbf16> to vector<8x64xbf16>
    %54 = vector.extract_strided_slice %10 {offsets = [0, 64], sizes = [8, 64], strides = [1, 1]} : vector<8x128xbf16> to vector<8x64xbf16>
    %55 = vector.extract_strided_slice %12 {offsets = [0, 64], sizes = [8, 64], strides = [1, 1]} : vector<8x128xbf16> to vector<8x64xbf16>
    %cst_34 = arith.constant dense<0.000000e+00> : vector<8x8xf32>
    %56 = tpu.matmul %53, %54, %cst_34 {dimension_numbers = #tpu.dot_dimension_numbers<[1], [1], [0], [0], [0, 0, 1, 0], [], []>} : vector<8x64xbf16>, vector<8x64xbf16>, vector<8x8xf32> -> vector<8x8xf32>
    %57 = vector.broadcast %14 : vector<1x8xf32> to vector<8x8xf32>
    %58 = arith.addf %56, %57 : vector<8x8xf32>
    %c1 = arith.constant 1 : index
    %c0_35 = arith.constant 0 : index
    %c0_36 = arith.constant 0 : index
    %59 = vector.load %arg8[%c1, %c0_35, %c0_36] : memref<2x8x1xf32, #tpu.memory_space<vmem>>, vector<1x8x1xf32>
    %60 = vector.shape_cast %59 : vector<1x8x1xf32> to vector<8x1xf32>
    %cst_37 = arith.constant dense<0xFF800000> : vector<8xf32>
    %61 = vector.multi_reduction <maximumf>, %58, %cst_37 [1] : vector<8x8xf32> to vector<8xf32>
    %62 = vector.shape_cast %61 : vector<8xf32> to vector<8x1xf32>
    %63 = arith.maximumf %60, %62 : vector<8x1xf32>
    %64 = arith.subf %60, %63 : vector<8x1xf32>
    %65 = math.exp %64 : vector<8x1xf32>
    %66 = vector.broadcast %63 : vector<8x1xf32> to vector<8x8xf32>
    %67 = arith.subf %58, %66 : vector<8x8xf32>
    %68 = math.exp %67 : vector<8x8xf32>
    %c1_38 = arith.constant 1 : index
    %c0_39 = arith.constant 0 : index
    %c0_40 = arith.constant 0 : index
    %69 = vector.load %arg9[%c1_38, %c0_39, %c0_40] : memref<2x8x1xf32, #tpu.memory_space<vmem>>, vector<1x8x1xf32>
    %70 = vector.shape_cast %69 : vector<1x8x1xf32> to vector<8x1xf32>
    %71 = arith.mulf %65, %70 : vector<8x1xf32>
    %cst_41 = arith.constant dense<0.000000e+00> : vector<8xf32>
    %72 = vector.multi_reduction <add>, %68, %cst_41 [1] : vector<8x8xf32> to vector<8xf32>
    %73 = vector.shape_cast %72 : vector<8xf32> to vector<8x1xf32>
    %74 = arith.addf %71, %73 : vector<8x1xf32>
    %c1_42 = arith.constant 1 : index
    %c0_43 = arith.constant 0 : index
    %c0_44 = arith.constant 0 : index
    %75 = vector.load %arg9[%c1_42, %c0_43, %c0_44] : memref<2x8x1xf32, #tpu.memory_space<vmem>>, vector<1x8x1xf32>
    %76 = vector.shape_cast %75 : vector<1x8x1xf32> to vector<8x1xf32>
    %77 = vector.shape_cast %74 : vector<8x1xf32> to vector<1x8x1xf32>
    tpu.vector_store %arg9[%c1_42, %c0_43, %c0_44], %77 {strides = array<i32>} : memref<2x8x1xf32, #tpu.memory_space<vmem>>, vector<1x8x1xf32>,
    %c1_45 = arith.constant 1 : index
    %c0_46 = arith.constant 0 : index
    %c0_47 = arith.constant 0 : index
    %78 = vector.load %arg10[%c1_45, %c0_46, %c0_47] : memref<2x8x64xf32, #tpu.memory_space<vmem>>, vector<1x8x64xf32>
    %79 = vector.shape_cast %78 : vector<1x8x64xf32> to vector<8x64xf32>
    %80 = vector.broadcast %65 : vector<8x1xf32> to vector<8x64xf32>
    %81 = arith.mulf %80, %79 : vector<8x64xf32>
    %82 = arith.truncf %68 : vector<8x8xf32> to vector<8x8xbf16>
    %cst_48 = arith.constant dense<0.000000e+00> : vector<8x64xf32>
    %83 = tpu.matmul %82, %55, %cst_48 {dimension_numbers = #tpu.dot_dimension_numbers<[1], [0], [0], [1], [0, 0, 1, 1], [], []>} : vector<8x8xbf16>, vector<8x64xbf16>, vector<8x64xf32> -> vector<8x64xf32>
    %84 = arith.addf %81, %83 : vector<8x64xf32>
    %c1_49 = arith.constant 1 : index
    %c0_50 = arith.constant 0 : index
    %c0_51 = arith.constant 0 : index
    %85 = vector.load %arg10[%c1_49, %c0_50, %c0_51] : memref<2x8x64xf32, #tpu.memory_space<vmem>>, vector<1x8x64xf32>
    %86 = vector.shape_cast %85 : vector<1x8x64xf32> to vector<8x64xf32>
    %87 = vector.shape_cast %84 : vector<8x64xf32> to vector<1x8x64xf32>
    tpu.vector_store %arg10[%c1_49, %c0_50, %c0_51], %87 {strides = array<i32>} : memref<2x8x64xf32, #tpu.memory_space<vmem>>, vector<1x8x64xf32>,
    %c1_52 = arith.constant 1 : index
    %c0_53 = arith.constant 0 : index
    %c0_54 = arith.constant 0 : index
    %88 = vector.load %arg8[%c1_52, %c0_53, %c0_54] : memref<2x8x1xf32, #tpu.memory_space<vmem>>, vector<1x8x1xf32>
    %89 = vector.shape_cast %88 : vector<1x8x1xf32> to vector<8x1xf32>
    %90 = vector.shape_cast %63 : vector<8x1xf32> to vector<1x8x1xf32>
    tpu.vector_store %arg8[%c1_52, %c0_53, %c0_54], %90 {strides = array<i32>} : memref<2x8x1xf32, #tpu.memory_space<vmem>>, vector<1x8x1xf32>,
    %c0_i32_55 = arith.constant 0 : i32
    %91 = arith.cmpi eq, %arg2, %c0_i32_55 : i32
    %92 = arith.extui %91 : i1 to i32
    %c0_i32_56 = arith.constant 0 : i32
    %93 = arith.cmpi ne, %92, %c0_i32_56 : i32
    scf.if %93 {
      %c0_57 = arith.constant 0 : index
      %c0_58 = arith.constant 0 : index
      %c0_59 = arith.constant 0 : index
      %94 = vector.load %arg10[%c0_57, %c0_58, %c0_59] : memref<2x8x64xf32, #tpu.memory_space<vmem>>, vector<1x8x64xf32>
      %95 = vector.shape_cast %94 : vector<1x8x64xf32> to vector<8x64xf32>
      %c0_60 = arith.constant 0 : index
      %c0_61 = arith.constant 0 : index
      %c0_62 = arith.constant 0 : index
      %96 = vector.load %arg9[%c0_60, %c0_61, %c0_62] : memref<2x8x1xf32, #tpu.memory_space<vmem>>, vector<1x8x1xf32>
      %97 = vector.shape_cast %96 : vector<1x8x1xf32> to vector<8x1xf32>
      %98 = vector.broadcast %97 : vector<8x1xf32> to vector<8x64xf32>
      %99 = arith.divf %95, %98 : vector<8x64xf32>
      %c1_63 = arith.constant 1 : index
      %c0_64 = arith.constant 0 : index
      %c0_65 = arith.constant 0 : index
      %100 = vector.load %arg10[%c1_63, %c0_64, %c0_65] : memref<2x8x64xf32, #tpu.memory_space<vmem>>, vector<1x8x64xf32>
      %101 = vector.shape_cast %100 : vector<1x8x64xf32> to vector<8x64xf32>
      %c1_66 = arith.constant 1 : index
      %c0_67 = arith.constant 0 : index
      %c0_68 = arith.constant 0 : index
      %102 = vector.load %arg9[%c1_66, %c0_67, %c0_68] : memref<2x8x1xf32, #tpu.memory_space<vmem>>, vector<1x8x1xf32>
      %103 = vector.shape_cast %102 : vector<1x8x1xf32> to vector<8x1xf32>
      %104 = vector.broadcast %103 : vector<8x1xf32> to vector<8x64xf32>
      %105 = arith.divf %101, %104 : vector<8x64xf32>
      %106 = tpu.concatenate %99, %105 in 1 : vector<8x64xf32>, vector<8x64xf32> -> vector<8x128xf32>
      %107 = arith.truncf %106 : vector<8x128xf32> to vector<8x128xbf16>
      %c0_69 = arith.constant 0 : index
      %c0_70 = arith.constant 0 : index
      %c0_71 = arith.constant 0 : index
      %108 = vector.load %arg7[%c0_69, %c0_70, %c0_71] : memref<1x8x128xbf16, #tpu.memory_space<vmem>>, vector<1x8x128xbf16>
      %109 = vector.shape_cast %108 : vector<1x8x128xbf16> to vector<8x128xbf16>
      %110 = vector.shape_cast %107 : vector<8x128xbf16> to vector<1x8x128xbf16>
      tpu.vector_store %arg7[%c0_69, %c0_70, %c0_71], %110 {strides = array<i32>} : memref<1x8x128xbf16, #tpu.memory_space<vmem>>, vector<1x8x128xbf16>,
    } else {
    }
    return
  }
  func.func @transform_0(%arg0: i32, %arg1: i32, %arg2: i32) -> (i32, i32, i32) {
    %c0_i32 = arith.constant 0 : i32
    %c0_i32_0 = arith.constant 0 : i32
    return %arg0, %arg1, %c0_i32 : i32, i32, i32
  }
  func.func @transform_1(%arg0: i32, %arg1: i32, %arg2: i32) -> (i32, i32, i32) {
    %c1_i32 = arith.constant 1 : i32
    %c0_i32 = arith.constant 0 : i32
    return %arg0, %arg2, %c1_i32 : i32, i32, i32
  }
  func.func @transform_2(%arg0: i32, %arg1: i32, %arg2: i32) -> (i32, i32, i32) {
    %c2_i32 = arith.constant 2 : i32
    %c0_i32 = arith.constant 0 : i32
    return %arg0, %arg2, %c2_i32 : i32, i32, i32
  }
  func.func @transform_3(%arg0: i32, %arg1: i32, %arg2: i32) -> (i32, i32, i32) {
    %c0_i32 = arith.constant 0 : i32
    %c0_i32_0 = arith.constant 0 : i32
    return %arg0, %c0_i32, %arg2 : i32, i32, i32
  }
  func.func @transform_4(%arg0: i32, %arg1: i32, %arg2: i32) -> (i32, i32, i32) {
    %c0_i32 = arith.constant 0 : i32
    %c0_i32_0 = arith.constant 0 : i32
    return %arg0, %arg1, %c0_i32 : i32, i32, i32
  }
}

module attributes {stable_mosaic.version = 11 : i64} {
  func.func @_ln_dense_kernel(%arg0: i32, %arg1: i32, %arg2: memref<16x128xbf16, #tpu.memory_space<vmem>>, %arg3: memref<1x128xf32, #tpu.memory_space<vmem>>, %arg4: memref<1x128xf32, #tpu.memory_space<vmem>>, %arg5: memref<128x512xbf16, #tpu.memory_space<vmem>>, %arg6: memref<1x512xf32, #tpu.memory_space<vmem>>, %arg7: memref<16x512xbf16, #tpu.memory_space<vmem>>, %arg8: memref<16x128xbf16, #tpu.memory_space<vmem>>) attributes {dimension_semantics = [#tpu.dimension_semantics<parallel>, #tpu.dimension_semantics<arbitrary>], iteration_bounds = array<i64: 1, 1>, scalar_prefetch = 0 : i64, scratch_operands = 1 : i64, tpu.core_type = #tpu.core_type<tc>, window_params = [{transform_indices = @transform_0, window_bounds = array<i64: 16, 128>}, {pipeline_mode = #tpu.pipeline_mode<synchronous>, transform_indices = @transform_1, window_bounds = array<i64: 1, 128>}, {pipeline_mode = #tpu.pipeline_mode<synchronous>, transform_indices = @transform_2, window_bounds = array<i64: 1, 128>}, {transform_indices = @transform_3, window_bounds = array<i64: 128, 512>}, {transform_indices = @transform_4, window_bounds = array<i64: 1, 512>}, {transform_indices = @transform_5, window_bounds = array<i64: 16, 512>}]} {
    %c0_i32 = arith.constant 0 : i32
    %0 = arith.cmpi eq, %arg1, %c0_i32 : i32
    %1 = arith.extui %0 : i1 to i32
    %c0_i32_0 = arith.constant 0 : i32
    %2 = arith.cmpi ne, %1, %c0_i32_0 : i32
    scf.if %2 {
      %c0_12 = arith.constant 0 : index
      %c0_13 = arith.constant 0 : index
      %24 = vector.load %arg2[%c0_12, %c0_13] : memref<16x128xbf16, #tpu.memory_space<vmem>>, vector<16x128xbf16>
      %25 = arith.extf %24 : vector<16x128xbf16> to vector<16x128xf32>
      %cst_14 = arith.constant dense<0.000000e+00> : vector<16xf32>
      %26 = vector.multi_reduction <add>, %25, %cst_14 [1] : vector<16x128xf32> to vector<16xf32>
      %27 = vector.shape_cast %26 : vector<16xf32> to vector<16x1xf32>
      %cst_15 = arith.constant 1.280000e+02 : f32
      %28 = vector.broadcast %cst_15 : f32 to vector<16x1xf32>
      %29 = arith.divf %27, %28 : vector<16x1xf32>
      %30 = vector.broadcast %29 : vector<16x1xf32> to vector<16x128xf32>
      %31 = arith.subf %25, %30 : vector<16x128xf32>
      %32 = arith.mulf %31, %31 : vector<16x128xf32>
      %cst_16 = arith.constant dense<0.000000e+00> : vector<16xf32>
      %33 = vector.multi_reduction <add>, %32, %cst_16 [1] : vector<16x128xf32> to vector<16xf32>
      %34 = vector.shape_cast %33 : vector<16xf32> to vector<16x1xf32>
      %cst_17 = arith.constant 1.280000e+02 : f32
      %35 = vector.broadcast %cst_17 : f32 to vector<16x1xf32>
      %36 = arith.divf %34, %35 : vector<16x1xf32>
      %37 = vector.broadcast %29 : vector<16x1xf32> to vector<16x128xf32>
      %38 = arith.subf %25, %37 : vector<16x128xf32>
      %cst_18 = arith.constant 9.99999974E-6 : f32
      %39 = vector.broadcast %cst_18 : f32 to vector<16x1xf32>
      %40 = arith.addf %36, %39 : vector<16x1xf32>
      %41 = math.rsqrt %40 : vector<16x1xf32>
      %42 = vector.broadcast %41 : vector<16x1xf32> to vector<16x128xf32>
      %43 = arith.mulf %38, %42 : vector<16x128xf32>
      %c0_19 = arith.constant 0 : index
      %c0_20 = arith.constant 0 : index
      %44 = vector.load %arg3[%c0_19, %c0_20] : memref<1x128xf32, #tpu.memory_space<vmem>>, vector<1x128xf32>
      %45 = vector.broadcast %44 : vector<1x128xf32> to vector<16x128xf32>
      %46 = arith.mulf %43, %45 : vector<16x128xf32>
      %c0_21 = arith.constant 0 : index
      %c0_22 = arith.constant 0 : index
      %47 = vector.load %arg4[%c0_21, %c0_22] : memref<1x128xf32, #tpu.memory_space<vmem>>, vector<1x128xf32>
      %48 = vector.broadcast %47 : vector<1x128xf32> to vector<16x128xf32>
      %49 = arith.addf %46, %48 : vector<16x128xf32>
      %50 = arith.truncf %49 : vector<16x128xf32> to vector<16x128xbf16>
      %c0_23 = arith.constant 0 : index
      %c0_24 = arith.constant 0 : index
      %51 = vector.load %arg8[%c0_23, %c0_24] : memref<16x128xbf16, #tpu.memory_space<vmem>>, vector<16x128xbf16>
      tpu.vector_store %arg8[%c0_23, %c0_24], %50 {strides = array<i32>} : memref<16x128xbf16, #tpu.memory_space<vmem>>, vector<16x128xbf16>,
    } else {
    }
    %c0 = arith.constant 0 : index
    %c0_1 = arith.constant 0 : index
    %3 = vector.load %arg8[%c0, %c0_1] : memref<16x128xbf16, #tpu.memory_space<vmem>>, vector<16x128xbf16>
    %c0_2 = arith.constant 0 : index
    %c0_3 = arith.constant 0 : index
    %4 = vector.load %arg5[%c0_2, %c0_3] : memref<128x512xbf16, #tpu.memory_space<vmem>>, vector<128x512xbf16>
    %cst = arith.constant dense<0.000000e+00> : vector<16x512xf32>
    %5 = tpu.matmul %3, %4, %cst {dimension_numbers = #tpu.dot_dimension_numbers<[1], [0], [0], [1], [0, 0, 1, 1], [], []>} : vector<16x128xbf16>, vector<128x512xbf16>, vector<16x512xf32> -> vector<16x512xf32>
    %c0_4 = arith.constant 0 : index
    %c0_5 = arith.constant 0 : index
    %6 = vector.load %arg6[%c0_4, %c0_5] : memref<1x512xf32, #tpu.memory_space<vmem>>, vector<1x512xf32>
    %7 = vector.broadcast %6 : vector<1x512xf32> to vector<16x512xf32>
    %8 = arith.addf %5, %7 : vector<16x512xf32>
    %9 = arith.mulf %8, %8 : vector<16x512xf32>
    %10 = arith.mulf %8, %9 : vector<16x512xf32>
    %cst_6 = arith.constant 4.471500e-02 : f32
    %11 = vector.broadcast %cst_6 : f32 to vector<16x512xf32>
    %12 = arith.mulf %11, %10 : vector<16x512xf32>
    %13 = arith.addf %8, %12 : vector<16x512xf32>
    %cst_7 = arith.constant 0.797884583 : f32
    %14 = vector.broadcast %cst_7 : f32 to vector<16x512xf32>
    %15 = arith.mulf %14, %13 : vector<16x512xf32>
    %16 = math.tanh %15 : vector<16x512xf32>
    %cst_8 = arith.constant 1.000000e+00 : f32
    %17 = vector.broadcast %cst_8 : f32 to vector<16x512xf32>
    %18 = arith.addf %17, %16 : vector<16x512xf32>
    %cst_9 = arith.constant 5.000000e-01 : f32
    %19 = vector.broadcast %cst_9 : f32 to vector<16x512xf32>
    %20 = arith.mulf %19, %18 : vector<16x512xf32>
    %21 = arith.mulf %8, %20 : vector<16x512xf32>
    %22 = arith.truncf %21 : vector<16x512xf32> to vector<16x512xbf16>
    %c0_10 = arith.constant 0 : index
    %c0_11 = arith.constant 0 : index
    %23 = vector.load %arg7[%c0_10, %c0_11] : memref<16x512xbf16, #tpu.memory_space<vmem>>, vector<16x512xbf16>
    tpu.vector_store %arg7[%c0_10, %c0_11], %22 {strides = array<i32>} : memref<16x512xbf16, #tpu.memory_space<vmem>>, vector<16x512xbf16>,
    return
  }
  func.func @transform_0(%arg0: i32, %arg1: i32) -> (i32, i32) {
    %c0_i32 = arith.constant 0 : i32
    %c0_i32_0 = arith.constant 0 : i32
    return %arg0, %c0_i32 : i32, i32
  }
  func.func @transform_1(%arg0: i32, %arg1: i32) -> (i32, i32) {
    %c0_i32 = arith.constant 0 : i32
    %c0_i32_0 = arith.constant 0 : i32
    %c0_i32_1 = arith.constant 0 : i32
    return %c0_i32, %c0_i32_0 : i32, i32
  }
  func.func @transform_2(%arg0: i32, %arg1: i32) -> (i32, i32) {
    %c0_i32 = arith.constant 0 : i32
    %c0_i32_0 = arith.constant 0 : i32
    %c0_i32_1 = arith.constant 0 : i32
    return %c0_i32, %c0_i32_0 : i32, i32
  }
  func.func @transform_3(%arg0: i32, %arg1: i32) -> (i32, i32) {
    %c0_i32 = arith.constant 0 : i32
    %c0_i32_0 = arith.constant 0 : i32
    return %c0_i32, %arg1 : i32, i32
  }
  func.func @transform_4(%arg0: i32, %arg1: i32) -> (i32, i32) {
    %c0_i32 = arith.constant 0 : i32
    %c0_i32_0 = arith.constant 0 : i32
    return %c0_i32, %arg1 : i32, i32
  }
  func.func @transform_5(%arg0: i32, %arg1: i32) -> (i32, i32) {
    %c0_i32 = arith.constant 0 : i32
    return %arg0, %arg1 : i32, i32
  }
}

module attributes {stable_mosaic.version = 11 : i64} {
  func.func @_dense_kernel(%arg0: i32, %arg1: i32, %arg2: i32, %arg3: memref<16x512xbf16, #tpu.memory_space<vmem>>, %arg4: memref<512x128xbf16, #tpu.memory_space<vmem>>, %arg5: memref<1x128xf32, #tpu.memory_space<vmem>>, %arg6: memref<16x128xbf16, #tpu.memory_space<vmem>>, %arg7: memref<16x128xbf16, #tpu.memory_space<vmem>>, %arg8: memref<16x128xf32, #tpu.memory_space<vmem>>) attributes {dimension_semantics = [#tpu.dimension_semantics<parallel>, #tpu.dimension_semantics<parallel>, #tpu.dimension_semantics<arbitrary>], iteration_bounds = array<i64: 1, 1, 1>, scalar_prefetch = 0 : i64, scratch_operands = 1 : i64, tpu.core_type = #tpu.core_type<tc>, window_params = [{transform_indices = @transform_0, window_bounds = array<i64: 16, 512>}, {transform_indices = @transform_1, window_bounds = array<i64: 512, 128>}, {transform_indices = @transform_2, window_bounds = array<i64: 1, 128>}, {transform_indices = @transform_3, window_bounds = array<i64: 16, 128>}, {transform_indices = @transform_4, window_bounds = array<i64: 16, 128>}]} {
    %c0_i32 = arith.constant 0 : i32
    %0 = arith.cmpi eq, %arg2, %c0_i32 : i32
    %1 = arith.extui %0 : i1 to i32
    %c0_i32_0 = arith.constant 0 : i32
    %2 = arith.cmpi ne, %1, %c0_i32_0 : i32
    scf.if %2 {
      %cst_10 = arith.constant 0.000000e+00 : f32
      %12 = vector.broadcast %cst_10 : f32 to vector<16x128xf32>
      %c0_11 = arith.constant 0 : index
      %c0_12 = arith.constant 0 : index
      %13 = vector.load %arg8[%c0_11, %c0_12] : memref<16x128xf32, #tpu.memory_space<vmem>>, vector<16x128xf32>
      tpu.vector_store %arg8[%c0_11, %c0_12], %12 {strides = array<i32>} : memref<16x128xf32, #tpu.memory_space<vmem>>, vector<16x128xf32>,
    } else {
    }
    %c0 = arith.constant 0 : index
    %c0_1 = arith.constant 0 : index
    %3 = vector.load %arg8[%c0, %c0_1] : memref<16x128xf32, #tpu.memory_space<vmem>>, vector<16x128xf32>
    %c0_2 = arith.constant 0 : index
    %c0_3 = arith.constant 0 : index
    %4 = vector.load %arg3[%c0_2, %c0_3] : memref<16x512xbf16, #tpu.memory_space<vmem>>, vector<16x512xbf16>
    %c0_4 = arith.constant 0 : index
    %c0_5 = arith.constant 0 : index
    %5 = vector.load %arg4[%c0_4, %c0_5] : memref<512x128xbf16, #tpu.memory_space<vmem>>, vector<512x128xbf16>
    %cst = arith.constant dense<0.000000e+00> : vector<16x128xf32>
    %6 = tpu.matmul %4, %5, %cst {dimension_numbers = #tpu.dot_dimension_numbers<[1], [0], [0], [1], [0, 0, 1, 1], [], []>} : vector<16x512xbf16>, vector<512x128xbf16>, vector<16x128xf32> -> vector<16x128xf32>
    %7 = arith.addf %3, %6 : vector<16x128xf32>
    %c0_6 = arith.constant 0 : index
    %c0_7 = arith.constant 0 : index
    %8 = vector.load %arg8[%c0_6, %c0_7] : memref<16x128xf32, #tpu.memory_space<vmem>>, vector<16x128xf32>
    tpu.vector_store %arg8[%c0_6, %c0_7], %7 {strides = array<i32>} : memref<16x128xf32, #tpu.memory_space<vmem>>, vector<16x128xf32>,
    %c0_i32_8 = arith.constant 0 : i32
    %9 = arith.cmpi eq, %arg2, %c0_i32_8 : i32
    %10 = arith.extui %9 : i1 to i32
    %c0_i32_9 = arith.constant 0 : i32
    %11 = arith.cmpi ne, %10, %c0_i32_9 : i32
    scf.if %11 {
      %c0_10 = arith.constant 0 : index
      %c0_11 = arith.constant 0 : index
      %12 = vector.load %arg8[%c0_10, %c0_11] : memref<16x128xf32, #tpu.memory_space<vmem>>, vector<16x128xf32>
      %c0_12 = arith.constant 0 : index
      %c0_13 = arith.constant 0 : index
      %13 = vector.load %arg5[%c0_12, %c0_13] : memref<1x128xf32, #tpu.memory_space<vmem>>, vector<1x128xf32>
      %14 = vector.broadcast %13 : vector<1x128xf32> to vector<16x128xf32>
      %15 = arith.addf %12, %14 : vector<16x128xf32>
      %c0_14 = arith.constant 0 : index
      %c0_15 = arith.constant 0 : index
      %16 = vector.load %arg6[%c0_14, %c0_15] : memref<16x128xbf16, #tpu.memory_space<vmem>>, vector<16x128xbf16>
      %17 = arith.extf %16 : vector<16x128xbf16> to vector<16x128xf32>
      %18 = arith.addf %15, %17 : vector<16x128xf32>
      %19 = arith.truncf %18 : vector<16x128xf32> to vector<16x128xbf16>
      %c0_16 = arith.constant 0 : index
      %c0_17 = arith.constant 0 : index
      %20 = vector.load %arg7[%c0_16, %c0_17] : memref<16x128xbf16, #tpu.memory_space<vmem>>, vector<16x128xbf16>
      tpu.vector_store %arg7[%c0_16, %c0_17], %19 {strides = array<i32>} : memref<16x128xbf16, #tpu.memory_space<vmem>>, vector<16x128xbf16>,
    } else {
    }
    return
  }
  func.func @transform_0(%arg0: i32, %arg1: i32, %arg2: i32) -> (i32, i32) {
    %c0_i32 = arith.constant 0 : i32
    return %arg0, %arg2 : i32, i32
  }
  func.func @transform_1(%arg0: i32, %arg1: i32, %arg2: i32) -> (i32, i32) {
    %c0_i32 = arith.constant 0 : i32
    return %arg2, %arg1 : i32, i32
  }
  func.func @transform_2(%arg0: i32, %arg1: i32, %arg2: i32) -> (i32, i32) {
    %c0_i32 = arith.constant 0 : i32
    %c0_i32_0 = arith.constant 0 : i32
    return %c0_i32, %arg1 : i32, i32
  }
  func.func @transform_3(%arg0: i32, %arg1: i32, %arg2: i32) -> (i32, i32) {
    %c0_i32 = arith.constant 0 : i32
    return %arg0, %arg1 : i32, i32
  }
  func.func @transform_4(%arg0: i32, %arg1: i32, %arg2: i32) -> (i32, i32) {
    %c0_i32 = arith.constant 0 : i32
    return %arg0, %arg1 : i32, i32
  }
}

module attributes {stable_mosaic.version = 11 : i64} {
  func.func @_ln_dense_kernel(%arg0: i32, %arg1: i32, %arg2: memref<16x128xbf16, #tpu.memory_space<vmem>>, %arg3: memref<1x128xf32, #tpu.memory_space<vmem>>, %arg4: memref<1x128xf32, #tpu.memory_space<vmem>>, %arg5: memref<128x256xbf16, #tpu.memory_space<vmem>>, %arg6: memref<1x256xf32, #tpu.memory_space<vmem>>, %arg7: memref<16x256xbf16, #tpu.memory_space<vmem>>, %arg8: memref<16x128xbf16, #tpu.memory_space<vmem>>) attributes {dimension_semantics = [#tpu.dimension_semantics<parallel>, #tpu.dimension_semantics<arbitrary>], iteration_bounds = array<i64: 1, 1>, scalar_prefetch = 0 : i64, scratch_operands = 1 : i64, tpu.core_type = #tpu.core_type<tc>, window_params = [{transform_indices = @transform_0, window_bounds = array<i64: 16, 128>}, {pipeline_mode = #tpu.pipeline_mode<synchronous>, transform_indices = @transform_1, window_bounds = array<i64: 1, 128>}, {pipeline_mode = #tpu.pipeline_mode<synchronous>, transform_indices = @transform_2, window_bounds = array<i64: 1, 128>}, {transform_indices = @transform_3, window_bounds = array<i64: 128, 256>}, {transform_indices = @transform_4, window_bounds = array<i64: 1, 256>}, {transform_indices = @transform_5, window_bounds = array<i64: 16, 256>}]} {
    %c0_i32 = arith.constant 0 : i32
    %0 = arith.cmpi eq, %arg1, %c0_i32 : i32
    %1 = arith.extui %0 : i1 to i32
    %c0_i32_0 = arith.constant 0 : i32
    %2 = arith.cmpi ne, %1, %c0_i32_0 : i32
    scf.if %2 {
      %c0_8 = arith.constant 0 : index
      %c0_9 = arith.constant 0 : index
      %11 = vector.load %arg2[%c0_8, %c0_9] : memref<16x128xbf16, #tpu.memory_space<vmem>>, vector<16x128xbf16>
      %12 = arith.extf %11 : vector<16x128xbf16> to vector<16x128xf32>
      %cst_10 = arith.constant dense<0.000000e+00> : vector<16xf32>
      %13 = vector.multi_reduction <add>, %12, %cst_10 [1] : vector<16x128xf32> to vector<16xf32>
      %14 = vector.shape_cast %13 : vector<16xf32> to vector<16x1xf32>
      %cst_11 = arith.constant 1.280000e+02 : f32
      %15 = vector.broadcast %cst_11 : f32 to vector<16x1xf32>
      %16 = arith.divf %14, %15 : vector<16x1xf32>
      %17 = vector.broadcast %16 : vector<16x1xf32> to vector<16x128xf32>
      %18 = arith.subf %12, %17 : vector<16x128xf32>
      %19 = arith.mulf %18, %18 : vector<16x128xf32>
      %cst_12 = arith.constant dense<0.000000e+00> : vector<16xf32>
      %20 = vector.multi_reduction <add>, %19, %cst_12 [1] : vector<16x128xf32> to vector<16xf32>
      %21 = vector.shape_cast %20 : vector<16xf32> to vector<16x1xf32>
      %cst_13 = arith.constant 1.280000e+02 : f32
      %22 = vector.broadcast %cst_13 : f32 to vector<16x1xf32>
      %23 = arith.divf %21, %22 : vector<16x1xf32>
      %24 = vector.broadcast %16 : vector<16x1xf32> to vector<16x128xf32>
      %25 = arith.subf %12, %24 : vector<16x128xf32>
      %cst_14 = arith.constant 9.99999974E-6 : f32
      %26 = vector.broadcast %cst_14 : f32 to vector<16x1xf32>
      %27 = arith.addf %23, %26 : vector<16x1xf32>
      %28 = math.rsqrt %27 : vector<16x1xf32>
      %29 = vector.broadcast %28 : vector<16x1xf32> to vector<16x128xf32>
      %30 = arith.mulf %25, %29 : vector<16x128xf32>
      %c0_15 = arith.constant 0 : index
      %c0_16 = arith.constant 0 : index
      %31 = vector.load %arg3[%c0_15, %c0_16] : memref<1x128xf32, #tpu.memory_space<vmem>>, vector<1x128xf32>
      %32 = vector.broadcast %31 : vector<1x128xf32> to vector<16x128xf32>
      %33 = arith.mulf %30, %32 : vector<16x128xf32>
      %c0_17 = arith.constant 0 : index
      %c0_18 = arith.constant 0 : index
      %34 = vector.load %arg4[%c0_17, %c0_18] : memref<1x128xf32, #tpu.memory_space<vmem>>, vector<1x128xf32>
      %35 = vector.broadcast %34 : vector<1x128xf32> to vector<16x128xf32>
      %36 = arith.addf %33, %35 : vector<16x128xf32>
      %37 = arith.truncf %36 : vector<16x128xf32> to vector<16x128xbf16>
      %c0_19 = arith.constant 0 : index
      %c0_20 = arith.constant 0 : index
      %38 = vector.load %arg8[%c0_19, %c0_20] : memref<16x128xbf16, #tpu.memory_space<vmem>>, vector<16x128xbf16>
      tpu.vector_store %arg8[%c0_19, %c0_20], %37 {strides = array<i32>} : memref<16x128xbf16, #tpu.memory_space<vmem>>, vector<16x128xbf16>,
    } else {
    }
    %c0 = arith.constant 0 : index
    %c0_1 = arith.constant 0 : index
    %3 = vector.load %arg8[%c0, %c0_1] : memref<16x128xbf16, #tpu.memory_space<vmem>>, vector<16x128xbf16>
    %c0_2 = arith.constant 0 : index
    %c0_3 = arith.constant 0 : index
    %4 = vector.load %arg5[%c0_2, %c0_3] : memref<128x256xbf16, #tpu.memory_space<vmem>>, vector<128x256xbf16>
    %cst = arith.constant dense<0.000000e+00> : vector<16x256xf32>
    %5 = tpu.matmul %3, %4, %cst {dimension_numbers = #tpu.dot_dimension_numbers<[1], [0], [0], [1], [0, 0, 1, 1], [], []>} : vector<16x128xbf16>, vector<128x256xbf16>, vector<16x256xf32> -> vector<16x256xf32>
    %c0_4 = arith.constant 0 : index
    %c0_5 = arith.constant 0 : index
    %6 = vector.load %arg6[%c0_4, %c0_5] : memref<1x256xf32, #tpu.memory_space<vmem>>, vector<1x256xf32>
    %7 = vector.broadcast %6 : vector<1x256xf32> to vector<16x256xf32>
    %8 = arith.addf %5, %7 : vector<16x256xf32>
    %9 = arith.truncf %8 : vector<16x256xf32> to vector<16x256xbf16>
    %c0_6 = arith.constant 0 : index
    %c0_7 = arith.constant 0 : index
    %10 = vector.load %arg7[%c0_6, %c0_7] : memref<16x256xbf16, #tpu.memory_space<vmem>>, vector<16x256xbf16>
    tpu.vector_store %arg7[%c0_6, %c0_7], %9 {strides = array<i32>} : memref<16x256xbf16, #tpu.memory_space<vmem>>, vector<16x256xbf16>,
    return
  }
  func.func @transform_0(%arg0: i32, %arg1: i32) -> (i32, i32) {
    %c0_i32 = arith.constant 0 : i32
    %c0_i32_0 = arith.constant 0 : i32
    return %arg0, %c0_i32 : i32, i32
  }
  func.func @transform_1(%arg0: i32, %arg1: i32) -> (i32, i32) {
    %c0_i32 = arith.constant 0 : i32
    %c0_i32_0 = arith.constant 0 : i32
    %c0_i32_1 = arith.constant 0 : i32
    return %c0_i32, %c0_i32_0 : i32, i32
  }
  func.func @transform_2(%arg0: i32, %arg1: i32) -> (i32, i32) {
    %c0_i32 = arith.constant 0 : i32
    %c0_i32_0 = arith.constant 0 : i32
    %c0_i32_1 = arith.constant 0 : i32
    return %c0_i32, %c0_i32_0 : i32, i32
  }
  func.func @transform_3(%arg0: i32, %arg1: i32) -> (i32, i32) {
    %c0_i32 = arith.constant 0 : i32
    %c0_i32_0 = arith.constant 0 : i32
    return %c0_i32, %arg1 : i32, i32
  }
  func.func @transform_4(%arg0: i32, %arg1: i32) -> (i32, i32) {
    %c0_i32 = arith.constant 0 : i32
    %c0_i32_0 = arith.constant 0 : i32
    return %c0_i32, %arg1 : i32, i32
  }
  func.func @transform_5(%arg0: i32, %arg1: i32) -> (i32, i32) {
    %c0_i32 = arith.constant 0 : i32
    return %arg0, %arg1 : i32, i32
  }
}

module attributes {stable_mosaic.version = 11 : i64} {
  func.func @_layernorm_kernel(%arg0: i32, %arg1: memref<16x128xbf16, #tpu.memory_space<vmem>>, %arg2: memref<1x128xf32, #tpu.memory_space<vmem>>, %arg3: memref<1x128xf32, #tpu.memory_space<vmem>>, %arg4: memref<16x128xbf16, #tpu.memory_space<vmem>>) attributes {dimension_semantics = [#tpu.dimension_semantics<parallel>], iteration_bounds = array<i64: 1>, scalar_prefetch = 0 : i64, scratch_operands = 0 : i64, tpu.core_type = #tpu.core_type<tc>, window_params = [{transform_indices = @transform_0, window_bounds = array<i64: 16, 128>}, {pipeline_mode = #tpu.pipeline_mode<synchronous>, transform_indices = @transform_1, window_bounds = array<i64: 1, 128>}, {pipeline_mode = #tpu.pipeline_mode<synchronous>, transform_indices = @transform_2, window_bounds = array<i64: 1, 128>}, {transform_indices = @transform_3, window_bounds = array<i64: 16, 128>}]} {
    %c0 = arith.constant 0 : index
    %c0_0 = arith.constant 0 : index
    %0 = vector.load %arg1[%c0, %c0_0] : memref<16x128xbf16, #tpu.memory_space<vmem>>, vector<16x128xbf16>
    %1 = arith.extf %0 : vector<16x128xbf16> to vector<16x128xf32>
    %cst = arith.constant dense<0.000000e+00> : vector<16xf32>
    %2 = vector.multi_reduction <add>, %1, %cst [1] : vector<16x128xf32> to vector<16xf32>
    %3 = vector.shape_cast %2 : vector<16xf32> to vector<16x1xf32>
    %cst_1 = arith.constant 1.280000e+02 : f32
    %4 = vector.broadcast %cst_1 : f32 to vector<16x1xf32>
    %5 = arith.divf %3, %4 : vector<16x1xf32>
    %6 = vector.broadcast %5 : vector<16x1xf32> to vector<16x128xf32>
    %7 = arith.subf %1, %6 : vector<16x128xf32>
    %8 = arith.mulf %7, %7 : vector<16x128xf32>
    %cst_2 = arith.constant dense<0.000000e+00> : vector<16xf32>
    %9 = vector.multi_reduction <add>, %8, %cst_2 [1] : vector<16x128xf32> to vector<16xf32>
    %10 = vector.shape_cast %9 : vector<16xf32> to vector<16x1xf32>
    %cst_3 = arith.constant 1.280000e+02 : f32
    %11 = vector.broadcast %cst_3 : f32 to vector<16x1xf32>
    %12 = arith.divf %10, %11 : vector<16x1xf32>
    %13 = vector.broadcast %5 : vector<16x1xf32> to vector<16x128xf32>
    %14 = arith.subf %1, %13 : vector<16x128xf32>
    %cst_4 = arith.constant 9.99999974E-6 : f32
    %15 = vector.broadcast %cst_4 : f32 to vector<16x1xf32>
    %16 = arith.addf %12, %15 : vector<16x1xf32>
    %17 = math.rsqrt %16 : vector<16x1xf32>
    %18 = vector.broadcast %17 : vector<16x1xf32> to vector<16x128xf32>
    %19 = arith.mulf %14, %18 : vector<16x128xf32>
    %c0_5 = arith.constant 0 : index
    %c0_6 = arith.constant 0 : index
    %20 = vector.load %arg2[%c0_5, %c0_6] : memref<1x128xf32, #tpu.memory_space<vmem>>, vector<1x128xf32>
    %21 = vector.broadcast %20 : vector<1x128xf32> to vector<16x128xf32>
    %22 = arith.mulf %19, %21 : vector<16x128xf32>
    %c0_7 = arith.constant 0 : index
    %c0_8 = arith.constant 0 : index
    %23 = vector.load %arg3[%c0_7, %c0_8] : memref<1x128xf32, #tpu.memory_space<vmem>>, vector<1x128xf32>
    %24 = vector.broadcast %23 : vector<1x128xf32> to vector<16x128xf32>
    %25 = arith.addf %22, %24 : vector<16x128xf32>
    %26 = arith.truncf %25 : vector<16x128xf32> to vector<16x128xbf16>
    %c0_9 = arith.constant 0 : index
    %c0_10 = arith.constant 0 : index
    %27 = vector.load %arg4[%c0_9, %c0_10] : memref<16x128xbf16, #tpu.memory_space<vmem>>, vector<16x128xbf16>
    tpu.vector_store %arg4[%c0_9, %c0_10], %26 {strides = array<i32>} : memref<16x128xbf16, #tpu.memory_space<vmem>>, vector<16x128xbf16>,
    return
  }
  func.func @transform_0(%arg0: i32) -> (i32, i32) {
    %c0_i32 = arith.constant 0 : i32
    %c0_i32_0 = arith.constant 0 : i32
    return %arg0, %c0_i32 : i32, i32
  }
  func.func @transform_1(%arg0: i32) -> (i32, i32) {
    %c0_i32 = arith.constant 0 : i32
    %c0_i32_0 = arith.constant 0 : i32
    %c0_i32_1 = arith.constant 0 : i32
    return %c0_i32, %c0_i32_0 : i32, i32
  }
  func.func @transform_2(%arg0: i32) -> (i32, i32) {
    %c0_i32 = arith.constant 0 : i32
    %c0_i32_0 = arith.constant 0 : i32
    %c0_i32_1 = arith.constant 0 : i32
    return %c0_i32, %c0_i32_0 : i32, i32
  }
  func.func @transform_3(%arg0: i32) -> (i32, i32) {
    %c0_i32 = arith.constant 0 : i32
    %c0_i32_0 = arith.constant 0 : i32
    return %arg0, %c0_i32 : i32, i32
  }
}

module attributes {stable_mosaic.version = 11 : i64} {
  func.func @_mha_kernel(%arg0: i32, %arg1: i32, %arg2: i32, %arg3: memref<1x16x128xbf16, #tpu.memory_space<vmem>>, %arg4: memref<1x8x128xbf16, #tpu.memory_space<vmem>>, %arg5: memref<1x8x128xbf16, #tpu.memory_space<vmem>>, %arg6: memref<1x1x8xf32, #tpu.memory_space<vmem>>, %arg7: memref<1x16x128xbf16, #tpu.memory_space<vmem>>, %arg8: memref<2x16x1xf32, #tpu.memory_space<vmem>>, %arg9: memref<2x16x1xf32, #tpu.memory_space<vmem>>, %arg10: memref<2x16x64xf32, #tpu.memory_space<vmem>>) attributes {dimension_semantics = [#tpu.dimension_semantics<parallel>, #tpu.dimension_semantics<parallel>, #tpu.dimension_semantics<arbitrary>], iteration_bounds = array<i64: 2, 1, 1>, scalar_prefetch = 0 : i64, scratch_operands = 3 : i64, tpu.core_type = #tpu.core_type<tc>, window_params = [{transform_indices = @transform_0, window_bounds = array<i64: 1, 16, 128>}, {transform_indices = @transform_1, window_bounds = array<i64: 1, 8, 128>}, {transform_indices = @transform_2, window_bounds = array<i64: 1, 8, 128>}, {transform_indices = @transform_3, window_bounds = array<i64: 1, 1, 8>}, {transform_indices = @transform_4, window_bounds = array<i64: 1, 16, 128>}]} {
    %c0_i32 = arith.constant 0 : i32
    %0 = arith.cmpi eq, %arg2, %c0_i32 : i32
    %1 = arith.extui %0 : i1 to i32
    %c0_i32_0 = arith.constant 0 : i32
    %2 = arith.cmpi ne, %1, %c0_i32_0 : i32
    scf.if %2 {
      %cst_57 = arith.constant 0xFF800000 : f32
      %94 = vector.broadcast %cst_57 : f32 to vector<2x16x1xf32>
      %c0_58 = arith.constant 0 : index
      %c0_59 = arith.constant 0 : index
      %c0_60 = arith.constant 0 : index
      %95 = vector.load %arg8[%c0_58, %c0_59, %c0_60] : memref<2x16x1xf32, #tpu.memory_space<vmem>>, vector<2x16x1xf32>
      tpu.vector_store %arg8[%c0_58, %c0_59, %c0_60], %94 {strides = array<i32>} : memref<2x16x1xf32, #tpu.memory_space<vmem>>, vector<2x16x1xf32>,
      %cst_61 = arith.constant 0.000000e+00 : f32
      %96 = vector.broadcast %cst_61 : f32 to vector<2x16x1xf32>
      %c0_62 = arith.constant 0 : index
      %c0_63 = arith.constant 0 : index
      %c0_64 = arith.constant 0 : index
      %97 = vector.load %arg9[%c0_62, %c0_63, %c0_64] : memref<2x16x1xf32, #tpu.memory_space<vmem>>, vector<2x16x1xf32>
      tpu.vector_store %arg9[%c0_62, %c0_63, %c0_64], %96 {strides = array<i32>} : memref<2x16x1xf32, #tpu.memory_space<vmem>>, vector<2x16x1xf32>,
      %cst_65 = arith.constant 0.000000e+00 : f32
      %98 = vector.broadcast %cst_65 : f32 to vector<2x16x64xf32>
      %c0_66 = arith.constant 0 : index
      %c0_67 = arith.constant 0 : index
      %c0_68 = arith.constant 0 : index
      %99 = vector.load %arg10[%c0_66, %c0_67, %c0_68] : memref<2x16x64xf32, #tpu.memory_space<vmem>>, vector<2x16x64xf32>
      tpu.vector_store %arg10[%c0_66, %c0_67, %c0_68], %98 {strides = array<i32>} : memref<2x16x64xf32, #tpu.memory_space<vmem>>, vector<2x16x64xf32>,
    } else {
    }
    %c0 = arith.constant 0 : index
    %c0_1 = arith.constant 0 : index
    %c0_2 = arith.constant 0 : index
    %3 = vector.load %arg3[%c0, %c0_1, %c0_2] : memref<1x16x128xbf16, #tpu.memory_space<vmem>>, vector<1x16x128xbf16>
    %4 = vector.shape_cast %3 : vector<1x16x128xbf16> to vector<16x128xbf16>
    %5 = arith.extf %4 : vector<16x128xbf16> to vector<16x128xf32>
    %cst = arith.constant 1.250000e-01 : f32
    %6 = vector.broadcast %cst : f32 to vector<16x128xf32>
    %7 = arith.mulf %5, %6 : vector<16x128xf32>
    %8 = arith.truncf %7 : vector<16x128xf32> to vector<16x128xbf16>
    %c0_3 = arith.constant 0 : index
    %c0_4 = arith.constant 0 : index
    %c0_5 = arith.constant 0 : index
    %9 = vector.load %arg4[%c0_3, %c0_4, %c0_5] : memref<1x8x128xbf16, #tpu.memory_space<vmem>>, vector<1x8x128xbf16>
    %10 = vector.shape_cast %9 : vector<1x8x128xbf16> to vector<8x128xbf16>
    %c0_6 = arith.constant 0 : index
    %c0_7 = arith.constant 0 : index
    %c0_8 = arith.constant 0 : index
    %11 = vector.load %arg5[%c0_6, %c0_7, %c0_8] : memref<1x8x128xbf16, #tpu.memory_space<vmem>>, vector<1x8x128xbf16>
    %12 = vector.shape_cast %11 : vector<1x8x128xbf16> to vector<8x128xbf16>
    %c0_9 = arith.constant 0 : index
    %c0_10 = arith.constant 0 : index
    %c0_11 = arith.constant 0 : index
    %13 = vector.load %arg6[%c0_9, %c0_10, %c0_11] : memref<1x1x8xf32, #tpu.memory_space<vmem>>, vector<1x1x8xf32>
    %14 = vector.shape_cast %13 : vector<1x1x8xf32> to vector<1x8xf32>
    %15 = vector.extract_strided_slice %8 {offsets = [0, 0], sizes = [16, 64], strides = [1, 1]} : vector<16x128xbf16> to vector<16x64xbf16>
    %16 = vector.extract_strided_slice %10 {offsets = [0, 0], sizes = [8, 64], strides = [1, 1]} : vector<8x128xbf16> to vector<8x64xbf16>
    %17 = vector.extract_strided_slice %12 {offsets = [0, 0], sizes = [8, 64], strides = [1, 1]} : vector<8x128xbf16> to vector<8x64xbf16>
    %cst_12 = arith.constant dense<0.000000e+00> : vector<16x8xf32>
    %18 = tpu.matmul %15, %16, %cst_12 {dimension_numbers = #tpu.dot_dimension_numbers<[1], [1], [0], [0], [0, 0, 1, 0], [], []>} : vector<16x64xbf16>, vector<8x64xbf16>, vector<16x8xf32> -> vector<16x8xf32>
    %19 = vector.broadcast %14 : vector<1x8xf32> to vector<16x8xf32>
    %20 = arith.addf %18, %19 : vector<16x8xf32>
    %c0_13 = arith.constant 0 : index
    %c0_14 = arith.constant 0 : index
    %c0_15 = arith.constant 0 : index
    %21 = vector.load %arg8[%c0_13, %c0_14, %c0_15] : memref<2x16x1xf32, #tpu.memory_space<vmem>>, vector<1x16x1xf32>
    %22 = vector.shape_cast %21 : vector<1x16x1xf32> to vector<16x1xf32>
    %cst_16 = arith.constant dense<0xFF800000> : vector<16xf32>
    %23 = vector.multi_reduction <maximumf>, %20, %cst_16 [1] : vector<16x8xf32> to vector<16xf32>
    %24 = vector.shape_cast %23 : vector<16xf32> to vector<16x1xf32>
    %25 = arith.maximumf %22, %24 : vector<16x1xf32>
    %26 = arith.subf %22, %25 : vector<16x1xf32>
    %27 = math.exp %26 : vector<16x1xf32>
    %28 = vector.broadcast %25 : vector<16x1xf32> to vector<16x8xf32>
    %29 = arith.subf %20, %28 : vector<16x8xf32>
    %30 = math.exp %29 : vector<16x8xf32>
    %c0_17 = arith.constant 0 : index
    %c0_18 = arith.constant 0 : index
    %c0_19 = arith.constant 0 : index
    %31 = vector.load %arg9[%c0_17, %c0_18, %c0_19] : memref<2x16x1xf32, #tpu.memory_space<vmem>>, vector<1x16x1xf32>
    %32 = vector.shape_cast %31 : vector<1x16x1xf32> to vector<16x1xf32>
    %33 = arith.mulf %27, %32 : vector<16x1xf32>
    %cst_20 = arith.constant dense<0.000000e+00> : vector<16xf32>
    %34 = vector.multi_reduction <add>, %30, %cst_20 [1] : vector<16x8xf32> to vector<16xf32>
    %35 = vector.shape_cast %34 : vector<16xf32> to vector<16x1xf32>
    %36 = arith.addf %33, %35 : vector<16x1xf32>
    %c0_21 = arith.constant 0 : index
    %c0_22 = arith.constant 0 : index
    %c0_23 = arith.constant 0 : index
    %37 = vector.load %arg9[%c0_21, %c0_22, %c0_23] : memref<2x16x1xf32, #tpu.memory_space<vmem>>, vector<1x16x1xf32>
    %38 = vector.shape_cast %37 : vector<1x16x1xf32> to vector<16x1xf32>
    %39 = vector.shape_cast %36 : vector<16x1xf32> to vector<1x16x1xf32>
    tpu.vector_store %arg9[%c0_21, %c0_22, %c0_23], %39 {strides = array<i32>} : memref<2x16x1xf32, #tpu.memory_space<vmem>>, vector<1x16x1xf32>,
    %c0_24 = arith.constant 0 : index
    %c0_25 = arith.constant 0 : index
    %c0_26 = arith.constant 0 : index
    %40 = vector.load %arg10[%c0_24, %c0_25, %c0_26] : memref<2x16x64xf32, #tpu.memory_space<vmem>>, vector<1x16x64xf32>
    %41 = vector.shape_cast %40 : vector<1x16x64xf32> to vector<16x64xf32>
    %42 = vector.broadcast %27 : vector<16x1xf32> to vector<16x64xf32>
    %43 = arith.mulf %42, %41 : vector<16x64xf32>
    %44 = arith.truncf %30 : vector<16x8xf32> to vector<16x8xbf16>
    %cst_27 = arith.constant dense<0.000000e+00> : vector<16x64xf32>
    %45 = tpu.matmul %44, %17, %cst_27 {dimension_numbers = #tpu.dot_dimension_numbers<[1], [0], [0], [1], [0, 0, 1, 1], [], []>} : vector<16x8xbf16>, vector<8x64xbf16>, vector<16x64xf32> -> vector<16x64xf32>
    %46 = arith.addf %43, %45 : vector<16x64xf32>
    %c0_28 = arith.constant 0 : index
    %c0_29 = arith.constant 0 : index
    %c0_30 = arith.constant 0 : index
    %47 = vector.load %arg10[%c0_28, %c0_29, %c0_30] : memref<2x16x64xf32, #tpu.memory_space<vmem>>, vector<1x16x64xf32>
    %48 = vector.shape_cast %47 : vector<1x16x64xf32> to vector<16x64xf32>
    %49 = vector.shape_cast %46 : vector<16x64xf32> to vector<1x16x64xf32>
    tpu.vector_store %arg10[%c0_28, %c0_29, %c0_30], %49 {strides = array<i32>} : memref<2x16x64xf32, #tpu.memory_space<vmem>>, vector<1x16x64xf32>,
    %c0_31 = arith.constant 0 : index
    %c0_32 = arith.constant 0 : index
    %c0_33 = arith.constant 0 : index
    %50 = vector.load %arg8[%c0_31, %c0_32, %c0_33] : memref<2x16x1xf32, #tpu.memory_space<vmem>>, vector<1x16x1xf32>
    %51 = vector.shape_cast %50 : vector<1x16x1xf32> to vector<16x1xf32>
    %52 = vector.shape_cast %25 : vector<16x1xf32> to vector<1x16x1xf32>
    tpu.vector_store %arg8[%c0_31, %c0_32, %c0_33], %52 {strides = array<i32>} : memref<2x16x1xf32, #tpu.memory_space<vmem>>, vector<1x16x1xf32>,
    %53 = vector.extract_strided_slice %8 {offsets = [0, 64], sizes = [16, 64], strides = [1, 1]} : vector<16x128xbf16> to vector<16x64xbf16>
    %54 = vector.extract_strided_slice %10 {offsets = [0, 64], sizes = [8, 64], strides = [1, 1]} : vector<8x128xbf16> to vector<8x64xbf16>
    %55 = vector.extract_strided_slice %12 {offsets = [0, 64], sizes = [8, 64], strides = [1, 1]} : vector<8x128xbf16> to vector<8x64xbf16>
    %cst_34 = arith.constant dense<0.000000e+00> : vector<16x8xf32>
    %56 = tpu.matmul %53, %54, %cst_34 {dimension_numbers = #tpu.dot_dimension_numbers<[1], [1], [0], [0], [0, 0, 1, 0], [], []>} : vector<16x64xbf16>, vector<8x64xbf16>, vector<16x8xf32> -> vector<16x8xf32>
    %57 = vector.broadcast %14 : vector<1x8xf32> to vector<16x8xf32>
    %58 = arith.addf %56, %57 : vector<16x8xf32>
    %c1 = arith.constant 1 : index
    %c0_35 = arith.constant 0 : index
    %c0_36 = arith.constant 0 : index
    %59 = vector.load %arg8[%c1, %c0_35, %c0_36] : memref<2x16x1xf32, #tpu.memory_space<vmem>>, vector<1x16x1xf32>
    %60 = vector.shape_cast %59 : vector<1x16x1xf32> to vector<16x1xf32>
    %cst_37 = arith.constant dense<0xFF800000> : vector<16xf32>
    %61 = vector.multi_reduction <maximumf>, %58, %cst_37 [1] : vector<16x8xf32> to vector<16xf32>
    %62 = vector.shape_cast %61 : vector<16xf32> to vector<16x1xf32>
    %63 = arith.maximumf %60, %62 : vector<16x1xf32>
    %64 = arith.subf %60, %63 : vector<16x1xf32>
    %65 = math.exp %64 : vector<16x1xf32>
    %66 = vector.broadcast %63 : vector<16x1xf32> to vector<16x8xf32>
    %67 = arith.subf %58, %66 : vector<16x8xf32>
    %68 = math.exp %67 : vector<16x8xf32>
    %c1_38 = arith.constant 1 : index
    %c0_39 = arith.constant 0 : index
    %c0_40 = arith.constant 0 : index
    %69 = vector.load %arg9[%c1_38, %c0_39, %c0_40] : memref<2x16x1xf32, #tpu.memory_space<vmem>>, vector<1x16x1xf32>
    %70 = vector.shape_cast %69 : vector<1x16x1xf32> to vector<16x1xf32>
    %71 = arith.mulf %65, %70 : vector<16x1xf32>
    %cst_41 = arith.constant dense<0.000000e+00> : vector<16xf32>
    %72 = vector.multi_reduction <add>, %68, %cst_41 [1] : vector<16x8xf32> to vector<16xf32>
    %73 = vector.shape_cast %72 : vector<16xf32> to vector<16x1xf32>
    %74 = arith.addf %71, %73 : vector<16x1xf32>
    %c1_42 = arith.constant 1 : index
    %c0_43 = arith.constant 0 : index
    %c0_44 = arith.constant 0 : index
    %75 = vector.load %arg9[%c1_42, %c0_43, %c0_44] : memref<2x16x1xf32, #tpu.memory_space<vmem>>, vector<1x16x1xf32>
    %76 = vector.shape_cast %75 : vector<1x16x1xf32> to vector<16x1xf32>
    %77 = vector.shape_cast %74 : vector<16x1xf32> to vector<1x16x1xf32>
    tpu.vector_store %arg9[%c1_42, %c0_43, %c0_44], %77 {strides = array<i32>} : memref<2x16x1xf32, #tpu.memory_space<vmem>>, vector<1x16x1xf32>,
    %c1_45 = arith.constant 1 : index
    %c0_46 = arith.constant 0 : index
    %c0_47 = arith.constant 0 : index
    %78 = vector.load %arg10[%c1_45, %c0_46, %c0_47] : memref<2x16x64xf32, #tpu.memory_space<vmem>>, vector<1x16x64xf32>
    %79 = vector.shape_cast %78 : vector<1x16x64xf32> to vector<16x64xf32>
    %80 = vector.broadcast %65 : vector<16x1xf32> to vector<16x64xf32>
    %81 = arith.mulf %80, %79 : vector<16x64xf32>
    %82 = arith.truncf %68 : vector<16x8xf32> to vector<16x8xbf16>
    %cst_48 = arith.constant dense<0.000000e+00> : vector<16x64xf32>
    %83 = tpu.matmul %82, %55, %cst_48 {dimension_numbers = #tpu.dot_dimension_numbers<[1], [0], [0], [1], [0, 0, 1, 1], [], []>} : vector<16x8xbf16>, vector<8x64xbf16>, vector<16x64xf32> -> vector<16x64xf32>
    %84 = arith.addf %81, %83 : vector<16x64xf32>
    %c1_49 = arith.constant 1 : index
    %c0_50 = arith.constant 0 : index
    %c0_51 = arith.constant 0 : index
    %85 = vector.load %arg10[%c1_49, %c0_50, %c0_51] : memref<2x16x64xf32, #tpu.memory_space<vmem>>, vector<1x16x64xf32>
    %86 = vector.shape_cast %85 : vector<1x16x64xf32> to vector<16x64xf32>
    %87 = vector.shape_cast %84 : vector<16x64xf32> to vector<1x16x64xf32>
    tpu.vector_store %arg10[%c1_49, %c0_50, %c0_51], %87 {strides = array<i32>} : memref<2x16x64xf32, #tpu.memory_space<vmem>>, vector<1x16x64xf32>,
    %c1_52 = arith.constant 1 : index
    %c0_53 = arith.constant 0 : index
    %c0_54 = arith.constant 0 : index
    %88 = vector.load %arg8[%c1_52, %c0_53, %c0_54] : memref<2x16x1xf32, #tpu.memory_space<vmem>>, vector<1x16x1xf32>
    %89 = vector.shape_cast %88 : vector<1x16x1xf32> to vector<16x1xf32>
    %90 = vector.shape_cast %63 : vector<16x1xf32> to vector<1x16x1xf32>
    tpu.vector_store %arg8[%c1_52, %c0_53, %c0_54], %90 {strides = array<i32>} : memref<2x16x1xf32, #tpu.memory_space<vmem>>, vector<1x16x1xf32>,
    %c0_i32_55 = arith.constant 0 : i32
    %91 = arith.cmpi eq, %arg2, %c0_i32_55 : i32
    %92 = arith.extui %91 : i1 to i32
    %c0_i32_56 = arith.constant 0 : i32
    %93 = arith.cmpi ne, %92, %c0_i32_56 : i32
    scf.if %93 {
      %c0_57 = arith.constant 0 : index
      %c0_58 = arith.constant 0 : index
      %c0_59 = arith.constant 0 : index
      %94 = vector.load %arg10[%c0_57, %c0_58, %c0_59] : memref<2x16x64xf32, #tpu.memory_space<vmem>>, vector<1x16x64xf32>
      %95 = vector.shape_cast %94 : vector<1x16x64xf32> to vector<16x64xf32>
      %c0_60 = arith.constant 0 : index
      %c0_61 = arith.constant 0 : index
      %c0_62 = arith.constant 0 : index
      %96 = vector.load %arg9[%c0_60, %c0_61, %c0_62] : memref<2x16x1xf32, #tpu.memory_space<vmem>>, vector<1x16x1xf32>
      %97 = vector.shape_cast %96 : vector<1x16x1xf32> to vector<16x1xf32>
      %98 = vector.broadcast %97 : vector<16x1xf32> to vector<16x64xf32>
      %99 = arith.divf %95, %98 : vector<16x64xf32>
      %c1_63 = arith.constant 1 : index
      %c0_64 = arith.constant 0 : index
      %c0_65 = arith.constant 0 : index
      %100 = vector.load %arg10[%c1_63, %c0_64, %c0_65] : memref<2x16x64xf32, #tpu.memory_space<vmem>>, vector<1x16x64xf32>
      %101 = vector.shape_cast %100 : vector<1x16x64xf32> to vector<16x64xf32>
      %c1_66 = arith.constant 1 : index
      %c0_67 = arith.constant 0 : index
      %c0_68 = arith.constant 0 : index
      %102 = vector.load %arg9[%c1_66, %c0_67, %c0_68] : memref<2x16x1xf32, #tpu.memory_space<vmem>>, vector<1x16x1xf32>
      %103 = vector.shape_cast %102 : vector<1x16x1xf32> to vector<16x1xf32>
      %104 = vector.broadcast %103 : vector<16x1xf32> to vector<16x64xf32>
      %105 = arith.divf %101, %104 : vector<16x64xf32>
      %106 = tpu.concatenate %99, %105 in 1 : vector<16x64xf32>, vector<16x64xf32> -> vector<16x128xf32>
      %107 = arith.truncf %106 : vector<16x128xf32> to vector<16x128xbf16>
      %c0_69 = arith.constant 0 : index
      %c0_70 = arith.constant 0 : index
      %c0_71 = arith.constant 0 : index
      %108 = vector.load %arg7[%c0_69, %c0_70, %c0_71] : memref<1x16x128xbf16, #tpu.memory_space<vmem>>, vector<1x16x128xbf16>
      %109 = vector.shape_cast %108 : vector<1x16x128xbf16> to vector<16x128xbf16>
      %110 = vector.shape_cast %107 : vector<16x128xbf16> to vector<1x16x128xbf16>
      tpu.vector_store %arg7[%c0_69, %c0_70, %c0_71], %110 {strides = array<i32>} : memref<1x16x128xbf16, #tpu.memory_space<vmem>>, vector<1x16x128xbf16>,
    } else {
    }
    return
  }
  func.func @transform_0(%arg0: i32, %arg1: i32, %arg2: i32) -> (i32, i32, i32) {
    %c0_i32 = arith.constant 0 : i32
    %c0_i32_0 = arith.constant 0 : i32
    return %arg0, %arg1, %c0_i32 : i32, i32, i32
  }
  func.func @transform_1(%arg0: i32, %arg1: i32, %arg2: i32) -> (i32, i32, i32) {
    %c0_i32 = arith.constant 0 : i32
    %c0_i32_0 = arith.constant 0 : i32
    return %arg0, %arg2, %c0_i32 : i32, i32, i32
  }
  func.func @transform_2(%arg0: i32, %arg1: i32, %arg2: i32) -> (i32, i32, i32) {
    %c1_i32 = arith.constant 1 : i32
    %c0_i32 = arith.constant 0 : i32
    return %arg0, %arg2, %c1_i32 : i32, i32, i32
  }
  func.func @transform_3(%arg0: i32, %arg1: i32, %arg2: i32) -> (i32, i32, i32) {
    %c0_i32 = arith.constant 0 : i32
    %c0_i32_0 = arith.constant 0 : i32
    return %arg0, %c0_i32, %arg2 : i32, i32, i32
  }
  func.func @transform_4(%arg0: i32, %arg1: i32, %arg2: i32) -> (i32, i32, i32) {
    %c0_i32 = arith.constant 0 : i32
    %c0_i32_0 = arith.constant 0 : i32
    return %arg0, %arg1, %c0_i32 : i32, i32, i32
  }
}

module attributes {stable_mosaic.version = 11 : i64} {
  func.func @_ln_dense_kernel(%arg0: i32, %arg1: i32, %arg2: memref<32x128xbf16, #tpu.memory_space<vmem>>, %arg3: memref<1x128xf32, #tpu.memory_space<vmem>>, %arg4: memref<1x128xf32, #tpu.memory_space<vmem>>, %arg5: memref<128x512xbf16, #tpu.memory_space<vmem>>, %arg6: memref<1x512xf32, #tpu.memory_space<vmem>>, %arg7: memref<32x512xbf16, #tpu.memory_space<vmem>>, %arg8: memref<32x128xbf16, #tpu.memory_space<vmem>>) attributes {dimension_semantics = [#tpu.dimension_semantics<parallel>, #tpu.dimension_semantics<arbitrary>], iteration_bounds = array<i64: 1, 1>, scalar_prefetch = 0 : i64, scratch_operands = 1 : i64, tpu.core_type = #tpu.core_type<tc>, window_params = [{transform_indices = @transform_0, window_bounds = array<i64: 32, 128>}, {pipeline_mode = #tpu.pipeline_mode<synchronous>, transform_indices = @transform_1, window_bounds = array<i64: 1, 128>}, {pipeline_mode = #tpu.pipeline_mode<synchronous>, transform_indices = @transform_2, window_bounds = array<i64: 1, 128>}, {transform_indices = @transform_3, window_bounds = array<i64: 128, 512>}, {transform_indices = @transform_4, window_bounds = array<i64: 1, 512>}, {transform_indices = @transform_5, window_bounds = array<i64: 32, 512>}]} {
    %c0_i32 = arith.constant 0 : i32
    %0 = arith.cmpi eq, %arg1, %c0_i32 : i32
    %1 = arith.extui %0 : i1 to i32
    %c0_i32_0 = arith.constant 0 : i32
    %2 = arith.cmpi ne, %1, %c0_i32_0 : i32
    scf.if %2 {
      %c0_12 = arith.constant 0 : index
      %c0_13 = arith.constant 0 : index
      %24 = vector.load %arg2[%c0_12, %c0_13] : memref<32x128xbf16, #tpu.memory_space<vmem>>, vector<32x128xbf16>
      %25 = arith.extf %24 : vector<32x128xbf16> to vector<32x128xf32>
      %cst_14 = arith.constant dense<0.000000e+00> : vector<32xf32>
      %26 = vector.multi_reduction <add>, %25, %cst_14 [1] : vector<32x128xf32> to vector<32xf32>
      %27 = vector.shape_cast %26 : vector<32xf32> to vector<32x1xf32>
      %cst_15 = arith.constant 1.280000e+02 : f32
      %28 = vector.broadcast %cst_15 : f32 to vector<32x1xf32>
      %29 = arith.divf %27, %28 : vector<32x1xf32>
      %30 = vector.broadcast %29 : vector<32x1xf32> to vector<32x128xf32>
      %31 = arith.subf %25, %30 : vector<32x128xf32>
      %32 = arith.mulf %31, %31 : vector<32x128xf32>
      %cst_16 = arith.constant dense<0.000000e+00> : vector<32xf32>
      %33 = vector.multi_reduction <add>, %32, %cst_16 [1] : vector<32x128xf32> to vector<32xf32>
      %34 = vector.shape_cast %33 : vector<32xf32> to vector<32x1xf32>
      %cst_17 = arith.constant 1.280000e+02 : f32
      %35 = vector.broadcast %cst_17 : f32 to vector<32x1xf32>
      %36 = arith.divf %34, %35 : vector<32x1xf32>
      %37 = vector.broadcast %29 : vector<32x1xf32> to vector<32x128xf32>
      %38 = arith.subf %25, %37 : vector<32x128xf32>
      %cst_18 = arith.constant 9.99999974E-6 : f32
      %39 = vector.broadcast %cst_18 : f32 to vector<32x1xf32>
      %40 = arith.addf %36, %39 : vector<32x1xf32>
      %41 = math.rsqrt %40 : vector<32x1xf32>
      %42 = vector.broadcast %41 : vector<32x1xf32> to vector<32x128xf32>
      %43 = arith.mulf %38, %42 : vector<32x128xf32>
      %c0_19 = arith.constant 0 : index
      %c0_20 = arith.constant 0 : index
      %44 = vector.load %arg3[%c0_19, %c0_20] : memref<1x128xf32, #tpu.memory_space<vmem>>, vector<1x128xf32>
      %45 = vector.broadcast %44 : vector<1x128xf32> to vector<32x128xf32>
      %46 = arith.mulf %43, %45 : vector<32x128xf32>
      %c0_21 = arith.constant 0 : index
      %c0_22 = arith.constant 0 : index
      %47 = vector.load %arg4[%c0_21, %c0_22] : memref<1x128xf32, #tpu.memory_space<vmem>>, vector<1x128xf32>
      %48 = vector.broadcast %47 : vector<1x128xf32> to vector<32x128xf32>
      %49 = arith.addf %46, %48 : vector<32x128xf32>
      %50 = arith.truncf %49 : vector<32x128xf32> to vector<32x128xbf16>
      %c0_23 = arith.constant 0 : index
      %c0_24 = arith.constant 0 : index
      %51 = vector.load %arg8[%c0_23, %c0_24] : memref<32x128xbf16, #tpu.memory_space<vmem>>, vector<32x128xbf16>
      tpu.vector_store %arg8[%c0_23, %c0_24], %50 {strides = array<i32>} : memref<32x128xbf16, #tpu.memory_space<vmem>>, vector<32x128xbf16>,
    } else {
    }
    %c0 = arith.constant 0 : index
    %c0_1 = arith.constant 0 : index
    %3 = vector.load %arg8[%c0, %c0_1] : memref<32x128xbf16, #tpu.memory_space<vmem>>, vector<32x128xbf16>
    %c0_2 = arith.constant 0 : index
    %c0_3 = arith.constant 0 : index
    %4 = vector.load %arg5[%c0_2, %c0_3] : memref<128x512xbf16, #tpu.memory_space<vmem>>, vector<128x512xbf16>
    %cst = arith.constant dense<0.000000e+00> : vector<32x512xf32>
    %5 = tpu.matmul %3, %4, %cst {dimension_numbers = #tpu.dot_dimension_numbers<[1], [0], [0], [1], [0, 0, 1, 1], [], []>} : vector<32x128xbf16>, vector<128x512xbf16>, vector<32x512xf32> -> vector<32x512xf32>
    %c0_4 = arith.constant 0 : index
    %c0_5 = arith.constant 0 : index
    %6 = vector.load %arg6[%c0_4, %c0_5] : memref<1x512xf32, #tpu.memory_space<vmem>>, vector<1x512xf32>
    %7 = vector.broadcast %6 : vector<1x512xf32> to vector<32x512xf32>
    %8 = arith.addf %5, %7 : vector<32x512xf32>
    %9 = arith.mulf %8, %8 : vector<32x512xf32>
    %10 = arith.mulf %8, %9 : vector<32x512xf32>
    %cst_6 = arith.constant 4.471500e-02 : f32
    %11 = vector.broadcast %cst_6 : f32 to vector<32x512xf32>
    %12 = arith.mulf %11, %10 : vector<32x512xf32>
    %13 = arith.addf %8, %12 : vector<32x512xf32>
    %cst_7 = arith.constant 0.797884583 : f32
    %14 = vector.broadcast %cst_7 : f32 to vector<32x512xf32>
    %15 = arith.mulf %14, %13 : vector<32x512xf32>
    %16 = math.tanh %15 : vector<32x512xf32>
    %cst_8 = arith.constant 1.000000e+00 : f32
    %17 = vector.broadcast %cst_8 : f32 to vector<32x512xf32>
    %18 = arith.addf %17, %16 : vector<32x512xf32>
    %cst_9 = arith.constant 5.000000e-01 : f32
    %19 = vector.broadcast %cst_9 : f32 to vector<32x512xf32>
    %20 = arith.mulf %19, %18 : vector<32x512xf32>
    %21 = arith.mulf %8, %20 : vector<32x512xf32>
    %22 = arith.truncf %21 : vector<32x512xf32> to vector<32x512xbf16>
    %c0_10 = arith.constant 0 : index
    %c0_11 = arith.constant 0 : index
    %23 = vector.load %arg7[%c0_10, %c0_11] : memref<32x512xbf16, #tpu.memory_space<vmem>>, vector<32x512xbf16>
    tpu.vector_store %arg7[%c0_10, %c0_11], %22 {strides = array<i32>} : memref<32x512xbf16, #tpu.memory_space<vmem>>, vector<32x512xbf16>,
    return
  }
  func.func @transform_0(%arg0: i32, %arg1: i32) -> (i32, i32) {
    %c0_i32 = arith.constant 0 : i32
    %c0_i32_0 = arith.constant 0 : i32
    return %arg0, %c0_i32 : i32, i32
  }
  func.func @transform_1(%arg0: i32, %arg1: i32) -> (i32, i32) {
    %c0_i32 = arith.constant 0 : i32
    %c0_i32_0 = arith.constant 0 : i32
    %c0_i32_1 = arith.constant 0 : i32
    return %c0_i32, %c0_i32_0 : i32, i32
  }
  func.func @transform_2(%arg0: i32, %arg1: i32) -> (i32, i32) {
    %c0_i32 = arith.constant 0 : i32
    %c0_i32_0 = arith.constant 0 : i32
    %c0_i32_1 = arith.constant 0 : i32
    return %c0_i32, %c0_i32_0 : i32, i32
  }
  func.func @transform_3(%arg0: i32, %arg1: i32) -> (i32, i32) {
    %c0_i32 = arith.constant 0 : i32
    %c0_i32_0 = arith.constant 0 : i32
    return %c0_i32, %arg1 : i32, i32
  }
  func.func @transform_4(%arg0: i32, %arg1: i32) -> (i32, i32) {
    %c0_i32 = arith.constant 0 : i32
    %c0_i32_0 = arith.constant 0 : i32
    return %c0_i32, %arg1 : i32, i32
  }
  func.func @transform_5(%arg0: i32, %arg1: i32) -> (i32, i32) {
    %c0_i32 = arith.constant 0 : i32
    return %arg0, %arg1 : i32, i32
  }
}

module attributes {stable_mosaic.version = 11 : i64} {
  func.func @_dense_kernel(%arg0: i32, %arg1: i32, %arg2: i32, %arg3: memref<32x512xbf16, #tpu.memory_space<vmem>>, %arg4: memref<512x128xbf16, #tpu.memory_space<vmem>>, %arg5: memref<1x128xf32, #tpu.memory_space<vmem>>, %arg6: memref<32x128xbf16, #tpu.memory_space<vmem>>, %arg7: memref<32x128xbf16, #tpu.memory_space<vmem>>, %arg8: memref<32x128xf32, #tpu.memory_space<vmem>>) attributes {dimension_semantics = [#tpu.dimension_semantics<parallel>, #tpu.dimension_semantics<parallel>, #tpu.dimension_semantics<arbitrary>], iteration_bounds = array<i64: 1, 1, 1>, scalar_prefetch = 0 : i64, scratch_operands = 1 : i64, tpu.core_type = #tpu.core_type<tc>, window_params = [{transform_indices = @transform_0, window_bounds = array<i64: 32, 512>}, {transform_indices = @transform_1, window_bounds = array<i64: 512, 128>}, {transform_indices = @transform_2, window_bounds = array<i64: 1, 128>}, {transform_indices = @transform_3, window_bounds = array<i64: 32, 128>}, {transform_indices = @transform_4, window_bounds = array<i64: 32, 128>}]} {
    %c0_i32 = arith.constant 0 : i32
    %0 = arith.cmpi eq, %arg2, %c0_i32 : i32
    %1 = arith.extui %0 : i1 to i32
    %c0_i32_0 = arith.constant 0 : i32
    %2 = arith.cmpi ne, %1, %c0_i32_0 : i32
    scf.if %2 {
      %cst_10 = arith.constant 0.000000e+00 : f32
      %12 = vector.broadcast %cst_10 : f32 to vector<32x128xf32>
      %c0_11 = arith.constant 0 : index
      %c0_12 = arith.constant 0 : index
      %13 = vector.load %arg8[%c0_11, %c0_12] : memref<32x128xf32, #tpu.memory_space<vmem>>, vector<32x128xf32>
      tpu.vector_store %arg8[%c0_11, %c0_12], %12 {strides = array<i32>} : memref<32x128xf32, #tpu.memory_space<vmem>>, vector<32x128xf32>,
    } else {
    }
    %c0 = arith.constant 0 : index
    %c0_1 = arith.constant 0 : index
    %3 = vector.load %arg8[%c0, %c0_1] : memref<32x128xf32, #tpu.memory_space<vmem>>, vector<32x128xf32>
    %c0_2 = arith.constant 0 : index
    %c0_3 = arith.constant 0 : index
    %4 = vector.load %arg3[%c0_2, %c0_3] : memref<32x512xbf16, #tpu.memory_space<vmem>>, vector<32x512xbf16>
    %c0_4 = arith.constant 0 : index
    %c0_5 = arith.constant 0 : index
    %5 = vector.load %arg4[%c0_4, %c0_5] : memref<512x128xbf16, #tpu.memory_space<vmem>>, vector<512x128xbf16>
    %cst = arith.constant dense<0.000000e+00> : vector<32x128xf32>
    %6 = tpu.matmul %4, %5, %cst {dimension_numbers = #tpu.dot_dimension_numbers<[1], [0], [0], [1], [0, 0, 1, 1], [], []>} : vector<32x512xbf16>, vector<512x128xbf16>, vector<32x128xf32> -> vector<32x128xf32>
    %7 = arith.addf %3, %6 : vector<32x128xf32>
    %c0_6 = arith.constant 0 : index
    %c0_7 = arith.constant 0 : index
    %8 = vector.load %arg8[%c0_6, %c0_7] : memref<32x128xf32, #tpu.memory_space<vmem>>, vector<32x128xf32>
    tpu.vector_store %arg8[%c0_6, %c0_7], %7 {strides = array<i32>} : memref<32x128xf32, #tpu.memory_space<vmem>>, vector<32x128xf32>,
    %c0_i32_8 = arith.constant 0 : i32
    %9 = arith.cmpi eq, %arg2, %c0_i32_8 : i32
    %10 = arith.extui %9 : i1 to i32
    %c0_i32_9 = arith.constant 0 : i32
    %11 = arith.cmpi ne, %10, %c0_i32_9 : i32
    scf.if %11 {
      %c0_10 = arith.constant 0 : index
      %c0_11 = arith.constant 0 : index
      %12 = vector.load %arg8[%c0_10, %c0_11] : memref<32x128xf32, #tpu.memory_space<vmem>>, vector<32x128xf32>
      %c0_12 = arith.constant 0 : index
      %c0_13 = arith.constant 0 : index
      %13 = vector.load %arg5[%c0_12, %c0_13] : memref<1x128xf32, #tpu.memory_space<vmem>>, vector<1x128xf32>
      %14 = vector.broadcast %13 : vector<1x128xf32> to vector<32x128xf32>
      %15 = arith.addf %12, %14 : vector<32x128xf32>
      %c0_14 = arith.constant 0 : index
      %c0_15 = arith.constant 0 : index
      %16 = vector.load %arg6[%c0_14, %c0_15] : memref<32x128xbf16, #tpu.memory_space<vmem>>, vector<32x128xbf16>
      %17 = arith.extf %16 : vector<32x128xbf16> to vector<32x128xf32>
      %18 = arith.addf %15, %17 : vector<32x128xf32>
      %19 = arith.truncf %18 : vector<32x128xf32> to vector<32x128xbf16>
      %c0_16 = arith.constant 0 : index
      %c0_17 = arith.constant 0 : index
      %20 = vector.load %arg7[%c0_16, %c0_17] : memref<32x128xbf16, #tpu.memory_space<vmem>>, vector<32x128xbf16>
      tpu.vector_store %arg7[%c0_16, %c0_17], %19 {strides = array<i32>} : memref<32x128xbf16, #tpu.memory_space<vmem>>, vector<32x128xbf16>,
    } else {
    }
    return
  }
  func.func @transform_0(%arg0: i32, %arg1: i32, %arg2: i32) -> (i32, i32) {
    %c0_i32 = arith.constant 0 : i32
    return %arg0, %arg2 : i32, i32
  }
  func.func @transform_1(%arg0: i32, %arg1: i32, %arg2: i32) -> (i32, i32) {
    %c0_i32 = arith.constant 0 : i32
    return %arg2, %arg1 : i32, i32
  }
  func.func @transform_2(%arg0: i32, %arg1: i32, %arg2: i32) -> (i32, i32) {
    %c0_i32 = arith.constant 0 : i32
    %c0_i32_0 = arith.constant 0 : i32
    return %c0_i32, %arg1 : i32, i32
  }
  func.func @transform_3(%arg0: i32, %arg1: i32, %arg2: i32) -> (i32, i32) {
    %c0_i32 = arith.constant 0 : i32
    return %arg0, %arg1 : i32, i32
  }
  func.func @transform_4(%arg0: i32, %arg1: i32, %arg2: i32) -> (i32, i32) {
    %c0_i32 = arith.constant 0 : i32
    return %arg0, %arg1 : i32, i32
  }
}

module attributes {stable_mosaic.version = 11 : i64} {
  func.func @_ln_dense_kernel(%arg0: i32, %arg1: i32, %arg2: memref<32x128xbf16, #tpu.memory_space<vmem>>, %arg3: memref<1x128xf32, #tpu.memory_space<vmem>>, %arg4: memref<1x128xf32, #tpu.memory_space<vmem>>, %arg5: memref<128x128xbf16, #tpu.memory_space<vmem>>, %arg6: memref<1x128xf32, #tpu.memory_space<vmem>>, %arg7: memref<32x128xf32, #tpu.memory_space<vmem>>, %arg8: memref<32x128xbf16, #tpu.memory_space<vmem>>) attributes {dimension_semantics = [#tpu.dimension_semantics<parallel>, #tpu.dimension_semantics<arbitrary>], iteration_bounds = array<i64: 1, 1>, scalar_prefetch = 0 : i64, scratch_operands = 1 : i64, tpu.core_type = #tpu.core_type<tc>, window_params = [{transform_indices = @transform_0, window_bounds = array<i64: 32, 128>}, {pipeline_mode = #tpu.pipeline_mode<synchronous>, transform_indices = @transform_1, window_bounds = array<i64: 1, 128>}, {pipeline_mode = #tpu.pipeline_mode<synchronous>, transform_indices = @transform_2, window_bounds = array<i64: 1, 128>}, {transform_indices = @transform_3, window_bounds = array<i64: 128, 128>}, {transform_indices = @transform_4, window_bounds = array<i64: 1, 128>}, {transform_indices = @transform_5, window_bounds = array<i64: 32, 128>}]} {
    %c0_i32 = arith.constant 0 : i32
    %0 = arith.cmpi eq, %arg1, %c0_i32 : i32
    %1 = arith.extui %0 : i1 to i32
    %c0_i32_0 = arith.constant 0 : i32
    %2 = arith.cmpi ne, %1, %c0_i32_0 : i32
    scf.if %2 {
      %c0_8 = arith.constant 0 : index
      %c0_9 = arith.constant 0 : index
      %10 = vector.load %arg2[%c0_8, %c0_9] : memref<32x128xbf16, #tpu.memory_space<vmem>>, vector<32x128xbf16>
      %11 = arith.extf %10 : vector<32x128xbf16> to vector<32x128xf32>
      %cst_10 = arith.constant dense<0.000000e+00> : vector<32xf32>
      %12 = vector.multi_reduction <add>, %11, %cst_10 [1] : vector<32x128xf32> to vector<32xf32>
      %13 = vector.shape_cast %12 : vector<32xf32> to vector<32x1xf32>
      %cst_11 = arith.constant 1.280000e+02 : f32
      %14 = vector.broadcast %cst_11 : f32 to vector<32x1xf32>
      %15 = arith.divf %13, %14 : vector<32x1xf32>
      %16 = vector.broadcast %15 : vector<32x1xf32> to vector<32x128xf32>
      %17 = arith.subf %11, %16 : vector<32x128xf32>
      %18 = arith.mulf %17, %17 : vector<32x128xf32>
      %cst_12 = arith.constant dense<0.000000e+00> : vector<32xf32>
      %19 = vector.multi_reduction <add>, %18, %cst_12 [1] : vector<32x128xf32> to vector<32xf32>
      %20 = vector.shape_cast %19 : vector<32xf32> to vector<32x1xf32>
      %cst_13 = arith.constant 1.280000e+02 : f32
      %21 = vector.broadcast %cst_13 : f32 to vector<32x1xf32>
      %22 = arith.divf %20, %21 : vector<32x1xf32>
      %23 = vector.broadcast %15 : vector<32x1xf32> to vector<32x128xf32>
      %24 = arith.subf %11, %23 : vector<32x128xf32>
      %cst_14 = arith.constant 9.99999974E-6 : f32
      %25 = vector.broadcast %cst_14 : f32 to vector<32x1xf32>
      %26 = arith.addf %22, %25 : vector<32x1xf32>
      %27 = math.rsqrt %26 : vector<32x1xf32>
      %28 = vector.broadcast %27 : vector<32x1xf32> to vector<32x128xf32>
      %29 = arith.mulf %24, %28 : vector<32x128xf32>
      %c0_15 = arith.constant 0 : index
      %c0_16 = arith.constant 0 : index
      %30 = vector.load %arg3[%c0_15, %c0_16] : memref<1x128xf32, #tpu.memory_space<vmem>>, vector<1x128xf32>
      %31 = vector.broadcast %30 : vector<1x128xf32> to vector<32x128xf32>
      %32 = arith.mulf %29, %31 : vector<32x128xf32>
      %c0_17 = arith.constant 0 : index
      %c0_18 = arith.constant 0 : index
      %33 = vector.load %arg4[%c0_17, %c0_18] : memref<1x128xf32, #tpu.memory_space<vmem>>, vector<1x128xf32>
      %34 = vector.broadcast %33 : vector<1x128xf32> to vector<32x128xf32>
      %35 = arith.addf %32, %34 : vector<32x128xf32>
      %36 = arith.truncf %35 : vector<32x128xf32> to vector<32x128xbf16>
      %c0_19 = arith.constant 0 : index
      %c0_20 = arith.constant 0 : index
      %37 = vector.load %arg8[%c0_19, %c0_20] : memref<32x128xbf16, #tpu.memory_space<vmem>>, vector<32x128xbf16>
      tpu.vector_store %arg8[%c0_19, %c0_20], %36 {strides = array<i32>} : memref<32x128xbf16, #tpu.memory_space<vmem>>, vector<32x128xbf16>,
    } else {
    }
    %c0 = arith.constant 0 : index
    %c0_1 = arith.constant 0 : index
    %3 = vector.load %arg8[%c0, %c0_1] : memref<32x128xbf16, #tpu.memory_space<vmem>>, vector<32x128xbf16>
    %c0_2 = arith.constant 0 : index
    %c0_3 = arith.constant 0 : index
    %4 = vector.load %arg5[%c0_2, %c0_3] : memref<128x128xbf16, #tpu.memory_space<vmem>>, vector<128x128xbf16>
    %cst = arith.constant dense<0.000000e+00> : vector<32x128xf32>
    %5 = tpu.matmul %3, %4, %cst {dimension_numbers = #tpu.dot_dimension_numbers<[1], [0], [0], [1], [0, 0, 1, 1], [], []>} : vector<32x128xbf16>, vector<128x128xbf16>, vector<32x128xf32> -> vector<32x128xf32>
    %c0_4 = arith.constant 0 : index
    %c0_5 = arith.constant 0 : index
    %6 = vector.load %arg6[%c0_4, %c0_5] : memref<1x128xf32, #tpu.memory_space<vmem>>, vector<1x128xf32>
    %7 = vector.broadcast %6 : vector<1x128xf32> to vector<32x128xf32>
    %8 = arith.addf %5, %7 : vector<32x128xf32>
    %c0_6 = arith.constant 0 : index
    %c0_7 = arith.constant 0 : index
    %9 = vector.load %arg7[%c0_6, %c0_7] : memref<32x128xf32, #tpu.memory_space<vmem>>, vector<32x128xf32>
    tpu.vector_store %arg7[%c0_6, %c0_7], %8 {strides = array<i32>} : memref<32x128xf32, #tpu.memory_space<vmem>>, vector<32x128xf32>,
    return
  }
  func.func @transform_0(%arg0: i32, %arg1: i32) -> (i32, i32) {
    %c0_i32 = arith.constant 0 : i32
    %c0_i32_0 = arith.constant 0 : i32
    return %arg0, %c0_i32 : i32, i32
  }
  func.func @transform_1(%arg0: i32, %arg1: i32) -> (i32, i32) {
    %c0_i32 = arith.constant 0 : i32
    %c0_i32_0 = arith.constant 0 : i32
    %c0_i32_1 = arith.constant 0 : i32
    return %c0_i32, %c0_i32_0 : i32, i32
  }
  func.func @transform_2(%arg0: i32, %arg1: i32) -> (i32, i32) {
    %c0_i32 = arith.constant 0 : i32
    %c0_i32_0 = arith.constant 0 : i32
    %c0_i32_1 = arith.constant 0 : i32
    return %c0_i32, %c0_i32_0 : i32, i32
  }
  func.func @transform_3(%arg0: i32, %arg1: i32) -> (i32, i32) {
    %c0_i32 = arith.constant 0 : i32
    %c0_i32_0 = arith.constant 0 : i32
    return %c0_i32, %arg1 : i32, i32
  }
  func.func @transform_4(%arg0: i32, %arg1: i32) -> (i32, i32) {
    %c0_i32 = arith.constant 0 : i32
    %c0_i32_0 = arith.constant 0 : i32
    return %c0_i32, %arg1 : i32, i32
  }
  func.func @transform_5(%arg0: i32, %arg1: i32) -> (i32, i32) {
    %c0_i32 = arith.constant 0 : i32
    return %arg0, %arg1 : i32, i32
  }
}

</mosaic_0001>

<bundles_post_ra>
// kernel: solospeech_tse_forward.29
= control target key start
LH: loop header
LB: loop body
LE: loop exit
PB: predicated region body
PF: predicated region fallthrough
CT: control target
= control target key end

     0   :  { %v157_v2 = vmov 0.0   ;;  %s211_s1 = inlined_call_operand.vmem [shape: bf16[128,128], index: 1, kind: input, shape index: {}]   ;;  %s212_s2 = inlined_call_operand.vmem [shape: f32[1,128], index: 2, kind: input, shape index: {}]   ;;  %s213_s0 = inlined_call_operand.vmem [shape: bf16[2,128], index: 0, kind: input, shape index: {}]   ;;  %s214_s3 = inlined_call_operand.vmem [shape: bf16[2,128], index: 3, kind: output, shape index: {}]  }
   0x1   :  { %v154_v0 = vld [vmem:[%s211_s1 + $0x38] sm:$0xff]  ;;  %v153_v1 = vld [vmem:[%s211_s1 + $0x30] sm:$0xff]  ;;  %18 = vst [vmem:[#allocation2] sm:$0x3] %v157_v2  ;;  %v152_v3 = vld [vmem:[%s211_s1 + $0x28] sm:$0xff] }
   0x2   :  { %85 = vmatpush.bf16.msra.mxu0 %v154_v0  ;;  %v151_v4 = vld [vmem:[%s211_s1 + $0x20] sm:$0xff]  ;;  %v150_v5 = vld [vmem:[%s211_s1 + $0x18] sm:$0xff]  ;;  %v149_v6 = vld [vmem:[%s211_s1 + $0x10] sm:$0xff] }
   0x3   :  { %v148_v7 = vld [vmem:[%s211_s1 + $0x8] sm:$0xff]  ;;  %v147_v8 = vld [vmem:[%s211_s1] sm:$0xff] }
   0x4   :  { %v20_v9 = vld [vmem:[%s213_s0] sm:$0x1] }
   0x5   :  { %v156_v13 = vld [vmem:[%s212_s2] ss:$0 sm:$0xff] }
   0x6   :  { %86 = vmatpush.bf16.msra.mxu0 %v153_v1 }
   0x8   :  { %v19_v10 = vld [vmem:[#allocation2] sm:$0x3] }
   0xa   :  { %87 = vmatpush.bf16.msra.mxu0 %v152_v3 }
   0xe   :  { %88 = vmatpush.bf16.msra.mxu0 %v151_v4 }
  0x12   :  { %89 = vmatpush.bf16.msra.mxu0 %v150_v5 }
  0x16   :  { %90 = vmatpush.bf16.msra.mxu0 %v149_v6 }
  0x1a   :  { %91 = vmatpush.bf16.msra.mxu0 %v148_v7 }
  0x1e   :  { %92 = vmatpush.bf16.msra.mxu0 %v147_v8 }
  0x21   :  { %93 = vmatmul.bf16.vlgmr.msra.gmra.mxu0 %v20_v9 }
  0x9e   :  { %v94_v11 = vpop.f32.mrf.mxu0 }
  0x9f   :  { %v98_v12 = vadd.f32 %v94_v11, %v19_v10 }
  0xa1   :  { %99 = vst [vmem:[#allocation2] sm:$0x3] %v98_v12 }
  0xa6   :  { %v96_v14 = vpop.f32.mrf.mxu0 }
  0xa8   :  { %v103_v15 = vld [vmem:[#allocation2] sm:$0x3] }
  0xa9   :  { %v108_v16 = vadd.f32 %v156_v13, %v103_v15 }
  0xab   :  { %v109_v17 = vpack.c.bf16 %v108_v16, %v108_v16 }
  0xad   :  { %110 = vst [vmem:[%s214_s3] sm:$0x1] %v109_v17 }

// kernel: solospeech_tse_forward.27
= control target key start
LH: loop header
LB: loop body
LE: loop exit
PB: predicated region body
PF: predicated region fallthrough
CT: control target
= control target key end

     0   :  { %vm41_vm0 = vcmask 130048   ;;  %s166_s1 = inlined_call_operand.vmem [shape: bf16[16,128], index: 1, kind: input, shape index: {}]   ;;  %s167_s0 = inlined_call_operand.vmem [shape: f32[32,16], index: 0, kind: input, shape index: {}]   ;;  %s168_s2 = inlined_call_operand.vmem [shape: f32[1,128], index: 2, kind: input, shape index: {}]   ;;  %s169_s3 = inlined_call_operand.vmem [shape: bf16[32,128], index: 3, kind: output, shape index: {}]  }
   0x1   :  { %v108_v0 = vld [vmem:[%s166_s1] sm:$0xff]  ;;  %v28_v2 = vld [vmem:[%s167_s0 + $0x8] sm:$0xff]  ;;  %v29_v4 = vld [vmem:[%s167_s0 + $0x10] sm:$0xff] }
   0x2   :  { %v27_v1 = vld [vmem:[%s167_s0] sm:$0xff]  ;;  %v30_v5 = vld [vmem:[%s167_s0 + $0x18] sm:$0xff]  ;;  %55 = vmatpush.bf16.msra.mxu0 %v108_v0  ;;  %120 = vmatpush.bf16.msra.mxu1 %v108_v0 }
   0x3   :  { %v31_v3 = vpack.c.bf16 %v28_v2, %v27_v1  ;;  %v32_v6 = vpack.c.bf16 %v30_v5, %v29_v4  ;;  %v121_v9 = vld [vmem:[%s168_s2] ss:$0 sm:$0xff] }
   0x5   :  { %106 = vmatmul.msk.bf16.vlgmr.msra.gmra.mxu0 %vm41_vm0, %v31_v3  ;;  %107 = vmatmul.msk.bf16.vlgmr.msra.gmra.mxu1 %vm41_vm0, %v32_v6 }
  0x82   :  { %v57_v7 = vpop.f32.mrf.mxu0  ;;  %v62_v8 = vpop.f32.mrf.mxu1 }
  0x83   :  { %v86_v12 = vadd.f32 %v121_v9, %v57_v7  ;;  %v88_v13 = vadd.f32 %v121_v9, %v62_v8 }
  0x8a   :  { %v59_v10 = vpop.f32.mrf.mxu0  ;;  %v64_v11 = vpop.f32.mrf.mxu1 }
  0x8b   :  { %v87_v14 = vadd.f32 %v121_v9, %v59_v10  ;;  %v89_v15 = vadd.f32 %v121_v9, %v64_v11 }
  0x8d   :  { %v112_v16 = vpack.c.bf16 %v87_v14, %v86_v12  ;;  %v117_v17 = vpack.c.bf16 %v89_v15, %v88_v13 }
  0x8f   :  { %113 = vst [vmem:[%s169_s3] sm:$0xff] %v112_v16  }
  0x90   :  { %119 = vst [vmem:[%s169_s3 + $0x8] sm:$0xff] %v117_v17  }

// kernel: solospeech_tse_forward.28
= control target key start
LH: loop header
LB: loop body
LE: loop exit
PB: predicated region body
PF: predicated region fallthrough
CT: control target
= control target key end

     0   :  { %v169_v2 = vmov 0.0   ;;  %s223_s1 = inlined_call_operand.vmem [shape: bf16[128,128], index: 1, kind: input, shape index: {}]   ;;  %s224_s2 = inlined_call_operand.vmem [shape: f32[1,128], index: 2, kind: input, shape index: {}]   ;;  %s225_s0 = inlined_call_operand.vmem [shape: f32[2,128], index: 0, kind: input, shape index: {}]   ;;  %s226_s3 = inlined_call_operand.vmem [shape: bf16[2,128], index: 3, kind: output, shape index: {}]  }
   0x1   :  { %v164_v0 = vld [vmem:[%s223_s1 + $0x38] sm:$0xff]  ;;  %v163_v1 = vld [vmem:[%s223_s1 + $0x30] sm:$0xff]  ;;  %18 = vst [vmem:[#allocation2] sm:$0x3] %v169_v2  ;;  %v162_v3 = vld [vmem:[%s223_s1 + $0x28] sm:$0xff] }
   0x2   :  { %86 = vmatpush.bf16.msra.mxu0 %v164_v0  ;;  %v161_v4 = vld [vmem:[%s223_s1 + $0x20] sm:$0xff]  ;;  %v160_v5 = vld [vmem:[%s223_s1 + $0x18] sm:$0xff]  ;;  %v159_v6 = vld [vmem:[%s223_s1 + $0x10] sm:$0xff] }
   0x3   :  { %v158_v7 = vld [vmem:[%s223_s1 + $0x8] sm:$0xff]  ;;  %v157_v8 = vld [vmem:[%s223_s1] sm:$0xff] }
   0x4   :  { %v20_v9 = vld [vmem:[%s225_s0] sm:$0x3] }
   0x5   :  { %v21_v10 = vpack.c.bf16 %v20_v9, %v20_v9  ;;  %v166_v14 = vld [vmem:[%s224_s2] ss:$0 sm:$0xff] }
   0x6   :  { %87 = vmatpush.bf16.msra.mxu0 %v163_v1 }
   0x8   :  { %v19_v11 = vld [vmem:[#allocation2] sm:$0x3] }
   0xa   :  { %88 = vmatpush.bf16.msra.mxu0 %v162_v3 }
   0xe   :  { %89 = vmatpush.bf16.msra.mxu0 %v161_v4 }
  0x12   :  { %90 = vmatpush.bf16.msra.mxu0 %v160_v5 }
  0x16   :  { %91 = vmatpush.bf16.msra.mxu0 %v159_v6 }
  0x1a   :  { %92 = vmatpush.bf16.msra.mxu0 %v158_v7 }
  0x1e   :  { %93 = vmatpush.bf16.msra.mxu0 %v157_v8 }
  0x21   :  { %94 = vmatmul.bf16.vlgmr.msra.gmra.mxu0 %v21_v10 }
  0x9e   :  { %v95_v12 = vpop.f32.mrf.mxu0 }
  0x9f   :  { %v99_v13 = vadd.f32 %v95_v12, %v19_v11 }
  0xa1   :  { %100 = vst [vmem:[#allocation2] sm:$0x3] %v99_v13 }
  0xa6   :  { %v97_v15 = vpop.f32.mrf.mxu0 }
  0xa8   :  { %v104_v16 = vld [vmem:[#allocation2] sm:$0x3] }
  0xa9   :  { %v109_v17 = vadd.f32 %v166_v14, %v104_v16 }
  0xab   :  { %v110_v18 = vmul.f32 %v109_v17, %v109_v17 }
  0xad   :  { %v111_v19 = vmul.f32 %v110_v18, %v109_v17 }
  0xaf   :  { %v112_v20 = vmul.f32 0.044715, %v111_v19 }
  0xb1   :  { %v113_v21 = vadd.f32 %v112_v20, %v109_v17 }
  0xb3   :  { %v114_v22 = vmul.f32 0.7978846, %v113_v21 }
  0xb5   :  { %167 = vtanh.f32 %v114_v22 }
  0xbb   :  { %v168_v23 = vpop.eup %167 }
  0xbc   :  { %v116_v24 = vadd.f32 1.0, %v168_v23 }
  0xbe   :  { %v117_v25 = vmul.f32 0.5, %v116_v24 }
  0xc0   :  { %v118_v26 = vmul.f32 %v117_v25, %v109_v17 }
  0xc2   :  { %v119_v27 = vpack.c.bf16 %v118_v26, %v118_v26 }
  0xc4   :  { %120 = vst [vmem:[%s226_s3] sm:$0x1] %v119_v27 }

// kernel: solospeech_tse_forward.32
= control target key start
LH: loop header
LB: loop body
LE: loop exit
PB: predicated region body
PF: predicated region fallthrough
CT: control target
= control target key end

     0   :  { %s324_s1 = inlined_call_operand.vmem [shape: bf16[128,128], index: 1, kind: input, shape index: {}]   ;;  %s325_s2 = inlined_call_operand.vmem [shape: f32[1,128], index: 2, kind: input, shape index: {}]   ;;  %s326_s0 = inlined_call_operand.vmem [shape: bf16[32,128], index: 0, kind: input, shape index: {}]   ;;  %s327_s3 = inlined_call_operand.vmem [shape: bf16[32,128], index: 3, kind: input, shape index: {}]   ;;  %s328_s4 = inlined_call_operand.vmem [shape: bf16[32,128], index: 4, kind: output, shape index: {}]  }
   0x1   :  { %v224_v0 = vld [vmem:[%s324_s1 + $0x38] sm:$0xff]  ;;  %v223_v1 = vld [vmem:[%s324_s1 + $0x30] sm:$0xff]  ;;  %v222_v2 = vld [vmem:[%s324_s1 + $0x28] sm:$0xff] }
   0x2   :  { %109 = vmatpush.bf16.msra.mxu0 %v224_v0  ;;  %245 = vmatpush.bf16.msra.mxu1 %v224_v0  ;;  %v221_v3 = vld [vmem:[%s324_s1 + $0x20] sm:$0xff]  ;;  %v220_v4 = vld [vmem:[%s324_s1 + $0x18] sm:$0xff]  ;;  %v219_v5 = vld [vmem:[%s324_s1 + $0x10] sm:$0xff] }
   0x3   :  { %v218_v6 = vld [vmem:[%s324_s1 + $0x8] sm:$0xff]  ;;  %v217_v7 = vld [vmem:[%s324_s1] sm:$0xff] }
   0x4   :  { %v215_v8 = vld [vmem:[%s326_s0] sm:$0xff]  ;;  %v216_v9 = vld [vmem:[%s326_s0 + $0x8] sm:$0xff] }
   0x5   :  { %v253_v12 = vld [vmem:[%s325_s2] ss:$0 sm:$0xff]  ;;  %v243_v14 = vld [vmem:[%s327_s3 + $0x8] sm:$0xff]  }
   0x6   :  { %110 = vmatpush.bf16.msra.mxu0 %v223_v1  ;;  %246 = vmatpush.bf16.msra.mxu1 %v223_v1  ;;  %v226_v13 = vld [vmem:[%s327_s3] sm:$0xff]   ;;  %v231_v16 = vunpack.c.l.bf16 %v243_v14  ;;  %v232_v20 = vunpack.c.h.bf16 %v243_v14 }
   0x7   :  { %v227_v15 = vunpack.c.l.bf16 %v226_v13  ;;  %v228_v19 = vunpack.c.h.bf16 %v226_v13 }
   0xa   :  { %111 = vmatpush.bf16.msra.mxu0 %v222_v2  ;;  %247 = vmatpush.bf16.msra.mxu1 %v222_v2 }
   0xe   :  { %112 = vmatpush.bf16.msra.mxu0 %v221_v3  ;;  %248 = vmatpush.bf16.msra.mxu1 %v221_v3 }
  0x12   :  { %113 = vmatpush.bf16.msra.mxu0 %v220_v4  ;;  %249 = vmatpush.bf16.msra.mxu1 %v220_v4 }
  0x16   :  { %114 = vmatpush.bf16.msra.mxu0 %v219_v5  ;;  %250 = vmatpush.bf16.msra.mxu1 %v219_v5 }
  0x1a   :  { %115 = vmatpush.bf16.msra.mxu0 %v218_v6  ;;  %251 = vmatpush.bf16.msra.mxu1 %v218_v6 }
  0x1e   :  { %116 = vmatpush.bf16.msra.mxu0 %v217_v7  ;;  %252 = vmatpush.bf16.msra.mxu1 %v217_v7 }
  0x21   :  { %117 = vmatmul.bf16.vlgmr.msra.gmra.mxu0 %v215_v8  ;;  %122 = vmatmul.bf16.vlgmr.msra.gmra.mxu1 %v216_v9 }
  0x9e   :  { %v118_v10 = vpop.f32.mrf.mxu0  ;;  %v123_v11 = vpop.f32.mrf.mxu1 }
  0x9f   :  { %v147_v17 = vadd.f32 %v253_v12, %v118_v10  ;;  %v149_v18 = vadd.f32 %v253_v12, %v123_v11 }
  0xa1   :  { %v159_v25 = vadd.f32 %v227_v15, %v147_v17  ;;  %v161_v26 = vadd.f32 %v231_v16, %v149_v18 }
  0xa6   :  { %v120_v21 = vpop.f32.mrf.mxu0  ;;  %v125_v22 = vpop.f32.mrf.mxu1 }
  0xa7   :  { %v148_v23 = vadd.f32 %v253_v12, %v120_v21  ;;  %v150_v24 = vadd.f32 %v253_v12, %v125_v22 }
  0xa9   :  { %v160_v27 = vadd.f32 %v228_v19, %v148_v23  ;;  %v162_v28 = vadd.f32 %v232_v20, %v150_v24 }
  0xab   :  { %v236_v29 = vpack.c.bf16 %v160_v27, %v159_v25  ;;  %v241_v30 = vpack.c.bf16 %v162_v28, %v161_v26 }
  0xad   :  { %237 = vst [vmem:[%s328_s4] sm:$0xff] %v236_v29  }
  0xae   :  { %244 = vst [vmem:[%s328_s4 + $0x8] sm:$0xff] %v241_v30  }

// kernel: solospeech_tse_forward.33
= control target key start
LH: loop header
LB: loop body
LE: loop exit
PB: predicated region body
PF: predicated region fallthrough
CT: control target
= control target key end

     0   :  { %v361_v6 = vmov 128.0   ;;  %s457_s0 = inlined_call_operand.vmem [shape: bf16[32,128], index: 0, kind: input, shape index: {}]   ;;  %s458_s1 = inlined_call_operand.vmem [shape: f32[1,128], index: 1, kind: input, shape index: {}]   ;;  %s459_s2 = inlined_call_operand.vmem [shape: f32[1,128], index: 2, kind: input, shape index: {}]   ;;  %s460_s4 = inlined_call_operand.vmem [shape: f32[1,128], index: 4, kind: input, shape index: {}]   ;;  %s461_s3 = inlined_call_operand.vmem [shape: bf16[128,128], index: 3, kind: input, shape index: {}]   ;;  %s462_s5 = inlined_call_operand.vmem [shape: bf16[32,128], index: 5, kind: output, shape index: {}]  }
   0x1   :  { %v336_v0 = vld [vmem:[%s457_s0 + $0x8] sm:$0xff]   ;;  %v309_v1 = vld [vmem:[%s457_s0] sm:$0xff]   ;;  %351 = vrcp.f32 %v361_v6  ;;  %v307_v29 = vld [vmem:[%s461_s3 + $0x38] sm:$0xff] }
   0x2   :  { %v314_v2 = vunpack.c.l.bf16 %v336_v0  ;;  %v310_v3 = vunpack.c.l.bf16 %v309_v1  ;;  %v315_v4 = vunpack.c.h.bf16 %v336_v0  ;;  %v311_v5 = vunpack.c.h.bf16 %v309_v1  ;;  %227 = vmatpush.bf16.msra.mxu0 %v307_v29  ;;  %339 = vmatpush.bf16.msra.mxu1 %v307_v29  ;;  %v306_v30 = vld [vmem:[%s461_s3 + $0x30] sm:$0xff]  ;;  %v305_v31 = vld [vmem:[%s461_s3 + $0x28] sm:$0xff]  ;;  %v304_v32 = vld [vmem:[%s461_s3 + $0x20] sm:$0xff] }
   0x3   :  { %v303_v35 = vld [vmem:[%s461_s3 + $0x18] sm:$0xff]  ;;  %v302_v40 = vld [vmem:[%s461_s3 + $0x10] sm:$0xff]  ;;  %v301_v43 = vld [vmem:[%s461_s3 + $0x8] sm:$0xff] }
   0x4   :  { %36 = vadd.xlane.f32.xlu1 %v314_v2  ;;  %32 = vadd.xlane.f32.xlu0 %v310_v3  ;;  %v300_v46 = vld [vmem:[%s461_s3] sm:$0xff] }
   0x6   :  { %228 = vmatpush.bf16.msra.mxu0 %v306_v30  ;;  %340 = vmatpush.bf16.msra.mxu1 %v306_v30 }
   0x7   :  { %v352_v7 = vpop.eup %351 }
   0x8   :  { %v41_v8 = vmul.f32 128.0, %v352_v7  ;;  %vm45_vm0 = vweird.f32 %v352_v7 }
   0xa   :  { %v42_v9 = vsub.f32 1.0, %v41_v8  ;;  %229 = vmatpush.bf16.msra.mxu0 %v305_v31  ;;  %341 = vmatpush.bf16.msra.mxu1 %v305_v31  ;;  %v348_v8 = vld [vmem:[%s458_s1] ss:$0 sm:$0xff] }
   0xc   :  { %38 = vadd.xlane.f32.xlu1 %v315_v4  ;;  %34 = vadd.xlane.f32.xlu0 %v311_v5  ;;  %v43_v10 = vmul.f32 %v352_v7, %v42_v9 }
   0xe   :  { %v44_v11 = vadd.f32 %v352_v7, %v43_v10  ;;  %230 = vmatpush.bf16.msra.mxu0 %v304_v32  ;;  %342 = vmatpush.bf16.msra.mxu1 %v304_v32 }
  0x10   :  { %v46_v12 = vsel %vm45_vm0, %v352_v7, %v44_v11 }
  0x12   :  { %231 = vmatpush.bf16.msra.mxu0 %v303_v35  ;;  %343 = vmatpush.bf16.msra.mxu1 %v303_v35 }
  0x16   :  { %232 = vmatpush.bf16.msra.mxu0 %v302_v40  ;;  %344 = vmatpush.bf16.msra.mxu1 %v302_v40 }
  0x1a   :  { %233 = vmatpush.bf16.msra.mxu0 %v301_v43  ;;  %345 = vmatpush.bf16.msra.mxu1 %v301_v43 }
  0x1e   :  { %234 = vmatpush.bf16.msra.mxu0 %v300_v46  ;;  %346 = vmatpush.bf16.msra.mxu1 %v300_v46 }
  0x77   :  { %v37_v13 = vpop.xlane.xlu1 %36  ;;  %v33_v14 = vpop.xlane.xlu0 %32 }
  0x78   :  { %v49_v15 = vmul.f32 %v46_v12, %v37_v13  ;;  %v47_v16 = vmul.f32 %v46_v12, %v33_v14 }
  0x7a   :  { %v398_v17 = vsub.f32 %v314_v2, %v49_v15  ;;  %v400_v18 = vsub.f32 %v310_v3, %v47_v16  ;;  %v349_v15 = vld [vmem:[%s459_s2] ss:$0 sm:$0xff] }
  0x7c   :  { %v57_v19 = vmul.f32 %v398_v17, %v398_v17  ;;  %v55_v20 = vmul.f32 %v400_v18, %v400_v18 }
  0x7e   :  { %63 = vadd.xlane.f32.xlu0 %v57_v19  ;;  %59 = vadd.xlane.f32.xlu2 %v55_v20 }
  0x7f   :  { %v39_v21 = vpop.xlane.xlu1 %38  ;;  %v35_v22 = vpop.xlane.xlu0 %34 }
  0x80   :  { %v50_v23 = vmul.f32 %v46_v12, %v39_v21  ;;  %v48_v24 = vmul.f32 %v46_v12, %v35_v22 }
  0x82   :  { %v406_v25 = vsub.f32 %v315_v4, %v50_v23  ;;  %v408_v26 = vsub.f32 %v311_v5, %v48_v24 }
  0x84   :  { %v58_v27 = vmul.f32 %v406_v25, %v406_v25  ;;  %v56_v28 = vmul.f32 %v408_v26, %v408_v26 }
  0x86   :  { %65 = vadd.xlane.f32.xlu1 %v58_v27  ;;  %61 = vadd.xlane.f32.xlu2 %v56_v28 }
  0xf1   :  { %v60_v33 = vpop.xlane.xlu2 %59  ;;  %v64_v34 = vpop.xlane.xlu0 %63 }
  0xf2   :  { %v67_v36 = vmul.f32 %v60_v33, %v46_v12  ;;  %v69_v37 = vmul.f32 %v64_v34, %v46_v12 }
  0xf4   :  { %v71_v38 = vadd.f32 1e-05, %v67_v36  ;;  %v73_v39 = vadd.f32 1e-05, %v69_v37 }
  0xf6   :  { %353 = vrsqrt.f32 %v71_v38  ;;  %vm101_vm3 = vweird.f32 %v73_v39  ;;  %vm81_vm4 = vweird.f32 %v71_v38 }
  0xf7   :  { %355 = vrsqrt.f32 %v73_v39 }
  0xf9   :  { %v66_v41 = vpop.xlane.xlu1 %65  ;;  %v62_v42 = vpop.xlane.xlu2 %61 }
  0xfa   :  { %v70_v44 = vmul.f32 %v66_v41, %v46_v12  ;;  %v68_v45 = vmul.f32 %v62_v42, %v46_v12 }
  0xfc   :  { %v354_v47 = vpop.eup %353  ;;  %v74_v48 = vadd.f32 1e-05, %v70_v44  ;;  %v72_v49 = vadd.f32 1e-05, %v68_v45 }
  0xfd   :  { %v356_v50 = vpop.eup %355  ;;  %v76_v51 = vmul.f32 %v354_v47, %v71_v38  ;;  %vm82_vm2 = vweird.f32 %v354_v47 }
  0xfe   :  { %v96_v52 = vmul.f32 %v356_v50, %v73_v39  ;;  %357 = vrsqrt.f32 %v74_v48  ;;  %vm102_vm1 = vweird.f32 %v356_v50  ;;  %vm83_vm6 = vmor %vm81_vm4, %vm82_vm2  ;;  %vm111_vm9 = vweird.f32 %v74_v48 }
  0xff   :  { %v77_v53 = vmul.f32 %v354_v47, %v76_v51  ;;  %359 = vrsqrt.f32 %v72_v49  ;;  %vm103_vm5 = vmor %vm101_vm3, %vm102_vm1  ;;  %vm91_vm11 = vweird.f32 %v72_v49 }
 0x100   :  { %v97_v54 = vmul.f32 %v356_v50, %v96_v52 }
 0x101   :  { %v78_v55 = vmul.f32 0.5, %v77_v53 }
 0x102   :  { %v98_v56 = vmul.f32 0.5, %v97_v54 }
 0x103   :  { %v79_v57 = vsub.f32 1.5, %v78_v55 }
 0x104   :  { %v358_v58 = vpop.eup %357  ;;  %v99_v59 = vsub.f32 1.5, %v98_v56 }
 0x105   :  { %v360_v60 = vpop.eup %359  ;;  %v106_v61 = vmul.f32 %v358_v58, %v74_v48  ;;  %v80_v62 = vmul.f32 %v354_v47, %v79_v57  ;;  %vm112_vm7 = vweird.f32 %v358_v58 }
 0x106   :  { %v100_v63 = vmul.f32 %v356_v50, %v99_v59  ;;  %v86_v0 = vmul.f32 %v360_v60, %v72_v49  ;;  %vm92_vm8 = vweird.f32 %v360_v60  ;;  %vm113_vm10 = vmor %vm111_vm9, %vm112_vm7 }
 0x107   :  { %v107_v1 = vmul.f32 %v358_v58, %v106_v61  ;;  %v84_v5 = vsel %vm83_vm6, %v354_v47, %v80_v62  ;;  %vm93_vm12 = vmor %vm91_vm11, %vm92_vm8 }
 0x108   :  { %v87_v2 = vmul.f32 %v360_v60, %v86_v0  ;;  %v104_v3 = vsel %vm103_vm5, %v356_v50, %v100_v63  ;;  %v115_v11 = vmul.f32 %v84_v5, %v400_v18 }
 0x109   :  { %v108_v4 = vmul.f32 0.5, %v107_v1  ;;  %v117_v9 = vmul.f32 %v104_v3, %v398_v17 }
 0x10a   :  { %v88_v6 = vmul.f32 0.5, %v87_v2  ;;  %v123_v17 = vmul.f32 %v348_v8, %v115_v11 }
 0x10b   :  { %v109_v7 = vsub.f32 1.5, %v108_v4  ;;  %v125_v16 = vmul.f32 %v348_v8, %v117_v9 }
 0x10c   :  { %v89_v10 = vsub.f32 1.5, %v88_v6  ;;  %v131_v27 = vadd.f32 %v349_v15, %v123_v17 }
 0x10d   :  { %v110_v12 = vmul.f32 %v358_v58, %v109_v7  ;;  %v133_v23 = vadd.f32 %v349_v15, %v125_v16 }
 0x10e   :  { %v90_v13 = vmul.f32 %v360_v60, %v89_v10 }
 0x10f   :  { %v114_v14 = vsel %vm113_vm10, %v358_v58, %v110_v12 }
 0x110   :  { %v118_v19 = vmul.f32 %v114_v14, %v406_v25  ;;  %v94_v20 = vsel %vm93_vm12, %v360_v60, %v90_v13 }
 0x111   :  { %v116_v21 = vmul.f32 %v94_v20, %v408_v26  ;;  %v350_v26 = vld [vmem:[%s460_s4] ss:$0 sm:$0xff] }
 0x112   :  { %v126_v22 = vmul.f32 %v348_v8, %v118_v19 }
 0x113   :  { %v124_v18 = vmul.f32 %v348_v8, %v116_v21 }
 0x114   :  { %v134_v24 = vadd.f32 %v349_v15, %v126_v22 }
 0x115   :  { %v132_v28 = vadd.f32 %v349_v15, %v124_v18 }
 0x116   :  { %v324_v29 = vpack.c.bf16 %v134_v24, %v133_v23 }
 0x117   :  { %v319_v30 = vpack.c.bf16 %v132_v28, %v131_v27 }
 0x118   :  { %337 = vst [vmem:[#allocation2 + $0x8] sm:$0xff] %v324_v29  }
 0x119   :  { %320 = vst [vmem:[#allocation2] sm:$0xff] %v319_v30  }
 0x11f   :  { %v299_v31 = vld [vmem:[#allocation2 + $0x8] sm:$0xff] }
 0x120   :  { %v298_v32 = vld [vmem:[#allocation2] sm:$0xff]  ;;  %240 = vmatmul.bf16.vlgmr.msra.gmra.mxu1 %v299_v31 }
 0x121   :  { %235 = vmatmul.bf16.vlgmr.msra.gmra.mxu0 %v298_v32 }
 0x19d   :  { %v241_v33 = vpop.f32.mrf.mxu1 }
 0x19e   :  { %v236_v25 = vpop.f32.mrf.mxu0  ;;  %v242_v35 = vadd.f32 %v350_v26, %v241_v33 }
 0x19f   :  { %v237_v38 = vadd.f32 %v350_v26, %v236_v25 }
 0x1a5   :  { %v243_v34 = vpop.f32.mrf.mxu1 }
 0x1a6   :  { %v238_v36 = vpop.f32.mrf.mxu0  ;;  %v244_v37 = vadd.f32 %v350_v26, %v243_v34 }
 0x1a7   :  { %v239_v39 = vadd.f32 %v350_v26, %v238_v36 }
 0x1a8   :  { %v334_v40 = vpack.c.bf16 %v244_v37, %v242_v35 }
 0x1a9   :  { %v329_v41 = vpack.c.bf16 %v239_v39, %v237_v38 }
 0x1aa   :  { %338 = vst [vmem:[%s462_s5 + $0x8] sm:$0xff] %v334_v40  }
 0x1ab   :  { %330 = vst [vmem:[%s462_s5] sm:$0xff] %v329_v41  }

// kernel: solospeech_tse_forward.30
= control target key start
LH: loop header
LB: loop body
LE: loop exit
PB: predicated region body
PF: predicated region fallthrough
CT: control target
= control target key end

     0   :  { %v575_v6 = vmov 128.0   ;;  %s829_s0 = inlined_call_operand.vmem [shape: bf16[32,128], index: 0, kind: input, shape index: {}]   ;;  %s830_s1 = inlined_call_operand.vmem [shape: f32[1,128], index: 1, kind: input, shape index: {}]   ;;  %s831_s2 = inlined_call_operand.vmem [shape: f32[1,128], index: 2, kind: input, shape index: {}]   ;;  %s832_s3 = inlined_call_operand.vmem [shape: bf16[128,384], index: 3, kind: input, shape index: {}]   ;;  %s833_s4 = inlined_call_operand.vmem [shape: f32[1,384], index: 4, kind: input, shape index: {}]   ;;  %s834_s5 = inlined_call_operand.vmem [shape: bf16[32,384], index: 5, kind: output, shape index: {}]  }
   0x1   :  { %v552_v0 = vld [vmem:[%s829_s0 + $0x8] sm:$0xff]   ;;  %v535_v1 = vld [vmem:[%s829_s0] sm:$0xff]   ;;  %565 = vrcp.f32 %v575_v6  ;;  %v532_v30 = vld [vmem:[%s832_s3 + $0xb0] sm:$0xf0] }
   0x2   :  { %v540_v2 = vunpack.c.l.bf16 %v552_v0  ;;  %v536_v3 = vunpack.c.l.bf16 %v535_v1  ;;  %v541_v4 = vunpack.c.h.bf16 %v552_v0  ;;  %v537_v5 = vunpack.c.h.bf16 %v535_v1  ;;  %v498_v29 = vld [vmem:[%s832_s3 + $0xa8] sm:$0xf]  ;;  %v531_v31 = vld [vmem:[%s832_s3 + $0xac] sm:$0xf]  ;;  %v500_v33 = vld [vmem:[%s832_s3 + $0xb4] sm:$0xf0] }
   0x3   :  { %v499_v32 = vor.u32 %v532_v30, %v498_v29  ;;  %v506_v34 = vld [vmem:[%s832_s3 + $0xb0] sm:$0xf]  ;;  %v533_v35 = vld [vmem:[%s832_s3 + $0xb8] sm:$0xf0]  ;;  %v503_v36 = vor.u32 %v531_v31, %v500_v33  ;;  %v528_v40 = vld [vmem:[%s832_s3 + $0x94] sm:$0xf] }
   0x4   :  { %36 = vadd.xlane.f32.xlu1 %v540_v2  ;;  %32 = vadd.xlane.f32.xlu0 %v536_v3  ;;  %v507_v37 = vor.u32 %v533_v35, %v506_v34  ;;  %v486_v38 = vld [vmem:[%s832_s3 + $0x90] sm:$0xf]  ;;  %v529_v39 = vld [vmem:[%s832_s3 + $0x98] sm:$0xf0]  ;;  %v488_v42 = vld [vmem:[%s832_s3 + $0x9c] sm:$0xf0] }
   0x5   :  { %327 = vmatpush.bf16.msra.mxu0 %v499_v32  ;;  %554 = vmatpush.bf16.msra.mxu3 %v499_v32  ;;  %v487_v41 = vor.u32 %v529_v39, %v486_v38  ;;  %v494_v43 = vld [vmem:[%s832_s3 + $0x98] sm:$0xf]  ;;  %v530_v44 = vld [vmem:[%s832_s3 + $0xa0] sm:$0xf0]  ;;  %v491_v45 = vor.u32 %v528_v40, %v488_v42  ;;  %v525_v49 = vld [vmem:[%s832_s3 + $0x7c] sm:$0xf] }
   0x6   :  { %346 = vmatpush.bf16.msra.mxu1 %v503_v36  ;;  %365 = vmatpush.bf16.msra.mxu2 %v507_v37  ;;  %v495_v46 = vor.u32 %v530_v44, %v494_v43  ;;  %v474_v47 = vld [vmem:[%s832_s3 + $0x78] sm:$0xf]  ;;  %v526_v48 = vld [vmem:[%s832_s3 + $0x80] sm:$0xf0]  ;;  %v476_v51 = vld [vmem:[%s832_s3 + $0x84] sm:$0xf0] }
   0x7   :  { %v566_v7 = vpop.eup %565  ;;  %v475_v50 = vor.u32 %v526_v48, %v474_v47  ;;  %v482_v52 = vld [vmem:[%s832_s3 + $0x80] sm:$0xf]  ;;  %v527_v53 = vld [vmem:[%s832_s3 + $0x88] sm:$0xf0]  ;;  %v479_v54 = vor.u32 %v525_v49, %v476_v51  ;;  %v522_v58 = vld [vmem:[%s832_s3 + $0x64] sm:$0xf] }
   0x8   :  { %v41_v8 = vmul.f32 128.0, %v566_v7  ;;  %vm45_vm0 = vweird.f32 %v566_v7  ;;  %v483_v55 = vor.u32 %v527_v53, %v482_v52  ;;  %v462_v56 = vld [vmem:[%s832_s3 + $0x60] sm:$0xf]  ;;  %v523_v57 = vld [vmem:[%s832_s3 + $0x68] sm:$0xf0] }
   0x9   :  { %328 = vmatpush.bf16.msra.mxu0 %v487_v41  ;;  %555 = vmatpush.bf16.msra.mxu3 %v487_v41  ;;  %v463_v59 = vor.u32 %v523_v57, %v462_v56  ;;  %v464_v60 = vld [vmem:[%s832_s3 + $0x6c] sm:$0xf0]  ;;  %v470_v61 = vld [vmem:[%s832_s3 + $0x68] sm:$0xf]  ;;  %v524_v62 = vld [vmem:[%s832_s3 + $0x70] sm:$0xf0] }
   0xa   :  { %v42_v9 = vsub.f32 1.0, %v41_v8  ;;  %347 = vmatpush.bf16.msra.mxu1 %v491_v45  ;;  %366 = vmatpush.bf16.msra.mxu2 %v495_v46  ;;  %v467_v63 = vor.u32 %v522_v58, %v464_v60  ;;  %v471_v0 = vor.u32 %v524_v62, %v470_v61  ;;  %v450_v1 = vld [vmem:[%s832_s3 + $0x48] sm:$0xf]  ;;  %v458_v8 = vld [vmem:[%s832_s3 + $0x50] sm:$0xf] }
   0xb   :  { %v426_v30 = vld [vmem:[%s832_s3 + $0x18] sm:$0xf]  ;;  %v514_v31 = vld [vmem:[%s832_s3 + $0x20] sm:$0xf0]  ;;  %v513_v32 = vld [vmem:[%s832_s3 + $0x1c] sm:$0xf] }
   0xc   :  { %38 = vadd.xlane.f32.xlu1 %v541_v4  ;;  %34 = vadd.xlane.f32.xlu0 %v537_v5  ;;  %v43_v10 = vmul.f32 %v566_v7, %v42_v9  ;;  %v521_v9 = vld [vmem:[%s832_s3 + $0x58] sm:$0xf0]  ;;  %v427_v35 = vor.u32 %v514_v31, %v426_v30  ;;  %v428_v36 = vld [vmem:[%s832_s3 + $0x24] sm:$0xf0]  ;;  %v434_v37 = vld [vmem:[%s832_s3 + $0x20] sm:$0xf] }
   0xd   :  { %329 = vmatpush.bf16.msra.mxu0 %v475_v50  ;;  %556 = vmatpush.bf16.msra.mxu3 %v475_v50  ;;  %v515_v38 = vld [vmem:[%s832_s3 + $0x28] sm:$0xf0]  ;;  %v431_v41 = vor.u32 %v513_v32, %v428_v36  ;;  %v414_v43 = vld [vmem:[%s832_s3] sm:$0xf]  ;;  %v510_v45 = vld [vmem:[%s832_s3 + $0x4] sm:$0xf] }
   0xe   :  { %v44_v11 = vadd.f32 %v566_v7, %v43_v10  ;;  %348 = vmatpush.bf16.msra.mxu1 %v479_v54  ;;  %367 = vmatpush.bf16.msra.mxu2 %v483_v55  ;;  %v435_v42 = vor.u32 %v515_v38, %v434_v37  ;;  %v511_v44 = vld [vmem:[%s832_s3 + $0x8] sm:$0xf0]  ;;  %v416_v46 = vld [vmem:[%s832_s3 + $0xc] sm:$0xf0]  ;;  %v512_v47 = vld [vmem:[%s832_s3 + $0x10] sm:$0xf0] }
   0xf   :  { %v415_v51 = vor.u32 %v511_v44, %v414_v43  ;;  %v419_v54 = vor.u32 %v510_v45, %v416_v46 }
  0x10   :  { %v612_v12 = vsel %vm45_vm0, %v566_v7, %v44_v11  ;;  %v452_v7 = vld [vmem:[%s832_s3 + $0x54] sm:$0xf0] }
  0x11   :  { %330 = vmatpush.bf16.msra.mxu0 %v463_v59  ;;  %557 = vmatpush.bf16.msra.mxu3 %v463_v59 }
  0x12   :  { %349 = vmatpush.bf16.msra.mxu1 %v467_v63  ;;  %368 = vmatpush.bf16.msra.mxu2 %v471_v0 }
  0x77   :  { %v37_v13 = vpop.xlane.xlu1 %36  ;;  %v33_v14 = vpop.xlane.xlu0 %32 }
  0x78   :  { %v49_v15 = vmul.f32 %v612_v12, %v37_v13  ;;  %v47_v16 = vmul.f32 %v612_v12, %v33_v14  ;;  %v459_v14 = vor.u32 %v521_v9, %v458_v8 }
  0x7a   :  { %v616_v17 = vsub.f32 %v540_v2, %v49_v15  ;;  %v618_v18 = vsub.f32 %v536_v3, %v47_v16  ;;  %v520_v2 = vld [vmem:[%s832_s3 + $0x50] sm:$0xf0]  ;;  %v519_v3 = vld [vmem:[%s832_s3 + $0x4c] sm:$0xf]  ;;  %369 = vmatpush.bf16.msra.mxu2 %v459_v14 }
  0x7b   :  { %v451_v6 = vor.u32 %v520_v2, %v450_v1  ;;  %v455_v13 = vor.u32 %v519_v3, %v452_v7 }
  0x7c   :  { %v57_v19 = vmul.f32 %v616_v17, %v616_v17  ;;  %v55_v20 = vmul.f32 %v618_v18, %v618_v18 }
  0x7d   :  { %331 = vmatpush.bf16.msra.mxu0 %v451_v6  ;;  %558 = vmatpush.bf16.msra.mxu3 %v451_v6 }
  0x7e   :  { %63 = vadd.xlane.f32.xlu0 %v57_v19  ;;  %59 = vadd.xlane.f32.xlu2 %v55_v20  ;;  %v438_v19 = vld [vmem:[%s832_s3 + $0x30] sm:$0xf]  ;;  %v517_v20 = vld [vmem:[%s832_s3 + $0x38] sm:$0xf0] }
  0x7f   :  { %v39_v21 = vpop.xlane.xlu1 %38  ;;  %v35_v22 = vpop.xlane.xlu0 %34  ;;  %350 = vmatpush.bf16.msra.mxu1 %v455_v13  ;;  %v563_v13 = vld [vmem:[%s830_s1] ss:$0 sm:$0xff] }
  0x80   :  { %v50_v23 = vmul.f32 %v612_v12, %v39_v21  ;;  %v48_v24 = vmul.f32 %v612_v12, %v35_v22  ;;  %v516_v21 = vld [vmem:[%s832_s3 + $0x34] sm:$0xf]  ;;  %v440_v22 = vld [vmem:[%s832_s3 + $0x3c] sm:$0xf0] }
  0x82   :  { %v626_v25 = vsub.f32 %v541_v4, %v50_v23  ;;  %v628_v26 = vsub.f32 %v537_v5, %v48_v24  ;;  %v439_v23 = vor.u32 %v517_v20, %v438_v19  ;;  %v446_v24 = vld [vmem:[%s832_s3 + $0x38] sm:$0xf] }
  0x84   :  { %v58_v27 = vmul.f32 %v626_v25, %v626_v25  ;;  %v56_v28 = vmul.f32 %v628_v26, %v628_v26  ;;  %332 = vmatpush.bf16.msra.mxu0 %v439_v23  ;;  %559 = vmatpush.bf16.msra.mxu3 %v439_v23 }
  0x86   :  { %65 = vadd.xlane.f32.xlu1 %v58_v27  ;;  %61 = vadd.xlane.f32.xlu2 %v56_v28  ;;  %v518_v27 = vld [vmem:[%s832_s3 + $0x40] sm:$0xf0]  ;;  %v443_v28 = vor.u32 %v516_v21, %v440_v22  ;;  %v564_v22 = vld [vmem:[%s831_s2] ss:$0 sm:$0xff] }
  0x87   :  { %v447_v29 = vor.u32 %v518_v27, %v446_v24 }
  0x88   :  { %351 = vmatpush.bf16.msra.mxu1 %v443_v28  ;;  %333 = vmatpush.bf16.msra.mxu0 %v427_v35 }
  0x89   :  { %370 = vmatpush.bf16.msra.mxu2 %v447_v29  ;;  %560 = vmatpush.bf16.msra.mxu3 %v427_v35 }
  0x8c   :  { %352 = vmatpush.bf16.msra.mxu1 %v431_v41  ;;  %334 = vmatpush.bf16.msra.mxu0 %v415_v51 }
  0x8d   :  { %371 = vmatpush.bf16.msra.mxu2 %v435_v42  ;;  %561 = vmatpush.bf16.msra.mxu3 %v415_v51 }
  0x90   :  { %353 = vmatpush.bf16.msra.mxu1 %v419_v54 }
  0xf1   :  { %v60_v4 = vpop.xlane.xlu2 %59  ;;  %v64_v5 = vpop.xlane.xlu0 %63 }
  0xf2   :  { %v67_v10 = vmul.f32 %v60_v4, %v612_v12  ;;  %v69_v11 = vmul.f32 %v64_v5, %v612_v12 }
  0xf4   :  { %v726_v15 = vadd.f32 1e-05, %v67_v10  ;;  %v728_v16 = vadd.f32 1e-05, %v69_v11 }
  0xf6   :  { %567 = vrsqrt.f32 %v726_v15  ;;  %vm101_vm1 = vweird.f32 %v728_v16  ;;  %vm81_vm5 = vweird.f32 %v726_v15 }
  0xf7   :  { %569 = vrsqrt.f32 %v728_v16 }
  0xf9   :  { %v66_v33 = vpop.xlane.xlu1 %65  ;;  %v62_v34 = vpop.xlane.xlu2 %61 }
  0xfa   :  { %v70_v39 = vmul.f32 %v66_v33, %v612_v12  ;;  %v68_v40 = vmul.f32 %v62_v34, %v612_v12  ;;  %v422_v12 = vld [vmem:[%s832_s3 + $0x8] sm:$0xf] }
  0xfb   :  { %v423_v55 = vor.u32 %v512_v47, %v422_v12 }
  0xfc   :  { %v568_v48 = vpop.eup %567  ;;  %v74_v49 = vadd.f32 1e-05, %v70_v39  ;;  %v72_v50 = vadd.f32 1e-05, %v68_v40 }
  0xfd   :  { %v570_v52 = vpop.eup %569  ;;  %v76_v53 = vmul.f32 %v568_v48, %v726_v15  ;;  %372 = vmatpush.bf16.msra.mxu2 %v423_v55  ;;  %vm82_vm3 = vweird.f32 %v568_v48 }
  0xfe   :  { %v96_v56 = vmul.f32 %v570_v52, %v728_v16  ;;  %571 = vrsqrt.f32 %v74_v49  ;;  %vm102_vm2 = vweird.f32 %v570_v52  ;;  %vm83_vm6 = vmor %vm81_vm5, %vm82_vm3  ;;  %vm111_vm7 = vweird.f32 %v74_v49 }
  0xff   :  { %v77_v57 = vmul.f32 %v568_v48, %v76_v53  ;;  %573 = vrsqrt.f32 %v72_v50  ;;  %vm103_vm4 = vmor %vm101_vm1, %vm102_vm2  ;;  %vm91_vm11 = vweird.f32 %v72_v50 }
 0x100   :  { %v97_v58 = vmul.f32 %v570_v52, %v96_v56 }
 0x101   :  { %v78_v59 = vmul.f32 0.5, %v77_v57 }
 0x102   :  { %v98_v60 = vmul.f32 0.5, %v97_v58 }
 0x103   :  { %v79_v61 = vsub.f32 1.5, %v78_v59 }
 0x104   :  { %v572_v62 = vpop.eup %571  ;;  %v99_v63 = vsub.f32 1.5, %v98_v60 }
 0x105   :  { %v574_v0 = vpop.eup %573  ;;  %v106_v1 = vmul.f32 %v572_v62, %v74_v49  ;;  %v80_v2 = vmul.f32 %v568_v48, %v79_v61  ;;  %vm112_vm8 = vweird.f32 %v572_v62 }
 0x106   :  { %v100_v3 = vmul.f32 %v570_v52, %v99_v63  ;;  %v86_v4 = vmul.f32 %v574_v0, %v72_v50  ;;  %vm113_vm9 = vmor %vm111_vm7, %vm112_vm8  ;;  %vm92_vm10 = vweird.f32 %v574_v0 }
 0x107   :  { %v107_v5 = vmul.f32 %v572_v62, %v106_v1  ;;  %v84_v9 = vsel %vm83_vm6, %v568_v48, %v80_v2  ;;  %vm93_vm12 = vmor %vm91_vm11, %vm92_vm10 }
 0x108   :  { %v87_v6 = vmul.f32 %v574_v0, %v86_v4  ;;  %v104_v7 = vsel %vm103_vm4, %v570_v52, %v100_v3  ;;  %v115_v15 = vmul.f32 %v84_v9, %v618_v18 }
 0x109   :  { %v108_v8 = vmul.f32 0.5, %v107_v5  ;;  %v117_v14 = vmul.f32 %v104_v7, %v616_v17 }
 0x10a   :  { %v88_v10 = vmul.f32 0.5, %v87_v6  ;;  %v123_v28 = vmul.f32 %v563_v13, %v115_v15 }
 0x10b   :  { %v109_v11 = vsub.f32 1.5, %v108_v8  ;;  %v125_v23 = vmul.f32 %v563_v13, %v117_v14 }
 0x10c   :  { %v89_v16 = vsub.f32 1.5, %v88_v10  ;;  %v131_v32 = vadd.f32 %v564_v22, %v123_v28 }
 0x10d   :  { %v110_v19 = vmul.f32 %v572_v62, %v109_v11  ;;  %v133_v31 = vadd.f32 %v564_v22, %v125_v23 }
 0x10e   :  { %v90_v20 = vmul.f32 %v574_v0, %v89_v16 }
 0x10f   :  { %v114_v21 = vsel %vm113_vm9, %v572_v62, %v110_v19 }
 0x110   :  { %v118_v24 = vmul.f32 %v114_v21, %v626_v25  ;;  %v94_v27 = vsel %vm93_vm12, %v574_v0, %v90_v20  ;;  %v179_v25 = vld [vmem:[%s833_s4] sm:$0x7] }
 0x111   :  { %v116_v17 = vmul.f32 %v94_v27, %v628_v26  ;;  %v181_v26 = vperm.slane %v179_v25, 0  ;;  %v182_v38 = vperm.slane %v179_v25, 1  ;;  %v183_v44 = vperm.slane %v179_v25, 2 }
 0x112   :  { %v126_v29 = vmul.f32 %v563_v13, %v118_v24 }
 0x113   :  { %v124_v30 = vmul.f32 %v563_v13, %v116_v17 }
 0x114   :  { %v134_v18 = vadd.f32 %v564_v22, %v126_v29 }
 0x115   :  { %v132_v33 = vadd.f32 %v564_v22, %v124_v30 }
 0x116   :  { %v550_v34 = vpack.c.bf16 %v134_v18, %v133_v31 }
 0x117   :  { %v545_v35 = vpack.c.bf16 %v132_v33, %v131_v32 }
 0x118   :  { %553 = vst [vmem:[#allocation2 + $0x8] sm:$0xff] %v550_v34  }
 0x119   :  { %546 = vst [vmem:[#allocation2] sm:$0xff] %v545_v35  }
 0x11f   :  { %v509_v36 = vld [vmem:[#allocation2 + $0x8] sm:$0xff] }
 0x120   :  { %v508_v37 = vld [vmem:[#allocation2] sm:$0xff]  ;;  %340 = vmatmul.bf16.vlgmr.msra.gmra.mxu3 %v509_v36 }
 0x121   :  { %335 = vmatmul.bf16.vlgmr.msra.gmra.mxu0 %v508_v37  ;;  %354 = vmatmul.bf16.vlgmr.msra.gmra.mxu1 %v508_v37 }
 0x122   :  { %373 = vmatmul.bf16.vlgmr.msra.gmra.mxu2 %v508_v37 }
 0x131   :  { %359 = vmatmul.bf16.gmra.mxu1 %v509_v36 }
 0x132   :  { %378 = vmatmul.bf16.gmra.mxu2 %v509_v36 }
 0x19e   :  { %v336_v39 = vpop.f32.mrf.mxu0  ;;  %v355_v40 = vpop.f32.mrf.mxu1 }
 0x19f   :  { %v337_v41 = vadd.f32 %v336_v39, %v181_v26  ;;  %v356_v42 = vadd.f32 %v355_v40, %v182_v38 }
 0x1a1   :  { %v384_v43 = vpack.c.bf16 %v356_v42, %v337_v41 }
 0x1a3   :  { %392 = vst [vmem:[%s834_s5] sm:$0xff] %v384_v43  ;;  %v341_v52 = vpop.f32.mrf.mxu3 }
 0x1a4   :  { %v342_v56 = vadd.f32 %v341_v52, %v181_v26 }
 0x1a5   :  { %v374_v45 = vpop.f32.mrf.mxu2 }
 0x1a6   :  { %v375_v46 = vadd.f32 %v374_v45, %v183_v44  ;;  %v338_v12 = vpop.f32.mrf.mxu0  ;;  %v357_v47 = vpop.f32.mrf.mxu1 }
 0x1a7   :  { %v339_v48 = vadd.f32 %v338_v12, %v181_v26  ;;  %v358_v49 = vadd.f32 %v357_v47, %v182_v38 }
 0x1a8   :  { %v385_v50 = vpack.c.bf16 %v375_v46, %v375_v46 }
 0x1a9   :  { %v386_v51 = vpack.c.bf16 %v358_v49, %v339_v48 }
 0x1aa   :  { %393 = vst [vmem:[%s834_s5 + $0x8] sm:$0xf] %v385_v50 }
 0x1ab   :  { %394 = vst [vmem:[%s834_s5 + $0xc] sm:$0xff] %v386_v51  ;;  %v343_v60 = vpop.f32.mrf.mxu3 }
 0x1ac   :  { %v344_v0 = vadd.f32 %v343_v60, %v181_v26 }
 0x1ad   :  { %v376_v53 = vpop.f32.mrf.mxu2 }
 0x1ae   :  { %v377_v54 = vadd.f32 %v376_v53, %v183_v44  ;;  %v360_v55 = vpop.f32.mrf.mxu1 }
 0x1af   :  { %v361_v57 = vadd.f32 %v360_v55, %v182_v38 }
 0x1b0   :  { %v387_v58 = vpack.c.bf16 %v377_v54, %v377_v54 }
 0x1b1   :  { %v388_v59 = vpack.c.bf16 %v361_v57, %v342_v56 }
 0x1b2   :  { %395 = vst [vmem:[%s834_s5 + $0x14] sm:$0xf] %v387_v58 }
 0x1b3   :  { %396 = vst [vmem:[%s834_s5 + $0x18] sm:$0xff] %v388_v59 }
 0x1b5   :  { %v379_v61 = vpop.f32.mrf.mxu2 }
 0x1b6   :  { %v380_v62 = vadd.f32 %v379_v61, %v183_v44  ;;  %v362_v63 = vpop.f32.mrf.mxu1 }
 0x1b7   :  { %v363_v1 = vadd.f32 %v362_v63, %v182_v38 }
 0x1b8   :  { %v389_v2 = vpack.c.bf16 %v380_v62, %v380_v62 }
 0x1b9   :  { %v390_v3 = vpack.c.bf16 %v363_v1, %v344_v0 }
 0x1ba   :  { %397 = vst [vmem:[%s834_s5 + $0x20] sm:$0xf] %v389_v2 }
 0x1bb   :  { %398 = vst [vmem:[%s834_s5 + $0x24] sm:$0xff] %v390_v3 }
 0x1bd   :  { %v381_v4 = vpop.f32.mrf.mxu2 }
 0x1be   :  { %v382_v5 = vadd.f32 %v381_v4, %v183_v44 }
 0x1c0   :  { %v391_v6 = vpack.c.bf16 %v382_v5, %v382_v5 }
 0x1c2   :  { %399 = vst [vmem:[%s834_s5 + $0x2c] sm:$0xf] %v391_v6 }

// kernel: solospeech_tse_forward.31
= control target key start
LH: loop header
LB: loop body
LE: loop exit
PB: predicated region body
PF: predicated region fallthrough
CT: control target
= control target key end

     0   :  { %s1176_s15 = smov 0   ;;  %s1178_s16 = smov 0   ;;  %s1338_s0 = inlined_call_operand.vmem [shape: bf16[2,16,384], index: 0, kind: input, shape index: {}, may-alias: {0,1,2}]   ;;  %s1339_s1 = inlined_call_operand.vmem [shape: bf16[2,16,384], index: 1, kind: input, shape index: {}, may-alias: {0,1,2}]   ;;  %s1340_s2 = inlined_call_operand.vmem [shape: bf16[2,16,384], index: 2, kind: input, shape index: {}, may-alias: {0,1,2}]   ;;  %s1341_s3 = inlined_call_operand.vmem [shape: f32[2,1,16], index: 3, kind: input, shape index: {}]   ;;  %s1342_s4 = inlined_call_operand.vmem [shape: bf16[2,16,128], index: 4, kind: output, shape index: {}]  }
   0x1   :  { %s1180_s17 = smov 0   ;;  %s1182_s18 = smov 0  }
   0x2   :  { %s1184_s19 = smov 0  }
   0x3 LB: > { %s33_s20 = sadd.s32 1, %s1141_s18  ;;  %p49_p1 = scmp.ne.s32.totalorder %s1133_s16, %s1129_s15  ;;  %s1145_s19 = sphi %s1184_s19, %s14_s19   ;;  %s1141_s18 = sphi %s1182_s18, %s1347_s18   ;;  %s1137_s17 = sphi %s1180_s17, %s1346_s17   ;;  %s1133_s16 = sphi %s1178_s16, %s1345_s16   ;;  %s1129_s15 = sphi %s1176_s15, %s1344_s15  }
   0x4   : > { %p35_p0 = scmp.ge.s32.totalorder %s33_s20, 2  ;;  %p50_p2 = scmp.eq.s32.totalorder %s1145_s19, 0 }
   0x5   : > { %s42_s23 = sadd.s32 1, %s1133_s16  ;;  %p986_p5 = scmp.ge.s32.totalorder %s1145_s19, 2 }
   0x6   : > { %s1349_s20 = smov (%p35_p0, %s33_s20), 0  ;;  %p1207_p3 = por %p50_p2, %p49_p1 }
   0x7   : > { %s37_s22 = ssub.s32 %s1141_s18, %s1349_s20  ;;  %187 = sbr.rel (%p986_p5) target bundleno = 33 (0x21), region = 16 }
   0x8   : > { %p40_p4 = scmp.eq.s32.totalorder %s37_s22, 0 }
   0xa   : > { %s1215_s24 = scalar_select %p40_p4, %s1133_s16, %s42_s23  }
   0xc   : > { %190 = sbr.rel (!%p1207_p3) target bundleno = 19 (0x13), region = 20  ;;  %s192_s25 = sand.u32 (%p1207_p3), 1, %s1133_s16  }
   0xd   : > { %s1029_s26 = smul.u32 (%p1207_p3), 24, %s1141_s18  ;;  %s987_s27 = sshll.u32 (%p1207_p3), %s192_s25, 3 }
   0xe   : > { %s194_s5 = scalar_lea.vmem (%p1207_p3), [#allocation5], %s987_s27 }
   0xf   : > { %s200_s30 = scalar_lea.vmem (%p1207_p3), %s1338_s0, %s1029_s26 }
  0x10   : > { %v217_v0 = vld [vmem:[%s200_s30] sm:$0xf] (%p1207_p3)  ;;  %v219_v1 = vld [vmem:[%s200_s30 + $0xc] sm:$0xf] (%p1207_p3) }
  0x11   : > { %218 = vst [vmem:[%s194_s5] sm:$0xf] %v217_v0 }
  0x12   : > { %220 = vst [vmem:[%s194_s5 + $0x4] sm:$0xf] %v219_v1 }
  0x13 PF: > { %248 = sbr.rel (!%p1207_p3) target bundleno = 26 (0x1a), region = 61  ;;  %s250_s6 = sand.u32 (%p1207_p3), 1, %s1133_s16  }
  0x14   : > { %s990_s7 = smul.u32 (%p1207_p3), 24, %s1141_s18  ;;  %s989_s8 = sshll.u32 (%p1207_p3), %s250_s6, 3 }
  0x15   : > { %s252_s12 = scalar_lea.vmem (%p1207_p3), [#allocation6], %s989_s8 }
  0x16   : > { %s877_s11 = scalar_lea.vmem (%p1207_p3), %s1339_s1, %s990_s7 }
  0x17   : > { %v991_v2 = vld [vmem:[%s877_s11 + $0x4] sm:$0xf] (%p1207_p3)  ;;  %v992_v3 = vld [vmem:[%s877_s11 + $0x10] sm:$0xf] (%p1207_p3) }
  0x18   : > { %277 = vst [vmem:[%s252_s12] sm:$0xf] %v991_v2 }
  0x19   : > { %279 = vst [vmem:[%s252_s12 + $0x4] sm:$0xf] %v992_v3 }
  0x1a PF: > { %307 = sbr.rel (!%p1207_p3) target bundleno = 33 (0x21), region = 102  ;;  %s309_s13 = sand.u32 (%p1207_p3), 1, %s1133_s16  }
  0x1b   : > { %s994_s14 = smul.u32 (%p1207_p3), 24, %s1141_s18  ;;  %s993_s22 = sshll.u32 (%p1207_p3), %s309_s13, 3 }
  0x1c   : > { %s311_s27 = scalar_lea.vmem (%p1207_p3), [#allocation7], %s993_s22 }
  0x1d   : > { %s885_s26 = scalar_lea.vmem (%p1207_p3), %s1340_s2, %s994_s14 }
  0x1e   : > { %v995_v4 = vld [vmem:[%s885_s26 + $0x8] sm:$0xf] (%p1207_p3)  ;;  %v996_v5 = vld [vmem:[%s885_s26 + $0x14] sm:$0xf] (%p1207_p3) }
  0x1f   : > { %336 = vst [vmem:[%s311_s27] sm:$0xf] %v995_v4 }
  0x20   : > { %338 = vst [vmem:[%s311_s27 + $0x4] sm:$0xf] %v996_v5 }
  0x21 PF: > { %p997_p6 = scmp.ge.s32.totalorder %s1145_s19, 1  ;;  %p374_p7 = scmp.lt.s32.totalorder %s1145_s19, 3 }
  0x23   : > { %p375_p8 = pnand %p997_p6, %p374_p7 }
  0x24   : > { %s381_s21 = sand.u32 (!%p375_p8), 1, %s1129_s15   ;;  %p441_p9 = scmp.lt.s32.totalorder (!%p375_p8), %s1137_s17, 1 }
  0x25   : > { %378 = sbr.rel (%p375_p8) target bundleno = 891 (0x37b), region = 147  ;;  %s1242_s28 = sshll.u32 (!%p375_p8), %s381_s21, 3 }
  0x26   : > { %s390_s29 = scalar_lea.vmem (!%p375_p8), [#allocation6], %s1242_s28  ;;  %s383_s30 = scalar_lea.vmem (!%p375_p8), [#allocation5], %s1242_s28 }
  0x27   : > { %s1147_s5 = smov (!%p375_p8), 64   ;;  %s397_s8 = scalar_lea.vmem (!%p375_p8), [#allocation7], %s1242_s28 }
  0x2a   : > { %vm471_vm0 = vcmask 523264   ;;  %v1018_v6 = vld [vmem:[%s390_s29] sm:$0xff]  ;;  %v1021_v7 = vld [vmem:[%s383_s30] sm:$0xff]   ;;  %s1351_s17 = smov (!%p441_p9, %s1137_s17), 1  ;;  %vm525_vm1 = vcmask 130048   ;;  %vm462_vm2 = vcmask 7168  }
  0x2b   : > { %v1022_v8 = vunpack.c.l.bf16 %v1021_v7  ;;  %v1023_v9 = vunpack.c.h.bf16 %v1021_v7  ;;  %617 = vrot.lane.b32.xlu0 %v1018_v6, %s1147_s5  ;;  %v507_v10 = vsel %vm471_vm0, %v1018_v6, 0  ;;  %s446_s7 = scalar_lea.vmem %s1341_s3, %s1351_s17  ;;  %v1148_v25 = vmov -inf   ;;  %v1019_v41 = vld [vmem:[%s397_s8] sm:$0xff]  ;;  %s1017_s9 = sshll.u32 %s1351_s17, 3 }
  0x2c   : > { %516 = vmatpush.bf16.xpose.msra.mxu0 %v507_v10  ;;  %v1082_v21 = vld [vmem:[%s446_s7] ss:$0 sm:$0xff]  ;;  %463 = vst.msk [vmem:[#allocation2] sm:$0xff] %vm462_vm2, %v1148_v25  ;;  %v1149_v26 = vmov 0   ;;  %v1150_v40 = vmov 0.0   ;;  %602 = vmatpush.bf16.msra.mxu1 %v1019_v41  ;;  %s455_s12 = scalar_lea.vmem %s1342_s4, %s1017_s9 }
  0x2d   : > { %v480_v11 = vmul.f32 0.125, %v1022_v8  ;;  %v481_v12 = vmul.f32 0.125, %v1023_v9  ;;  %1075 = vset.pattern.permute.xlu1 %v1149_v26  ;;  %1074 = vset.pattern.permute.xlu2 %v1149_v26  ;;  %464 = vst.msk [vmem:[#allocation2 + $0x8] sm:$0xff] %vm462_vm2, %v1148_v25 }
  0x2e   : > { %1076 = vset.pattern.permute.xlu0 %v1149_v26  ;;  %465 = vst.msk [vmem:[#allocation2 + $0x10] sm:$0xff] %vm462_vm2, %v1148_v25 }
  0x2f   : > { %v482_v13 = vpack.c.bf16 %v480_v11, %v480_v11  ;;  %v483_v14 = vpack.c.bf16 %v481_v12, %v481_v12  ;;  %466 = vst.msk [vmem:[#allocation2 + $0x18] sm:$0xff] %vm462_vm2, %v1148_v25 }
  0x30   : > { %467 = vst.msk [vmem:[#allocation3] sm:$0xff] %vm462_vm2, %v1150_v40 }
  0x31   : > { %v494_v15 = vunpack.c.l.b16 %v482_v13  ;;  %v495_v16 = vunpack.c.l.b16 %v483_v14  ;;  %468 = vst.msk [vmem:[#allocation3 + $0x8] sm:$0xff] %vm462_vm2, %v1150_v40 }
  0x32   : > { %469 = vst.msk [vmem:[#allocation3 + $0x10] sm:$0xff] %vm462_vm2, %v1150_v40 }
  0x33   : > { %v496_v17 = vpack.c.b16 %v495_v16, %v494_v15  ;;  %v1268_v27 = vld [vmem:[#allocation2] sm:$0xff]  ;;  %470 = vst.msk [vmem:[#allocation3 + $0x18] sm:$0xff] %vm462_vm2, %v1150_v40 }
  0x34   : > { %472 = vst.msk [vmem:[#allocation4] sm:$0xff] %vm471_vm0, %v1150_v40  ;;  %v524_v50 = vld [vmem:[#allocation2 + $0x8] sm:$0xff] }
  0x35   : > { %615 = vrot.lane.b32.xlu0 %v496_v17, %s1147_s5  ;;  %1007 = vmatmul.msk.bf16.vlgmr.msra.gmra.mxu0 %vm471_vm0, %v496_v17  ;;  %473 = vst.msk [vmem:[#allocation4 + $0x8] sm:$0xff] %vm471_vm0, %v1150_v40  ;;  %v640_v42 = vld [vmem:[#allocation2 + $0x10] sm:$0xff] }
  0x36   : > { %474 = vst.msk [vmem:[#allocation4 + $0x10] sm:$0xff] %vm471_vm0, %v1150_v40  ;;  %v1291_v46 = vld [vmem:[#allocation2 + $0x18] sm:$0xff] }
  0x37   : > { %475 = vst.msk [vmem:[#allocation4 + $0x18] sm:$0xff] %vm471_vm0, %v1150_v40 }
  0x3d   : > { %v688_v40 = vld [vmem:[#allocation4 + $0x10] sm:$0xff] }
  0x9d   : > { %v618_v18 = vpop.permute.xlu0 %617 }
  0x9e   : > { %v623_v19 = vsel %vm471_vm0, %v618_v18, 0 }
  0x9f   : > { %632 = vmatpush.bf16.xpose.msra.mxu2 %v623_v19  ;;  %v556_v19 = vld [vmem:[#allocation3] sm:$0xff] }
  0xa7   : > { %v616_v20 = vpop.permute.xlu0 %615 }
  0xa8   : > { %1013 = vmatmul.msk.bf16.vlgmr.msra.gmra.mxu2 %vm471_vm0, %v616_v20 }
  0xb2   : > { %v518_v22 = vpop.f32.mrf.mxu0 }
  0xb3   : > { %v1260_v23 = vadd.f32 %v1082_v21, %v518_v22 }
  0xb5   : > { %v526_v24 = vsel %vm525_vm1, %v1260_v23, -inf }
  0xb6   : > { %527 = vmax.xlane.f32.xlu0 %v526_v24  ;;  %v673_v24 = vld [vmem:[#allocation3 + $0x10] sm:$0xff] }
  0xba   : > { %v520_v36 = vpop.f32.mrf.mxu0 }
  0xbb   : > { %v521_v38 = vadd.f32 %v1082_v21, %v520_v36 }
  0xbd   : > { %v529_v39 = vsel %vm525_vm1, %v521_v38, -inf }
 0x129   : > { %v528_v28 = vpop.xlane.xlu0 %527 }
 0x12a   : > { %v1271_v29 = vmax.f32 %v1268_v27, %v528_v28 }
 0x12b   : > { %v634_v30 = vpop.f32.mrf.mxu2 }
 0x12c   : > { %v635_v31 = vadd.f32 %v1082_v21, %v634_v30  ;;  %v534_v32 = vsub.f32 %v1268_v27, %v1271_v29  ;;  %613 = vst.msk [vmem:[#allocation2] sm:$0xff] %vm462_vm2, %v1271_v29 }
 0x12e   : > { %v642_v33 = vsel %vm525_vm1, %v635_v31, -inf  ;;  %v536_v17 = vmul.f32 1.442695, %v534_v32 }
 0x12f   : > { %643 = vmax.xlane.f32.xlu1 %v642_v33 }
 0x133   : > { %v636_v34 = vpop.f32.mrf.mxu2 }
 0x134   : > { %v637_v35 = vadd.f32 %v1082_v21, %v636_v34 }
 0x136   : > { %v645_v37 = vsel %vm525_vm1, %v637_v35, -inf }
 0x137   : > { %646 = vmax.xlane.f32.xlu1 %v645_v37 }
 0x13f   : > { %530 = vmax.xlane.f32.xlu1 %v529_v39 }
 0x158   : > { %542 = vperm.xlu1 %1075, %v1271_v29  }
 0x1a2   : > { %v644_v43 = vpop.xlane.xlu1 %643 }
 0x1a3   : > { %v648_v44 = vmax.f32 %v640_v42, %v644_v43 }
 0x1a5   : > { %v650_v45 = vsub.f32 %v640_v42, %v648_v44  ;;  %727 = vst.msk [vmem:[#allocation2 + $0x10] sm:$0xff] %vm462_vm2, %v648_v44  ;;  %658 = vperm.xlu2 %1074, %v648_v44  }
 0x1a7   : > { %v652_v11 = vmul.f32 1.442695, %v650_v45 }
 0x1aa   : > { %v647_v47 = vpop.xlane.xlu1 %646 }
 0x1ab   : > { %v649_v48 = vmax.f32 %v1291_v46, %v647_v47  ;;  %v572_v47 = vld [vmem:[#allocation4 + $0x8] sm:$0xff] }
 0x1ad   : > { %v651_v49 = vsub.f32 %v1291_v46, %v649_v48  ;;  %728 = vst.msk [vmem:[#allocation2 + $0x18] sm:$0xff] %vm462_vm2, %v649_v48  ;;  %663 = vperm.xlu2 %1074, %v649_v48  }
 0x1b2   : > { %v531_v51 = vpop.xlane.xlu1 %530 }
 0x1b3   : > { %v533_v52 = vmax.f32 %v524_v50, %v531_v51 }
 0x1b5   : > { %703 = vrot.lane.b32.xlu2 %v1019_v41, %s1147_s5  ;;  %v535_v53 = vsub.f32 %v524_v50, %v533_v52  ;;  %614 = vst.msk [vmem:[#allocation2 + $0x8] sm:$0xff] %vm462_vm2, %v533_v52 }
 0x1b7   : > { %v538_v14 = vmul.f32 1.442695, %v535_v53  ;;  %v689_v53 = vld [vmem:[#allocation4 + $0x18] sm:$0xff] }
 0x1bd   : > { %547 = vperm.xlu2 %1074, %v533_v52  }
 0x1ca   : > { %v543_v54 = vpop.permute.xlu1 %542 }
 0x1cb   : > { %v550_v55 = vsub.f32 %v1260_v23, %v543_v54  ;;  %v654_v23 = vmul.f32 1.442695, %v651_v49 }
 0x1cd   : > { %v552_v56 = vmul.f32 1.442695, %v550_v55 }
 0x1cf   : > { %1083 = vpow2.f32 %v552_v56 }
 0x1d5   : > { %v1084_v57 = vpop.eup %1083 }
 0x1d6   : > { %v560_v58 = vsel %vm525_vm1, %v1084_v57, 0.0 }
 0x1d7   : > { %561 = vadd.xlane.f32.xlu0 %v560_v58 }
 0x1ff   : > { %v659_v59 = vpop.permute.xlu2 %658 }
 0x200   : > { %v666_v60 = vsub.f32 %v635_v31, %v659_v59  ;;  %v674_v31 = vld [vmem:[#allocation3 + $0x18] sm:$0xff] }
 0x202   : > { %v668_v61 = vmul.f32 1.442695, %v666_v60 }
 0x204   : > { %1085 = vpow2.f32 %v668_v61 }
 0x207   : > { %v664_v62 = vpop.permute.xlu2 %663 }
 0x208   : > { %v667_v63 = vsub.f32 %v637_v35, %v664_v62  ;;  %v557_v35 = vld [vmem:[#allocation3 + $0x8] sm:$0xff] }
 0x20a   : > { %v1086_v0 = vpop.eup %1085  ;;  %v670_v1 = vmul.f32 1.442695, %v667_v63  ;;  %v571_v63 = vld [vmem:[#allocation4] sm:$0xff] }
 0x20b   : > { %v677_v2 = vsel %vm525_vm1, %v1086_v0, 0.0 }
 0x20c   : > { %1087 = vpow2.f32 %v670_v1  ;;  %678 = vadd.xlane.f32.xlu2 %v677_v2 }
 0x20f   : > { %v704_v3 = vpop.permute.xlu2 %703 }
 0x210   : > { %716 = vmatpush.bf16.msra.mxu3 %v704_v3 }
 0x212   : > { %v1088_v4 = vpop.eup %1087 }
 0x213   : > { %v680_v5 = vsel %vm525_vm1, %v1088_v4, 0.0  ;;  %v702_v6 = vpack.c.bf16 %v1088_v4, %v1086_v0 }
 0x214   : > { %681 = vadd.xlane.f32.xlu1 %v680_v5 }
 0x215   : > { %1014 = vmatmul.msk.bf16.vlgmr.msra.gmra.mxu3 %vm525_vm1, %v702_v6 }
 0x217   : > { %v548_v7 = vpop.permute.xlu2 %547 }
 0x218   : > { %v551_v8 = vsub.f32 %v521_v38, %v548_v7 }
 0x21a   : > { %v554_v9 = vmul.f32 1.442695, %v551_v8 }
 0x21c   : > { %1089 = vpow2.f32 %v554_v9 }
 0x21d   : > { %1091 = vpow2.f32 %v652_v11 }
 0x21e   : > { %1093 = vpow2.f32 %v538_v14 }
 0x21f   : > { %1095 = vpow2.f32 %v536_v17 }
 0x220   : > { %1097 = vpow2.f32 %v654_v23 }
 0x222   : > { %v1090_v10 = vpop.eup %1089 }
 0x223   : > { %v563_v12 = vsel %vm525_vm1, %v1090_v10, 0.0  ;;  %v585_v13 = vpack.c.bf16 %v1090_v10, %v1084_v57  ;;  %v1092_v15 = vpop.eup %1091 }
 0x224   : > { %564 = vadd.xlane.f32.xlu0 %v563_v12  ;;  %v1094_v16 = vpop.eup %1093  ;;  %v675_v25 = vmul.f32 %v1092_v15, %v673_v24 }
 0x225   : > { %1012 = vmatmul.msk.bf16.vlgmr.msra.gmra.mxu1 %vm525_vm1, %v585_v13  ;;  %v1096_v18 = vpop.eup %1095  ;;  %v559_v36 = vmul.f32 %v1094_v16, %v557_v35 }
 0x226   : > { %v558_v20 = vmul.f32 %v1096_v18, %v556_v19  ;;  %v1098_v30 = vpop.eup %1097 }
 0x227   : > { %v676_v27 = vmul.f32 %v1098_v30, %v674_v31 }
 0x22d   : > { %692 = vperm.xlu1 %1075, %v1092_v15  }
 0x235   : > { %580 = vperm.xlu1 %1075, %v1094_v16  }
 0x24a   : > { %v562_v21 = vpop.xlane.xlu0 %561 }
 0x24b   : > { %v566_v22 = vadd.f32 %v562_v21, %v558_v20 }
 0x24d   : > { %569 = vst.msk [vmem:[#allocation3] sm:$0xff] %vm462_vm2, %v566_v22 }
 0x254   : > { %v734_v39 = vld [vmem:[#allocation3] sm:$0xff] }
 0x27f   : > { %v679_v26 = vpop.xlane.xlu2 %678 }
 0x280   : > { %v683_v28 = vadd.f32 %v679_v26, %v675_v25 }
 0x282   : > { %685 = vst.msk [vmem:[#allocation3 + $0x10] sm:$0xff] %vm462_vm2, %v683_v28 }
 0x287   : > { %v682_v29 = vpop.xlane.xlu1 %681 }
 0x288   : > { %v684_v32 = vadd.f32 %v682_v29, %v676_v27 }
 0x289   : > { %v778_v33 = vld [vmem:[#allocation3 + $0x10] sm:$0xff] }
 0x28a   : > { %686 = vst.msk [vmem:[#allocation3 + $0x18] sm:$0xff] %vm462_vm2, %v684_v32  ;;  %782 = vperm.xlu2 %1074, %v778_v33  }
 0x291   : > { %v779_v34 = vld [vmem:[#allocation3 + $0x18] sm:$0xff] }
 0x292   : > { %697 = vperm.xlu2 %1074, %v1098_v30   ;;  %787 = vperm.xlu0 %1076, %v779_v34  }
 0x297   : > { %v565_v37 = vpop.xlane.xlu0 %564 }
 0x298   : > { %v567_v38 = vadd.f32 %v565_v37, %v559_v36  ;;  %v718_v43 = vpop.f32.mrf.mxu3 }
 0x29a   : > { %570 = vst.msk [vmem:[#allocation3 + $0x8] sm:$0xff] %vm462_vm2, %v567_v38  ;;  %575 = vperm.xlu0 %1076, %v1096_v18   ;;  %738 = vperm.xlu2 %1074, %v734_v39  }
 0x29f   : > { %v693_v41 = vpop.permute.xlu1 %692 }
 0x2a0   : > { %v700_v42 = vmul.f32 %v693_v41, %v688_v40  ;;  %v720_v56 = vpop.f32.mrf.mxu3 }
 0x2a1   : > { %v735_v44 = vld [vmem:[#allocation3 + $0x8] sm:$0xff] }
 0x2a2   : > { %v723_v45 = vadd.f32 %v718_v43, %v700_v42  ;;  %v604_v46 = vpop.f32.mrf.mxu1  ;;  %743 = vperm.xlu2 %1074, %v735_v44  }
 0x2a4   : > { %725 = vst.msk [vmem:[#allocation4 + $0x10] sm:$0xff] %vm471_vm0, %v723_v45 }
 0x2a7   : > { %v581_v48 = vpop.permute.xlu1 %580 }
 0x2a8   : > { %v584_v49 = vmul.f32 %v581_v48, %v572_v47 }
 0x2aa   : > { %v606_v50 = vpop.f32.mrf.mxu1 }
 0x2ab   : > { %v610_v51 = vadd.f32 %v606_v50, %v584_v49  ;;  %v776_v18 = vld [vmem:[#allocation4 + $0x10] sm:$0xff] }
 0x2ad   : > { %612 = vst.msk [vmem:[#allocation4 + $0x8] sm:$0xff] %vm471_vm0, %v610_v51 }
 0x2e4   : > { %v783_v52 = vpop.permute.xlu2 %782 }
 0x2e5   : > { %1099 = vrcp.f32 %v783_v52  ;;  %v801_v4 = vand.u32 2147483648, %v783_v52  ;;  %vm795_vm4 = vweird.f32 %v783_v52  ;;  %v799_v6 = vand.u32 2147483647, %v783_v52 }
 0x2e7   : > { %v802_v13 = vor.u32 1.1754944e-38, %v801_v4  ;;  %vm800_vm7 = vcmp.eq.f32.partialorder %v799_v6, 8.507059e+37 }
 0x2eb   : > { %v1100_v58 = vpop.eup %1099 }
 0x2ec   : > { %v698_v54 = vpop.permute.xlu2 %697  ;;  %v791_v59 = vmul.f32 %v1100_v58, %v783_v52  ;;  %vm796_vm3 = vweird.f32 %v1100_v58 }
 0x2ed   : > { %v701_v55 = vmul.f32 %v698_v54, %v689_v53  ;;  %vm797_vm5 = vmor %vm795_vm4, %vm796_vm3 }
 0x2ee   : > { %v792_v60 = vsub.f32 1.0, %v791_v59 }
 0x2ef   : > { %v724_v57 = vadd.f32 %v720_v56, %v701_v55 }
 0x2f0   : > { %v793_v62 = vmul.f32 %v1100_v58, %v792_v60 }
 0x2f1   : > { %726 = vst.msk [vmem:[#allocation4 + $0x18] sm:$0xff] %vm471_vm0, %v724_v57 }
 0x2f2   : > { %v794_v1 = vadd.f32 %v1100_v58, %v793_v62 }
 0x2f4   : > { %v798_v12 = vsel %vm797_vm5, %v1100_v58, %v794_v1  ;;  %v739_v24 = vpop.permute.xlu2 %738 }
 0x2f5   : > { %v803_v16 = vsel %vm800_vm7, %v802_v13, %v798_v12  ;;  %v757_v38 = vand.u32 2147483648, %v739_v24  ;;  %vm751_vm15 = vweird.f32 %v739_v24  ;;  %v755_v39 = vand.u32 2147483647, %v739_v24 }
 0x2f6   : > { %v804_v21 = vmul.f32 %v803_v16, %v776_v18 }
 0x2f7   : > { %v758_v43 = vor.u32 1.1754944e-38, %v757_v38  ;;  %vm756_vm3 = vcmp.eq.f32.partialorder %v755_v39, 8.507059e+37 }
 0x2f8   : > { %v777_v19 = vld [vmem:[#allocation4 + $0x18] sm:$0xff] }
 0x2fc   : > { %v744_v25 = vpop.permute.xlu2 %743 }
 0x2fd   : > { %v772_v35 = vand.u32 2147483648, %v744_v25  ;;  %vm766_vm13 = vweird.f32 %v744_v25  ;;  %v770_v37 = vand.u32 2147483647, %v744_v25 }
 0x2ff   : > { %v773_v41 = vor.u32 1.1754944e-38, %v772_v35  ;;  %vm771_vm2 = vcmp.eq.f32.partialorder %v770_v37, 8.507059e+37 }
 0x304   : > { %v788_v61 = vpop.permute.xlu0 %787 }
 0x305   : > { %1101 = vrcp.f32 %v788_v61  ;;  %v816_v8 = vand.u32 2147483648, %v788_v61  ;;  %v814_v11 = vand.u32 2147483647, %v788_v61  ;;  %vm810_vm8 = vweird.f32 %v788_v61 }
 0x306   : > { %1103 = vrcp.f32 %v744_v25 }
 0x307   : > { %v817_v15 = vor.u32 1.1754944e-38, %v816_v8  ;;  %vm815_vm10 = vcmp.eq.f32.partialorder %v814_v11, 8.507059e+37  ;;  %1105 = vrcp.f32 %v739_v24 }
 0x30b   : > { %v1102_v0 = vpop.eup %1101 }
 0x30c   : > { %v806_v2 = vmul.f32 %v1102_v0, %v788_v61  ;;  %v576_v3 = vpop.permute.xlu0 %575  ;;  %vm811_vm6 = vweird.f32 %v1102_v0  ;;  %v1104_v26 = vpop.eup %1103 }
 0x30d   : > { %v583_v5 = vmul.f32 %v576_v3, %v571_v63  ;;  %vm812_vm9 = vmor %vm810_vm8, %vm811_vm6  ;;  %v1106_v28 = vpop.eup %1105  ;;  %v762_v30 = vmul.f32 %v1104_v26, %v744_v25  ;;  %vm767_vm11 = vweird.f32 %v1104_v26 }
 0x30e   : > { %v807_v7 = vsub.f32 1.0, %v806_v2  ;;  %v747_v31 = vmul.f32 %v1106_v28, %v739_v24  ;;  %vm752_vm12 = vweird.f32 %v1106_v28  ;;  %vm768_vm14 = vmor %vm766_vm13, %vm767_vm11 }
 0x30f   : > { %v609_v9 = vadd.f32 %v604_v46, %v583_v5  ;;  %v763_v27 = vsub.f32 1.0, %v762_v30  ;;  %vm753_vm1 = vmor %vm751_vm15, %vm752_vm12  ;;  %v733_v46 = vld [vmem:[#allocation4 + $0x8] sm:$0xff] }
 0x310   : > { %v808_v10 = vmul.f32 %v1102_v0, %v807_v7  ;;  %v748_v29 = vsub.f32 1.0, %v747_v31 }
 0x311   : > { %611 = vst.msk [vmem:[#allocation4] sm:$0xff] %vm471_vm0, %v609_v9  ;;  %v764_v32 = vmul.f32 %v1104_v26, %v763_v27 }
 0x312   : > { %v809_v14 = vadd.f32 %v1102_v0, %v808_v10  ;;  %v749_v33 = vmul.f32 %v1106_v28, %v748_v29 }
 0x313   : > { %v765_v34 = vadd.f32 %v1104_v26, %v764_v32 }
 0x314   : > { %v813_v17 = vsel %vm812_vm9, %v1102_v0, %v809_v14  ;;  %v750_v36 = vadd.f32 %v1106_v28, %v749_v33 }
 0x315   : > { %v818_v20 = vsel %vm815_vm10, %v817_v15, %v813_v17  ;;  %v769_v40 = vsel %vm768_vm14, %v1104_v26, %v765_v34 }
 0x316   : > { %v819_v22 = vmul.f32 %v818_v20, %v777_v19  ;;  %v754_v42 = vsel %vm753_vm1, %v1106_v28, %v750_v36  ;;  %v774_v45 = vsel %vm771_vm2, %v773_v41, %v769_v40 }
 0x317   : > { %v759_v47 = vsel %vm756_vm3, %v758_v43, %v754_v42  ;;  %v775_v50 = vmul.f32 %v774_v45, %v733_v46 }
 0x318   : > { %v1077_v23 = vpack.i.bf16 %v819_v22, %v804_v21  ;;  %v732_v44 = vld [vmem:[#allocation4] sm:$0xff] }
 0x319   : > { %v760_v49 = vmul.f32 %v759_v47, %v732_v44 }
 0x31a   : > { %1078 = vrot.lane.b32.xlu2 %v1077_v23, %s1147_s5 }
 0x374   : > { %v1079_v48 = vpop.permute.xlu2 %1078 }
 0x375   : > { %v1081_v51 = vunpack.i.h.bf16 %v1079_v48  ;;  %v1080_v52 = vunpack.i.l.bf16 %v1079_v48 }
 0x377   : > { %v829_v53 = vsel %vm471_vm0, %v775_v50, %v1081_v51  ;;  %v828_v54 = vsel %vm471_vm0, %v760_v49, %v1080_v52 }
 0x378   : > { %v1027_v55 = vpack.c.bf16 %v829_v53, %v828_v54 }
 0x37a   : > { %1028 = vst [vmem:[%s455_s12] sm:$0xff] %v1027_v55  }
 0x37b PF: > { %s14_s19 = sadd.s32 1, %s1145_s19   ;;  %s1344_s15 = smov %s1133_s16 }
 0x37c   : > { %p11_p10 = scmp.ge.s32.totalorder %s14_s19, 4   ;;  %s1345_s16 = smov %s1215_s24 }
 0x37d   : > { %s1346_s17 = smov %s1141_s18  ;;  %s1347_s18 = smov %s1349_s20 }
 0x37e   :  { %13 = sbr.rel (!%p11_p10) target bundleno = 3 (0x3), region = 224 }

// kernel: solospeech_tse_forward.20
= control target key start
LH: loop header
LB: loop body
LE: loop exit
PB: predicated region body
PF: predicated region fallthrough
CT: control target
= control target key end

     0   :  { %vm31_vm0 = vcmask 1043456   ;;  %vm27_vm1 = vcmask 64512   ;;  %s114_s1 = inlined_call_operand.vmem [shape: bf16[8,128], index: 1, kind: input, shape index: {}]   ;;  %s115_s0 = inlined_call_operand.vmem [shape: f32[16,8], index: 0, kind: input, shape index: {}]   ;;  %s116_s2 = inlined_call_operand.vmem [shape: f32[1,128], index: 2, kind: input, shape index: {}]   ;;  %s117_s3 = inlined_call_operand.vmem [shape: bf16[16,128], index: 3, kind: output, shape index: {}]  }
   0x1   :  { %v26_v0 = vld [vmem:[%s114_s1] sm:$0xf]  ;;  %v24_v2 = vld [vmem:[%s115_s0 + $0x8] sm:$0xff] }
   0x2   :  { %v23_v1 = vld [vmem:[%s115_s0] sm:$0xff]  ;;  %v33_v3 = vsel %vm31_vm0, %v26_v0, 0 }
   0x3   :  { %v25_v4 = vpack.c.bf16 %v24_v2, %v23_v1  ;;  %42 = vmatpush.bf16.msra.mxu0 %v33_v3  ;;  %v78_v6 = vld [vmem:[%s116_s2] ss:$0 sm:$0xff] }
   0x6   :  { %72 = vmatmul.msk.bf16.vlgmr.msra.gmra.mxu0 %vm27_vm1, %v25_v4 }
  0x83   :  { %v44_v5 = vpop.f32.mrf.mxu0 }
  0x84   :  { %v62_v8 = vadd.f32 %v78_v6, %v44_v5 }
  0x8b   :  { %v46_v7 = vpop.f32.mrf.mxu0 }
  0x8c   :  { %v63_v9 = vadd.f32 %v78_v6, %v46_v7 }
  0x8e   :  { %v76_v10 = vpack.c.bf16 %v63_v9, %v62_v8 }
  0x90   :  { %77 = vst [vmem:[%s117_s3] sm:$0xff] %v76_v10  }

// kernel: solospeech_tse_forward.23
= control target key start
LH: loop header
LB: loop body
LE: loop exit
PB: predicated region body
PF: predicated region fallthrough
CT: control target
= control target key end

     0   :  { %s256_s1 = inlined_call_operand.vmem [shape: bf16[128,128], index: 1, kind: input, shape index: {}]   ;;  %s257_s2 = inlined_call_operand.vmem [shape: f32[1,128], index: 2, kind: input, shape index: {}]   ;;  %s258_s0 = inlined_call_operand.vmem [shape: bf16[16,128], index: 0, kind: input, shape index: {}]   ;;  %s259_s3 = inlined_call_operand.vmem [shape: bf16[16,128], index: 3, kind: input, shape index: {}]   ;;  %s260_s4 = inlined_call_operand.vmem [shape: bf16[16,128], index: 4, kind: output, shape index: {}]  }
   0x1   :  { %v184_v0 = vld [vmem:[%s256_s1 + $0x38] sm:$0xff]  ;;  %v183_v1 = vld [vmem:[%s256_s1 + $0x30] sm:$0xff]  ;;  %v182_v2 = vld [vmem:[%s256_s1 + $0x28] sm:$0xff] }
   0x2   :  { %97 = vmatpush.bf16.msra.mxu0 %v184_v0  ;;  %v181_v3 = vld [vmem:[%s256_s1 + $0x20] sm:$0xff]  ;;  %v180_v4 = vld [vmem:[%s256_s1 + $0x18] sm:$0xff]  ;;  %v179_v5 = vld [vmem:[%s256_s1 + $0x10] sm:$0xff] }
   0x3   :  { %v178_v6 = vld [vmem:[%s256_s1 + $0x8] sm:$0xff]  ;;  %v177_v7 = vld [vmem:[%s256_s1] sm:$0xff] }
   0x4   :  { %v176_v8 = vld [vmem:[%s258_s0] sm:$0xff] }
   0x5   :  { %v194_v10 = vld [vmem:[%s257_s2] ss:$0 sm:$0xff] }
   0x6   :  { %98 = vmatpush.bf16.msra.mxu0 %v183_v1  ;;  %v186_v11 = vld [vmem:[%s259_s3] sm:$0xff]  }
   0x7   :  { %v187_v13 = vunpack.c.l.bf16 %v186_v11  ;;  %v188_v14 = vunpack.c.h.bf16 %v186_v11 }
   0xa   :  { %99 = vmatpush.bf16.msra.mxu0 %v182_v2 }
   0xe   :  { %100 = vmatpush.bf16.msra.mxu0 %v181_v3 }
  0x12   :  { %101 = vmatpush.bf16.msra.mxu0 %v180_v4 }
  0x16   :  { %102 = vmatpush.bf16.msra.mxu0 %v179_v5 }
  0x1a   :  { %103 = vmatpush.bf16.msra.mxu0 %v178_v6 }
  0x1e   :  { %104 = vmatpush.bf16.msra.mxu0 %v177_v7 }
  0x21   :  { %105 = vmatmul.bf16.vlgmr.msra.gmra.mxu0 %v176_v8 }
  0x9e   :  { %v106_v9 = vpop.f32.mrf.mxu0 }
  0x9f   :  { %v124_v12 = vadd.f32 %v194_v10, %v106_v9 }
  0xa1   :  { %v130_v17 = vadd.f32 %v187_v13, %v124_v12 }
  0xa6   :  { %v108_v15 = vpop.f32.mrf.mxu0 }
  0xa7   :  { %v125_v16 = vadd.f32 %v194_v10, %v108_v15 }
  0xa9   :  { %v131_v18 = vadd.f32 %v188_v14, %v125_v16 }
  0xab   :  { %v192_v19 = vpack.c.bf16 %v131_v18, %v130_v17 }
  0xad   :  { %193 = vst [vmem:[%s260_s4] sm:$0xff] %v192_v19  }

// kernel: solospeech_tse_forward.21
= control target key start
LH: loop header
LB: loop body
LE: loop exit
PB: predicated region body
PF: predicated region fallthrough
CT: control target
= control target key end

     0   :  { %v464_v3 = vmov 128.0   ;;  %s679_s0 = inlined_call_operand.vmem [shape: bf16[16,128], index: 0, kind: input, shape index: {}]   ;;  %s680_s1 = inlined_call_operand.vmem [shape: f32[1,128], index: 1, kind: input, shape index: {}]   ;;  %s681_s2 = inlined_call_operand.vmem [shape: f32[1,128], index: 2, kind: input, shape index: {}]   ;;  %s682_s3 = inlined_call_operand.vmem [shape: bf16[128,384], index: 3, kind: input, shape index: {}]   ;;  %s683_s4 = inlined_call_operand.vmem [shape: f32[1,384], index: 4, kind: input, shape index: {}]   ;;  %s684_s5 = inlined_call_operand.vmem [shape: bf16[16,384], index: 5, kind: output, shape index: {}]  }
   0x1   :  { %v447_v0 = vld [vmem:[%s679_s0] sm:$0xff]   ;;  %458 = vrcp.f32 %v464_v3  ;;  %v411_v18 = vld [vmem:[%s682_s3 + $0xa8] sm:$0xf]  ;;  %v444_v19 = vld [vmem:[%s682_s3 + $0xb0] sm:$0xf0] }
   0x2   :  { %v448_v1 = vunpack.c.l.bf16 %v447_v0  ;;  %v449_v2 = vunpack.c.h.bf16 %v447_v0  ;;  %v443_v20 = vld [vmem:[%s682_s3 + $0xac] sm:$0xf]  ;;  %v412_v21 = vor.u32 %v444_v19, %v411_v18  ;;  %v413_v22 = vld [vmem:[%s682_s3 + $0xb4] sm:$0xf0]  ;;  %v419_v23 = vld [vmem:[%s682_s3 + $0xb0] sm:$0xf] }
   0x3   :  { %v445_v24 = vld [vmem:[%s682_s3 + $0xb8] sm:$0xf0]  ;;  %v416_v25 = vor.u32 %v443_v20, %v413_v22  ;;  %v399_v27 = vld [vmem:[%s682_s3 + $0x90] sm:$0xf]  ;;  %v440_v29 = vld [vmem:[%s682_s3 + $0x94] sm:$0xf] }
   0x4   :  { %28 = vadd.xlane.f32.xlu0 %v448_v1  ;;  %v420_v26 = vor.u32 %v445_v24, %v419_v23  ;;  %267 = vmatpush.bf16.msra.mxu0 %v412_v21  ;;  %v441_v28 = vld [vmem:[%s682_s3 + $0x98] sm:$0xf0]  ;;  %v401_v31 = vld [vmem:[%s682_s3 + $0x9c] sm:$0xf0]  ;;  %v407_v32 = vld [vmem:[%s682_s3 + $0x98] sm:$0xf] }
   0x5   :  { %281 = vmatpush.bf16.msra.mxu1 %v416_v25  ;;  %v400_v30 = vor.u32 %v441_v28, %v399_v27  ;;  %v442_v33 = vld [vmem:[%s682_s3 + $0xa0] sm:$0xf0]  ;;  %v404_v34 = vor.u32 %v440_v29, %v401_v31  ;;  %v387_v36 = vld [vmem:[%s682_s3 + $0x78] sm:$0xf]  ;;  %v437_v38 = vld [vmem:[%s682_s3 + $0x7c] sm:$0xf] }
   0x6   :  { %295 = vmatpush.bf16.msra.mxu2 %v420_v26  ;;  %v408_v35 = vor.u32 %v442_v33, %v407_v32  ;;  %v438_v37 = vld [vmem:[%s682_s3 + $0x80] sm:$0xf0]  ;;  %v389_v40 = vld [vmem:[%s682_s3 + $0x84] sm:$0xf0]  ;;  %v395_v41 = vld [vmem:[%s682_s3 + $0x80] sm:$0xf] }
   0x7   :  { %v459_v4 = vpop.eup %458  ;;  %v388_v39 = vor.u32 %v438_v37, %v387_v36  ;;  %v439_v42 = vld [vmem:[%s682_s3 + $0x88] sm:$0xf0]  ;;  %v392_v43 = vor.u32 %v437_v38, %v389_v40  ;;  %v375_v45 = vld [vmem:[%s682_s3 + $0x60] sm:$0xf]  ;;  %v434_v47 = vld [vmem:[%s682_s3 + $0x64] sm:$0xf] }
   0x8   :  { %v33_v5 = vmul.f32 128.0, %v459_v4  ;;  %vm37_vm0 = vweird.f32 %v459_v4  ;;  %268 = vmatpush.bf16.msra.mxu0 %v400_v30  ;;  %v396_v44 = vor.u32 %v439_v42, %v395_v41  ;;  %v435_v46 = vld [vmem:[%s682_s3 + $0x68] sm:$0xf0]  ;;  %v377_v49 = vld [vmem:[%s682_s3 + $0x6c] sm:$0xf0] }
   0x9   :  { %282 = vmatpush.bf16.msra.mxu1 %v404_v34  ;;  %v376_v48 = vor.u32 %v435_v46, %v375_v45  ;;  %v383_v50 = vld [vmem:[%s682_s3 + $0x68] sm:$0xf]  ;;  %v436_v51 = vld [vmem:[%s682_s3 + $0x70] sm:$0xf0]  ;;  %v380_v52 = vor.u32 %v434_v47, %v377_v49  ;;  %v431_v56 = vld [vmem:[%s682_s3 + $0x4c] sm:$0xf] }
   0xa   :  { %v34_v6 = vsub.f32 1.0, %v33_v5  ;;  %296 = vmatpush.bf16.msra.mxu2 %v408_v35  ;;  %v384_v53 = vor.u32 %v436_v51, %v383_v50  ;;  %v363_v54 = vld [vmem:[%s682_s3 + $0x48] sm:$0xf]  ;;  %v432_v55 = vld [vmem:[%s682_s3 + $0x50] sm:$0xf0] }
   0xb   :  { %v364_v57 = vor.u32 %v432_v55, %v363_v54  ;;  %v365_v58 = vld [vmem:[%s682_s3 + $0x54] sm:$0xf0]  ;;  %v371_v59 = vld [vmem:[%s682_s3 + $0x50] sm:$0xf]  ;;  %v433_v60 = vld [vmem:[%s682_s3 + $0x58] sm:$0xf0] }
   0xc   :  { %30 = vadd.xlane.f32.xlu0 %v449_v2  ;;  %v35_v7 = vmul.f32 %v459_v4, %v34_v6  ;;  %269 = vmatpush.bf16.msra.mxu0 %v388_v39  ;;  %v368_v62 = vor.u32 %v431_v56, %v365_v58  ;;  %v372_v63 = vor.u32 %v433_v60, %v371_v59  ;;  %v428_v3 = vld [vmem:[%s682_s3 + $0x34] sm:$0xf]  ;;  %v353_v6 = vld [vmem:[%s682_s3 + $0x3c] sm:$0xf0]  ;;  %v341_v18 = vld [vmem:[%s682_s3 + $0x24] sm:$0xf0] }
   0xd   :  { %283 = vmatpush.bf16.msra.mxu1 %v392_v43  ;;  %v347_v19 = vld [vmem:[%s682_s3 + $0x20] sm:$0xf]  ;;  %v427_v20 = vld [vmem:[%s682_s3 + $0x28] sm:$0xf0]  ;;  %v422_v26 = vld [vmem:[%s682_s3 + $0x4] sm:$0xf] }
   0xe   :  { %v36_v8 = vadd.f32 %v459_v4, %v35_v7  ;;  %297 = vmatpush.bf16.msra.mxu2 %v396_v44  ;;  %v359_v7 = vld [vmem:[%s682_s3 + $0x38] sm:$0xf]  ;;  %v348_v23 = vor.u32 %v427_v20, %v347_v19  ;;  %v327_v24 = vld [vmem:[%s682_s3] sm:$0xf]  ;;  %v423_v25 = vld [vmem:[%s682_s3 + $0x8] sm:$0xf0] }
   0xf   :  { %v328_v28 = vor.u32 %v423_v25, %v327_v24  ;;  %v329_v29 = vld [vmem:[%s682_s3 + $0xc] sm:$0xf0]  ;;  %v335_v30 = vld [vmem:[%s682_s3 + $0x8] sm:$0xf]  ;;  %v424_v31 = vld [vmem:[%s682_s3 + $0x10] sm:$0xf0] }
  0x10   :  { %v498_v9 = vsel %vm37_vm0, %v459_v4, %v36_v8  ;;  %270 = vmatpush.bf16.msra.mxu0 %v376_v48  ;;  %v356_v8 = vor.u32 %v428_v3, %v353_v6  ;;  %v332_v32 = vor.u32 %v422_v26, %v329_v29  ;;  %v456_v46 = vld [vmem:[%s680_s1] ss:$0 sm:$0xff] }
  0x11   :  { %284 = vmatpush.bf16.msra.mxu1 %v380_v52  ;;  %v457_v50 = vld [vmem:[%s681_s2] ss:$0 sm:$0xff] }
  0x12   :  { %298 = vmatpush.bf16.msra.mxu2 %v384_v53 }
  0x14   :  { %271 = vmatpush.bf16.msra.mxu0 %v364_v57 }
  0x15   :  { %285 = vmatpush.bf16.msra.mxu1 %v368_v62 }
  0x16   :  { %299 = vmatpush.bf16.msra.mxu2 %v372_v63 }
  0x19   :  { %286 = vmatpush.bf16.msra.mxu1 %v356_v8 }
  0x77   :  { %v29_v10 = vpop.xlane.xlu0 %28 }
  0x78   :  { %v39_v11 = vmul.f32 %v498_v9, %v29_v10  ;;  %v430_v10 = vld [vmem:[%s682_s3 + $0x40] sm:$0xf0] }
  0x7a   :  { %v501_v12 = vsub.f32 %v448_v1, %v39_v11  ;;  %v351_v1 = vld [vmem:[%s682_s3 + $0x30] sm:$0xf]  ;;  %v360_v11 = vor.u32 %v430_v10, %v359_v7 }
  0x7c   :  { %v43_v13 = vmul.f32 %v501_v12, %v501_v12  ;;  %300 = vmatpush.bf16.msra.mxu2 %v360_v11 }
  0x7e   :  { %45 = vadd.xlane.f32.xlu1 %v43_v13  ;;  %v339_v13 = vld [vmem:[%s682_s3 + $0x18] sm:$0xf] }
  0x7f   :  { %v31_v14 = vpop.xlane.xlu0 %30 }
  0x80   :  { %v40_v15 = vmul.f32 %v498_v9, %v31_v14  ;;  %v426_v14 = vld [vmem:[%s682_s3 + $0x20] sm:$0xf0]  ;;  %301 = vmatpush.bf16.msra.mxu2 %v348_v23 }
  0x82   :  { %v506_v16 = vsub.f32 %v449_v2, %v40_v15  ;;  %v429_v2 = vld [vmem:[%s682_s3 + $0x38] sm:$0xf0] }
  0x83   :  { %v352_v5 = vor.u32 %v429_v2, %v351_v1  ;;  %v425_v15 = vld [vmem:[%s682_s3 + $0x1c] sm:$0xf] }
  0x84   :  { %v44_v17 = vmul.f32 %v506_v16, %v506_v16  ;;  %v344_v22 = vor.u32 %v425_v15, %v341_v18 }
  0x85   :  { %272 = vmatpush.bf16.msra.mxu0 %v352_v5 }
  0x86   :  { %47 = vadd.xlane.f32.xlu1 %v44_v17  ;;  %v340_v17 = vor.u32 %v426_v14, %v339_v13  ;;  %287 = vmatpush.bf16.msra.mxu1 %v344_v22 }
  0x89   :  { %273 = vmatpush.bf16.msra.mxu0 %v340_v17 }
  0x8a   :  { %288 = vmatpush.bf16.msra.mxu1 %v332_v32 }
  0x8d   :  { %274 = vmatpush.bf16.msra.mxu0 %v328_v28 }
  0xf1   :  { %v46_v61 = vpop.xlane.xlu1 %45 }
  0xf2   :  { %v49_v0 = vmul.f32 %v46_v61, %v498_v9 }
  0xf4   :  { %v51_v4 = vadd.f32 1e-05, %v49_v0 }
  0xf6   :  { %460 = vrsqrt.f32 %v51_v4  ;;  %vm59_vm2 = vweird.f32 %v51_v4 }
  0xf9   :  { %v48_v21 = vpop.xlane.xlu1 %47 }
  0xfa   :  { %v50_v27 = vmul.f32 %v48_v21, %v498_v9  ;;  %v336_v9 = vor.u32 %v424_v31, %v335_v30 }
  0xfc   :  { %v461_v33 = vpop.eup %460  ;;  %v52_v34 = vadd.f32 1e-05, %v50_v27  ;;  %302 = vmatpush.bf16.msra.mxu2 %v336_v9 }
  0xfd   :  { %v54_v35 = vmul.f32 %v461_v33, %v51_v4  ;;  %vm60_vm1 = vweird.f32 %v461_v33 }
  0xfe   :  { %462 = vrsqrt.f32 %v52_v34  ;;  %vm61_vm3 = vmor %vm59_vm2, %vm60_vm1  ;;  %vm69_vm5 = vweird.f32 %v52_v34 }
  0xff   :  { %v55_v36 = vmul.f32 %v461_v33, %v54_v35 }
 0x101   :  { %v56_v37 = vmul.f32 0.5, %v55_v36 }
 0x103   :  { %v57_v38 = vsub.f32 1.5, %v56_v37 }
 0x104   :  { %v463_v39 = vpop.eup %462 }
 0x105   :  { %v58_v40 = vmul.f32 %v461_v33, %v57_v38  ;;  %v64_v41 = vmul.f32 %v463_v39, %v52_v34  ;;  %vm70_vm4 = vweird.f32 %v463_v39 }
 0x106   :  { %vm71_vm6 = vmor %vm69_vm5, %vm70_vm4 }
 0x107   :  { %v65_v42 = vmul.f32 %v463_v39, %v64_v41  ;;  %v62_v43 = vsel %vm61_vm3, %v461_v33, %v58_v40 }
 0x108   :  { %v73_v47 = vmul.f32 %v62_v43, %v501_v12  ;;  %v125_v12 = vld [vmem:[%s683_s4] sm:$0x7] }
 0x109   :  { %v66_v44 = vmul.f32 0.5, %v65_v42  ;;  %v127_v58 = vperm.slane %v125_v12, 0  ;;  %v128_v59 = vperm.slane %v125_v12, 1  ;;  %v129_v0 = vperm.slane %v125_v12, 2 }
 0x10a   :  { %v79_v51 = vmul.f32 %v456_v46, %v73_v47 }
 0x10b   :  { %v67_v45 = vsub.f32 1.5, %v66_v44 }
 0x10c   :  { %v85_v54 = vadd.f32 %v457_v50, %v79_v51 }
 0x10d   :  { %v68_v48 = vmul.f32 %v463_v39, %v67_v45 }
 0x10f   :  { %v72_v49 = vsel %vm71_vm6, %v463_v39, %v68_v48 }
 0x110   :  { %v74_v52 = vmul.f32 %v72_v49, %v506_v16 }
 0x112   :  { %v80_v53 = vmul.f32 %v456_v46, %v74_v52 }
 0x114   :  { %v86_v55 = vadd.f32 %v457_v50, %v80_v53 }
 0x116   :  { %v453_v56 = vpack.c.bf16 %v86_v55, %v85_v54 }
 0x118   :  { %454 = vst [vmem:[#allocation2] sm:$0xff] %v453_v56  }
 0x11f   :  { %v421_v57 = vld [vmem:[#allocation2] sm:$0xff] }
 0x120   :  { %275 = vmatmul.bf16.vlgmr.msra.gmra.mxu0 %v421_v57  ;;  %289 = vmatmul.bf16.vlgmr.msra.gmra.mxu1 %v421_v57 }
 0x121   :  { %303 = vmatmul.bf16.vlgmr.msra.gmra.mxu2 %v421_v57 }
 0x19d   :  { %v276_v60 = vpop.f32.mrf.mxu0  ;;  %v290_v61 = vpop.f32.mrf.mxu1 }
 0x19e   :  { %v277_v62 = vadd.f32 %v276_v60, %v127_v58  ;;  %v291_v63 = vadd.f32 %v290_v61, %v128_v59 }
 0x1a0   :  { %v309_v16 = vpack.c.bf16 %v291_v63, %v277_v62 }
 0x1a2   :  { %313 = vst [vmem:[%s684_s5] sm:$0xff] %v309_v16 }
 0x1a4   :  { %v304_v1 = vpop.f32.mrf.mxu2 }
 0x1a5   :  { %v305_v2 = vadd.f32 %v304_v1, %v129_v0  ;;  %v278_v3 = vpop.f32.mrf.mxu0  ;;  %v292_v4 = vpop.f32.mrf.mxu1 }
 0x1a6   :  { %v279_v5 = vadd.f32 %v278_v3, %v127_v58  ;;  %v293_v6 = vadd.f32 %v292_v4, %v128_v59 }
 0x1a7   :  { %v310_v7 = vpack.c.bf16 %v305_v2, %v305_v2 }
 0x1a8   :  { %v311_v8 = vpack.c.bf16 %v293_v6, %v279_v5 }
 0x1a9   :  { %314 = vst [vmem:[%s684_s5 + $0x8] sm:$0xf] %v310_v7 }
 0x1aa   :  { %315 = vst [vmem:[%s684_s5 + $0xc] sm:$0xff] %v311_v8 }
 0x1ac   :  { %v306_v10 = vpop.f32.mrf.mxu2 }
 0x1ad   :  { %v307_v11 = vadd.f32 %v306_v10, %v129_v0 }
 0x1af   :  { %v312_v13 = vpack.c.bf16 %v307_v11, %v307_v11 }
 0x1b1   :  { %316 = vst [vmem:[%s684_s5 + $0x14] sm:$0xf] %v312_v13 }

// kernel: solospeech_tse_forward.22
= control target key start
LH: loop header
LB: loop body
LE: loop exit
PB: predicated region body
PF: predicated region fallthrough
CT: control target
= control target key end

     0   :  { %s836_s15 = smov 0   ;;  %s838_s16 = smov 0   ;;  %s917_s0 = inlined_call_operand.vmem [shape: bf16[2,8,384], index: 0, kind: input, shape index: {}, may-alias: {0,1,2}]   ;;  %s918_s1 = inlined_call_operand.vmem [shape: bf16[2,8,384], index: 1, kind: input, shape index: {}, may-alias: {0,1,2}]   ;;  %s919_s2 = inlined_call_operand.vmem [shape: bf16[2,8,384], index: 2, kind: input, shape index: {}, may-alias: {0,1,2}]   ;;  %s920_s3 = inlined_call_operand.vmem [shape: f32[2,1,8], index: 3, kind: input, shape index: {}]   ;;  %s921_s4 = inlined_call_operand.vmem [shape: bf16[2,8,128], index: 4, kind: output, shape index: {}]  }
   0x1   :  { %s840_s17 = smov 0  }
   0x2 LB: > { %s33_s18 = sadd.s32 1, %s801_s16  ;;  %p726_p0 = scmp.ge.s32.totalorder %s805_s17, 1  ;;  %s805_s17 = sphi %s840_s17, %s14_s17   ;;  %s801_s16 = sphi %s838_s16, %s923_s16   ;;  %s797_s15 = sphi %s836_s15, %s922_s15  }
   0x3   : > { %p35_p1 = scmp.ge.s32.totalorder %s33_s18, 2  ;;  %p236_p2 = scmp.lt.s32.totalorder %s805_s17, 3 }
   0x5   : > { %s925_s18 = smov (%p35_p1, %s33_s18), 0  ;;  %p237_p3 = pnand %p726_p0, %p236_p2 }
   0x6   : > { %p294_p4 = scmp.lt.s32.totalorder (!%p237_p3), %s797_s15, 1  ;;  %s807_s29 = smov (!%p237_p3), 64  }
   0x7   : > { %240 = sbr.rel (%p237_p3) target bundleno = 906 (0x38a), region = 36 }
   0xc   : > { %s927_s15 = smov (!%p294_p4, %s797_s15), 1  ;;  %vm346_vm0 = vcmask 523264   ;;  %vm341_vm1 = vcmask 7168   ;;  %v808_v10 = vmov -inf   ;;  %vm380_vm2 = vcmask 64512  }
   0xd   : > { %s857_s19 = smul.u32 12, %s927_s15  ;;  %s328_s28 = scalar_lea.vmem %s920_s3, %s927_s15  ;;  %342 = vst.msk [vmem:[#allocation2] sm:$0xff] %vm341_vm1, %v808_v10  ;;  %v809_v19 = vmov 0   ;;  %vm415_vm3 = vcmask 1043456   ;;  %v810_v32 = vmov 0.0  }
   0xe   : > { %343 = vst.msk [vmem:[#allocation2 + $0x8] sm:$0xff] %vm341_vm1, %v808_v10  ;;  %v770_v14 = vld [vmem:[%s328_s28] ss:$0 sm:$0xff]  ;;  %769 = vset.pattern.permute.xlu0 %v809_v19  ;;  %768 = vset.pattern.permute.xlu1 %v809_v19  ;;  %s730_s7 = sshll.u32 %s927_s15, 2 }
   0xf   : > { %s654_s22 = scalar_lea.vmem %s918_s1, %s857_s19  ;;  %s302_s25 = scalar_lea.vmem %s917_s0, %s857_s19  ;;  %344 = vst.msk [vmem:[#allocation3] sm:$0xff] %vm341_vm1, %v810_v32 }
  0x10   : > { %v731_v0 = vld [vmem:[%s654_s22 + $0x4] sm:$0xf]  ;;  %v349_v1 = vld [vmem:[%s302_s25] sm:$0xf]  ;;  %s660_s6 = scalar_lea.vmem %s919_s2, %s857_s19  ;;  %345 = vst.msk [vmem:[#allocation3 + $0x8] sm:$0xff] %vm341_vm1, %v810_v32  ;;  %s335_s10 = scalar_lea.vmem %s921_s4, %s730_s7 }
  0x11   : > { %v364_v2 = vsel %vm346_vm0, %v731_v0, 0  ;;  %v441_v3 = vunpack.c.l.b16 %v731_v0  ;;  %v350_v4 = vunpack.c.l.bf16 %v349_v1  ;;  %v732_v20 = vld [vmem:[%s660_s6 + $0x8] sm:$0xf]  ;;  %347 = vst.msk [vmem:[#allocation4] sm:$0xff] %vm346_vm0, %v810_v32 }
  0x12   : > { %373 = vmatpush.bf16.xpose.msra.mxu0 %v364_v2  ;;  %v499_v21 = vunpack.c.l.b16 %v732_v20  ;;  %v417_v31 = vsel %vm415_vm3, %v732_v20, 0  ;;  %348 = vst.msk [vmem:[#allocation4 + $0x8] sm:$0xff] %vm346_vm0, %v810_v32 }
  0x13   : > { %v442_v5 = vpack.c.b16 %v441_v3, %v441_v3  ;;  %v351_v6 = vmul.f32 0.125, %v350_v4  ;;  %426 = vmatpush.bf16.msra.mxu1 %v417_v31 }
  0x14   : > { %v500_v22 = vpack.c.b16 %v499_v21, %v499_v21  ;;  %v379_v23 = vld [vmem:[#allocation2] sm:$0xff] }
  0x15   : > { %443 = vrot.lane.b32.xlu0 %v442_v5, %s807_s29  ;;  %v352_v7 = vpack.c.bf16 %v351_v6, %v351_v6  ;;  %v465_v36 = vld [vmem:[#allocation2 + $0x8] sm:$0xff] }
  0x16   : > { %v396_v47 = vld [vmem:[#allocation3] sm:$0xff] }
  0x17   : > { %v436_v8 = vunpack.c.l.b16 %v352_v7  ;;  %v482_v61 = vld [vmem:[#allocation3 + $0x8] sm:$0xff] }
  0x19   : > { %733 = vmatmul.msk.bf16.vlgmr.msra.gmra.mxu0 %vm346_vm0, %v352_v7  ;;  %v437_v9 = vpack.c.b16 %v436_v8, %v436_v8  ;;  %v490_v6 = vld [vmem:[#allocation4 + $0x8] sm:$0xff] }
  0x1d   : > { %438 = vrot.lane.b32.xlu0 %v437_v9, %s807_s29 }
  0x87   : > { %v444_v11 = vpop.permute.xlu0 %443 }
  0x88   : > { %v449_v12 = vsel %vm346_vm0, %v444_v11, 0 }
  0x89   : > { %458 = vmatpush.bf16.xpose.msra.mxu2 %v449_v12 }
  0x8f   : > { %v439_v13 = vpop.permute.xlu0 %438 }
  0x90   : > { %735 = vmatmul.msk.bf16.vlgmr.msra.gmra.mxu2 %vm346_vm0, %v439_v13 }
  0x96   : > { %v375_v15 = vpop.f32.mrf.mxu0 }
  0x97   : > { %v376_v16 = vadd.f32 %v770_v14, %v375_v15 }
  0x99   : > { %v381_v17 = vsel %vm380_vm2, %v376_v16, -inf }
  0x9a   : > { %382 = vmax.xlane.f32.xlu2 %v381_v17 }
  0x9e   : > { %v377_v18 = vpop.f32.mrf.mxu0 }
  0xb2   : > { %501 = vrot.lane.b32.xlu2 %v500_v22, %s807_s29 }
 0x10d   : > { %v383_v24 = vpop.xlane.xlu2 %382 }
 0x10e   : > { %v384_v25 = vmax.f32 %v379_v23, %v383_v24 }
 0x110   : > { %v385_v26 = vsub.f32 %v379_v23, %v384_v25  ;;  %434 = vst.msk [vmem:[#allocation2] sm:$0xff] %vm341_vm1, %v384_v25  ;;  %390 = vperm.xlu0 %769, %v384_v25   ;;  %v404_v23 = vld [vmem:[#allocation4] sm:$0xff] }
 0x112   : > { %v386_v45 = vmul.f32 1.442695, %v385_v26 }
 0x113   : > { %v460_v27 = vpop.f32.mrf.mxu2 }
 0x114   : > { %v461_v28 = vadd.f32 %v770_v14, %v460_v27 }
 0x115   : > { %v502_v43 = vpop.permute.xlu2 %501 }
 0x116   : > { %v466_v29 = vsel %vm380_vm2, %v461_v28, -inf  ;;  %v507_v44 = vsel %vm415_vm3, %v502_v43, 0 }
 0x117   : > { %467 = vmax.xlane.f32.xlu1 %v466_v29  ;;  %516 = vmatpush.bf16.msra.mxu3 %v507_v44 }
 0x11b   : > { %v462_v30 = vpop.f32.mrf.mxu2 }
 0x182   : > { %v391_v33 = vpop.permute.xlu0 %390 }
 0x183   : > { %v393_v34 = vsub.f32 %v376_v16, %v391_v33 }
 0x185   : > { %v394_v35 = vmul.f32 1.442695, %v393_v34 }
 0x187   : > { %771 = vpow2.f32 %v394_v35 }
 0x188   : > { %773 = vpow2.f32 %v386_v45 }
 0x18a   : > { %v468_v37 = vpop.xlane.xlu1 %467 }
 0x18b   : > { %v469_v38 = vmax.f32 %v465_v36, %v468_v37 }
 0x18d   : > { %v772_v39 = vpop.eup %771  ;;  %v470_v40 = vsub.f32 %v465_v36, %v469_v38  ;;  %524 = vst.msk [vmem:[#allocation2 + $0x8] sm:$0xff] %vm341_vm1, %v469_v38  ;;  %475 = vperm.xlu1 %768, %v469_v38  }
 0x18e   : > { %v398_v41 = vsel %vm380_vm2, %v772_v39, 0.0  ;;  %v411_v42 = vpack.c.bf16 %v772_v39, %v772_v39  ;;  %v774_v46 = vpop.eup %773 }
 0x18f   : > { %399 = vadd.xlane.f32.xlu2 %v398_v41  ;;  %v397_v50 = vmul.f32 %v774_v46, %v396_v47  ;;  %v471_v59 = vmul.f32 1.442695, %v470_v40 }
 0x190   : > { %734 = vmatmul.msk.bf16.vlgmr.msra.gmra.mxu1 %vm380_vm2, %v411_v42 }
 0x1ff   : > { %v476_v48 = vpop.permute.xlu1 %475 }
 0x200   : > { %v478_v49 = vsub.f32 %v461_v28, %v476_v48 }
 0x202   : > { %v479_v51 = vmul.f32 1.442695, %v478_v49  ;;  %v400_v52 = vpop.xlane.xlu2 %399 }
 0x203   : > { %v401_v53 = vadd.f32 %v400_v52, %v397_v50 }
 0x204   : > { %775 = vpow2.f32 %v479_v51 }
 0x205   : > { %403 = vst.msk [vmem:[#allocation3] sm:$0xff] %vm341_vm1, %v401_v53  ;;  %777 = vpow2.f32 %v471_v59 }
 0x20a   : > { %v776_v54 = vpop.eup %775 }
 0x20b   : > { %v484_v55 = vsel %vm380_vm2, %v776_v54, 0.0  ;;  %v497_v56 = vpack.c.bf16 %v776_v54, %v776_v54  ;;  %v778_v60 = vpop.eup %777 }
 0x20c   : > { %485 = vadd.xlane.f32.xlu0 %v484_v55  ;;  %v483_v62 = vmul.f32 %v778_v60, %v482_v61  ;;  %v529_v4 = vld [vmem:[#allocation3] sm:$0xff] }
 0x20d   : > { %v428_v57 = vpop.f32.mrf.mxu1  ;;  %736 = vmatmul.msk.bf16.vlgmr.msra.gmra.mxu3 %vm380_vm2, %v497_v56 }
 0x215   : > { %v430_v58 = vpop.f32.mrf.mxu1 }
 0x27f   : > { %v486_v63 = vpop.xlane.xlu0 %485 }
 0x280   : > { %v487_v0 = vadd.f32 %v486_v63, %v483_v62 }
 0x282   : > { %488 = vst.msk [vmem:[#allocation3 + $0x8] sm:$0xff] %vm341_vm1, %v487_v0 }
 0x289   : > { %v551_v1 = vld [vmem:[#allocation3 + $0x8] sm:$0xff] }
 0x28a   : > { %554 = vperm.xlu1 %768, %v551_v1  }
 0x290   : > { %v518_v2 = vpop.f32.mrf.mxu3 }
 0x292   : > { %493 = vperm.xlu1 %768, %v778_v60  }
 0x298   : > { %v520_v3 = vpop.f32.mrf.mxu3 }
 0x29a   : > { %532 = vperm.xlu1 %768, %v529_v4  }
 0x2a2   : > { %407 = vperm.xlu1 %768, %v774_v46  }
 0x2fc   : > { %v555_v5 = vpop.permute.xlu1 %554 }
 0x2fd   : > { %779 = vrcp.f32 %v555_v5  ;;  %v568_v14 = vand.u32 2147483648, %v555_v5  ;;  %vm562_vm5 = vweird.f32 %v555_v5  ;;  %v566_v16 = vand.u32 2147483647, %v555_v5 }
 0x2ff   : > { %v569_v19 = vor.u32 1.1754944e-38, %v568_v14  ;;  %vm567_vm7 = vcmp.eq.f32.partialorder %v566_v16, 8.507059e+37 }
 0x303   : > { %v780_v7 = vpop.eup %779 }
 0x304   : > { %v558_v8 = vmul.f32 %v780_v7, %v555_v5  ;;  %v494_v9 = vpop.permute.xlu1 %493  ;;  %vm563_vm4 = vweird.f32 %v780_v7 }
 0x305   : > { %v496_v10 = vmul.f32 %v494_v9, %v490_v6  ;;  %vm564_vm6 = vmor %vm562_vm5, %vm563_vm4 }
 0x306   : > { %v559_v11 = vsub.f32 1.0, %v558_v8 }
 0x307   : > { %v522_v12 = vadd.f32 %v518_v2, %v496_v10 }
 0x308   : > { %v560_v13 = vmul.f32 %v780_v7, %v559_v11 }
 0x309   : > { %523 = vst.msk [vmem:[#allocation4 + $0x8] sm:$0xff] %vm346_vm0, %v522_v12 }
 0x30a   : > { %v561_v15 = vadd.f32 %v780_v7, %v560_v13 }
 0x30c   : > { %v533_v17 = vpop.permute.xlu1 %532  ;;  %v565_v18 = vsel %vm564_vm6, %v780_v7, %v561_v15 }
 0x30d   : > { %v570_v21 = vsel %vm567_vm7, %v569_v19, %v565_v18  ;;  %781 = vrcp.f32 %v533_v17  ;;  %v546_v32 = vand.u32 2147483648, %v533_v17  ;;  %vm540_vm9 = vweird.f32 %v533_v17 }
 0x30e   : > { %v544_v33 = vand.u32 2147483647, %v533_v17 }
 0x30f   : > { %v547_v35 = vor.u32 1.1754944e-38, %v546_v32 }
 0x310   : > { %v550_v20 = vld [vmem:[#allocation4 + $0x8] sm:$0xff]  ;;  %vm545_vm11 = vcmp.eq.f32.partialorder %v544_v33, 8.507059e+37 }
 0x311   : > { %v571_v22 = vmul.f32 %v570_v21, %v550_v20 }
 0x313   : > { %573 = vrot.lane.b32.xlu1 %v571_v22, %s807_s29  ;;  %v782_v27 = vpop.eup %781 }
 0x314   : > { %v408_v24 = vpop.permute.xlu1 %407  ;;  %v536_v28 = vmul.f32 %v782_v27, %v533_v17  ;;  %vm541_vm8 = vweird.f32 %v782_v27 }
 0x315   : > { %v410_v25 = vmul.f32 %v408_v24, %v404_v23  ;;  %vm542_vm10 = vmor %vm540_vm9, %vm541_vm8 }
 0x316   : > { %v537_v29 = vsub.f32 1.0, %v536_v28 }
 0x317   : > { %v432_v26 = vadd.f32 %v428_v57, %v410_v25 }
 0x318   : > { %v538_v30 = vmul.f32 %v782_v27, %v537_v29 }
 0x319   : > { %433 = vst.msk [vmem:[#allocation4] sm:$0xff] %vm346_vm0, %v432_v26 }
 0x31a   : > { %v539_v31 = vadd.f32 %v782_v27, %v538_v30 }
 0x31c   : > { %v543_v34 = vsel %vm542_vm10, %v782_v27, %v539_v31 }
 0x31d   : > { %v548_v37 = vsel %vm545_vm11, %v547_v35, %v543_v34 }
 0x320   : > { %v528_v36 = vld [vmem:[#allocation4] sm:$0xff] }
 0x321   : > { %v549_v38 = vmul.f32 %v548_v37, %v528_v36 }
 0x385   : > { %v574_v39 = vpop.permute.xlu1 %573 }
 0x386   : > { %v576_v40 = vsel %vm346_vm0, %v549_v38, %v574_v39 }
 0x387   : > { %v577_v41 = vpack.c.bf16 %v576_v40, %v576_v40 }
 0x389   : > { %578 = vst [vmem:[%s335_s10] sm:$0xf] %v577_v41 }
 0x38a PF: > { %s14_s17 = sadd.s32 1, %s805_s17   ;;  %s922_s15 = smov %s801_s16 }
 0x38b   : > { %p11_p5 = scmp.ge.s32.totalorder %s14_s17, 4   ;;  %s923_s16 = smov %s925_s18 }
 0x38d   :  { %13 = sbr.rel (!%p11_p5) target bundleno = 2 (0x2), region = 86 }

// kernel: solospeech_tse_forward.24
= control target key start
LH: loop header
LB: loop body
LE: loop exit
PB: predicated region body
PF: predicated region fallthrough
CT: control target
= control target key end

     0   :  { %v640_v3 = vmov 128.0   ;;  %s950_s0 = inlined_call_operand.vmem [shape: bf16[16,128], index: 0, kind: input, shape index: {}]   ;;  %s951_s1 = inlined_call_operand.vmem [shape: f32[1,128], index: 1, kind: input, shape index: {}]   ;;  %s952_s2 = inlined_call_operand.vmem [shape: f32[1,128], index: 2, kind: input, shape index: {}]   ;;  %s953_s3 = inlined_call_operand.vmem [shape: bf16[128,512], index: 3, kind: input, shape index: {}]   ;;  %s954_s4 = inlined_call_operand.vmem [shape: f32[1,512], index: 4, kind: input, shape index: {}]   ;;  %s955_s5 = inlined_call_operand.vmem [shape: bf16[16,512], index: 5, kind: output, shape index: {}]  }
   0x1   :  { %v607_v0 = vld [vmem:[%s950_s0] sm:$0xff]   ;;  %618 = vrcp.f32 %v640_v3  ;;  %v604_v19 = vld [vmem:[%s953_s3 + $0xec] sm:$0xf0]  ;;  %v561_v22 = vld [vmem:[%s953_s3 + $0xf0] sm:$0xf0] }
   0x2   :  { %v608_v1 = vunpack.c.l.bf16 %v607_v0  ;;  %v609_v2 = vunpack.c.h.bf16 %v607_v0  ;;  %v559_v18 = vld [vmem:[%s953_s3 + $0xe0] sm:$0xf]  ;;  %v602_v20 = vld [vmem:[%s953_s3 + $0xe4] sm:$0xf]  ;;  %v567_v23 = vld [vmem:[%s953_s3 + $0xe8] sm:$0xf] }
   0x3   :  { %v560_v21 = vor.u32 %v604_v19, %v559_v18  ;;  %v605_v24 = vld [vmem:[%s953_s3 + $0xf4] sm:$0xf0]  ;;  %v564_v25 = vor.u32 %v602_v20, %v561_v22  ;;  %v603_v27 = vld [vmem:[%s953_s3 + $0xec] sm:$0xf]  ;;  %v569_v28 = vld [vmem:[%s953_s3 + $0xf8] sm:$0xf0] }
   0x4   :  { %28 = vadd.xlane.f32.xlu0 %v608_v1  ;;  %v568_v26 = vor.u32 %v605_v24, %v567_v23  ;;  %v572_v29 = vor.u32 %v603_v27, %v569_v28  ;;  %v543_v30 = vld [vmem:[%s953_s3 + $0xc0] sm:$0xf]  ;;  %v600_v31 = vld [vmem:[%s953_s3 + $0xcc] sm:$0xf0]  ;;  %v598_v32 = vld [vmem:[%s953_s3 + $0xc4] sm:$0xf] }
   0x5   :  { %301 = vmatpush.bf16.msra.mxu0 %v560_v21  ;;  %315 = vmatpush.bf16.msra.mxu1 %v564_v25  ;;  %v544_v33 = vor.u32 %v600_v31, %v543_v30  ;;  %v545_v34 = vld [vmem:[%s953_s3 + $0xd0] sm:$0xf0]  ;;  %v551_v35 = vld [vmem:[%s953_s3 + $0xc8] sm:$0xf]  ;;  %v601_v36 = vld [vmem:[%s953_s3 + $0xd4] sm:$0xf0] }
   0x6   :  { %329 = vmatpush.bf16.msra.mxu2 %v568_v26  ;;  %343 = vmatpush.bf16.msra.mxu3 %v572_v29  ;;  %v548_v37 = vor.u32 %v598_v32, %v545_v34  ;;  %v552_v38 = vor.u32 %v601_v36, %v551_v35  ;;  %v599_v39 = vld [vmem:[%s953_s3 + $0xcc] sm:$0xf]  ;;  %v553_v40 = vld [vmem:[%s953_s3 + $0xd8] sm:$0xf0]  ;;  %v527_v42 = vld [vmem:[%s953_s3 + $0xa0] sm:$0xf] }
   0x7   :  { %v619_v4 = vpop.eup %618  ;;  %v556_v41 = vor.u32 %v599_v39, %v553_v40  ;;  %v596_v43 = vld [vmem:[%s953_s3 + $0xac] sm:$0xf0]  ;;  %v594_v44 = vld [vmem:[%s953_s3 + $0xa4] sm:$0xf]  ;;  %v529_v46 = vld [vmem:[%s953_s3 + $0xb0] sm:$0xf0] }
   0x8   :  { %v33_v5 = vmul.f32 128.0, %v619_v4  ;;  %vm37_vm0 = vweird.f32 %v619_v4  ;;  %v528_v45 = vor.u32 %v596_v43, %v527_v42  ;;  %v535_v47 = vld [vmem:[%s953_s3 + $0xa8] sm:$0xf]  ;;  %v597_v48 = vld [vmem:[%s953_s3 + $0xb4] sm:$0xf0]  ;;  %v532_v49 = vor.u32 %v594_v44, %v529_v46 }
   0x9   :  { %302 = vmatpush.bf16.msra.mxu0 %v544_v33  ;;  %316 = vmatpush.bf16.msra.mxu1 %v548_v37  ;;  %v536_v50 = vor.u32 %v597_v48, %v535_v47  ;;  %v595_v51 = vld [vmem:[%s953_s3 + $0xac] sm:$0xf]  ;;  %v537_v52 = vld [vmem:[%s953_s3 + $0xb8] sm:$0xf0]  ;;  %v511_v54 = vld [vmem:[%s953_s3 + $0x80] sm:$0xf] }
   0xa   :  { %v34_v6 = vsub.f32 1.0, %v33_v5  ;;  %330 = vmatpush.bf16.msra.mxu2 %v552_v38  ;;  %344 = vmatpush.bf16.msra.mxu3 %v556_v41  ;;  %v540_v53 = vor.u32 %v595_v51, %v537_v52  ;;  %v592_v55 = vld [vmem:[%s953_s3 + $0x8c] sm:$0xf0]  ;;  %v590_v56 = vld [vmem:[%s953_s3 + $0x84] sm:$0xf] }
   0xb   :  { %v512_v57 = vor.u32 %v592_v55, %v511_v54  ;;  %v513_v58 = vld [vmem:[%s953_s3 + $0x90] sm:$0xf0]  ;;  %v519_v59 = vld [vmem:[%s953_s3 + $0x88] sm:$0xf]  ;;  %v593_v60 = vld [vmem:[%s953_s3 + $0x94] sm:$0xf0] }
   0xc   :  { %30 = vadd.xlane.f32.xlu0 %v609_v2  ;;  %v35_v7 = vmul.f32 %v619_v4, %v34_v6  ;;  %v516_v61 = vor.u32 %v590_v56, %v513_v58  ;;  %v520_v62 = vor.u32 %v593_v60, %v519_v59  ;;  %v591_v63 = vld [vmem:[%s953_s3 + $0x8c] sm:$0xf]  ;;  %v521_v0 = vld [vmem:[%s953_s3 + $0x98] sm:$0xf0]  ;;  %v588_v3 = vld [vmem:[%s953_s3 + $0x6c] sm:$0xf0] }
   0xd   :  { %303 = vmatpush.bf16.msra.mxu0 %v528_v45  ;;  %317 = vmatpush.bf16.msra.mxu1 %v532_v49  ;;  %v497_v6 = vld [vmem:[%s953_s3 + $0x70] sm:$0xf0]  ;;  %v479_v19 = vld [vmem:[%s953_s3 + $0x40] sm:$0xf]  ;;  %v584_v20 = vld [vmem:[%s953_s3 + $0x4c] sm:$0xf0] }
   0xe   :  { %v36_v8 = vadd.f32 %v619_v4, %v35_v7  ;;  %331 = vmatpush.bf16.msra.mxu2 %v536_v50  ;;  %345 = vmatpush.bf16.msra.mxu3 %v540_v53  ;;  %v503_v7 = vld [vmem:[%s953_s3 + $0x68] sm:$0xf]  ;;  %v582_v21 = vld [vmem:[%s953_s3 + $0x44] sm:$0xf]  ;;  %v480_v23 = vor.u32 %v584_v20, %v479_v19  ;;  %v481_v24 = vld [vmem:[%s953_s3 + $0x50] sm:$0xf0] }
   0xf   :  { %v487_v25 = vld [vmem:[%s953_s3 + $0x48] sm:$0xf]  ;;  %v484_v26 = vor.u32 %v582_v21, %v481_v24  ;;  %v585_v27 = vld [vmem:[%s953_s3 + $0x54] sm:$0xf0]  ;;  %v583_v28 = vld [vmem:[%s953_s3 + $0x4c] sm:$0xf] }
  0x10   :  { %v674_v9 = vsel %vm37_vm0, %v619_v4, %v36_v8  ;;  %v586_v4 = vld [vmem:[%s953_s3 + $0x64] sm:$0xf]  ;;  %v589_v8 = vld [vmem:[%s953_s3 + $0x74] sm:$0xf0]  ;;  %v489_v29 = vld [vmem:[%s953_s3 + $0x58] sm:$0xf0]  ;;  %v488_v30 = vor.u32 %v585_v27, %v487_v25 }
  0x11   :  { %304 = vmatpush.bf16.msra.mxu0 %v512_v57  ;;  %318 = vmatpush.bf16.msra.mxu1 %v516_v61  ;;  %v492_v31 = vor.u32 %v583_v28, %v489_v29  ;;  %v463_v32 = vld [vmem:[%s953_s3 + $0x20] sm:$0xf]  ;;  %v580_v33 = vld [vmem:[%s953_s3 + $0x2c] sm:$0xf0]  ;;  %v578_v34 = vld [vmem:[%s953_s3 + $0x24] sm:$0xf] }
  0x12   :  { %332 = vmatpush.bf16.msra.mxu2 %v520_v62  ;;  %v464_v35 = vor.u32 %v580_v33, %v463_v32  ;;  %v465_v36 = vld [vmem:[%s953_s3 + $0x30] sm:$0xf0]  ;;  %v471_v37 = vld [vmem:[%s953_s3 + $0x28] sm:$0xf]  ;;  %v581_v38 = vld [vmem:[%s953_s3 + $0x34] sm:$0xf0] }
  0x13   :  { %v468_v40 = vor.u32 %v578_v34, %v465_v36  ;;  %v472_v41 = vor.u32 %v581_v38, %v471_v37  ;;  %v579_v42 = vld [vmem:[%s953_s3 + $0x2c] sm:$0xf]  ;;  %v473_v43 = vld [vmem:[%s953_s3 + $0x38] sm:$0xf0]  ;;  %v447_v44 = vld [vmem:[%s953_s3] sm:$0xf] }
  0x14   :  { %v476_v46 = vor.u32 %v579_v42, %v473_v43  ;;  %v576_v47 = vld [vmem:[%s953_s3 + $0xc] sm:$0xf0]  ;;  %v574_v48 = vld [vmem:[%s953_s3 + $0x4] sm:$0xf]  ;;  %v449_v49 = vld [vmem:[%s953_s3 + $0x10] sm:$0xf0] }
  0x15   :  { %v448_v50 = vor.u32 %v576_v47, %v447_v44  ;;  %v452_v51 = vor.u32 %v574_v48, %v449_v49  ;;  %v577_v52 = vld [vmem:[%s953_s3 + $0x14] sm:$0xf0]  ;;  %v575_v53 = vld [vmem:[%s953_s3 + $0xc] sm:$0xf]  ;;  %v457_v57 = vld [vmem:[%s953_s3 + $0x18] sm:$0xf0] }
  0x16   :  { %v460_v59 = vor.u32 %v575_v53, %v457_v57 }
  0x77   :  { %v29_v10 = vpop.xlane.xlu0 %28 }
  0x78   :  { %v39_v11 = vmul.f32 %v674_v9, %v29_v10 }
  0x7a   :  { %v677_v12 = vsub.f32 %v608_v1, %v39_v11  ;;  %v524_v1 = vor.u32 %v591_v63, %v521_v0  ;;  %v500_v11 = vor.u32 %v586_v4, %v497_v6  ;;  %v616_v6 = vld [vmem:[%s951_s1] ss:$0 sm:$0xff] }
  0x7c   :  { %v43_v13 = vmul.f32 %v677_v12, %v677_v12  ;;  %346 = vmatpush.bf16.msra.mxu3 %v524_v1  ;;  %319 = vmatpush.bf16.msra.mxu1 %v500_v11  ;;  %v617_v11 = vld [vmem:[%s952_s2] ss:$0 sm:$0xff] }
  0x7e   :  { %45 = vadd.xlane.f32.xlu1 %v43_v13  ;;  %v504_v13 = vor.u32 %v589_v8, %v503_v7 }
  0x7f   :  { %v31_v14 = vpop.xlane.xlu0 %30 }
  0x80   :  { %v40_v15 = vmul.f32 %v674_v9, %v31_v14  ;;  %v587_v14 = vld [vmem:[%s953_s3 + $0x6c] sm:$0xf]  ;;  %333 = vmatpush.bf16.msra.mxu2 %v504_v13  ;;  %320 = vmatpush.bf16.msra.mxu1 %v484_v26 }
  0x82   :  { %v682_v16 = vsub.f32 %v609_v2, %v40_v15  ;;  %v495_v2 = vld [vmem:[%s953_s3 + $0x60] sm:$0xf]  ;;  %v505_v15 = vld [vmem:[%s953_s3 + $0x78] sm:$0xf0] }
  0x83   :  { %v496_v5 = vor.u32 %v588_v3, %v495_v2  ;;  %v508_v18 = vor.u32 %v587_v14, %v505_v15 }
  0x84   :  { %v44_v17 = vmul.f32 %v682_v16, %v682_v16  ;;  %334 = vmatpush.bf16.msra.mxu2 %v488_v30  ;;  %321 = vmatpush.bf16.msra.mxu1 %v468_v40 }
  0x85   :  { %305 = vmatpush.bf16.msra.mxu0 %v496_v5  ;;  %347 = vmatpush.bf16.msra.mxu3 %v508_v18 }
  0x86   :  { %47 = vadd.xlane.f32.xlu1 %v44_v17 }
  0x88   :  { %335 = vmatpush.bf16.msra.mxu2 %v472_v41  ;;  %322 = vmatpush.bf16.msra.mxu1 %v452_v51 }
  0x89   :  { %306 = vmatpush.bf16.msra.mxu0 %v480_v23  ;;  %348 = vmatpush.bf16.msra.mxu3 %v492_v31 }
  0x8d   :  { %307 = vmatpush.bf16.msra.mxu0 %v464_v35  ;;  %349 = vmatpush.bf16.msra.mxu3 %v476_v46 }
  0x91   :  { %308 = vmatpush.bf16.msra.mxu0 %v448_v50  ;;  %350 = vmatpush.bf16.msra.mxu3 %v460_v59 }
  0xf1   :  { %v46_v10 = vpop.xlane.xlu1 %45 }
  0xf2   :  { %v49_v17 = vmul.f32 %v46_v10, %v674_v9 }
  0xf4   :  { %v816_v22 = vadd.f32 1e-05, %v49_v17 }
  0xf6   :  { %620 = vrsqrt.f32 %v816_v22  ;;  %vm59_vm2 = vweird.f32 %v816_v22 }
  0xf9   :  { %v48_v39 = vpop.xlane.xlu1 %47 }
  0xfa   :  { %v50_v45 = vmul.f32 %v48_v39, %v674_v9  ;;  %v455_v9 = vld [vmem:[%s953_s3 + $0x8] sm:$0xf] }
  0xfb   :  { %v456_v56 = vor.u32 %v577_v52, %v455_v9 }
  0xfc   :  { %v621_v54 = vpop.eup %620  ;;  %v52_v55 = vadd.f32 1e-05, %v50_v45 }
  0xfd   :  { %v54_v58 = vmul.f32 %v621_v54, %v816_v22  ;;  %336 = vmatpush.bf16.msra.mxu2 %v456_v56  ;;  %vm60_vm1 = vweird.f32 %v621_v54 }
  0xfe   :  { %622 = vrsqrt.f32 %v52_v55  ;;  %vm61_vm3 = vmor %vm59_vm2, %vm60_vm1  ;;  %vm69_vm5 = vweird.f32 %v52_v55 }
  0xff   :  { %v55_v60 = vmul.f32 %v621_v54, %v54_v58 }
 0x101   :  { %v56_v61 = vmul.f32 0.5, %v55_v60 }
 0x103   :  { %v57_v62 = vsub.f32 1.5, %v56_v61 }
 0x104   :  { %v623_v63 = vpop.eup %622 }
 0x105   :  { %v58_v0 = vmul.f32 %v621_v54, %v57_v62  ;;  %v64_v1 = vmul.f32 %v623_v63, %v52_v55  ;;  %vm70_vm4 = vweird.f32 %v623_v63 }
 0x106   :  { %vm71_vm6 = vmor %vm69_vm5, %vm70_vm4 }
 0x107   :  { %v65_v2 = vmul.f32 %v623_v63, %v64_v1  ;;  %v62_v3 = vsel %vm61_vm3, %v621_v54, %v58_v0 }
 0x108   :  { %v73_v7 = vmul.f32 %v62_v3, %v677_v12  ;;  %v125_v12 = vld [vmem:[%s954_s4] sm:$0xf] }
 0x109   :  { %v66_v4 = vmul.f32 0.5, %v65_v2  ;;  %v127_v21 = vperm.slane %v125_v12, 0  ;;  %v128_v22 = vperm.slane %v125_v12, 1  ;;  %v129_v28 = vperm.slane %v125_v12, 2 }
 0x10a   :  { %v79_v13 = vmul.f32 %v616_v6, %v73_v7  ;;  %v130_v29 = vperm.slane %v125_v12, 3 }
 0x10b   :  { %v67_v5 = vsub.f32 1.5, %v66_v4 }
 0x10c   :  { %v85_v17 = vadd.f32 %v617_v11, %v79_v13 }
 0x10d   :  { %v68_v8 = vmul.f32 %v623_v63, %v67_v5 }
 0x10f   :  { %v72_v10 = vsel %vm71_vm6, %v623_v63, %v68_v8 }
 0x110   :  { %v74_v14 = vmul.f32 %v72_v10, %v682_v16 }
 0x112   :  { %v80_v15 = vmul.f32 %v616_v6, %v74_v14 }
 0x114   :  { %v86_v18 = vadd.f32 %v617_v11, %v80_v15 }
 0x116   :  { %v613_v19 = vpack.c.bf16 %v86_v18, %v85_v17 }
 0x118   :  { %614 = vst [vmem:[#allocation2] sm:$0xff] %v613_v19  }
 0x11f   :  { %v573_v20 = vld [vmem:[#allocation2] sm:$0xff] }
 0x120   :  { %309 = vmatmul.bf16.vlgmr.msra.gmra.mxu0 %v573_v20  ;;  %323 = vmatmul.bf16.vlgmr.msra.gmra.mxu1 %v573_v20 }
 0x121   :  { %337 = vmatmul.bf16.vlgmr.msra.gmra.mxu2 %v573_v20  ;;  %351 = vmatmul.bf16.vlgmr.msra.gmra.mxu3 %v573_v20 }
 0x19d   :  { %v310_v23 = vpop.f32.mrf.mxu0  ;;  %v324_v24 = vpop.f32.mrf.mxu1 }
 0x19e   :  { %v896_v25 = vadd.f32 %v310_v23, %v127_v21  ;;  %v898_v16 = vadd.f32 %v324_v24, %v128_v22 }
 0x1a0   :  { %v357_v26 = vmul.f32 %v896_v25, %v896_v25  ;;  %v358_v27 = vmul.f32 %v898_v16, %v898_v16 }
 0x1a2   :  { %v365_v30 = vmul.f32 %v357_v26, %v896_v25  ;;  %v366_v31 = vmul.f32 %v358_v27, %v898_v16 }
 0x1a4   :  { %v373_v32 = vmul.f32 0.044715, %v365_v30  ;;  %v374_v33 = vmul.f32 0.044715, %v366_v31  ;;  %v338_v34 = vpop.f32.mrf.mxu2  ;;  %v352_v35 = vpop.f32.mrf.mxu3 }
 0x1a5   :  { %v906_v36 = vadd.f32 %v338_v34, %v129_v28  ;;  %v908_v37 = vadd.f32 %v352_v35, %v130_v29  ;;  %v312_v38 = vpop.f32.mrf.mxu0  ;;  %v326_v39 = vpop.f32.mrf.mxu1 }
 0x1a6   :  { %v381_v40 = vadd.f32 %v373_v32, %v896_v25  ;;  %v382_v41 = vadd.f32 %v374_v33, %v898_v16  ;;  %v912_v42 = vadd.f32 %v312_v38, %v127_v21  ;;  %v914_v43 = vadd.f32 %v326_v39, %v128_v22 }
 0x1a7   :  { %v359_v44 = vmul.f32 %v906_v36, %v906_v36  ;;  %v360_v45 = vmul.f32 %v908_v37, %v908_v37 }
 0x1a8   :  { %v389_v46 = vmul.f32 0.7978846, %v381_v40  ;;  %v390_v47 = vmul.f32 0.7978846, %v382_v41  ;;  %v361_v48 = vmul.f32 %v912_v42, %v912_v42  ;;  %v362_v49 = vmul.f32 %v914_v43, %v914_v43 }
 0x1a9   :  { %v367_v50 = vmul.f32 %v359_v44, %v906_v36  ;;  %v368_v51 = vmul.f32 %v360_v45, %v908_v37 }
 0x1aa   :  { %624 = vtanh.f32 %v389_v46  ;;  %v369_v9 = vmul.f32 %v361_v48, %v912_v42  ;;  %v370_v52 = vmul.f32 %v362_v49, %v914_v43 }
 0x1ab   :  { %626 = vtanh.f32 %v390_v47  ;;  %v375_v53 = vmul.f32 0.044715, %v367_v50  ;;  %v376_v54 = vmul.f32 0.044715, %v368_v51 }
 0x1ac   :  { %v377_v55 = vmul.f32 0.044715, %v369_v9  ;;  %v378_v56 = vmul.f32 0.044715, %v370_v52  ;;  %v340_v57 = vpop.f32.mrf.mxu2  ;;  %v354_v58 = vpop.f32.mrf.mxu3 }
 0x1ad   :  { %v383_v59 = vadd.f32 %v375_v53, %v906_v36  ;;  %v384_v60 = vadd.f32 %v376_v54, %v908_v37  ;;  %v341_v61 = vadd.f32 %v340_v57, %v129_v28  ;;  %v355_v62 = vadd.f32 %v354_v58, %v130_v29 }
 0x1ae   :  { %v385_v63 = vadd.f32 %v377_v55, %v912_v42  ;;  %v386_v0 = vadd.f32 %v378_v56, %v914_v43 }
 0x1af   :  { %v391_v1 = vmul.f32 0.7978846, %v383_v59  ;;  %v392_v2 = vmul.f32 0.7978846, %v384_v60  ;;  %v363_v3 = vmul.f32 %v341_v61, %v341_v61  ;;  %v364_v4 = vmul.f32 %v355_v62, %v355_v62 }
 0x1b0   :  { %v625_v5 = vpop.eup %624  ;;  %v393_v6 = vmul.f32 0.7978846, %v385_v63  ;;  %v394_v7 = vmul.f32 0.7978846, %v386_v0 }
 0x1b1   :  { %v627_v8 = vpop.eup %626  ;;  %v405_v10 = vadd.f32 1.0, %v625_v5  ;;  %628 = vtanh.f32 %v391_v1  ;;  %v371_v11 = vmul.f32 %v363_v3, %v341_v61  ;;  %v372_v13 = vmul.f32 %v364_v4, %v355_v62 }
 0x1b2   :  { %v406_v14 = vadd.f32 1.0, %v627_v8  ;;  %630 = vtanh.f32 %v392_v2 }
 0x1b3   :  { %v413_v15 = vmul.f32 0.5, %v405_v10  ;;  %632 = vtanh.f32 %v393_v6  ;;  %v379_v17 = vmul.f32 0.044715, %v371_v11  ;;  %v380_v18 = vmul.f32 0.044715, %v372_v13 }
 0x1b4   :  { %v414_v19 = vmul.f32 0.5, %v406_v14  ;;  %634 = vtanh.f32 %v394_v7 }
 0x1b5   :  { %v421_v20 = vmul.f32 %v413_v15, %v896_v25  ;;  %v387_v12 = vadd.f32 %v379_v17, %v341_v61  ;;  %v388_v21 = vadd.f32 %v380_v18, %v355_v62 }
 0x1b6   :  { %v422_v22 = vmul.f32 %v414_v19, %v898_v16 }
 0x1b7   :  { %v629_v23 = vpop.eup %628  ;;  %v395_v24 = vmul.f32 0.7978846, %v387_v12  ;;  %v396_v26 = vmul.f32 0.7978846, %v388_v21 }
 0x1b8   :  { %v631_v27 = vpop.eup %630  ;;  %v429_v28 = vpack.c.bf16 %v422_v22, %v421_v20  ;;  %v407_v29 = vadd.f32 1.0, %v629_v23 }
 0x1b9   :  { %v633_v30 = vpop.eup %632  ;;  %v408_v31 = vadd.f32 1.0, %v631_v27  ;;  %636 = vtanh.f32 %v395_v24 }
 0x1ba   :  { %v635_v32 = vpop.eup %634  ;;  %433 = vst [vmem:[%s955_s5] sm:$0xff] %v429_v28  ;;  %v415_v33 = vmul.f32 0.5, %v407_v29  ;;  %v409_v25 = vadd.f32 1.0, %v633_v30  ;;  %638 = vtanh.f32 %v396_v26 }
 0x1bb   :  { %v416_v34 = vmul.f32 0.5, %v408_v31  ;;  %v410_v35 = vadd.f32 1.0, %v635_v32 }
 0x1bc   :  { %v423_v16 = vmul.f32 %v415_v33, %v906_v36  ;;  %v417_v38 = vmul.f32 0.5, %v409_v25 }
 0x1bd   :  { %v424_v39 = vmul.f32 %v416_v34, %v908_v37  ;;  %v418_v40 = vmul.f32 0.5, %v410_v35 }
 0x1be   :  { %v425_v41 = vmul.f32 %v417_v38, %v912_v42 }
 0x1bf   :  { %v637_v44 = vpop.eup %636  ;;  %v430_v45 = vpack.c.bf16 %v424_v39, %v423_v16  ;;  %v426_v46 = vmul.f32 %v418_v40, %v914_v43 }
 0x1c0   :  { %v639_v47 = vpop.eup %638  ;;  %v411_v48 = vadd.f32 1.0, %v637_v44 }
 0x1c1   :  { %434 = vst [vmem:[%s955_s5 + $0x8] sm:$0xff] %v430_v45  ;;  %v431_v49 = vpack.c.bf16 %v426_v46, %v425_v41  ;;  %v412_v50 = vadd.f32 1.0, %v639_v47 }
 0x1c2   :  { %v419_v51 = vmul.f32 0.5, %v411_v48 }
 0x1c3   :  { %435 = vst [vmem:[%s955_s5 + $0x10] sm:$0xff] %v431_v49  ;;  %v420_v36 = vmul.f32 0.5, %v412_v50 }
 0x1c4   :  { %v427_v37 = vmul.f32 %v419_v51, %v341_v61 }
 0x1c5   :  { %v428_v42 = vmul.f32 %v420_v36, %v355_v62 }
 0x1c7   :  { %v432_v9 = vpack.c.bf16 %v428_v42, %v427_v37 }
 0x1c9   :  { %436 = vst [vmem:[%s955_s5 + $0x18] sm:$0xff] %v432_v9 }

// kernel: solospeech_tse_forward.25
= control target key start
LH: loop header
LB: loop body
LE: loop exit
PB: predicated region body
PF: predicated region fallthrough
CT: control target
= control target key end

     0   :  { %s734_s1 = inlined_call_operand.vmem [shape: bf16[512,128], index: 1, kind: input, shape index: {}]   ;;  %s735_s0 = inlined_call_operand.vmem [shape: bf16[16,512], index: 0, kind: input, shape index: {}]   ;;  %s736_s2 = inlined_call_operand.vmem [shape: f32[1,128], index: 2, kind: input, shape index: {}]   ;;  %s737_s3 = inlined_call_operand.vmem [shape: bf16[16,128], index: 3, kind: input, shape index: {}]   ;;  %s738_s4 = inlined_call_operand.vmem [shape: bf16[16,128], index: 4, kind: output, shape index: {}]  }
   0x1   :  { %v545_v0 = vld [vmem:[%s734_s1 + $0x38] sm:$0xff]  ;;  %v544_v4 = vld [vmem:[%s734_s1 + $0x30] sm:$0xff]  ;;  %v543_v8 = vld [vmem:[%s734_s1 + $0x28] sm:$0xff] }
   0x2   :  { %v553_v1 = vld [vmem:[%s734_s1 + $0x78] sm:$0xff]  ;;  %305 = vmatpush.bf16.msra.mxu0 %v545_v0  ;;  %v552_v5 = vld [vmem:[%s734_s1 + $0x70] sm:$0xff]  ;;  %v551_v9 = vld [vmem:[%s734_s1 + $0x68] sm:$0xff] }
   0x3   :  { %v561_v2 = vld [vmem:[%s734_s1 + $0xb8] sm:$0xff]  ;;  %319 = vmatpush.bf16.msra.mxu1 %v553_v1  ;;  %v560_v6 = vld [vmem:[%s734_s1 + $0xb0] sm:$0xff]  ;;  %v559_v10 = vld [vmem:[%s734_s1 + $0xa8] sm:$0xff] }
   0x4   :  { %v569_v3 = vld [vmem:[%s734_s1 + $0xf8] sm:$0xff]  ;;  %333 = vmatpush.bf16.msra.mxu2 %v561_v2  ;;  %v568_v7 = vld [vmem:[%s734_s1 + $0xf0] sm:$0xff]  ;;  %v567_v11 = vld [vmem:[%s734_s1 + $0xe8] sm:$0xff] }
   0x5   :  { %347 = vmatpush.bf16.msra.mxu3 %v569_v3  ;;  %v542_v12 = vld [vmem:[%s734_s1 + $0x20] sm:$0xff]  ;;  %v541_v16 = vld [vmem:[%s734_s1 + $0x18] sm:$0xff]  ;;  %v540_v20 = vld [vmem:[%s734_s1 + $0x10] sm:$0xff] }
   0x6   :  { %306 = vmatpush.bf16.msra.mxu0 %v544_v4  ;;  %v550_v13 = vld [vmem:[%s734_s1 + $0x60] sm:$0xff]  ;;  %v549_v17 = vld [vmem:[%s734_s1 + $0x58] sm:$0xff]  ;;  %v548_v21 = vld [vmem:[%s734_s1 + $0x50] sm:$0xff] }
   0x7   :  { %320 = vmatpush.bf16.msra.mxu1 %v552_v5  ;;  %v558_v14 = vld [vmem:[%s734_s1 + $0xa0] sm:$0xff]  ;;  %v557_v18 = vld [vmem:[%s734_s1 + $0x98] sm:$0xff]  ;;  %v556_v22 = vld [vmem:[%s734_s1 + $0x90] sm:$0xff] }
   0x8   :  { %334 = vmatpush.bf16.msra.mxu2 %v560_v6  ;;  %v566_v15 = vld [vmem:[%s734_s1 + $0xe0] sm:$0xff]  ;;  %v565_v19 = vld [vmem:[%s734_s1 + $0xd8] sm:$0xff]  ;;  %v564_v23 = vld [vmem:[%s734_s1 + $0xd0] sm:$0xff] }
   0x9   :  { %348 = vmatpush.bf16.msra.mxu3 %v568_v7  ;;  %v539_v24 = vld [vmem:[%s734_s1 + $0x8] sm:$0xff]  ;;  %v538_v28 = vld [vmem:[%s734_s1] sm:$0xff]  ;;  %v536_v33 = vld [vmem:[%s735_s0 + $0xc] sm:$0xf0] }
   0xa   :  { %307 = vmatpush.bf16.msra.mxu0 %v543_v8  ;;  %v547_v25 = vld [vmem:[%s734_s1 + $0x48] sm:$0xff]  ;;  %v546_v29 = vld [vmem:[%s734_s1 + $0x40] sm:$0xff]  ;;  %v394_v35 = vld [vmem:[%s735_s0 + $0x10] sm:$0xf0] }
   0xb   :  { %321 = vmatpush.bf16.msra.mxu1 %v551_v9  ;;  %v555_v26 = vld [vmem:[%s734_s1 + $0x88] sm:$0xff]  ;;  %v554_v30 = vld [vmem:[%s734_s1 + $0x80] sm:$0xff]  ;;  %v537_v37 = vld [vmem:[%s735_s0 + $0x14] sm:$0xf0] }
   0xc   :  { %335 = vmatpush.bf16.msra.mxu2 %v559_v10  ;;  %v563_v27 = vld [vmem:[%s734_s1 + $0xc8] sm:$0xff]  ;;  %v562_v31 = vld [vmem:[%s734_s1 + $0xc0] sm:$0xff]  ;;  %v402_v39 = vld [vmem:[%s735_s0 + $0x18] sm:$0xf0] }
   0xd   :  { %349 = vmatpush.bf16.msra.mxu3 %v567_v11  ;;  %v392_v32 = vld [vmem:[%s735_s0] sm:$0xf]  ;;  %v534_v34 = vld [vmem:[%s735_s0 + $0x4] sm:$0xf]  ;;  %v400_v36 = vld [vmem:[%s735_s0 + $0x8] sm:$0xf] }
   0xe   :  { %308 = vmatpush.bf16.msra.mxu0 %v542_v12  ;;  %v535_v38 = vld [vmem:[%s735_s0 + $0xc] sm:$0xf]  ;;  %v393_v40 = vor.u32 %v536_v33, %v392_v32  ;;  %v397_v41 = vor.u32 %v534_v34, %v394_v35  ;;  %v401_v42 = vor.u32 %v537_v37, %v400_v36  ;;  %v579_v53 = vld [vmem:[%s736_s2] ss:$0 sm:$0xff] }
   0xf   :  { %322 = vmatpush.bf16.msra.mxu1 %v550_v13  ;;  %v405_v43 = vor.u32 %v535_v38, %v402_v39  ;;  %v571_v55 = vld [vmem:[%s737_s3] sm:$0xff]  }
  0x10   :  { %336 = vmatpush.bf16.msra.mxu2 %v558_v14  ;;  %v572_v60 = vunpack.c.l.bf16 %v571_v55  ;;  %v573_v62 = vunpack.c.h.bf16 %v571_v55 }
  0x11   :  { %350 = vmatpush.bf16.msra.mxu3 %v566_v15 }
  0x12   :  { %309 = vmatpush.bf16.msra.mxu0 %v541_v16 }
  0x13   :  { %323 = vmatpush.bf16.msra.mxu1 %v549_v17 }
  0x14   :  { %337 = vmatpush.bf16.msra.mxu2 %v557_v18 }
  0x15   :  { %351 = vmatpush.bf16.msra.mxu3 %v565_v19 }
  0x16   :  { %310 = vmatpush.bf16.msra.mxu0 %v540_v20 }
  0x17   :  { %324 = vmatpush.bf16.msra.mxu1 %v548_v21 }
  0x18   :  { %338 = vmatpush.bf16.msra.mxu2 %v556_v22 }
  0x19   :  { %352 = vmatpush.bf16.msra.mxu3 %v564_v23 }
  0x1a   :  { %311 = vmatpush.bf16.msra.mxu0 %v539_v24 }
  0x1b   :  { %325 = vmatpush.bf16.msra.mxu1 %v547_v25 }
  0x1c   :  { %339 = vmatpush.bf16.msra.mxu2 %v555_v26 }
  0x1d   :  { %353 = vmatpush.bf16.msra.mxu3 %v563_v27 }
  0x1e   :  { %312 = vmatpush.bf16.msra.mxu0 %v538_v28 }
  0x1f   :  { %326 = vmatpush.bf16.msra.mxu1 %v546_v29 }
  0x20   :  { %340 = vmatpush.bf16.msra.mxu2 %v554_v30 }
  0x21   :  { %354 = vmatpush.bf16.msra.mxu3 %v562_v31  ;;  %313 = vmatmul.bf16.vlgmr.msra.gmra.mxu0 %v393_v40 }
  0x22   :  { %327 = vmatmul.bf16.vlgmr.msra.gmra.mxu1 %v397_v41 }
  0x23   :  { %341 = vmatmul.bf16.vlgmr.msra.gmra.mxu2 %v401_v42 }
  0x24   :  { %355 = vmatmul.bf16.vlgmr.msra.gmra.mxu3 %v405_v43 }
  0x9e   :  { %v314_v44 = vpop.f32.mrf.mxu0 }
  0x9f   :  { %v328_v45 = vpop.f32.mrf.mxu1 }
  0xa0   :  { %v329_v46 = vadd.f32 %v328_v45, %v314_v44 }
  0xa6   :  { %v342_v47 = vpop.f32.mrf.mxu2  ;;  %v316_v50 = vpop.f32.mrf.mxu0 }
  0xa7   :  { %v356_v48 = vpop.f32.mrf.mxu3  ;;  %v343_v49 = vadd.f32 %v342_v47, %v329_v46  ;;  %v330_v51 = vpop.f32.mrf.mxu1 }
  0xa8   :  { %v331_v54 = vadd.f32 %v330_v51, %v316_v50 }
  0xa9   :  { %v357_v52 = vadd.f32 %v356_v48, %v343_v49 }
  0xab   :  { %v374_v59 = vadd.f32 %v579_v53, %v357_v52 }
  0xad   :  { %v380_v0 = vadd.f32 %v572_v60, %v374_v59 }
  0xae   :  { %v344_v56 = vpop.f32.mrf.mxu2 }
  0xaf   :  { %v345_v57 = vadd.f32 %v344_v56, %v331_v54  ;;  %v358_v58 = vpop.f32.mrf.mxu3 }
  0xb1   :  { %v359_v61 = vadd.f32 %v358_v58, %v345_v57 }
  0xb3   :  { %v375_v63 = vadd.f32 %v579_v53, %v359_v61 }
  0xb5   :  { %v381_v1 = vadd.f32 %v573_v62, %v375_v63 }
  0xb7   :  { %v577_v2 = vpack.c.bf16 %v381_v1, %v380_v0 }
  0xb9   :  { %578 = vst [vmem:[%s738_s4] sm:$0xff] %v577_v2  }

// kernel: solospeech_tse_forward.34
= control target key start
LH: loop header
LB: loop body
LE: loop exit
PB: predicated region body
PF: predicated region fallthrough
CT: control target
= control target key end

     0   :  { %v340_v3 = vmov 128.0   ;;  %s501_s0 = inlined_call_operand.vmem [shape: bf16[16,128], index: 0, kind: input, shape index: {}]   ;;  %s502_s1 = inlined_call_operand.vmem [shape: f32[1,128], index: 1, kind: input, shape index: {}]   ;;  %s503_s2 = inlined_call_operand.vmem [shape: f32[1,128], index: 2, kind: input, shape index: {}]   ;;  %s504_s3 = inlined_call_operand.vmem [shape: bf16[128,256], index: 3, kind: input, shape index: {}]   ;;  %s505_s4 = inlined_call_operand.vmem [shape: f32[1,256], index: 4, kind: input, shape index: {}]   ;;  %s506_s5 = inlined_call_operand.vmem [shape: bf16[16,256], index: 5, kind: output, shape index: {}]  }
   0x1   :  { %v323_v0 = vld [vmem:[%s501_s0] sm:$0xff]   ;;  %334 = vrcp.f32 %v340_v3  ;;  %v299_v18 = vld [vmem:[%s504_s3 + $0x70] sm:$0xf]  ;;  %v321_v19 = vld [vmem:[%s504_s3 + $0x74] sm:$0xf0] }
   0x2   :  { %v324_v1 = vunpack.c.l.bf16 %v323_v0  ;;  %v325_v2 = vunpack.c.h.bf16 %v323_v0  ;;  %v320_v20 = vld [vmem:[%s504_s3 + $0x74] sm:$0xf]  ;;  %v300_v21 = vor.u32 %v321_v19, %v299_v18  ;;  %v301_v22 = vld [vmem:[%s504_s3 + $0x78] sm:$0xf0]  ;;  %v291_v24 = vld [vmem:[%s504_s3 + $0x60] sm:$0xf] }
   0x3   :  { %v304_v23 = vor.u32 %v320_v20, %v301_v22  ;;  %v319_v25 = vld [vmem:[%s504_s3 + $0x64] sm:$0xf0]  ;;  %v318_v26 = vld [vmem:[%s504_s3 + $0x64] sm:$0xf]  ;;  %v293_v28 = vld [vmem:[%s504_s3 + $0x68] sm:$0xf0] }
   0x4   :  { %28 = vadd.xlane.f32.xlu0 %v324_v1  ;;  %201 = vmatpush.bf16.msra.mxu0 %v300_v21  ;;  %v292_v27 = vor.u32 %v319_v25, %v291_v24  ;;  %v296_v29 = vor.u32 %v318_v26, %v293_v28  ;;  %v283_v30 = vld [vmem:[%s504_s3 + $0x50] sm:$0xf]  ;;  %v317_v31 = vld [vmem:[%s504_s3 + $0x54] sm:$0xf0]  ;;  %v316_v32 = vld [vmem:[%s504_s3 + $0x54] sm:$0xf] }
   0x5   :  { %215 = vmatpush.bf16.msra.mxu1 %v304_v23  ;;  %v284_v33 = vor.u32 %v317_v31, %v283_v30  ;;  %v285_v34 = vld [vmem:[%s504_s3 + $0x58] sm:$0xf0]  ;;  %v275_v36 = vld [vmem:[%s504_s3 + $0x40] sm:$0xf]  ;;  %v315_v37 = vld [vmem:[%s504_s3 + $0x44] sm:$0xf0] }
   0x6   :  { %v288_v35 = vor.u32 %v316_v32, %v285_v34  ;;  %v314_v38 = vld [vmem:[%s504_s3 + $0x44] sm:$0xf]  ;;  %v276_v39 = vor.u32 %v315_v37, %v275_v36  ;;  %v277_v40 = vld [vmem:[%s504_s3 + $0x48] sm:$0xf0]  ;;  %v267_v42 = vld [vmem:[%s504_s3 + $0x30] sm:$0xf] }
   0x7   :  { %v335_v4 = vpop.eup %334  ;;  %v280_v41 = vor.u32 %v314_v38, %v277_v40  ;;  %v313_v43 = vld [vmem:[%s504_s3 + $0x34] sm:$0xf0]  ;;  %v312_v44 = vld [vmem:[%s504_s3 + $0x34] sm:$0xf]  ;;  %v269_v46 = vld [vmem:[%s504_s3 + $0x38] sm:$0xf0] }
   0x8   :  { %v33_v5 = vmul.f32 128.0, %v335_v4  ;;  %vm37_vm0 = vweird.f32 %v335_v4  ;;  %202 = vmatpush.bf16.msra.mxu0 %v292_v27  ;;  %v268_v45 = vor.u32 %v313_v43, %v267_v42  ;;  %v272_v48 = vor.u32 %v312_v44, %v269_v46  ;;  %v259_v50 = vld [vmem:[%s504_s3 + $0x20] sm:$0xf]  ;;  %v311_v51 = vld [vmem:[%s504_s3 + $0x24] sm:$0xf0] }
   0x9   :  { %216 = vmatpush.bf16.msra.mxu1 %v296_v29  ;;  %v310_v52 = vld [vmem:[%s504_s3 + $0x24] sm:$0xf]  ;;  %v260_v54 = vor.u32 %v311_v51, %v259_v50  ;;  %v261_v55 = vld [vmem:[%s504_s3 + $0x28] sm:$0xf0]  ;;  %v251_v57 = vld [vmem:[%s504_s3 + $0x10] sm:$0xf] }
   0xa   :  { %v34_v6 = vsub.f32 1.0, %v33_v5  ;;  %v264_v56 = vor.u32 %v310_v52, %v261_v55  ;;  %v309_v58 = vld [vmem:[%s504_s3 + $0x14] sm:$0xf0]  ;;  %v308_v59 = vld [vmem:[%s504_s3 + $0x14] sm:$0xf] }
   0xb   :  { %v252_v60 = vor.u32 %v309_v58, %v251_v57  ;;  %v253_v61 = vld [vmem:[%s504_s3 + $0x18] sm:$0xf0]  ;;  %v243_v62 = vld [vmem:[%s504_s3] sm:$0xf]  ;;  %v307_v63 = vld [vmem:[%s504_s3 + $0x4] sm:$0xf0] }
   0xc   :  { %30 = vadd.xlane.f32.xlu0 %v325_v2  ;;  %v35_v7 = vmul.f32 %v335_v4, %v34_v6  ;;  %203 = vmatpush.bf16.msra.mxu0 %v284_v33  ;;  %v245_v3 = vld [vmem:[%s504_s3 + $0x8] sm:$0xf0]  ;;  %v244_v5 = vor.u32 %v307_v63, %v243_v62  ;;  %v332_v22 = vld [vmem:[%s502_s1] ss:$0 sm:$0xff] }
   0xd   :  { %217 = vmatpush.bf16.msra.mxu1 %v288_v35  ;;  %v333_v26 = vld [vmem:[%s503_s2] ss:$0 sm:$0xff] }
   0xe   :  { %v36_v8 = vadd.f32 %v335_v4, %v35_v7 }
  0x10   :  { %v374_v9 = vsel %vm37_vm0, %v335_v4, %v36_v8  ;;  %204 = vmatpush.bf16.msra.mxu0 %v276_v39 }
  0x11   :  { %218 = vmatpush.bf16.msra.mxu1 %v280_v41 }
  0x14   :  { %205 = vmatpush.bf16.msra.mxu0 %v268_v45 }
  0x15   :  { %219 = vmatpush.bf16.msra.mxu1 %v272_v48 }
  0x18   :  { %206 = vmatpush.bf16.msra.mxu0 %v260_v54 }
  0x19   :  { %220 = vmatpush.bf16.msra.mxu1 %v264_v56 }
  0x1c   :  { %207 = vmatpush.bf16.msra.mxu0 %v252_v60 }
  0x20   :  { %208 = vmatpush.bf16.msra.mxu0 %v244_v5 }
  0x77   :  { %v29_v10 = vpop.xlane.xlu0 %28 }
  0x78   :  { %v39_v11 = vmul.f32 %v374_v9, %v29_v10 }
  0x7a   :  { %v377_v12 = vsub.f32 %v324_v1, %v39_v11  ;;  %v256_v1 = vor.u32 %v308_v59, %v253_v61 }
  0x7c   :  { %v43_v13 = vmul.f32 %v377_v12, %v377_v12  ;;  %221 = vmatpush.bf16.msra.mxu1 %v256_v1 }
  0x7e   :  { %45 = vadd.xlane.f32.xlu1 %v43_v13 }
  0x7f   :  { %v31_v14 = vpop.xlane.xlu0 %30 }
  0x80   :  { %v40_v15 = vmul.f32 %v374_v9, %v31_v14 }
  0x82   :  { %v382_v16 = vsub.f32 %v325_v2, %v40_v15  ;;  %v306_v2 = vld [vmem:[%s504_s3 + $0x4] sm:$0xf] }
  0x83   :  { %v248_v6 = vor.u32 %v306_v2, %v245_v3 }
  0x84   :  { %v44_v17 = vmul.f32 %v382_v16, %v382_v16 }
  0x85   :  { %222 = vmatpush.bf16.msra.mxu1 %v248_v6 }
  0x86   :  { %47 = vadd.xlane.f32.xlu1 %v44_v17 }
  0xf1   :  { %v46_v47 = vpop.xlane.xlu1 %45 }
  0xf2   :  { %v49_v49 = vmul.f32 %v46_v47, %v374_v9 }
  0xf4   :  { %v51_v53 = vadd.f32 1e-05, %v49_v49 }
  0xf6   :  { %336 = vrsqrt.f32 %v51_v53  ;;  %vm59_vm2 = vweird.f32 %v51_v53 }
  0xf9   :  { %v48_v0 = vpop.xlane.xlu1 %47 }
  0xfa   :  { %v50_v4 = vmul.f32 %v48_v0, %v374_v9 }
  0xfc   :  { %v337_v7 = vpop.eup %336  ;;  %v52_v8 = vadd.f32 1e-05, %v50_v4 }
  0xfd   :  { %v54_v10 = vmul.f32 %v337_v7, %v51_v53  ;;  %vm60_vm1 = vweird.f32 %v337_v7 }
  0xfe   :  { %338 = vrsqrt.f32 %v52_v8  ;;  %vm61_vm3 = vmor %vm59_vm2, %vm60_vm1  ;;  %vm69_vm5 = vweird.f32 %v52_v8 }
  0xff   :  { %v55_v11 = vmul.f32 %v337_v7, %v54_v10 }
 0x101   :  { %v56_v13 = vmul.f32 0.5, %v55_v11 }
 0x103   :  { %v57_v14 = vsub.f32 1.5, %v56_v13 }
 0x104   :  { %v339_v15 = vpop.eup %338 }
 0x105   :  { %v58_v17 = vmul.f32 %v337_v7, %v57_v14  ;;  %v64_v18 = vmul.f32 %v339_v15, %v52_v8  ;;  %vm70_vm4 = vweird.f32 %v339_v15 }
 0x106   :  { %vm71_vm6 = vmor %vm69_vm5, %vm70_vm4 }
 0x107   :  { %v65_v19 = vmul.f32 %v339_v15, %v64_v18  ;;  %v62_v9 = vsel %vm61_vm3, %v337_v7, %v58_v17 }
 0x108   :  { %v73_v23 = vmul.f32 %v62_v9, %v377_v12  ;;  %v109_v12 = vld [vmem:[%s505_s4] sm:$0x3] }
 0x109   :  { %v66_v20 = vmul.f32 0.5, %v65_v19  ;;  %v111_v34 = vperm.slane %v109_v12, 0  ;;  %v112_v35 = vperm.slane %v109_v12, 1 }
 0x10a   :  { %v79_v27 = vmul.f32 %v332_v22, %v73_v23 }
 0x10b   :  { %v67_v21 = vsub.f32 1.5, %v66_v20 }
 0x10c   :  { %v85_v30 = vadd.f32 %v333_v26, %v79_v27 }
 0x10d   :  { %v68_v24 = vmul.f32 %v339_v15, %v67_v21 }
 0x10f   :  { %v72_v25 = vsel %vm71_vm6, %v339_v15, %v68_v24 }
 0x110   :  { %v74_v28 = vmul.f32 %v72_v25, %v382_v16 }
 0x112   :  { %v80_v29 = vmul.f32 %v332_v22, %v74_v28 }
 0x114   :  { %v86_v31 = vadd.f32 %v333_v26, %v80_v29 }
 0x116   :  { %v329_v32 = vpack.c.bf16 %v86_v31, %v85_v30 }
 0x118   :  { %330 = vst [vmem:[#allocation2] sm:$0xff] %v329_v32  }
 0x11f   :  { %v305_v33 = vld [vmem:[#allocation2] sm:$0xff] }
 0x120   :  { %209 = vmatmul.bf16.vlgmr.msra.gmra.mxu0 %v305_v33  ;;  %223 = vmatmul.bf16.vlgmr.msra.gmra.mxu1 %v305_v33 }
 0x19d   :  { %v210_v36 = vpop.f32.mrf.mxu0  ;;  %v224_v37 = vpop.f32.mrf.mxu1 }
 0x19e   :  { %v211_v38 = vadd.f32 %v210_v36, %v111_v34  ;;  %v225_v39 = vadd.f32 %v224_v37, %v112_v35 }
 0x1a0   :  { %v229_v40 = vpack.c.bf16 %v225_v39, %v211_v38 }
 0x1a2   :  { %231 = vst [vmem:[%s506_s5] sm:$0xff] %v229_v40 }
 0x1a5   :  { %v212_v16 = vpop.f32.mrf.mxu0  ;;  %v226_v41 = vpop.f32.mrf.mxu1 }
 0x1a6   :  { %v213_v42 = vadd.f32 %v212_v16, %v111_v34  ;;  %v227_v43 = vadd.f32 %v226_v41, %v112_v35 }
 0x1a8   :  { %v230_v44 = vpack.c.bf16 %v227_v43, %v213_v42 }
 0x1aa   :  { %232 = vst [vmem:[%s506_s5 + $0x8] sm:$0xff] %v230_v44 }

// kernel: solospeech_tse_forward.26
= control target key start
LH: loop header
LB: loop body
LE: loop exit
PB: predicated region body
PF: predicated region fallthrough
CT: control target
= control target key end

     0   :  { %v103_v3 = vmov 128.0   ;;  %s136_s0 = inlined_call_operand.vmem [shape: bf16[16,128], index: 0, kind: input, shape index: {}]   ;;  %s137_s1 = inlined_call_operand.vmem [shape: f32[1,128], index: 1, kind: input, shape index: {}]   ;;  %s138_s2 = inlined_call_operand.vmem [shape: f32[1,128], index: 2, kind: input, shape index: {}]   ;;  %s139_s3 = inlined_call_operand.vmem [shape: bf16[16,128], index: 3, kind: output, shape index: {}]  }
   0x1   :  { %v86_v0 = vld [vmem:[%s136_s0] sm:$0xff]   ;;  %97 = vrcp.f32 %v103_v3 }
   0x2   :  { %v87_v1 = vunpack.c.l.bf16 %v86_v0  ;;  %v88_v2 = vunpack.c.h.bf16 %v86_v0  ;;  %v95_v36 = vld [vmem:[%s137_s1] ss:$0 sm:$0xff] }
   0x3   :  { %v96_v40 = vld [vmem:[%s138_s2] ss:$0 sm:$0xff] }
   0x4   :  { %18 = vadd.xlane.f32.xlu0 %v87_v1 }
   0x7   :  { %v98_v4 = vpop.eup %97 }
   0x8   :  { %v23_v5 = vmul.f32 128.0, %v98_v4  ;;  %vm27_vm0 = vweird.f32 %v98_v4 }
   0xa   :  { %v24_v6 = vsub.f32 1.0, %v23_v5 }
   0xc   :  { %20 = vadd.xlane.f32.xlu0 %v88_v2  ;;  %v25_v7 = vmul.f32 %v98_v4, %v24_v6 }
   0xe   :  { %v26_v8 = vadd.f32 %v98_v4, %v25_v7 }
  0x10   :  { %v28_v9 = vsel %vm27_vm0, %v98_v4, %v26_v8 }
  0x77   :  { %v19_v10 = vpop.xlane.xlu0 %18 }
  0x78   :  { %v29_v11 = vmul.f32 %v28_v9, %v19_v10 }
  0x7a   :  { %v31_v12 = vsub.f32 %v87_v1, %v29_v11 }
  0x7c   :  { %v33_v13 = vmul.f32 %v31_v12, %v31_v12 }
  0x7e   :  { %35 = vadd.xlane.f32.xlu1 %v33_v13 }
  0x7f   :  { %v21_v14 = vpop.xlane.xlu0 %20 }
  0x80   :  { %v30_v15 = vmul.f32 %v28_v9, %v21_v14 }
  0x82   :  { %v32_v16 = vsub.f32 %v88_v2, %v30_v15 }
  0x84   :  { %v34_v17 = vmul.f32 %v32_v16, %v32_v16 }
  0x86   :  { %37 = vadd.xlane.f32.xlu1 %v34_v17 }
  0xf1   :  { %v36_v18 = vpop.xlane.xlu1 %35 }
  0xf2   :  { %v39_v19 = vmul.f32 %v36_v18, %v28_v9 }
  0xf4   :  { %v41_v20 = vadd.f32 1e-05, %v39_v19 }
  0xf6   :  { %99 = vrsqrt.f32 %v41_v20  ;;  %vm49_vm2 = vweird.f32 %v41_v20 }
  0xf9   :  { %v38_v21 = vpop.xlane.xlu1 %37 }
  0xfa   :  { %v40_v22 = vmul.f32 %v38_v21, %v28_v9 }
  0xfc   :  { %v100_v23 = vpop.eup %99  ;;  %v42_v24 = vadd.f32 1e-05, %v40_v22 }
  0xfd   :  { %v44_v25 = vmul.f32 %v100_v23, %v41_v20  ;;  %vm50_vm1 = vweird.f32 %v100_v23 }
  0xfe   :  { %101 = vrsqrt.f32 %v42_v24  ;;  %vm51_vm3 = vmor %vm49_vm2, %vm50_vm1  ;;  %vm59_vm5 = vweird.f32 %v42_v24 }
  0xff   :  { %v45_v26 = vmul.f32 %v100_v23, %v44_v25 }
 0x101   :  { %v46_v27 = vmul.f32 0.5, %v45_v26 }
 0x103   :  { %v47_v28 = vsub.f32 1.5, %v46_v27 }
 0x104   :  { %v102_v29 = vpop.eup %101 }
 0x105   :  { %v48_v30 = vmul.f32 %v100_v23, %v47_v28  ;;  %v54_v31 = vmul.f32 %v102_v29, %v42_v24  ;;  %vm60_vm4 = vweird.f32 %v102_v29 }
 0x106   :  { %vm61_vm6 = vmor %vm59_vm5, %vm60_vm4 }
 0x107   :  { %v55_v32 = vmul.f32 %v102_v29, %v54_v31  ;;  %v52_v33 = vsel %vm51_vm3, %v100_v23, %v48_v30 }
 0x108   :  { %v63_v37 = vmul.f32 %v52_v33, %v31_v12 }
 0x109   :  { %v56_v34 = vmul.f32 0.5, %v55_v32 }
 0x10a   :  { %v69_v41 = vmul.f32 %v95_v36, %v63_v37 }
 0x10b   :  { %v57_v35 = vsub.f32 1.5, %v56_v34 }
 0x10c   :  { %v75_v44 = vadd.f32 %v96_v40, %v69_v41 }
 0x10d   :  { %v58_v38 = vmul.f32 %v102_v29, %v57_v35 }
 0x10f   :  { %v62_v39 = vsel %vm61_vm6, %v102_v29, %v58_v38 }
 0x110   :  { %v64_v42 = vmul.f32 %v62_v39, %v32_v16 }
 0x112   :  { %v70_v43 = vmul.f32 %v95_v36, %v64_v42 }
 0x114   :  { %v76_v45 = vadd.f32 %v96_v40, %v70_v43 }
 0x116   :  { %v92_v46 = vpack.c.bf16 %v76_v45, %v75_v44 }
 0x118   :  { %93 = vst [vmem:[%s139_s3] sm:$0xff] %v92_v46  }

// kernel: solospeech_tse_forward.35
= control target key start
LH: loop header
LB: loop body
LE: loop exit
PB: predicated region body
PF: predicated region fallthrough
CT: control target
= control target key end

     0   :  { %s1010_s15 = smov 0   ;;  %s1012_s16 = smov 0   ;;  %s1138_s0 = inlined_call_operand.vmem [shape: bf16[2,16,128], index: 0, kind: input, shape index: {}]   ;;  %s1139_s1 = inlined_call_operand.vmem [shape: bf16[2,8,256], index: 1, kind: input, shape index: {}, may-alias: {1,2}]   ;;  %s1140_s2 = inlined_call_operand.vmem [shape: bf16[2,8,256], index: 2, kind: input, shape index: {}, may-alias: {1,2}]   ;;  %s1141_s3 = inlined_call_operand.vmem [shape: f32[2,1,8], index: 3, kind: input, shape index: {}]   ;;  %s1142_s4 = inlined_call_operand.vmem [shape: bf16[2,16,128], index: 4, kind: output, shape index: {}]  }
   0x1   :  { %s1014_s17 = smov 0  }
   0x2 LB: > { %s33_s18 = sadd.s32 1, %s975_s16  ;;  %p867_p0 = scmp.ge.s32.totalorder %s979_s17, 1  ;;  %s979_s17 = sphi %s1014_s17, %s14_s17   ;;  %s975_s16 = sphi %s1012_s16, %s1144_s16   ;;  %s971_s15 = sphi %s1010_s15, %s1143_s15  }
   0x3   : > { %p35_p1 = scmp.ge.s32.totalorder %s33_s18, 2  ;;  %p236_p2 = scmp.lt.s32.totalorder %s979_s17, 3 }
   0x5   : > { %s1146_s18 = smov (%p35_p1, %s33_s18), 0  ;;  %p237_p3 = pnand %p867_p0, %p236_p2 }
   0x6   : > { %p296_p4 = scmp.lt.s32.totalorder (!%p237_p3), %s971_s15, 1  ;;  %s981_s29 = smov (!%p237_p3), 64  }
   0x7   : > { %240 = sbr.rel (%p237_p3) target bundleno = 866 (0x362), region = 36 }
   0xc   : > { %s1148_s15 = smov (!%p296_p4, %s971_s15), 1  ;;  %vm354_vm0 = vcmask 523264   ;;  %vm401_vm1 = vcmask 64512   ;;  %vm345_vm2 = vcmask 7168   ;;  %v982_v21 = vmov -inf  }
   0xd   : > { %s1031_s19 = sshll.u32 %s1148_s15, 3  ;;  %s329_s28 = scalar_lea.vmem %s1141_s3, %s1148_s15  ;;  %346 = vst.msk [vmem:[#allocation2] sm:$0xff] %vm345_vm2, %v982_v21  ;;  %v983_v22 = vmov 0   ;;  %v984_v36 = vmov 0.0   ;;  %vm465_vm3 = vcmask 1043456  }
   0xe   : > { %s313_s22 = scalar_lea.vmem %s1139_s1, %s1031_s19  ;;  %s303_s25 = scalar_lea.vmem %s1138_s0, %s1031_s19  ;;  %v932_v17 = vld [vmem:[%s329_s28] ss:$0 sm:$0xff]  ;;  %925 = vset.pattern.permute.xlu1 %v983_v22  ;;  %924 = vset.pattern.permute.xlu2 %v983_v22  ;;  %347 = vst.msk [vmem:[#allocation2 + $0x8] sm:$0xff] %vm345_vm2, %v982_v21 }
   0xf   : > { %v367_v0 = vld [vmem:[%s313_s22] sm:$0xf]  ;;  %926 = vset.pattern.permute.xlu0 %v983_v22  ;;  %348 = vst.msk [vmem:[#allocation2 + $0x10] sm:$0xff] %vm345_vm2, %v982_v21  ;;  %s797_s6 = scalar_lea.vmem %s1140_s2, %s1031_s19  ;;  %s338_s9 = scalar_lea.vmem %s1142_s4, %s1031_s19 }
  0x10   : > { %v888_v1 = vld [vmem:[%s303_s25] sm:$0xff]   ;;  %v492_v2 = vunpack.c.l.b16 %v367_v0  ;;  %v383_v5 = vsel %vm354_vm0, %v367_v0, 0  ;;  %349 = vst.msk [vmem:[#allocation2 + $0x18] sm:$0xff] %vm345_vm2, %v982_v21 }
  0x11   : > { %v889_v3 = vunpack.c.l.bf16 %v888_v1  ;;  %v890_v4 = vunpack.c.h.bf16 %v888_v1  ;;  %392 = vmatpush.bf16.xpose.msra.mxu0 %v383_v5  ;;  %350 = vst.msk [vmem:[#allocation3] sm:$0xff] %vm345_vm2, %v984_v36  ;;  %v876_v43 = vld [vmem:[%s797_s6 + $0x4] sm:$0xf] }
  0x12   : > { %v493_v6 = vpack.c.b16 %v492_v2, %v492_v2  ;;  %351 = vst.msk [vmem:[#allocation3 + $0x8] sm:$0xff] %vm345_vm2, %v984_v36  ;;  %v581_v46 = vunpack.c.l.b16 %v876_v43  ;;  %v467_v57 = vsel %vm465_vm3, %v876_v43, 0 }
  0x13   : > { %v363_v7 = vmul.f32 0.125, %v889_v3  ;;  %v364_v8 = vmul.f32 0.125, %v890_v4  ;;  %352 = vst.msk [vmem:[#allocation3 + $0x10] sm:$0xff] %vm345_vm2, %v984_v36  ;;  %476 = vmatpush.bf16.msra.mxu1 %v467_v57 }
  0x14   : > { %494 = vrot.lane.b32.xlu0 %v493_v6, %s981_s29  ;;  %v1059_v23 = vld [vmem:[#allocation2] sm:$0xff]  ;;  %353 = vst.msk [vmem:[#allocation3 + $0x18] sm:$0xff] %vm345_vm2, %v984_v36  ;;  %v582_v48 = vpack.c.b16 %v581_v46, %v581_v46 }
  0x15   : > { %v365_v9 = vpack.c.bf16 %v363_v7, %v363_v7  ;;  %v366_v10 = vpack.c.bf16 %v364_v8, %v364_v8  ;;  %355 = vst.msk [vmem:[#allocation4] sm:$0xff] %vm354_vm0, %v984_v36  ;;  %v400_v47 = vld [vmem:[#allocation2 + $0x8] sm:$0xff] }
  0x16   : > { %356 = vst.msk [vmem:[#allocation4 + $0x8] sm:$0xff] %vm354_vm0, %v984_v36  ;;  %v517_v37 = vld [vmem:[#allocation2 + $0x10] sm:$0xff] }
  0x17   : > { %v375_v11 = vunpack.c.l.b16 %v365_v9  ;;  %v376_v12 = vunpack.c.l.b16 %v366_v10  ;;  %357 = vst.msk [vmem:[#allocation4 + $0x10] sm:$0xff] %vm354_vm0, %v984_v36  ;;  %v1088_v41 = vld [vmem:[#allocation2 + $0x18] sm:$0xff] }
  0x18   : > { %358 = vst.msk [vmem:[#allocation4 + $0x18] sm:$0xff] %vm354_vm0, %v984_v36 }
  0x19   : > { %v377_v13 = vpack.c.b16 %v376_v12, %v375_v11 }
  0x1b   : > { %877 = vmatmul.msk.bf16.vlgmr.msra.gmra.mxu0 %vm354_vm0, %v377_v13 }
  0x1c   : > { %489 = vrot.lane.b32.xlu0 %v377_v13, %s981_s29 }
  0x86   : > { %v495_v14 = vpop.permute.xlu0 %494 }
  0x87   : > { %v500_v15 = vsel %vm354_vm0, %v495_v14, 0 }
  0x88   : > { %509 = vmatpush.bf16.xpose.msra.mxu2 %v500_v15 }
  0x8e   : > { %v490_v16 = vpop.permute.xlu0 %489 }
  0x8f   : > { %879 = vmatmul.msk.bf16.vlgmr.msra.gmra.mxu2 %vm354_vm0, %v490_v16 }
  0x98   : > { %v394_v18 = vpop.f32.mrf.mxu0 }
  0x99   : > { %v1051_v19 = vadd.f32 %v932_v17, %v394_v18 }
  0x9b   : > { %v402_v20 = vsel %vm401_vm1, %v1051_v19, -inf }
  0x9c   : > { %403 = vmax.xlane.f32.xlu0 %v402_v20 }
  0xa0   : > { %v396_v32 = vpop.f32.mrf.mxu0 }
  0xa1   : > { %v1070_v34 = vadd.f32 %v932_v17, %v396_v32 }
  0xa3   : > { %v405_v35 = vsel %vm401_vm1, %v1070_v34, -inf }
 0x10f   : > { %v404_v24 = vpop.xlane.xlu0 %403 }
 0x110   : > { %v1062_v25 = vmax.f32 %v1059_v23, %v404_v24 }
 0x112   : > { %v410_v26 = vsub.f32 %v1059_v23, %v1062_v25  ;;  %487 = vst.msk [vmem:[#allocation2] sm:$0xff] %vm345_vm2, %v1062_v25  ;;  %v511_v27 = vpop.f32.mrf.mxu2 }
 0x113   : > { %v512_v28 = vadd.f32 %v932_v17, %v511_v27  ;;  %v550_v27 = vld [vmem:[#allocation3 + $0x10] sm:$0xff] }
 0x115   : > { %v519_v29 = vsel %vm401_vm1, %v512_v28, -inf }
 0x116   : > { %520 = vmax.xlane.f32.xlu1 %v519_v29 }
 0x11a   : > { %v513_v30 = vpop.f32.mrf.mxu2 }
 0x11b   : > { %v514_v31 = vadd.f32 %v932_v17, %v513_v30  ;;  %v412_v17 = vmul.f32 1.442695, %v410_v26 }
 0x11d   : > { %v522_v33 = vsel %vm401_vm1, %v514_v31, -inf }
 0x11e   : > { %523 = vmax.xlane.f32.xlu1 %v522_v33 }
 0x126   : > { %406 = vmax.xlane.f32.xlu1 %v405_v35  ;;  %v433_v35 = vld [vmem:[#allocation3 + $0x8] sm:$0xff] }
 0x13f   : > { %418 = vperm.xlu1 %925, %v1062_v25   ;;  %v551_v25 = vld [vmem:[#allocation3 + $0x18] sm:$0xff] }
 0x189   : > { %v521_v38 = vpop.xlane.xlu1 %520 }
 0x18a   : > { %v525_v39 = vmax.f32 %v517_v37, %v521_v38 }
 0x18c   : > { %v527_v40 = vsub.f32 %v517_v37, %v525_v39  ;;  %609 = vst.msk [vmem:[#allocation2 + $0x10] sm:$0xff] %vm345_vm2, %v525_v39  ;;  %535 = vperm.xlu2 %924, %v525_v39  }
 0x18e   : > { %v529_v11 = vmul.f32 1.442695, %v527_v40  ;;  %v565_v40 = vld [vmem:[#allocation4 + $0x10] sm:$0xff] }
 0x191   : > { %v524_v42 = vpop.xlane.xlu1 %523 }
 0x192   : > { %v1091_v44 = vmax.f32 %v1088_v41, %v524_v42 }
 0x194   : > { %v528_v45 = vsub.f32 %v1088_v41, %v1091_v44  ;;  %610 = vst.msk [vmem:[#allocation2 + $0x18] sm:$0xff] %vm345_vm2, %v1091_v44  ;;  %540 = vperm.xlu2 %924, %v1091_v44  }
 0x196   : > { %v531_v24 = vmul.f32 1.442695, %v528_v45 }
 0x199   : > { %v407_v49 = vpop.xlane.xlu1 %406 }
 0x19a   : > { %v409_v50 = vmax.f32 %v400_v47, %v407_v49 }
 0x19c   : > { %583 = vrot.lane.b32.xlu2 %v582_v48, %s981_s29  ;;  %v411_v51 = vsub.f32 %v400_v47, %v409_v50  ;;  %488 = vst.msk [vmem:[#allocation2 + $0x8] sm:$0xff] %vm345_vm2, %v409_v50  ;;  %v448_v47 = vld [vmem:[#allocation4 + $0x8] sm:$0xff] }
 0x19e   : > { %v414_v14 = vmul.f32 1.442695, %v411_v51 }
 0x1a4   : > { %423 = vperm.xlu2 %924, %v409_v50  }
 0x1b1   : > { %v419_v52 = vpop.permute.xlu1 %418 }
 0x1b2   : > { %v426_v53 = vsub.f32 %v1051_v19, %v419_v52  ;;  %v432_v19 = vld [vmem:[#allocation3] sm:$0xff] }
 0x1b4   : > { %v428_v54 = vmul.f32 1.442695, %v426_v53  ;;  %v566_v53 = vld [vmem:[#allocation4 + $0x18] sm:$0xff] }
 0x1b6   : > { %933 = vpow2.f32 %v428_v54 }
 0x1bc   : > { %v934_v55 = vpop.eup %933 }
 0x1bd   : > { %v436_v56 = vsel %vm401_vm1, %v934_v55, 0.0 }
 0x1be   : > { %437 = vadd.xlane.f32.xlu0 %v436_v56 }
 0x1e6   : > { %v536_v58 = vpop.permute.xlu2 %535 }
 0x1e7   : > { %v543_v59 = vsub.f32 %v512_v28, %v536_v58 }
 0x1e9   : > { %v545_v60 = vmul.f32 1.442695, %v543_v59 }
 0x1eb   : > { %935 = vpow2.f32 %v545_v60 }
 0x1ee   : > { %v541_v61 = vpop.permute.xlu2 %540 }
 0x1ef   : > { %v544_v62 = vsub.f32 %v514_v31, %v541_v61 }
 0x1f1   : > { %v936_v63 = vpop.eup %935  ;;  %v547_v0 = vmul.f32 1.442695, %v544_v62 }
 0x1f2   : > { %v554_v1 = vsel %vm401_vm1, %v936_v63, 0.0 }
 0x1f3   : > { %937 = vpow2.f32 %v547_v0  ;;  %555 = vadd.xlane.f32.xlu2 %v554_v1 }
 0x1f6   : > { %v584_v2 = vpop.permute.xlu2 %583 }
 0x1f7   : > { %v589_v3 = vsel %vm465_vm3, %v584_v2, 0 }
 0x1f8   : > { %598 = vmatpush.bf16.msra.mxu3 %v589_v3 }
 0x1f9   : > { %v938_v4 = vpop.eup %937 }
 0x1fa   : > { %v557_v5 = vsel %vm401_vm1, %v938_v4, 0.0  ;;  %v579_v6 = vpack.c.bf16 %v938_v4, %v936_v63  ;;  %v447_v63 = vld [vmem:[#allocation4] sm:$0xff] }
 0x1fb   : > { %558 = vadd.xlane.f32.xlu1 %v557_v5 }
 0x1fc   : > { %880 = vmatmul.msk.bf16.vlgmr.msra.gmra.mxu3 %vm401_vm1, %v579_v6 }
 0x1fe   : > { %v424_v7 = vpop.permute.xlu2 %423 }
 0x1ff   : > { %v427_v8 = vsub.f32 %v1070_v34, %v424_v7 }
 0x201   : > { %v430_v9 = vmul.f32 1.442695, %v427_v8 }
 0x203   : > { %939 = vpow2.f32 %v430_v9 }
 0x204   : > { %941 = vpow2.f32 %v529_v11 }
 0x205   : > { %943 = vpow2.f32 %v414_v14 }
 0x206   : > { %945 = vpow2.f32 %v412_v17 }
 0x207   : > { %947 = vpow2.f32 %v531_v24 }
 0x209   : > { %v940_v10 = vpop.eup %939 }
 0x20a   : > { %v439_v12 = vsel %vm401_vm1, %v940_v10, 0.0  ;;  %v461_v13 = vpack.c.bf16 %v940_v10, %v934_v55  ;;  %v942_v15 = vpop.eup %941 }
 0x20b   : > { %440 = vadd.xlane.f32.xlu0 %v439_v12  ;;  %v944_v16 = vpop.eup %943  ;;  %v552_v28 = vmul.f32 %v942_v15, %v550_v27 }
 0x20c   : > { %878 = vmatmul.msk.bf16.vlgmr.msra.gmra.mxu1 %vm401_vm1, %v461_v13  ;;  %v946_v18 = vpop.eup %945  ;;  %v435_v36 = vmul.f32 %v944_v16, %v433_v35 }
 0x20d   : > { %v434_v20 = vmul.f32 %v946_v18, %v432_v19  ;;  %v948_v23 = vpop.eup %947 }
 0x20e   : > { %v553_v26 = vmul.f32 %v948_v23, %v551_v25 }
 0x214   : > { %569 = vperm.xlu1 %925, %v942_v15  }
 0x21c   : > { %456 = vperm.xlu1 %925, %v944_v16  }
 0x231   : > { %v438_v21 = vpop.xlane.xlu0 %437 }
 0x232   : > { %v442_v22 = vadd.f32 %v438_v21, %v434_v20 }
 0x234   : > { %445 = vst.msk [vmem:[#allocation3] sm:$0xff] %vm345_vm2, %v442_v22 }
 0x23b   : > { %v616_v39 = vld [vmem:[#allocation3] sm:$0xff] }
 0x266   : > { %v556_v29 = vpop.xlane.xlu2 %555 }
 0x267   : > { %v560_v30 = vadd.f32 %v556_v29, %v552_v28 }
 0x269   : > { %562 = vst.msk [vmem:[#allocation3 + $0x10] sm:$0xff] %vm345_vm2, %v560_v30 }
 0x26e   : > { %v559_v31 = vpop.xlane.xlu1 %558 }
 0x26f   : > { %v561_v32 = vadd.f32 %v559_v31, %v553_v26 }
 0x270   : > { %v660_v33 = vld [vmem:[#allocation3 + $0x10] sm:$0xff] }
 0x271   : > { %563 = vst.msk [vmem:[#allocation3 + $0x18] sm:$0xff] %vm345_vm2, %v561_v32  ;;  %664 = vperm.xlu2 %924, %v660_v33  }
 0x278   : > { %v661_v34 = vld [vmem:[#allocation3 + $0x18] sm:$0xff] }
 0x279   : > { %574 = vperm.xlu2 %924, %v948_v23   ;;  %669 = vperm.xlu0 %926, %v661_v34  }
 0x27e   : > { %v441_v37 = vpop.xlane.xlu0 %440 }
 0x27f   : > { %v443_v38 = vadd.f32 %v441_v37, %v435_v36  ;;  %v600_v43 = vpop.f32.mrf.mxu3 }
 0x281   : > { %446 = vst.msk [vmem:[#allocation3 + $0x8] sm:$0xff] %vm345_vm2, %v443_v38  ;;  %451 = vperm.xlu0 %926, %v946_v18   ;;  %620 = vperm.xlu2 %924, %v616_v39  }
 0x286   : > { %v570_v41 = vpop.permute.xlu1 %569 }
 0x287   : > { %v577_v42 = vmul.f32 %v570_v41, %v565_v40  ;;  %v602_v56 = vpop.f32.mrf.mxu3 }
 0x288   : > { %v617_v44 = vld [vmem:[#allocation3 + $0x8] sm:$0xff] }
 0x289   : > { %v605_v45 = vadd.f32 %v600_v43, %v577_v42  ;;  %v478_v46 = vpop.f32.mrf.mxu1  ;;  %625 = vperm.xlu2 %924, %v617_v44  }
 0x28b   : > { %607 = vst.msk [vmem:[#allocation4 + $0x10] sm:$0xff] %vm354_vm0, %v605_v45 }
 0x28e   : > { %v457_v48 = vpop.permute.xlu1 %456 }
 0x28f   : > { %v460_v49 = vmul.f32 %v457_v48, %v448_v47 }
 0x291   : > { %v480_v50 = vpop.f32.mrf.mxu1 }
 0x292   : > { %v484_v51 = vadd.f32 %v480_v50, %v460_v49  ;;  %v658_v18 = vld [vmem:[#allocation4 + $0x10] sm:$0xff] }
 0x294   : > { %486 = vst.msk [vmem:[#allocation4 + $0x8] sm:$0xff] %vm354_vm0, %v484_v51 }
 0x2cb   : > { %v665_v52 = vpop.permute.xlu2 %664 }
 0x2cc   : > { %949 = vrcp.f32 %v665_v52  ;;  %v683_v4 = vand.u32 2147483648, %v665_v52  ;;  %vm677_vm5 = vweird.f32 %v665_v52  ;;  %v681_v6 = vand.u32 2147483647, %v665_v52 }
 0x2ce   : > { %v684_v13 = vor.u32 1.1754944e-38, %v683_v4  ;;  %vm682_vm8 = vcmp.eq.f32.partialorder %v681_v6, 8.507059e+37 }
 0x2d2   : > { %v950_v58 = vpop.eup %949 }
 0x2d3   : > { %v575_v54 = vpop.permute.xlu2 %574  ;;  %v673_v59 = vmul.f32 %v950_v58, %v665_v52  ;;  %vm678_vm4 = vweird.f32 %v950_v58 }
 0x2d4   : > { %v578_v55 = vmul.f32 %v575_v54, %v566_v53  ;;  %vm679_vm6 = vmor %vm677_vm5, %vm678_vm4 }
 0x2d5   : > { %v674_v60 = vsub.f32 1.0, %v673_v59 }
 0x2d6   : > { %v606_v57 = vadd.f32 %v602_v56, %v578_v55 }
 0x2d7   : > { %v675_v62 = vmul.f32 %v950_v58, %v674_v60 }
 0x2d8   : > { %608 = vst.msk [vmem:[#allocation4 + $0x18] sm:$0xff] %vm354_vm0, %v606_v57 }
 0x2d9   : > { %v676_v1 = vadd.f32 %v950_v58, %v675_v62 }
 0x2db   : > { %v680_v12 = vsel %vm679_vm6, %v950_v58, %v676_v1  ;;  %v621_v27 = vpop.permute.xlu2 %620 }
 0x2dc   : > { %v685_v16 = vsel %vm682_vm8, %v684_v13, %v680_v12  ;;  %v639_v38 = vand.u32 2147483648, %v621_v27  ;;  %vm633_vm1 = vweird.f32 %v621_v27  ;;  %v637_v39 = vand.u32 2147483647, %v621_v27 }
 0x2dd   : > { %v686_v21 = vmul.f32 %v685_v16, %v658_v18 }
 0x2de   : > { %v640_v43 = vor.u32 1.1754944e-38, %v639_v38  ;;  %vm638_vm4 = vcmp.eq.f32.partialorder %v637_v39, 8.507059e+37 }
 0x2df   : > { %v659_v19 = vld [vmem:[#allocation4 + $0x18] sm:$0xff] }
 0x2e3   : > { %v626_v28 = vpop.permute.xlu2 %625 }
 0x2e4   : > { %v654_v35 = vand.u32 2147483648, %v626_v28  ;;  %vm648_vm14 = vweird.f32 %v626_v28  ;;  %v652_v37 = vand.u32 2147483647, %v626_v28 }
 0x2e6   : > { %v655_v41 = vor.u32 1.1754944e-38, %v654_v35  ;;  %vm653_vm3 = vcmp.eq.f32.partialorder %v652_v37, 8.507059e+37 }
 0x2eb   : > { %v670_v61 = vpop.permute.xlu0 %669 }
 0x2ec   : > { %951 = vrcp.f32 %v670_v61  ;;  %v698_v8 = vand.u32 2147483648, %v670_v61  ;;  %v696_v11 = vand.u32 2147483647, %v670_v61  ;;  %vm692_vm9 = vweird.f32 %v670_v61 }
 0x2ed   : > { %953 = vrcp.f32 %v626_v28 }
 0x2ee   : > { %v699_v15 = vor.u32 1.1754944e-38, %v698_v8  ;;  %vm697_vm11 = vcmp.eq.f32.partialorder %v696_v11, 8.507059e+37  ;;  %955 = vrcp.f32 %v621_v27 }
 0x2f2   : > { %v952_v0 = vpop.eup %951 }
 0x2f3   : > { %v688_v2 = vmul.f32 %v952_v0, %v670_v61  ;;  %v452_v3 = vpop.permute.xlu0 %451  ;;  %vm693_vm7 = vweird.f32 %v952_v0  ;;  %v954_v29 = vpop.eup %953 }
 0x2f4   : > { %v459_v5 = vmul.f32 %v452_v3, %v447_v63  ;;  %vm694_vm10 = vmor %vm692_vm9, %vm693_vm7  ;;  %v956_v30 = vpop.eup %955  ;;  %v644_v23 = vmul.f32 %v954_v29, %v626_v28  ;;  %vm649_vm12 = vweird.f32 %v954_v29 }
 0x2f5   : > { %v689_v7 = vsub.f32 1.0, %v688_v2  ;;  %v629_v25 = vmul.f32 %v956_v30, %v621_v27  ;;  %vm634_vm13 = vweird.f32 %v956_v30  ;;  %vm650_vm15 = vmor %vm648_vm14, %vm649_vm12 }
 0x2f6   : > { %v483_v9 = vadd.f32 %v478_v46, %v459_v5  ;;  %v645_v26 = vsub.f32 1.0, %v644_v23  ;;  %vm635_vm2 = vmor %vm633_vm1, %vm634_vm13  ;;  %v615_v46 = vld [vmem:[#allocation4 + $0x8] sm:$0xff] }
 0x2f7   : > { %v690_v10 = vmul.f32 %v952_v0, %v689_v7  ;;  %v630_v31 = vsub.f32 1.0, %v629_v25 }
 0x2f8   : > { %485 = vst.msk [vmem:[#allocation4] sm:$0xff] %vm354_vm0, %v483_v9  ;;  %v646_v32 = vmul.f32 %v954_v29, %v645_v26 }
 0x2f9   : > { %v691_v14 = vadd.f32 %v952_v0, %v690_v10  ;;  %v631_v33 = vmul.f32 %v956_v30, %v630_v31 }
 0x2fa   : > { %v647_v34 = vadd.f32 %v954_v29, %v646_v32 }
 0x2fb   : > { %v695_v17 = vsel %vm694_vm10, %v952_v0, %v691_v14  ;;  %v632_v36 = vadd.f32 %v956_v30, %v631_v33 }
 0x2fc   : > { %v700_v20 = vsel %vm697_vm11, %v699_v15, %v695_v17  ;;  %v651_v40 = vsel %vm650_vm15, %v954_v29, %v647_v34 }
 0x2fd   : > { %v701_v22 = vmul.f32 %v700_v20, %v659_v19  ;;  %v636_v42 = vsel %vm635_vm2, %v956_v30, %v632_v36  ;;  %v656_v45 = vsel %vm653_vm3, %v655_v41, %v651_v40 }
 0x2fe   : > { %v641_v47 = vsel %vm638_vm4, %v640_v43, %v636_v42  ;;  %v657_v50 = vmul.f32 %v656_v45, %v615_v46 }
 0x2ff   : > { %v927_v24 = vpack.i.bf16 %v701_v22, %v686_v21  ;;  %v614_v44 = vld [vmem:[#allocation4] sm:$0xff] }
 0x300   : > { %v642_v49 = vmul.f32 %v641_v47, %v614_v44 }
 0x301   : > { %928 = vrot.lane.b32.xlu2 %v927_v24, %s981_s29 }
 0x35b   : > { %v929_v48 = vpop.permute.xlu2 %928 }
 0x35c   : > { %v931_v51 = vunpack.i.h.bf16 %v929_v48  ;;  %v930_v52 = vunpack.i.l.bf16 %v929_v48 }
 0x35e   : > { %v711_v53 = vsel %vm354_vm0, %v657_v50, %v931_v51  ;;  %v710_v54 = vsel %vm354_vm0, %v642_v49, %v930_v52 }
 0x35f   : > { %v894_v55 = vpack.c.bf16 %v711_v53, %v710_v54 }
 0x361   : > { %895 = vst [vmem:[%s338_s9] sm:$0xff] %v894_v55  }
 0x362 PF: > { %s14_s17 = sadd.s32 1, %s979_s17   ;;  %s1143_s15 = smov %s975_s16 }
 0x363   : > { %p11_p5 = scmp.ge.s32.totalorder %s14_s17, 4   ;;  %s1144_s16 = smov %s1146_s18 }
 0x365   :  { %13 = sbr.rel (!%p11_p5) target bundleno = 2 (0x2), region = 86 }

// kernel: solospeech_tse_forward.37
= control target key start
LH: loop header
LB: loop body
LE: loop exit
PB: predicated region body
PF: predicated region fallthrough
CT: control target
= control target key end

     0   :  { %v836_v6 = vmov 128.0   ;;  %s1267_s0 = inlined_call_operand.vmem [shape: bf16[32,128], index: 0, kind: input, shape index: {}]   ;;  %s1268_s1 = inlined_call_operand.vmem [shape: f32[1,128], index: 1, kind: input, shape index: {}]   ;;  %s1269_s2 = inlined_call_operand.vmem [shape: f32[1,128], index: 2, kind: input, shape index: {}]   ;;  %s1270_s3 = inlined_call_operand.vmem [shape: bf16[128,512], index: 3, kind: input, shape index: {}]   ;;  %s1271_s4 = inlined_call_operand.vmem [shape: f32[1,512], index: 4, kind: input, shape index: {}]   ;;  %s1272_s5 = inlined_call_operand.vmem [shape: bf16[32,512], index: 5, kind: output, shape index: {}]  }
   0x1   :  { %v789_v0 = vld [vmem:[%s1267_s0 + $0x8] sm:$0xff]   ;;  %v772_v1 = vld [vmem:[%s1267_s0] sm:$0xff]   ;;  %794 = vrcp.f32 %v836_v6  ;;  %v769_v30 = vld [vmem:[%s1270_s3 + $0xec] sm:$0xf0] }
   0x2   :  { %v777_v2 = vunpack.c.l.bf16 %v789_v0  ;;  %v773_v3 = vunpack.c.l.bf16 %v772_v1  ;;  %v778_v4 = vunpack.c.h.bf16 %v789_v0  ;;  %v774_v5 = vunpack.c.h.bf16 %v772_v1  ;;  %v723_v29 = vld [vmem:[%s1270_s3 + $0xe0] sm:$0xf]  ;;  %v767_v31 = vld [vmem:[%s1270_s3 + $0xe4] sm:$0xf]  ;;  %v725_v33 = vld [vmem:[%s1270_s3 + $0xf0] sm:$0xf0] }
   0x3   :  { %v724_v32 = vor.u32 %v769_v30, %v723_v29  ;;  %v731_v34 = vld [vmem:[%s1270_s3 + $0xe8] sm:$0xf]  ;;  %v770_v35 = vld [vmem:[%s1270_s3 + $0xf4] sm:$0xf0]  ;;  %v728_v36 = vor.u32 %v767_v31, %v725_v33  ;;  %v768_v38 = vld [vmem:[%s1270_s3 + $0xec] sm:$0xf] }
   0x4   :  { %36 = vadd.xlane.f32.xlu1 %v777_v2  ;;  %32 = vadd.xlane.f32.xlu0 %v773_v3  ;;  %v732_v37 = vor.u32 %v770_v35, %v731_v34  ;;  %v733_v39 = vld [vmem:[%s1270_s3 + $0xf8] sm:$0xf0]  ;;  %v707_v41 = vld [vmem:[%s1270_s3 + $0xc0] sm:$0xf]  ;;  %v765_v42 = vld [vmem:[%s1270_s3 + $0xcc] sm:$0xf0] }
   0x5   :  { %361 = vmatpush.bf16.msra.mxu0 %v724_v32  ;;  %v736_v40 = vor.u32 %v768_v38, %v733_v39  ;;  %380 = vmatpush.bf16.msra.mxu1 %v728_v36  ;;  %v763_v43 = vld [vmem:[%s1270_s3 + $0xc4] sm:$0xf]  ;;  %v708_v44 = vor.u32 %v765_v42, %v707_v41  ;;  %v709_v45 = vld [vmem:[%s1270_s3 + $0xd0] sm:$0xf0]  ;;  %v715_v46 = vld [vmem:[%s1270_s3 + $0xc8] sm:$0xf] }
   0x6   :  { %399 = vmatpush.bf16.msra.mxu2 %v732_v37  ;;  %v766_v47 = vld [vmem:[%s1270_s3 + $0xd4] sm:$0xf0]  ;;  %v712_v48 = vor.u32 %v763_v43, %v709_v45  ;;  %v764_v50 = vld [vmem:[%s1270_s3 + $0xcc] sm:$0xf]  ;;  %v717_v51 = vld [vmem:[%s1270_s3 + $0xd8] sm:$0xf0] }
   0x7   :  { %v795_v7 = vpop.eup %794  ;;  %418 = vmatpush.bf16.msra.mxu3 %v736_v40  ;;  %v716_v49 = vor.u32 %v766_v47, %v715_v46  ;;  %v720_v52 = vor.u32 %v764_v50, %v717_v51  ;;  %v691_v53 = vld [vmem:[%s1270_s3 + $0xa0] sm:$0xf]  ;;  %v761_v54 = vld [vmem:[%s1270_s3 + $0xac] sm:$0xf0]  ;;  %v759_v55 = vld [vmem:[%s1270_s3 + $0xa4] sm:$0xf] }
   0x8   :  { %v41_v8 = vmul.f32 128.0, %v795_v7  ;;  %vm45_vm0 = vweird.f32 %v795_v7  ;;  %v692_v56 = vor.u32 %v761_v54, %v691_v53  ;;  %v693_v57 = vld [vmem:[%s1270_s3 + $0xb0] sm:$0xf0]  ;;  %v699_v58 = vld [vmem:[%s1270_s3 + $0xa8] sm:$0xf] }
   0x9   :  { %362 = vmatpush.bf16.msra.mxu0 %v708_v44  ;;  %381 = vmatpush.bf16.msra.mxu1 %v712_v48  ;;  %v762_v59 = vld [vmem:[%s1270_s3 + $0xb4] sm:$0xf0]  ;;  %v696_v60 = vor.u32 %v759_v55, %v693_v57  ;;  %v760_v62 = vld [vmem:[%s1270_s3 + $0xac] sm:$0xf]  ;;  %v701_v63 = vld [vmem:[%s1270_s3 + $0xb8] sm:$0xf0] }
   0xa   :  { %v42_v9 = vsub.f32 1.0, %v41_v8  ;;  %400 = vmatpush.bf16.msra.mxu2 %v716_v49  ;;  %v700_v61 = vor.u32 %v762_v59, %v699_v58  ;;  %v704_v0 = vor.u32 %v760_v62, %v701_v63  ;;  %v675_v1 = vld [vmem:[%s1270_s3 + $0x80] sm:$0xf]  ;;  %v683_v6 = vld [vmem:[%s1270_s3 + $0x88] sm:$0xf] }
   0xb   :  { %419 = vmatpush.bf16.msra.mxu3 %v720_v52  ;;  %v752_v31 = vld [vmem:[%s1270_s3 + $0x6c] sm:$0xf]  ;;  %v669_v32 = vld [vmem:[%s1270_s3 + $0x78] sm:$0xf0]  ;;  %v643_v36 = vld [vmem:[%s1270_s3 + $0x40] sm:$0xf] }
   0xc   :  { %38 = vadd.xlane.f32.xlu1 %v778_v4  ;;  %34 = vadd.xlane.f32.xlu0 %v774_v5  ;;  %v43_v10 = vmul.f32 %v795_v7, %v42_v9  ;;  %v672_v33 = vor.u32 %v752_v31, %v669_v32  ;;  %v749_v37 = vld [vmem:[%s1270_s3 + $0x4c] sm:$0xf0]  ;;  %v747_v38 = vld [vmem:[%s1270_s3 + $0x44] sm:$0xf]  ;;  %v645_v39 = vld [vmem:[%s1270_s3 + $0x50] sm:$0xf0] }
   0xd   :  { %363 = vmatpush.bf16.msra.mxu0 %v692_v56  ;;  %382 = vmatpush.bf16.msra.mxu1 %v696_v60  ;;  %v644_v40 = vor.u32 %v749_v37, %v643_v36  ;;  %v651_v41 = vld [vmem:[%s1270_s3 + $0x48] sm:$0xf]  ;;  %v750_v42 = vld [vmem:[%s1270_s3 + $0x54] sm:$0xf0]  ;;  %v748_v43 = vld [vmem:[%s1270_s3 + $0x4c] sm:$0xf]  ;;  %v648_v44 = vor.u32 %v747_v38, %v645_v39 }
   0xe   :  { %v44_v11 = vadd.f32 %v795_v7, %v43_v10  ;;  %401 = vmatpush.bf16.msra.mxu2 %v700_v61  ;;  %v756_v10 = vld [vmem:[%s1270_s3 + $0x8c] sm:$0xf]  ;;  %v652_v45 = vor.u32 %v750_v42, %v651_v41  ;;  %v653_v46 = vld [vmem:[%s1270_s3 + $0x58] sm:$0xf0]  ;;  %v627_v48 = vld [vmem:[%s1270_s3 + $0x20] sm:$0xf] }
   0xf   :  { %420 = vmatpush.bf16.msra.mxu3 %v704_v0  ;;  %v656_v47 = vor.u32 %v748_v43, %v653_v46  ;;  %v745_v49 = vld [vmem:[%s1270_s3 + $0x2c] sm:$0xf0]  ;;  %v743_v50 = vld [vmem:[%s1270_s3 + $0x24] sm:$0xf]  ;;  %v629_v54 = vld [vmem:[%s1270_s3 + $0x30] sm:$0xf0] }
  0x10   :  { %v873_v12 = vsel %vm45_vm0, %v795_v7, %v44_v11  ;;  %v758_v7 = vld [vmem:[%s1270_s3 + $0x94] sm:$0xf0]  ;;  %v685_v11 = vld [vmem:[%s1270_s3 + $0x98] sm:$0xf0]  ;;  %v628_v53 = vor.u32 %v745_v49, %v627_v48  ;;  %v635_v55 = vld [vmem:[%s1270_s3 + $0x28] sm:$0xf]  ;;  %v632_v59 = vor.u32 %v743_v50, %v629_v54 }
  0x11   :  { %v684_v9 = vor.u32 %v758_v7, %v683_v6  ;;  %v746_v56 = vld [vmem:[%s1270_s3 + $0x34] sm:$0xf0]  ;;  %v744_v61 = vld [vmem:[%s1270_s3 + $0x2c] sm:$0xf]  ;;  %v637_v62 = vld [vmem:[%s1270_s3 + $0x38] sm:$0xf0] }
  0x12   :  { %v636_v60 = vor.u32 %v746_v56, %v635_v55  ;;  %v611_v63 = vld [vmem:[%s1270_s3] sm:$0xf]  ;;  %v640_v0 = vor.u32 %v744_v61, %v637_v62  ;;  %v619_v7 = vld [vmem:[%s1270_s3 + $0x8] sm:$0xf] }
  0x13   :  { %402 = vmatpush.bf16.msra.mxu2 %v684_v9  ;;  %v792_v42 = vld [vmem:[%s1268_s1] ss:$0 sm:$0xff] }
  0x14   :  { %v793_v48 = vld [vmem:[%s1269_s2] ss:$0 sm:$0xff] }
  0x77   :  { %v37_v13 = vpop.xlane.xlu1 %36  ;;  %v33_v14 = vpop.xlane.xlu0 %32 }
  0x78   :  { %v49_v15 = vmul.f32 %v873_v12, %v37_v13  ;;  %v47_v16 = vmul.f32 %v873_v12, %v33_v14  ;;  %v688_v13 = vor.u32 %v756_v10, %v685_v11  ;;  %v659_v14 = vld [vmem:[%s1270_s3 + $0x60] sm:$0xf]  ;;  %v742_v11 = vld [vmem:[%s1270_s3 + $0x14] sm:$0xf0] }
  0x7a   :  { %v877_v17 = vsub.f32 %v777_v2, %v49_v15  ;;  %v879_v18 = vsub.f32 %v773_v3, %v47_v16  ;;  %v757_v2 = vld [vmem:[%s1270_s3 + $0x8c] sm:$0xf0]  ;;  %v755_v3 = vld [vmem:[%s1270_s3 + $0x84] sm:$0xf]  ;;  %421 = vmatpush.bf16.msra.mxu3 %v688_v13  ;;  %v740_v13 = vld [vmem:[%s1270_s3 + $0xc] sm:$0xf] }
  0x7b   :  { %v753_v15 = vld [vmem:[%s1270_s3 + $0x6c] sm:$0xf0]  ;;  %v751_v16 = vld [vmem:[%s1270_s3 + $0x64] sm:$0xf] }
  0x7c   :  { %v57_v19 = vmul.f32 %v877_v17, %v877_v17  ;;  %v55_v20 = vmul.f32 %v879_v18, %v879_v18 }
  0x7e   :  { %63 = vadd.xlane.f32.xlu0 %v57_v19  ;;  %59 = vadd.xlane.f32.xlu2 %v55_v20 }
  0x7f   :  { %v39_v21 = vpop.xlane.xlu1 %38  ;;  %v35_v22 = vpop.xlane.xlu0 %34  ;;  %422 = vmatpush.bf16.msra.mxu3 %v672_v33 }
  0x80   :  { %v50_v23 = vmul.f32 %v873_v12, %v39_v21  ;;  %v48_v24 = vmul.f32 %v873_v12, %v35_v22  ;;  %v660_v21 = vor.u32 %v753_v15, %v659_v14  ;;  %v661_v22 = vld [vmem:[%s1270_s3 + $0x70] sm:$0xf0]  ;;  %v621_v14 = vld [vmem:[%s1270_s3 + $0x18] sm:$0xf0] }
  0x81   :  { %v664_v29 = vor.u32 %v751_v16, %v661_v22 }
  0x82   :  { %v887_v25 = vsub.f32 %v778_v4, %v50_v23  ;;  %v889_v26 = vsub.f32 %v774_v5, %v48_v24  ;;  %v676_v4 = vor.u32 %v757_v2, %v675_v1  ;;  %v677_v5 = vld [vmem:[%s1270_s3 + $0x90] sm:$0xf0]  ;;  %v667_v23 = vld [vmem:[%s1270_s3 + $0x68] sm:$0xf]  ;;  %v754_v24 = vld [vmem:[%s1270_s3 + $0x74] sm:$0xf0] }
  0x83   :  { %v680_v8 = vor.u32 %v755_v3, %v677_v5  ;;  %v668_v30 = vor.u32 %v754_v24, %v667_v23  ;;  %423 = vmatpush.bf16.msra.mxu3 %v656_v47  ;;  %v739_v1 = vld [vmem:[%s1270_s3 + $0x4] sm:$0xf]  ;;  %v613_v2 = vld [vmem:[%s1270_s3 + $0x10] sm:$0xf0] }
  0x84   :  { %v58_v27 = vmul.f32 %v887_v25, %v887_v25  ;;  %v56_v28 = vmul.f32 %v889_v26, %v889_v26  ;;  %364 = vmatpush.bf16.msra.mxu0 %v676_v4  ;;  %v616_v10 = vor.u32 %v739_v1, %v613_v2 }
  0x85   :  { %383 = vmatpush.bf16.msra.mxu1 %v680_v8  ;;  %403 = vmatpush.bf16.msra.mxu2 %v668_v30 }
  0x86   :  { %65 = vadd.xlane.f32.xlu1 %v58_v27  ;;  %61 = vadd.xlane.f32.xlu2 %v56_v28 }
  0x87   :  { %424 = vmatpush.bf16.msra.mxu3 %v640_v0 }
  0x88   :  { %365 = vmatpush.bf16.msra.mxu0 %v660_v21  ;;  %v624_v21 = vor.u32 %v740_v13, %v621_v14 }
  0x89   :  { %384 = vmatpush.bf16.msra.mxu1 %v664_v29  ;;  %404 = vmatpush.bf16.msra.mxu2 %v652_v45 }
  0x8b   :  { %425 = vmatpush.bf16.msra.mxu3 %v624_v21 }
  0x8c   :  { %366 = vmatpush.bf16.msra.mxu0 %v644_v40 }
  0x8d   :  { %385 = vmatpush.bf16.msra.mxu1 %v648_v44  ;;  %405 = vmatpush.bf16.msra.mxu2 %v636_v60 }
  0x90   :  { %367 = vmatpush.bf16.msra.mxu0 %v628_v53 }
  0x91   :  { %386 = vmatpush.bf16.msra.mxu1 %v632_v59 }
  0x95   :  { %387 = vmatpush.bf16.msra.mxu1 %v616_v10 }
  0xf1   :  { %v60_v19 = vpop.xlane.xlu2 %59  ;;  %v64_v20 = vpop.xlane.xlu0 %63 }
  0xf2   :  { %v67_v27 = vmul.f32 %v60_v19, %v873_v12  ;;  %v69_v28 = vmul.f32 %v64_v20, %v873_v12  ;;  %v620_v19 = vor.u32 %v742_v11, %v619_v7 }
  0xf4   :  { %v1017_v34 = vadd.f32 1e-05, %v67_v27  ;;  %v1019_v35 = vadd.f32 1e-05, %v69_v28  ;;  %406 = vmatpush.bf16.msra.mxu2 %v620_v19 }
  0xf6   :  { %796 = vrsqrt.f32 %v1017_v34  ;;  %vm101_vm1 = vweird.f32 %v1019_v35  ;;  %vm81_vm5 = vweird.f32 %v1017_v34 }
  0xf7   :  { %798 = vrsqrt.f32 %v1019_v35 }
  0xf9   :  { %v66_v51 = vpop.xlane.xlu1 %65  ;;  %v62_v52 = vpop.xlane.xlu2 %61 }
  0xfa   :  { %v70_v57 = vmul.f32 %v66_v51, %v873_v12  ;;  %v68_v58 = vmul.f32 %v62_v52, %v873_v12  ;;  %v741_v12 = vld [vmem:[%s1270_s3 + $0xc] sm:$0xf0] }
  0xfb   :  { %v612_v6 = vor.u32 %v741_v12, %v611_v63 }
  0xfc   :  { %v797_v3 = vpop.eup %796  ;;  %v74_v4 = vadd.f32 1e-05, %v70_v57  ;;  %v72_v5 = vadd.f32 1e-05, %v68_v58 }
  0xfd   :  { %v799_v8 = vpop.eup %798  ;;  %v76_v9 = vmul.f32 %v797_v3, %v1017_v34  ;;  %368 = vmatpush.bf16.msra.mxu0 %v612_v6  ;;  %vm82_vm3 = vweird.f32 %v797_v3 }
  0xfe   :  { %v96_v15 = vmul.f32 %v799_v8, %v1019_v35  ;;  %800 = vrsqrt.f32 %v74_v4  ;;  %vm102_vm2 = vweird.f32 %v799_v8  ;;  %vm83_vm6 = vmor %vm81_vm5, %vm82_vm3  ;;  %vm111_vm7 = vweird.f32 %v74_v4 }
  0xff   :  { %v77_v16 = vmul.f32 %v797_v3, %v76_v9  ;;  %802 = vrsqrt.f32 %v72_v5  ;;  %vm103_vm4 = vmor %vm101_vm1, %vm102_vm2  ;;  %vm91_vm11 = vweird.f32 %v72_v5 }
 0x100   :  { %v97_v20 = vmul.f32 %v799_v8, %v96_v15 }
 0x101   :  { %v78_v22 = vmul.f32 0.5, %v77_v16 }
 0x102   :  { %v98_v23 = vmul.f32 0.5, %v97_v20 }
 0x103   :  { %v79_v24 = vsub.f32 1.5, %v78_v22 }
 0x104   :  { %v801_v27 = vpop.eup %800  ;;  %v99_v28 = vsub.f32 1.5, %v98_v23 }
 0x105   :  { %v803_v29 = vpop.eup %802  ;;  %v106_v30 = vmul.f32 %v801_v27, %v74_v4  ;;  %v80_v31 = vmul.f32 %v797_v3, %v79_v24  ;;  %vm112_vm8 = vweird.f32 %v801_v27 }
 0x106   :  { %v100_v32 = vmul.f32 %v799_v8, %v99_v28  ;;  %v86_v33 = vmul.f32 %v803_v29, %v72_v5  ;;  %vm113_vm9 = vmor %vm111_vm7, %vm112_vm8  ;;  %vm92_vm10 = vweird.f32 %v803_v29 }
 0x107   :  { %v107_v36 = vmul.f32 %v801_v27, %v106_v30  ;;  %v84_v35 = vsel %vm83_vm6, %v797_v3, %v80_v31  ;;  %vm93_vm12 = vmor %vm91_vm11, %vm92_vm10 }
 0x108   :  { %v87_v37 = vmul.f32 %v803_v29, %v86_v33  ;;  %v104_v38 = vsel %vm103_vm4, %v799_v8, %v100_v32  ;;  %v115_v34 = vmul.f32 %v84_v35, %v879_v18 }
 0x109   :  { %v108_v39 = vmul.f32 0.5, %v107_v36  ;;  %v117_v43 = vmul.f32 %v104_v38, %v877_v17 }
 0x10a   :  { %v88_v40 = vmul.f32 0.5, %v87_v37  ;;  %v123_v52 = vmul.f32 %v792_v42, %v115_v34 }
 0x10b   :  { %v109_v41 = vsub.f32 1.5, %v108_v39  ;;  %v125_v49 = vmul.f32 %v792_v42, %v117_v43 }
 0x10c   :  { %v89_v44 = vsub.f32 1.5, %v88_v40  ;;  %v131_v56 = vadd.f32 %v793_v48, %v123_v52 }
 0x10d   :  { %v110_v45 = vmul.f32 %v801_v27, %v109_v41  ;;  %v133_v55 = vadd.f32 %v793_v48, %v125_v49 }
 0x10e   :  { %v90_v46 = vmul.f32 %v803_v29, %v89_v44 }
 0x10f   :  { %v114_v47 = vsel %vm113_vm9, %v801_v27, %v110_v45 }
 0x110   :  { %v118_v50 = vmul.f32 %v114_v47, %v887_v25  ;;  %v94_v51 = vsel %vm93_vm12, %v803_v29, %v90_v46 }
 0x111   :  { %v116_v17 = vmul.f32 %v94_v51, %v889_v26  ;;  %v179_v26 = vld [vmem:[%s1271_s4] sm:$0xf] }
 0x112   :  { %v126_v53 = vmul.f32 %v792_v42, %v118_v50  ;;  %v1114_v61 = vperm.slane %v179_v26, 0  ;;  %v1116_v62 = vperm.slane %v179_v26, 1  ;;  %v1128_v4 = vperm.slane %v179_v26, 2 }
 0x113   :  { %v124_v54 = vmul.f32 %v792_v42, %v116_v17  ;;  %v1130_v5 = vperm.slane %v179_v26, 3 }
 0x114   :  { %v134_v18 = vadd.f32 %v793_v48, %v126_v53 }
 0x115   :  { %v132_v57 = vadd.f32 %v793_v48, %v124_v54 }
 0x116   :  { %v787_v58 = vpack.c.bf16 %v134_v18, %v133_v55 }
 0x117   :  { %v782_v59 = vpack.c.bf16 %v132_v57, %v131_v56 }
 0x118   :  { %790 = vst [vmem:[#allocation2 + $0x8] sm:$0xff] %v787_v58  }
 0x119   :  { %783 = vst [vmem:[#allocation2] sm:$0xff] %v782_v59  }
 0x11f   :  { %v738_v25 = vld [vmem:[#allocation2 + $0x8] sm:$0xff] }
 0x120   :  { %v737_v60 = vld [vmem:[#allocation2] sm:$0xff] }
 0x121   :  { %369 = vmatmul.bf16.vlgmr.msra.gmra.mxu0 %v737_v60  ;;  %388 = vmatmul.bf16.vlgmr.msra.gmra.mxu1 %v737_v60 }
 0x122   :  { %407 = vmatmul.bf16.vlgmr.msra.gmra.mxu2 %v737_v60  ;;  %426 = vmatmul.bf16.vlgmr.msra.gmra.mxu3 %v737_v60 }
 0x131   :  { %374 = vmatmul.bf16.gmra.mxu0 %v738_v25  ;;  %393 = vmatmul.bf16.gmra.mxu1 %v738_v25 }
 0x132   :  { %412 = vmatmul.bf16.gmra.mxu2 %v738_v25  ;;  %431 = vmatmul.bf16.gmra.mxu3 %v738_v25 }
 0x19e   :  { %v370_v63 = vpop.f32.mrf.mxu0  ;;  %v389_v0 = vpop.f32.mrf.mxu1 }
 0x19f   :  { %v1119_v12 = vadd.f32 %v370_v63, %v1114_v61  ;;  %v1122_v1 = vadd.f32 %v389_v0, %v1116_v62 }
 0x1a1   :  { %v437_v2 = vmul.f32 %v1119_v12, %v1119_v12  ;;  %v438_v3 = vmul.f32 %v1122_v1, %v1122_v1 }
 0x1a3   :  { %v453_v6 = vmul.f32 %v437_v2, %v1119_v12  ;;  %v454_v7 = vmul.f32 %v438_v3, %v1122_v1 }
 0x1a5   :  { %v469_v8 = vmul.f32 0.044715, %v453_v6  ;;  %v470_v9 = vmul.f32 0.044715, %v454_v7  ;;  %v408_v10 = vpop.f32.mrf.mxu2  ;;  %v427_v11 = vpop.f32.mrf.mxu3 }
 0x1a6   :  { %v1135_v13 = vadd.f32 %v408_v10, %v1128_v4  ;;  %v1138_v14 = vadd.f32 %v427_v11, %v1130_v5  ;;  %v372_v15 = vpop.f32.mrf.mxu0  ;;  %v391_v16 = vpop.f32.mrf.mxu1 }
 0x1a7   :  { %v485_v19 = vadd.f32 %v469_v8, %v1119_v12  ;;  %v486_v20 = vadd.f32 %v470_v9, %v1122_v1  ;;  %v1143_v21 = vadd.f32 %v372_v15, %v1114_v61  ;;  %v1146_v22 = vadd.f32 %v391_v16, %v1116_v62 }
 0x1a8   :  { %v439_v23 = vmul.f32 %v1135_v13, %v1135_v13  ;;  %v440_v24 = vmul.f32 %v1138_v14, %v1138_v14 }
 0x1a9   :  { %v501_v27 = vmul.f32 0.7978846, %v485_v19  ;;  %v502_v28 = vmul.f32 0.7978846, %v486_v20  ;;  %v441_v29 = vmul.f32 %v1143_v21, %v1143_v21  ;;  %v442_v30 = vmul.f32 %v1146_v22, %v1146_v22 }
 0x1aa   :  { %v455_v31 = vmul.f32 %v439_v23, %v1135_v13  ;;  %v456_v32 = vmul.f32 %v440_v24, %v1138_v14 }
 0x1ab   :  { %804 = vtanh.f32 %v501_v27  ;;  %v457_v33 = vmul.f32 %v441_v29, %v1143_v21  ;;  %v458_v36 = vmul.f32 %v442_v30, %v1146_v22 }
 0x1ac   :  { %806 = vtanh.f32 %v502_v28  ;;  %v471_v37 = vmul.f32 0.044715, %v455_v31  ;;  %v472_v38 = vmul.f32 0.044715, %v456_v32 }
 0x1ad   :  { %v473_v39 = vmul.f32 0.044715, %v457_v33  ;;  %v474_v35 = vmul.f32 0.044715, %v458_v36  ;;  %v410_v40 = vpop.f32.mrf.mxu2  ;;  %v429_v41 = vpop.f32.mrf.mxu3 }
 0x1ae   :  { %v487_v42 = vadd.f32 %v471_v37, %v1135_v13  ;;  %v488_v43 = vadd.f32 %v472_v38, %v1138_v14  ;;  %v1163_v44 = vadd.f32 %v410_v40, %v1128_v4  ;;  %v1166_v34 = vadd.f32 %v429_v41, %v1130_v5  ;;  %v375_v45 = vpop.f32.mrf.mxu0  ;;  %v394_v46 = vpop.f32.mrf.mxu1 }
 0x1af   :  { %v489_v47 = vadd.f32 %v473_v39, %v1143_v21  ;;  %v490_v48 = vadd.f32 %v474_v35, %v1146_v22  ;;  %v1171_v49 = vadd.f32 %v375_v45, %v1114_v61  ;;  %v1174_v50 = vadd.f32 %v394_v46, %v1116_v62 }
 0x1b0   :  { %v503_v51 = vmul.f32 0.7978846, %v487_v42  ;;  %v504_v52 = vmul.f32 0.7978846, %v488_v43  ;;  %v443_v17 = vmul.f32 %v1163_v44, %v1163_v44  ;;  %v444_v53 = vmul.f32 %v1166_v34, %v1166_v34 }
 0x1b1   :  { %v805_v54 = vpop.eup %804  ;;  %v505_v55 = vmul.f32 0.7978846, %v489_v47  ;;  %v506_v18 = vmul.f32 0.7978846, %v490_v48  ;;  %v445_v56 = vmul.f32 %v1171_v49, %v1171_v49  ;;  %v446_v57 = vmul.f32 %v1174_v50, %v1174_v50 }
 0x1b2   :  { %v807_v58 = vpop.eup %806  ;;  %v533_v59 = vadd.f32 1.0, %v805_v54  ;;  %808 = vtanh.f32 %v503_v51  ;;  %v459_v60 = vmul.f32 %v443_v17, %v1163_v44  ;;  %v460_v25 = vmul.f32 %v444_v53, %v1166_v34 }
 0x1b3   :  { %v534_v26 = vadd.f32 1.0, %v807_v58  ;;  %810 = vtanh.f32 %v504_v52  ;;  %v461_v63 = vmul.f32 %v445_v56, %v1171_v49  ;;  %v462_v0 = vmul.f32 %v446_v57, %v1174_v50 }
 0x1b4   :  { %v549_v2 = vmul.f32 0.5, %v533_v59  ;;  %812 = vtanh.f32 %v505_v55  ;;  %v475_v3 = vmul.f32 0.044715, %v459_v60  ;;  %v476_v6 = vmul.f32 0.044715, %v460_v25 }
 0x1b5   :  { %v550_v7 = vmul.f32 0.5, %v534_v26  ;;  %814 = vtanh.f32 %v506_v18  ;;  %v477_v8 = vmul.f32 0.044715, %v461_v63  ;;  %v478_v9 = vmul.f32 0.044715, %v462_v0  ;;  %v413_v10 = vpop.f32.mrf.mxu2  ;;  %v432_v11 = vpop.f32.mrf.mxu3 }
 0x1b6   :  { %v565_v15 = vmul.f32 %v549_v2, %v1119_v12  ;;  %v491_v16 = vadd.f32 %v475_v3, %v1163_v44  ;;  %v492_v19 = vadd.f32 %v476_v6, %v1166_v34  ;;  %v1192_v20 = vadd.f32 %v413_v10, %v1128_v4  ;;  %v377_v23 = vpop.f32.mrf.mxu0  ;;  %v396_v52 = vpop.f32.mrf.mxu1 }
 0x1b7   :  { %v566_v24 = vmul.f32 %v550_v7, %v1122_v1  ;;  %v493_v27 = vadd.f32 %v477_v8, %v1171_v49  ;;  %v494_v28 = vadd.f32 %v478_v9, %v1174_v50  ;;  %v1198_v29 = vadd.f32 %v432_v11, %v1130_v5 }
 0x1b8   :  { %v809_v30 = vpop.eup %808  ;;  %v507_v31 = vmul.f32 0.7978846, %v491_v16  ;;  %v508_v12 = vmul.f32 0.7978846, %v492_v19  ;;  %v447_v32 = vmul.f32 %v1192_v20, %v1192_v20  ;;  %v1203_v33 = vadd.f32 %v377_v23, %v1114_v61 }
 0x1b9   :  { %v811_v36 = vpop.eup %810  ;;  %v581_v37 = vpack.c.bf16 %v566_v24, %v565_v15  ;;  %v535_v38 = vadd.f32 1.0, %v809_v30  ;;  %v509_v1 = vmul.f32 0.7978846, %v493_v27  ;;  %v510_v39 = vmul.f32 0.7978846, %v494_v28 }
 0x1ba   :  { %v813_v35 = vpop.eup %812  ;;  %v536_v40 = vadd.f32 1.0, %v811_v36  ;;  %816 = vtanh.f32 %v507_v31  ;;  %v463_v41 = vmul.f32 %v447_v32, %v1192_v20  ;;  %v448_v42 = vmul.f32 %v1198_v29, %v1198_v29 }
 0x1bb   :  { %v815_v43 = vpop.eup %814  ;;  %589 = vst [vmem:[%s1272_s5] sm:$0xff] %v581_v37  ;;  %v551_v61 = vmul.f32 0.5, %v535_v38  ;;  %v537_v45 = vadd.f32 1.0, %v813_v35  ;;  %818 = vtanh.f32 %v508_v12  ;;  %v449_v46 = vmul.f32 %v1203_v33, %v1203_v33 }
 0x1bc   :  { %v552_v47 = vmul.f32 0.5, %v536_v40  ;;  %v538_v48 = vadd.f32 1.0, %v815_v43  ;;  %820 = vtanh.f32 %v509_v1  ;;  %v479_v51 = vmul.f32 0.044715, %v463_v41 }
 0x1bd   :  { %v567_v17 = vmul.f32 %v551_v61, %v1135_v13  ;;  %v553_v53 = vmul.f32 0.5, %v537_v45  ;;  %822 = vtanh.f32 %v510_v39  ;;  %v464_v54 = vmul.f32 %v448_v42, %v1198_v29  ;;  %v415_v55 = vpop.f32.mrf.mxu2  ;;  %v434_v30 = vpop.f32.mrf.mxu3 }
 0x1be   :  { %v568_v18 = vmul.f32 %v552_v47, %v1138_v14  ;;  %v554_v56 = vmul.f32 0.5, %v538_v48  ;;  %v495_v57 = vadd.f32 %v479_v51, %v1192_v20  ;;  %v465_v58 = vmul.f32 %v449_v46, %v1203_v33 }
 0x1bf   :  { %v569_v59 = vmul.f32 %v553_v53, %v1143_v21  ;;  %v480_v60 = vmul.f32 0.044715, %v464_v54  ;;  %v1220_v25 = vadd.f32 %v396_v52, %v1116_v62  ;;  %v1223_v13 = vadd.f32 %v415_v55, %v1128_v4 }
 0x1c0   :  { %v817_v26 = vpop.eup %816  ;;  %v582_v63 = vpack.c.bf16 %v568_v18, %v567_v17  ;;  %v570_v0 = vmul.f32 %v554_v56, %v1146_v22  ;;  %v511_v2 = vmul.f32 0.7978846, %v495_v57  ;;  %v481_v14 = vmul.f32 0.044715, %v465_v58 }
 0x1c1   :  { %v819_v3 = vpop.eup %818  ;;  %v539_v6 = vadd.f32 1.0, %v817_v26  ;;  %v496_v7 = vadd.f32 %v480_v60, %v1198_v29  ;;  %v450_v21 = vmul.f32 %v1220_v25, %v1220_v25  ;;  %v451_v62 = vmul.f32 %v1223_v13, %v1223_v13 }
 0x1c2   :  { %v821_v8 = vpop.eup %820  ;;  %590 = vst [vmem:[%s1272_s5 + $0x8] sm:$0xff] %v582_v63  ;;  %v583_v4 = vpack.c.bf16 %v570_v0, %v569_v59  ;;  %v540_v9 = vadd.f32 1.0, %v819_v3  ;;  %824 = vtanh.f32 %v511_v2  ;;  %v497_v22 = vadd.f32 %v481_v14, %v1203_v33 }
 0x1c3   :  { %v823_v10 = vpop.eup %822  ;;  %v555_v11 = vmul.f32 0.5, %v539_v6  ;;  %v541_v15 = vadd.f32 1.0, %v821_v8  ;;  %v512_v16 = vmul.f32 0.7978846, %v496_v7  ;;  %v466_v19 = vmul.f32 %v450_v21, %v1220_v25 }
 0x1c4   :  { %591 = vst [vmem:[%s1272_s5 + $0x10] sm:$0xff] %v583_v4  ;;  %v556_v23 = vmul.f32 0.5, %v540_v9  ;;  %v542_v24 = vadd.f32 1.0, %v823_v10  ;;  %v513_v27 = vmul.f32 0.7978846, %v497_v22  ;;  %v467_v28 = vmul.f32 %v451_v62, %v1223_v13 }
 0x1c5   :  { %v571_v31 = vmul.f32 %v555_v11, %v1163_v44  ;;  %v557_v12 = vmul.f32 0.5, %v541_v15  ;;  %826 = vtanh.f32 %v512_v16  ;;  %v482_v32 = vmul.f32 0.044715, %v466_v19 }
 0x1c6   :  { %v572_v36 = vmul.f32 %v556_v23, %v1166_v34  ;;  %v558_v37 = vmul.f32 0.5, %v542_v24  ;;  %828 = vtanh.f32 %v513_v27  ;;  %v483_v38 = vmul.f32 0.044715, %v467_v28 }
 0x1c7   :  { %v573_v1 = vmul.f32 %v557_v12, %v1171_v49  ;;  %v498_v39 = vadd.f32 %v482_v32, %v1220_v25  ;;  %v435_v35 = vadd.f32 %v434_v30, %v1130_v5 }
 0x1c8   :  { %v825_v40 = vpop.eup %824  ;;  %v584_v41 = vpack.c.bf16 %v572_v36, %v571_v31  ;;  %v574_v42 = vmul.f32 %v558_v37, %v1174_v50  ;;  %v499_v44 = vadd.f32 %v483_v38, %v1223_v13 }
 0x1c9   :  { %v543_v43 = vadd.f32 1.0, %v825_v40  ;;  %v514_v61 = vmul.f32 0.7978846, %v498_v39  ;;  %v452_v45 = vmul.f32 %v435_v35, %v435_v35 }
 0x1ca   :  { %592 = vst [vmem:[%s1272_s5 + $0x18] sm:$0xff] %v584_v41  ;;  %v585_v34 = vpack.c.bf16 %v574_v42, %v573_v1  ;;  %v515_v46 = vmul.f32 0.7978846, %v499_v44 }
 0x1cb   :  { %v827_v49 = vpop.eup %826  ;;  %v559_v47 = vmul.f32 0.5, %v543_v43  ;;  %830 = vtanh.f32 %v514_v61  ;;  %v468_v48 = vmul.f32 %v452_v45, %v435_v35 }
 0x1cc   :  { %v829_v5 = vpop.eup %828  ;;  %593 = vst [vmem:[%s1272_s5 + $0x20] sm:$0xff] %v585_v34  ;;  %v544_v50 = vadd.f32 1.0, %v827_v49  ;;  %832 = vtanh.f32 %v515_v46 }
 0x1cd   :  { %v545_v51 = vadd.f32 1.0, %v829_v5  ;;  %v484_v52 = vmul.f32 0.044715, %v468_v48  ;;  %v575_v17 = vmul.f32 %v559_v47, %v1192_v20 }
 0x1ce   :  { %v560_v53 = vmul.f32 0.5, %v544_v50 }
 0x1cf   :  { %v500_v54 = vadd.f32 %v484_v52, %v435_v35  ;;  %v561_v18 = vmul.f32 0.5, %v545_v51 }
 0x1d0   :  { %v576_v55 = vmul.f32 %v560_v53, %v1198_v29 }
 0x1d1   :  { %v831_v56 = vpop.eup %830  ;;  %v516_v57 = vmul.f32 0.7978846, %v500_v54  ;;  %v577_v26 = vmul.f32 %v561_v18, %v1203_v33 }
 0x1d2   :  { %v833_v58 = vpop.eup %832  ;;  %v586_v59 = vpack.c.bf16 %v576_v55, %v575_v17  ;;  %v546_v60 = vadd.f32 1.0, %v831_v56 }
 0x1d3   :  { %834 = vtanh.f32 %v516_v57  ;;  %v547_v0 = vadd.f32 1.0, %v833_v58 }
 0x1d4   :  { %594 = vst [vmem:[%s1272_s5 + $0x28] sm:$0xff] %v586_v59  ;;  %v562_v63 = vmul.f32 0.5, %v546_v60 }
 0x1d5   :  { %v563_v14 = vmul.f32 0.5, %v547_v0 }
 0x1d6   :  { %v578_v20 = vmul.f32 %v562_v63, %v1220_v25 }
 0x1d7   :  { %v579_v6 = vmul.f32 %v563_v14, %v1223_v13 }
 0x1d8   :  { %v587_v2 = vpack.c.bf16 %v578_v20, %v577_v26 }
 0x1d9   :  { %v835_v29 = vpop.eup %834 }
 0x1da   :  { %595 = vst [vmem:[%s1272_s5 + $0x30] sm:$0xff] %v587_v2  ;;  %v548_v3 = vadd.f32 1.0, %v835_v29 }
 0x1dc   :  { %v564_v7 = vmul.f32 0.5, %v548_v3 }
 0x1de   :  { %v580_v21 = vmul.f32 %v564_v7, %v435_v35 }
 0x1e0   :  { %v588_v62 = vpack.c.bf16 %v580_v21, %v579_v6 }
 0x1e2   :  { %596 = vst [vmem:[%s1272_s5 + $0x38] sm:$0xff] %v588_v62 }

// kernel: solospeech_tse_forward.38
= control target key start
LH: loop header
LB: loop body
LE: loop exit
PB: predicated region body
PF: predicated region fallthrough
CT: control target
= control target key end

     0   :  { %s861_s1 = inlined_call_operand.vmem [shape: bf16[512,128], index: 1, kind: input, shape index: {}]   ;;  %s862_s0 = inlined_call_operand.vmem [shape: bf16[32,512], index: 0, kind: input, shape index: {}]   ;;  %s863_s2 = inlined_call_operand.vmem [shape: f32[1,128], index: 2, kind: input, shape index: {}]   ;;  %s864_s3 = inlined_call_operand.vmem [shape: bf16[32,128], index: 3, kind: input, shape index: {}]   ;;  %s865_s4 = inlined_call_operand.vmem [shape: bf16[32,128], index: 4, kind: output, shape index: {}]  }
   0x1   :  { %v631_v0 = vld [vmem:[%s861_s1 + $0x38] sm:$0xff]  ;;  %v630_v4 = vld [vmem:[%s861_s1 + $0x30] sm:$0xff]  ;;  %v629_v8 = vld [vmem:[%s861_s1 + $0x28] sm:$0xff] }
   0x2   :  { %v639_v1 = vld [vmem:[%s861_s1 + $0x78] sm:$0xff]  ;;  %333 = vmatpush.bf16.msra.mxu0 %v631_v0  ;;  %v638_v5 = vld [vmem:[%s861_s1 + $0x70] sm:$0xff]  ;;  %v637_v9 = vld [vmem:[%s861_s1 + $0x68] sm:$0xff] }
   0x3   :  { %v647_v2 = vld [vmem:[%s861_s1 + $0xb8] sm:$0xff]  ;;  %352 = vmatpush.bf16.msra.mxu1 %v639_v1  ;;  %v646_v6 = vld [vmem:[%s861_s1 + $0xb0] sm:$0xff]  ;;  %v645_v10 = vld [vmem:[%s861_s1 + $0xa8] sm:$0xff] }
   0x4   :  { %v655_v3 = vld [vmem:[%s861_s1 + $0xf8] sm:$0xff]  ;;  %371 = vmatpush.bf16.msra.mxu2 %v647_v2  ;;  %v654_v7 = vld [vmem:[%s861_s1 + $0xf0] sm:$0xff]  ;;  %v653_v11 = vld [vmem:[%s861_s1 + $0xe8] sm:$0xff] }
   0x5   :  { %390 = vmatpush.bf16.msra.mxu3 %v655_v3  ;;  %v628_v12 = vld [vmem:[%s861_s1 + $0x20] sm:$0xff]  ;;  %v627_v16 = vld [vmem:[%s861_s1 + $0x18] sm:$0xff]  ;;  %v626_v20 = vld [vmem:[%s861_s1 + $0x10] sm:$0xff] }
   0x6   :  { %334 = vmatpush.bf16.msra.mxu0 %v630_v4  ;;  %v636_v13 = vld [vmem:[%s861_s1 + $0x60] sm:$0xff]  ;;  %v635_v17 = vld [vmem:[%s861_s1 + $0x58] sm:$0xff]  ;;  %v634_v21 = vld [vmem:[%s861_s1 + $0x50] sm:$0xff] }
   0x7   :  { %353 = vmatpush.bf16.msra.mxu1 %v638_v5  ;;  %v644_v14 = vld [vmem:[%s861_s1 + $0xa0] sm:$0xff]  ;;  %v643_v18 = vld [vmem:[%s861_s1 + $0x98] sm:$0xff]  ;;  %v642_v22 = vld [vmem:[%s861_s1 + $0x90] sm:$0xff] }
   0x8   :  { %372 = vmatpush.bf16.msra.mxu2 %v646_v6  ;;  %v652_v15 = vld [vmem:[%s861_s1 + $0xe0] sm:$0xff]  ;;  %v651_v19 = vld [vmem:[%s861_s1 + $0xd8] sm:$0xff]  ;;  %v650_v23 = vld [vmem:[%s861_s1 + $0xd0] sm:$0xff] }
   0x9   :  { %391 = vmatpush.bf16.msra.mxu3 %v654_v7  ;;  %v625_v24 = vld [vmem:[%s861_s1 + $0x8] sm:$0xff]  ;;  %v624_v28 = vld [vmem:[%s861_s1] sm:$0xff]  ;;  %v618_v33 = vld [vmem:[%s862_s0 + $0xc] sm:$0xf0] }
   0xa   :  { %335 = vmatpush.bf16.msra.mxu0 %v629_v8  ;;  %v633_v25 = vld [vmem:[%s861_s1 + $0x48] sm:$0xff]  ;;  %v632_v29 = vld [vmem:[%s861_s1 + $0x40] sm:$0xff]  ;;  %v460_v35 = vld [vmem:[%s862_s0 + $0x10] sm:$0xf0] }
   0xb   :  { %354 = vmatpush.bf16.msra.mxu1 %v637_v9  ;;  %v641_v26 = vld [vmem:[%s861_s1 + $0x88] sm:$0xff]  ;;  %v640_v30 = vld [vmem:[%s861_s1 + $0x80] sm:$0xff]  ;;  %v619_v37 = vld [vmem:[%s862_s0 + $0x14] sm:$0xf0] }
   0xc   :  { %373 = vmatpush.bf16.msra.mxu2 %v645_v10  ;;  %v649_v27 = vld [vmem:[%s861_s1 + $0xc8] sm:$0xff]  ;;  %v648_v31 = vld [vmem:[%s861_s1 + $0xc0] sm:$0xff]  ;;  %v468_v39 = vld [vmem:[%s862_s0 + $0x18] sm:$0xf0] }
   0xd   :  { %392 = vmatpush.bf16.msra.mxu3 %v653_v11  ;;  %v458_v32 = vld [vmem:[%s862_s0] sm:$0xf]  ;;  %v616_v34 = vld [vmem:[%s862_s0 + $0x4] sm:$0xf]  ;;  %v466_v36 = vld [vmem:[%s862_s0 + $0x8] sm:$0xf] }
   0xe   :  { %336 = vmatpush.bf16.msra.mxu0 %v628_v12  ;;  %v617_v38 = vld [vmem:[%s862_s0 + $0xc] sm:$0xf]  ;;  %v459_v40 = vor.u32 %v618_v33, %v458_v32  ;;  %v463_v41 = vor.u32 %v616_v34, %v460_v35  ;;  %v467_v42 = vor.u32 %v619_v37, %v466_v36  ;;  %v474_v44 = vld [vmem:[%s862_s0 + $0x20] sm:$0xf]  ;;  %v622_v45 = vld [vmem:[%s862_s0 + $0x2c] sm:$0xf0] }
   0xf   :  { %355 = vmatpush.bf16.msra.mxu1 %v636_v13  ;;  %v471_v43 = vor.u32 %v617_v38, %v468_v39  ;;  %v620_v46 = vld [vmem:[%s862_s0 + $0x24] sm:$0xf]  ;;  %v476_v47 = vld [vmem:[%s862_s0 + $0x30] sm:$0xf0]  ;;  %v482_v48 = vld [vmem:[%s862_s0 + $0x28] sm:$0xf]  ;;  %v475_v52 = vor.u32 %v622_v45, %v474_v44 }
  0x10   :  { %374 = vmatpush.bf16.msra.mxu2 %v644_v14  ;;  %v623_v49 = vld [vmem:[%s862_s0 + $0x34] sm:$0xf0]  ;;  %v621_v50 = vld [vmem:[%s862_s0 + $0x2c] sm:$0xf]  ;;  %v484_v51 = vld [vmem:[%s862_s0 + $0x38] sm:$0xf0]  ;;  %v479_v53 = vor.u32 %v620_v46, %v476_v47 }
  0x11   :  { %393 = vmatpush.bf16.msra.mxu3 %v652_v15  ;;  %v483_v54 = vor.u32 %v623_v49, %v482_v48  ;;  %v487_v55 = vor.u32 %v621_v50, %v484_v51  ;;  %v676_v1 = vld [vmem:[%s863_s2] ss:$0 sm:$0xff] }
  0x12   :  { %337 = vmatpush.bf16.msra.mxu0 %v627_v16  ;;  %v657_v3 = vld [vmem:[%s864_s3] sm:$0xff]  }
  0x13   :  { %356 = vmatpush.bf16.msra.mxu1 %v635_v17  ;;  %v658_v10 = vunpack.c.l.bf16 %v657_v3  ;;  %v659_v12 = vunpack.c.h.bf16 %v657_v3 }
  0x14   :  { %375 = vmatpush.bf16.msra.mxu2 %v643_v18 }
  0x15   :  { %394 = vmatpush.bf16.msra.mxu3 %v651_v19 }
  0x16   :  { %338 = vmatpush.bf16.msra.mxu0 %v626_v20 }
  0x17   :  { %357 = vmatpush.bf16.msra.mxu1 %v634_v21 }
  0x18   :  { %376 = vmatpush.bf16.msra.mxu2 %v642_v22 }
  0x19   :  { %395 = vmatpush.bf16.msra.mxu3 %v650_v23 }
  0x1a   :  { %339 = vmatpush.bf16.msra.mxu0 %v625_v24 }
  0x1b   :  { %358 = vmatpush.bf16.msra.mxu1 %v633_v25  ;;  %v674_v25 = vld [vmem:[%s864_s3 + $0x8] sm:$0xff]  }
  0x1c   :  { %377 = vmatpush.bf16.msra.mxu2 %v641_v26  ;;  %v663_v32 = vunpack.c.h.bf16 %v674_v25 }
  0x1d   :  { %396 = vmatpush.bf16.msra.mxu3 %v649_v27 }
  0x1e   :  { %340 = vmatpush.bf16.msra.mxu0 %v624_v28 }
  0x1f   :  { %359 = vmatpush.bf16.msra.mxu1 %v632_v29 }
  0x20   :  { %378 = vmatpush.bf16.msra.mxu2 %v640_v30  ;;  %v662_v30 = vunpack.c.l.bf16 %v674_v25 }
  0x21   :  { %397 = vmatpush.bf16.msra.mxu3 %v648_v31  ;;  %341 = vmatmul.bf16.vlgmr.msra.gmra.mxu0 %v459_v40 }
  0x22   :  { %360 = vmatmul.bf16.vlgmr.msra.gmra.mxu1 %v463_v41 }
  0x23   :  { %379 = vmatmul.bf16.vlgmr.msra.gmra.mxu2 %v467_v42 }
  0x24   :  { %398 = vmatmul.bf16.vlgmr.msra.gmra.mxu3 %v471_v43 }
  0x31   :  { %346 = vmatmul.bf16.gmra.mxu0 %v475_v52 }
  0x32   :  { %365 = vmatmul.bf16.gmra.mxu1 %v479_v53 }
  0x33   :  { %384 = vmatmul.bf16.gmra.mxu2 %v483_v54 }
  0x34   :  { %403 = vmatmul.bf16.gmra.mxu3 %v487_v55 }
  0x9e   :  { %v342_v56 = vpop.f32.mrf.mxu0 }
  0x9f   :  { %v361_v57 = vpop.f32.mrf.mxu1 }
  0xa0   :  { %v362_v58 = vadd.f32 %v361_v57, %v342_v56 }
  0xa6   :  { %v380_v59 = vpop.f32.mrf.mxu2  ;;  %v344_v61 = vpop.f32.mrf.mxu0 }
  0xa7   :  { %v399_v60 = vpop.f32.mrf.mxu3  ;;  %v363_v62 = vpop.f32.mrf.mxu1  ;;  %v381_v63 = vadd.f32 %v380_v59, %v362_v58 }
  0xa8   :  { %v364_v2 = vadd.f32 %v363_v62, %v344_v61 }
  0xa9   :  { %v400_v0 = vadd.f32 %v399_v60, %v381_v63 }
  0xab   :  { %v428_v9 = vadd.f32 %v676_v1, %v400_v0 }
  0xad   :  { %v440_v14 = vadd.f32 %v658_v10, %v428_v9 }
  0xae   :  { %v382_v4 = vpop.f32.mrf.mxu2  ;;  %v347_v7 = vpop.f32.mrf.mxu0 }
  0xaf   :  { %v401_v5 = vpop.f32.mrf.mxu3  ;;  %v383_v6 = vadd.f32 %v382_v4, %v364_v2  ;;  %v366_v8 = vpop.f32.mrf.mxu1 }
  0xb0   :  { %v367_v16 = vadd.f32 %v366_v8, %v347_v7 }
  0xb1   :  { %v402_v11 = vadd.f32 %v401_v5, %v383_v6 }
  0xb3   :  { %v429_v13 = vadd.f32 %v676_v1, %v402_v11 }
  0xb5   :  { %v441_v15 = vadd.f32 %v659_v12, %v429_v13 }
  0xb6   :  { %v385_v17 = vpop.f32.mrf.mxu2  ;;  %v349_v21 = vpop.f32.mrf.mxu0 }
  0xb7   :  { %v404_v18 = vpop.f32.mrf.mxu3  ;;  %v667_v19 = vpack.c.bf16 %v441_v15, %v440_v14  ;;  %v386_v20 = vadd.f32 %v385_v17, %v367_v16  ;;  %v368_v22 = vpop.f32.mrf.mxu1 }
  0xb8   :  { %v369_v24 = vadd.f32 %v368_v22, %v349_v21 }
  0xb9   :  { %668 = vst [vmem:[%s865_s4] sm:$0xff] %v667_v19   ;;  %v405_v23 = vadd.f32 %v404_v18, %v386_v20 }
  0xbb   :  { %v430_v29 = vadd.f32 %v676_v1, %v405_v23 }
  0xbd   :  { %v442_v34 = vadd.f32 %v662_v30, %v430_v29 }
  0xbe   :  { %v387_v26 = vpop.f32.mrf.mxu2 }
  0xbf   :  { %v388_v27 = vadd.f32 %v387_v26, %v369_v24  ;;  %v406_v28 = vpop.f32.mrf.mxu3 }
  0xc1   :  { %v407_v31 = vadd.f32 %v406_v28, %v388_v27 }
  0xc3   :  { %v431_v33 = vadd.f32 %v676_v1, %v407_v31 }
  0xc5   :  { %v443_v35 = vadd.f32 %v663_v32, %v431_v33 }
  0xc7   :  { %v672_v36 = vpack.c.bf16 %v443_v35, %v442_v34 }
  0xc9   :  { %675 = vst [vmem:[%s865_s4 + $0x8] sm:$0xff] %v672_v36  }

// kernel: solospeech_tse_forward.39
= control target key start
LH: loop header
LB: loop body
LE: loop exit
PB: predicated region body
PF: predicated region fallthrough
CT: control target
= control target key end

     0   :  { %v346_v6 = vmov 128.0   ;;  %s448_s0 = inlined_call_operand.vmem [shape: bf16[32,128], index: 0, kind: input, shape index: {}]   ;;  %s449_s1 = inlined_call_operand.vmem [shape: f32[1,128], index: 1, kind: input, shape index: {}]   ;;  %s450_s2 = inlined_call_operand.vmem [shape: f32[1,128], index: 2, kind: input, shape index: {}]   ;;  %s451_s4 = inlined_call_operand.vmem [shape: f32[1,128], index: 4, kind: input, shape index: {}]   ;;  %s452_s3 = inlined_call_operand.vmem [shape: bf16[128,128], index: 3, kind: input, shape index: {}]   ;;  %s453_s5 = inlined_call_operand.vmem [shape: f32[32,128], index: 5, kind: output, shape index: {}]  }
   0x1   :  { %v322_v0 = vld [vmem:[%s448_s0 + $0x8] sm:$0xff]   ;;  %v305_v1 = vld [vmem:[%s448_s0] sm:$0xff]   ;;  %336 = vrcp.f32 %v346_v6  ;;  %v303_v29 = vld [vmem:[%s452_s3 + $0x38] sm:$0xff] }
   0x2   :  { %v310_v2 = vunpack.c.l.bf16 %v322_v0  ;;  %v306_v3 = vunpack.c.l.bf16 %v305_v1  ;;  %v311_v4 = vunpack.c.h.bf16 %v322_v0  ;;  %v307_v5 = vunpack.c.h.bf16 %v305_v1  ;;  %227 = vmatpush.bf16.msra.mxu0 %v303_v29  ;;  %324 = vmatpush.bf16.msra.mxu1 %v303_v29  ;;  %v302_v30 = vld [vmem:[%s452_s3 + $0x30] sm:$0xff]  ;;  %v301_v31 = vld [vmem:[%s452_s3 + $0x28] sm:$0xff]  ;;  %v300_v32 = vld [vmem:[%s452_s3 + $0x20] sm:$0xff] }
   0x3   :  { %v299_v35 = vld [vmem:[%s452_s3 + $0x18] sm:$0xff]  ;;  %v298_v40 = vld [vmem:[%s452_s3 + $0x10] sm:$0xff]  ;;  %v297_v43 = vld [vmem:[%s452_s3 + $0x8] sm:$0xff] }
   0x4   :  { %36 = vadd.xlane.f32.xlu1 %v310_v2  ;;  %32 = vadd.xlane.f32.xlu0 %v306_v3  ;;  %v296_v46 = vld [vmem:[%s452_s3] sm:$0xff] }
   0x6   :  { %228 = vmatpush.bf16.msra.mxu0 %v302_v30  ;;  %325 = vmatpush.bf16.msra.mxu1 %v302_v30 }
   0x7   :  { %v337_v7 = vpop.eup %336 }
   0x8   :  { %v41_v8 = vmul.f32 128.0, %v337_v7  ;;  %vm45_vm0 = vweird.f32 %v337_v7 }
   0xa   :  { %v42_v9 = vsub.f32 1.0, %v41_v8  ;;  %229 = vmatpush.bf16.msra.mxu0 %v301_v31  ;;  %326 = vmatpush.bf16.msra.mxu1 %v301_v31  ;;  %v333_v8 = vld [vmem:[%s449_s1] ss:$0 sm:$0xff] }
   0xc   :  { %38 = vadd.xlane.f32.xlu1 %v311_v4  ;;  %34 = vadd.xlane.f32.xlu0 %v307_v5  ;;  %v43_v10 = vmul.f32 %v337_v7, %v42_v9 }
   0xe   :  { %v44_v11 = vadd.f32 %v337_v7, %v43_v10  ;;  %230 = vmatpush.bf16.msra.mxu0 %v300_v32  ;;  %327 = vmatpush.bf16.msra.mxu1 %v300_v32 }
  0x10   :  { %v46_v12 = vsel %vm45_vm0, %v337_v7, %v44_v11 }
  0x12   :  { %231 = vmatpush.bf16.msra.mxu0 %v299_v35  ;;  %328 = vmatpush.bf16.msra.mxu1 %v299_v35 }
  0x16   :  { %232 = vmatpush.bf16.msra.mxu0 %v298_v40  ;;  %329 = vmatpush.bf16.msra.mxu1 %v298_v40 }
  0x1a   :  { %233 = vmatpush.bf16.msra.mxu0 %v297_v43  ;;  %330 = vmatpush.bf16.msra.mxu1 %v297_v43 }
  0x1e   :  { %234 = vmatpush.bf16.msra.mxu0 %v296_v46  ;;  %331 = vmatpush.bf16.msra.mxu1 %v296_v46 }
  0x77   :  { %v37_v13 = vpop.xlane.xlu1 %36  ;;  %v33_v14 = vpop.xlane.xlu0 %32 }
  0x78   :  { %v49_v15 = vmul.f32 %v46_v12, %v37_v13  ;;  %v47_v16 = vmul.f32 %v46_v12, %v33_v14 }
  0x7a   :  { %v383_v17 = vsub.f32 %v310_v2, %v49_v15  ;;  %v385_v18 = vsub.f32 %v306_v3, %v47_v16  ;;  %v334_v15 = vld [vmem:[%s450_s2] ss:$0 sm:$0xff] }
  0x7c   :  { %v57_v19 = vmul.f32 %v383_v17, %v383_v17  ;;  %v55_v20 = vmul.f32 %v385_v18, %v385_v18 }
  0x7e   :  { %63 = vadd.xlane.f32.xlu0 %v57_v19  ;;  %59 = vadd.xlane.f32.xlu2 %v55_v20 }
  0x7f   :  { %v39_v21 = vpop.xlane.xlu1 %38  ;;  %v35_v22 = vpop.xlane.xlu0 %34 }
  0x80   :  { %v50_v23 = vmul.f32 %v46_v12, %v39_v21  ;;  %v48_v24 = vmul.f32 %v46_v12, %v35_v22 }
  0x82   :  { %v391_v25 = vsub.f32 %v311_v4, %v50_v23  ;;  %v393_v26 = vsub.f32 %v307_v5, %v48_v24 }
  0x84   :  { %v58_v27 = vmul.f32 %v391_v25, %v391_v25  ;;  %v56_v28 = vmul.f32 %v393_v26, %v393_v26 }
  0x86   :  { %65 = vadd.xlane.f32.xlu1 %v58_v27  ;;  %61 = vadd.xlane.f32.xlu2 %v56_v28 }
  0xf1   :  { %v60_v33 = vpop.xlane.xlu2 %59  ;;  %v64_v34 = vpop.xlane.xlu0 %63 }
  0xf2   :  { %v67_v36 = vmul.f32 %v60_v33, %v46_v12  ;;  %v69_v37 = vmul.f32 %v64_v34, %v46_v12 }
  0xf4   :  { %v71_v38 = vadd.f32 1e-05, %v67_v36  ;;  %v73_v39 = vadd.f32 1e-05, %v69_v37 }
  0xf6   :  { %338 = vrsqrt.f32 %v71_v38  ;;  %vm101_vm3 = vweird.f32 %v73_v39  ;;  %vm81_vm4 = vweird.f32 %v71_v38 }
  0xf7   :  { %340 = vrsqrt.f32 %v73_v39 }
  0xf9   :  { %v66_v41 = vpop.xlane.xlu1 %65  ;;  %v62_v42 = vpop.xlane.xlu2 %61 }
  0xfa   :  { %v70_v44 = vmul.f32 %v66_v41, %v46_v12  ;;  %v68_v45 = vmul.f32 %v62_v42, %v46_v12 }
  0xfc   :  { %v339_v47 = vpop.eup %338  ;;  %v74_v48 = vadd.f32 1e-05, %v70_v44  ;;  %v72_v49 = vadd.f32 1e-05, %v68_v45 }
  0xfd   :  { %v341_v50 = vpop.eup %340  ;;  %v76_v51 = vmul.f32 %v339_v47, %v71_v38  ;;  %vm82_vm2 = vweird.f32 %v339_v47 }
  0xfe   :  { %v96_v52 = vmul.f32 %v341_v50, %v73_v39  ;;  %342 = vrsqrt.f32 %v74_v48  ;;  %vm102_vm1 = vweird.f32 %v341_v50  ;;  %vm83_vm6 = vmor %vm81_vm4, %vm82_vm2  ;;  %vm111_vm9 = vweird.f32 %v74_v48 }
  0xff   :  { %v77_v53 = vmul.f32 %v339_v47, %v76_v51  ;;  %344 = vrsqrt.f32 %v72_v49  ;;  %vm103_vm5 = vmor %vm101_vm3, %vm102_vm1  ;;  %vm91_vm11 = vweird.f32 %v72_v49 }
 0x100   :  { %v97_v54 = vmul.f32 %v341_v50, %v96_v52 }
 0x101   :  { %v78_v55 = vmul.f32 0.5, %v77_v53 }
 0x102   :  { %v98_v56 = vmul.f32 0.5, %v97_v54 }
 0x103   :  { %v79_v57 = vsub.f32 1.5, %v78_v55 }
 0x104   :  { %v343_v58 = vpop.eup %342  ;;  %v99_v59 = vsub.f32 1.5, %v98_v56 }
 0x105   :  { %v345_v60 = vpop.eup %344  ;;  %v106_v61 = vmul.f32 %v343_v58, %v74_v48  ;;  %v80_v62 = vmul.f32 %v339_v47, %v79_v57  ;;  %vm112_vm7 = vweird.f32 %v343_v58 }
 0x106   :  { %v100_v63 = vmul.f32 %v341_v50, %v99_v59  ;;  %v86_v0 = vmul.f32 %v345_v60, %v72_v49  ;;  %vm92_vm8 = vweird.f32 %v345_v60  ;;  %vm113_vm10 = vmor %vm111_vm9, %vm112_vm7 }
 0x107   :  { %v107_v1 = vmul.f32 %v343_v58, %v106_v61  ;;  %v84_v5 = vsel %vm83_vm6, %v339_v47, %v80_v62  ;;  %vm93_vm12 = vmor %vm91_vm11, %vm92_vm8 }
 0x108   :  { %v87_v2 = vmul.f32 %v345_v60, %v86_v0  ;;  %v104_v3 = vsel %vm103_vm5, %v341_v50, %v100_v63  ;;  %v115_v11 = vmul.f32 %v84_v5, %v385_v18 }
 0x109   :  { %v108_v4 = vmul.f32 0.5, %v107_v1  ;;  %v117_v9 = vmul.f32 %v104_v3, %v383_v17 }
 0x10a   :  { %v88_v6 = vmul.f32 0.5, %v87_v2  ;;  %v123_v17 = vmul.f32 %v333_v8, %v115_v11 }
 0x10b   :  { %v109_v7 = vsub.f32 1.5, %v108_v4  ;;  %v125_v16 = vmul.f32 %v333_v8, %v117_v9 }
 0x10c   :  { %v89_v10 = vsub.f32 1.5, %v88_v6  ;;  %v131_v27 = vadd.f32 %v334_v15, %v123_v17 }
 0x10d   :  { %v110_v12 = vmul.f32 %v343_v58, %v109_v7  ;;  %v133_v23 = vadd.f32 %v334_v15, %v125_v16 }
 0x10e   :  { %v90_v13 = vmul.f32 %v345_v60, %v89_v10 }
 0x10f   :  { %v114_v14 = vsel %vm113_vm10, %v343_v58, %v110_v12 }
 0x110   :  { %v118_v19 = vmul.f32 %v114_v14, %v391_v25  ;;  %v94_v20 = vsel %vm93_vm12, %v345_v60, %v90_v13  ;;  %v335_v25 = vld [vmem:[%s451_s4] ss:$0 sm:$0xff] }
 0x111   :  { %v116_v21 = vmul.f32 %v94_v20, %v393_v26 }
 0x112   :  { %v126_v22 = vmul.f32 %v333_v8, %v118_v19 }
 0x113   :  { %v124_v18 = vmul.f32 %v333_v8, %v116_v21 }
 0x114   :  { %v134_v24 = vadd.f32 %v334_v15, %v126_v22 }
 0x115   :  { %v132_v28 = vadd.f32 %v334_v15, %v124_v18 }
 0x116   :  { %v320_v29 = vpack.c.bf16 %v134_v24, %v133_v23 }
 0x117   :  { %v315_v30 = vpack.c.bf16 %v132_v28, %v131_v27 }
 0x118   :  { %323 = vst [vmem:[#allocation2 + $0x8] sm:$0xff] %v320_v29  }
 0x119   :  { %316 = vst [vmem:[#allocation2] sm:$0xff] %v315_v30  }
 0x11f   :  { %v295_v31 = vld [vmem:[#allocation2 + $0x8] sm:$0xff] }
 0x120   :  { %v294_v32 = vld [vmem:[#allocation2] sm:$0xff]  ;;  %240 = vmatmul.bf16.vlgmr.msra.gmra.mxu1 %v295_v31 }
 0x121   :  { %235 = vmatmul.bf16.vlgmr.msra.gmra.mxu0 %v294_v32 }
 0x19d   :  { %v241_v33 = vpop.f32.mrf.mxu1 }
 0x19e   :  { %v236_v26 = vpop.f32.mrf.mxu0  ;;  %v242_v34 = vadd.f32 %v335_v25, %v241_v33 }
 0x19f   :  { %v237_v35 = vadd.f32 %v335_v25, %v236_v26 }
 0x1a0   :  { %248 = vst [vmem:[%s453_s5 + $0x10] sm:$0xff] %v242_v34 }
 0x1a1   :  { %246 = vst [vmem:[%s453_s5] sm:$0xff] %v237_v35 }
 0x1a5   :  { %v243_v36 = vpop.f32.mrf.mxu1 }
 0x1a6   :  { %v238_v37 = vpop.f32.mrf.mxu0  ;;  %v244_v38 = vadd.f32 %v335_v25, %v243_v36 }
 0x1a7   :  { %v239_v39 = vadd.f32 %v335_v25, %v238_v37 }
 0x1a8   :  { %249 = vst [vmem:[%s453_s5 + $0x18] sm:$0xff] %v244_v38 }
 0x1a9   :  { %247 = vst [vmem:[%s453_s5 + $0x8] sm:$0xff] %v239_v39 }

</bundles_post_ra>
